<compile_context>
chip_gen: v7x
topology: tpu7x:2x2x1
jax: 0.10.0
libtpu: 0.0.40
codegen_flags: <defaults>
</compile_context>

<pallas_src>
import functools

import jax
import jax.numpy as jnp
from jax.experimental import pallas as pl
from jax.experimental.pallas import tpu as pltpu


def _round_up(x, m):
    return (x + m - 1) // m * m


# ----------------------------------------------------------------------------
# Pallas kernels
# ----------------------------------------------------------------------------
def _mm_bias_act_kernel(x_ref, w_ref, b_ref, o_ref, *, relu: bool):
    """o = act(x @ w + b); bf16 MXU operands, f32 accumulate + f32 epilogue."""
    acc = jnp.dot(x_ref[...], w_ref[...], preferred_element_type=jnp.float32)
    acc = acc + b_ref[...]
    if relu:
        acc = jnp.maximum(acc, 0.0)
    o_ref[...] = acc.astype(o_ref.dtype)


def matmul_bias_act(x, w, b, *, relu: bool, out_dtype):
    """x:(M,K) bf16, w:(K,N) bf16, b:(1,N) f32 -> (M,N) out_dtype.

    Full-K blocks (no K padding), N either full or tiled by 256/128, M padded
    (zeros) only up to the 16-row bf16 sublane tile for tiny batches.
    """
    M, K = x.shape
    N = w.shape[1]

    tm = _round_up(M, 16) if M <= 512 else 256
    Mp = _round_up(M, tm)
    if N % 256 == 0:
        tn = 256
    elif N % 128 == 0:
        tn = 128
    else:
        tn = N                      # full-dim (masked) stores beat pad+slice here

    x_p = x if Mp == M else jnp.pad(x, ((0, Mp - M), (0, 0)))

    kernel = functools.partial(_mm_bias_act_kernel, relu=relu)
    out = pl.pallas_call(
        kernel,
        out_shape=jax.ShapeDtypeStruct((Mp, N), out_dtype),
        grid=(Mp // tm, N // tn),
        in_specs=[
            pl.BlockSpec((tm, K), lambda i, j: (i, 0)),
            pl.BlockSpec((K, tn), lambda i, j: (0, j)),
            pl.BlockSpec((1, tn), lambda i, j: (0, j)),
        ],
        out_specs=pl.BlockSpec((tm, tn), lambda i, j: (i, j)),
        compiler_params=pltpu.CompilerParams(
            dimension_semantics=("parallel", "parallel")),
    )(x_p, w, b)
    return out if Mp == M else out[:M]


def _conv3x3_kernel(x_ref, w_ref, b_ref, o_ref, *, H: int, W: int):
    """One padded image per grid step.

    x_ref: ((H+2)*W, 3*Cin) bf16  - rows ordered (padded_row, col), K = (dw, cin)
    w_ref: (3, 3*Cin, Cout) bf16  - one (3*Cin, Cout) slab per vertical tap dh
    b_ref: (1, Cout) f32
    o_ref: (H*W, Cout) bf16
    """
    acc = None
    for dh in range(3):
        xs = x_ref[dh * W:dh * W + H * W, :]            # 16-aligned static slice
        p = jnp.dot(xs, w_ref[dh, :, :], preferred_element_type=jnp.float32)
        acc = p if acc is None else acc + p
    acc = jnp.maximum(acc + b_ref[...], 0.0)
    o_ref[...] = acc.astype(o_ref.dtype)


def _pool_kernel(x_ref, o_ref):
    """Fused 2x2/stride-2 max pool: vertical row-pair max + lane-half max."""
    v = x_ref[...]                                      # (rb, 2, W2, 2*C)
    a = jnp.maximum(v[:, 0, :, :], v[:, 1, :, :])       # (rb, W2, 2*C)
    c = o_ref.shape[-1]
    o_ref[...] = jnp.maximum(a[..., :c], a[..., c:])    # (rb, W2, C)


# ----------------------------------------------------------------------------
# Layers built on the kernels
# ----------------------------------------------------------------------------
def conv3x3_relu(x, wk, b):
    """3x3 conv, padding=1, stride=1, + ReLU.

    x: (N, H, W, Cin) bf16; wk: (3, 3*Cin, Cout) bf16 (prepared); b: (1, Cout) f32.
    Horizontal taps are folded into K in the wrapper (3x, not 9x); the vertical
    taps are accumulated inside the kernel from shifted row windows in VMEM.
    """
    n, h, w, c = x.shape
    cout = wk.shape[-1]
    xp = jnp.pad(x, ((0, 0), (1, 1), (1, 1), (0, 0)))            # (N, H+2, W+2, C)
    xcol = jnp.concatenate(
        [xp[:, :, dw:dw + w, :] for dw in range(3)], axis=-1)    # (N, H+2, W, 3C)

    # Keep in-kernel row-window offsets (dh*W) 16-aligned for bf16 sublane packing.
    wp = _round_up(w, 16)
    if wp != w:
        xcol = jnp.pad(xcol, ((0, 0), (0, 0), (0, wp - w), (0, 0)))
    x2 = xcol.reshape(n * (h + 2) * wp, 3 * c)

    kernel = functools.partial(_conv3x3_kernel, H=h, W=wp)
    out = pl.pallas_call(
        kernel,
        out_shape=jax.ShapeDtypeStruct((n * h * wp, cout), jnp.bfloat16),
        grid=(n,),
        in_specs=[
            pl.BlockSpec(((h + 2) * wp, 3 * c), lambda i: (i, 0)),
            pl.BlockSpec((3, 3 * c, cout), lambda i: (0, 0, 0)),
            pl.BlockSpec((1, cout), lambda i: (0, 0)),
        ],
        out_specs=pl.BlockSpec((h * wp, cout), lambda i: (i, 0)),
        compiler_params=pltpu.CompilerParams(dimension_semantics=("parallel",)),
    )(x2, wk, b)

    out = out.reshape(n, h, wp, cout)
    if wp != w:
        out = out[:, :, :w, :]
    return out


def maxpool2x2(x):
    """2x2 / stride-2 max pool on NHWC input, one fused Pallas pass."""
    n, h, w, c = x.shape
    h2, w2 = h // 2, w // 2
    xr = x.reshape(n * h2, 2, w2, 2 * c)     # free row-major reshape

    rows = n * h2
    row_bytes = 2 * w2 * 2 * c * x.dtype.itemsize
    max_rows = max(1, (2 * 1024 * 1024) // row_bytes)   # target ~<=2MB blocks
    rb = rows
    if rb > max_rows:
        rb = 1
        for d in range(min(max_rows, rows), 0, -1):
            if rows % d == 0:
                rb = d
                break

    out = pl.pallas_call(
        _pool_kernel,
        out_shape=jax.ShapeDtypeStruct((rows, w2, c), x.dtype),
        grid=(rows // rb,),
        in_specs=[pl.BlockSpec((rb, 2, w2, 2 * c), lambda i: (i, 0, 0, 0))],
        out_specs=pl.BlockSpec((rb, w2, c), lambda i: (i, 0, 0)),
        compiler_params=pltpu.CompilerParams(dimension_semantics=("parallel",)),
    )(xr)
    return out.reshape(n, h2, w2, c)


# ----------------------------------------------------------------------------
# Parameter init (kaiming_normal_, mode='fan_out', nonlinearity='relu'; bias=0)
# ----------------------------------------------------------------------------
def init_params(key, num_classes=10):
    ks = jax.random.split(key, 5)

    def conv_w(k, cout, cin):
        fan_out = cout * 3 * 3
        std = (2.0 / fan_out) ** 0.5
        return jax.random.normal(k, (cout, cin, 3, 3), jnp.float32) * std

    def lin_w(k, out_f, in_f):
        std = (2.0 / out_f) ** 0.5
        return jax.random.normal(k, (out_f, in_f), jnp.float32) * std

    return {
        "conv1_w": conv_w(ks[0], 32, 3),  "conv1_b": jnp.zeros((32,), jnp.float32),
        "conv2_w": conv_w(ks[1], 64, 32), "conv2_b": jnp.zeros((64,), jnp.float32),
        "conv3_w": conv_w(ks[2], 64, 64), "conv3_b": jnp.zeros((64,), jnp.float32),
        "fc1_w": lin_w(ks[3], 512, 64 * 4 * 4), "fc1_b": jnp.zeros((512,), jnp.float32),
        "fc2_w": lin_w(ks[4], num_classes, 512),
        "fc2_b": jnp.zeros((num_classes,), jnp.float32),
    }


def prepare_params(params):
    """One-time weight preprocessing (hoisted out of the jitted forward)."""
    def conv_wk(w):
        cout, cin = w.shape[0], w.shape[1]
        # (Cout,Cin,kh,kw) -> (kh, kw*Cin, Cout), matching (dh, dw-folded-K) order.
        return (jnp.transpose(w, (2, 3, 1, 0))
                .reshape(3, 3 * cin, cout).astype(jnp.bfloat16))

    # fc1 columns: PyTorch flattens (C=64,H=4,W=4) as (c,h,w); we flatten NHWC as (h,w,c).
    w1 = params["fc1_w"]
    w1 = (w1.reshape(w1.shape[0], 64, 4, 4).transpose(0, 2, 3, 1)
          .reshape(w1.shape[0], -1))
    return {
        "conv1_wk": conv_wk(params["conv1_w"]),
        "conv1_b": params["conv1_b"].reshape(1, -1),
        "conv2_wk": conv_wk(params["conv2_w"]),
        "conv2_b": params["conv2_b"].reshape(1, -1),
        "conv3_wk": conv_wk(params["conv3_w"]),
        "conv3_b": params["conv3_b"].reshape(1, -1),
        "fc1_wt": w1.T.astype(jnp.bfloat16),
        "fc1_b": params["fc1_b"].reshape(1, -1),
        "fc2_wt": params["fc2_w"].T.astype(jnp.bfloat16),
        "fc2_b": params["fc2_b"].reshape(1, -1),
    }


# ----------------------------------------------------------------------------
# Forward pass (mirrors AdamOnlyCNN.forward, eval mode)
# ----------------------------------------------------------------------------
@jax.jit
def adam_only_cnn_forward(prepared, x):
    x = jnp.transpose(x, (0, 2, 3, 1)).astype(jnp.bfloat16)      # NCHW -> NHWC, bf16
    x = conv3x3_relu(x, prepared["conv1_wk"], prepared["conv1_b"])   # (N,32,32,32)
    x = maxpool2x2(x)                                                # (N,16,16,32)
    x = conv3x3_relu(x, prepared["conv2_wk"], prepared["conv2_b"])   # (N,16,16,64)
    x = maxpool2x2(x)                                                # (N,8,8,64)
    x = conv3x3_relu(x, prepared["conv3_wk"], prepared["conv3_b"])   # (N,8,8,64)
    x = maxpool2x2(x)                                                # (N,4,4,64)

    n = x.shape[0]
    x = x.reshape(n, -1)                                             # (N,1024) in (h,w,c) order
    x = matmul_bias_act(x, prepared["fc1_wt"], prepared["fc1_b"],
                        relu=True, out_dtype=jnp.bfloat16)           # (N,512)
    # TODO(synk): nn.Dropout(0.5) is identity in eval mode; no RNG masking applied.
    x = matmul_bias_act(x, prepared["fc2_wt"], prepared["fc2_b"],
                        relu=False, out_dtype=jnp.float32)           # (N,num_classes)
    return x


if __name__ == "__main__":
    key = jax.random.PRNGKey(0)
    pkey, xkey = jax.random.split(key)
    params = init_params(pkey, num_classes=10)
    prepared = prepare_params(params)
    # Spatial size 32 is required by fc1 (64*4*4 after three 2x2 pools).
    x = jax.random.normal(xkey, (2, 3, 32, 32), jnp.float32)
    out = adam_only_cnn_forward(prepared, x)
    jax.block_until_ready(out)
    assert out.shape == (2, 10) and out.dtype == jnp.float32
    assert bool(jnp.all(jnp.isfinite(out)))
    print("KERNEL_OK")
</pallas_src>

<mosaic_0001>
module attributes {stable_mosaic.version = 11 : i64} {
  func.func @_conv3x3_kernel(%arg0: i32, %arg1: memref<1088x9xbf16, #tpu.memory_space<vmem>>, %arg2: memref<3x9x32xbf16, #tpu.memory_space<vmem>>, %arg3: memref<1x32xf32, #tpu.memory_space<vmem>>, %arg4: memref<1024x32xbf16, #tpu.memory_space<vmem>>) attributes {dimension_semantics = [#tpu.dimension_semantics<parallel>], iteration_bounds = array<i64: 2>, scalar_prefetch = 0 : i64, scratch_operands = 0 : i64, tpu.core_type = #tpu.core_type<tc>, window_params = [{transform_indices = @transform_0, window_bounds = array<i64: 1088, 9>}, {pipeline_mode = #tpu.pipeline_mode<synchronous>, transform_indices = @transform_1, window_bounds = array<i64: 3, 9, 32>}, {pipeline_mode = #tpu.pipeline_mode<synchronous>, transform_indices = @transform_2, window_bounds = array<i64: 1, 32>}, {transform_indices = @transform_3, window_bounds = array<i64: 1024, 32>}]} {
    %c0 = arith.constant 0 : index
    %c0_0 = arith.constant 0 : index
    %0 = vector.load %arg1[%c0, %c0_0] : memref<1088x9xbf16, #tpu.memory_space<vmem>>, vector<1024x9xbf16>
    %c0_1 = arith.constant 0 : index
    %c0_2 = arith.constant 0 : index
    %c0_3 = arith.constant 0 : index
    %1 = vector.load %arg2[%c0_1, %c0_2, %c0_3] : memref<3x9x32xbf16, #tpu.memory_space<vmem>>, vector<1x9x32xbf16>
    %2 = vector.shape_cast %1 : vector<1x9x32xbf16> to vector<9x32xbf16>
    %cst = arith.constant dense<0.000000e+00> : vector<1024x32xf32>
    %3 = tpu.matmul %0, %2, %cst {dimension_numbers = #tpu.dot_dimension_numbers<[1], [0], [0], [1], [0, 0, 1, 1], [], []>} : vector<1024x9xbf16>, vector<9x32xbf16>, vector<1024x32xf32> -> vector<1024x32xf32>
    %c32 = arith.constant 32 : index
    %c0_4 = arith.constant 0 : index
    %4 = vector.load %arg1[%c32, %c0_4] : memref<1088x9xbf16, #tpu.memory_space<vmem>>, vector<1024x9xbf16>
    %c1 = arith.constant 1 : index
    %c0_5 = arith.constant 0 : index
    %c0_6 = arith.constant 0 : index
    %5 = vector.load %arg2[%c1, %c0_5, %c0_6] : memref<3x9x32xbf16, #tpu.memory_space<vmem>>, vector<1x9x32xbf16>
    %6 = vector.shape_cast %5 : vector<1x9x32xbf16> to vector<9x32xbf16>
    %cst_7 = arith.constant dense<0.000000e+00> : vector<1024x32xf32>
    %7 = tpu.matmul %4, %6, %cst_7 {dimension_numbers = #tpu.dot_dimension_numbers<[1], [0], [0], [1], [0, 0, 1, 1], [], []>} : vector<1024x9xbf16>, vector<9x32xbf16>, vector<1024x32xf32> -> vector<1024x32xf32>
    %8 = arith.addf %3, %7 : vector<1024x32xf32>
    %c64 = arith.constant 64 : index
    %c0_8 = arith.constant 0 : index
    %9 = vector.load %arg1[%c64, %c0_8] : memref<1088x9xbf16, #tpu.memory_space<vmem>>, vector<1024x9xbf16>
    %c2 = arith.constant 2 : index
    %c0_9 = arith.constant 0 : index
    %c0_10 = arith.constant 0 : index
    %10 = vector.load %arg2[%c2, %c0_9, %c0_10] : memref<3x9x32xbf16, #tpu.memory_space<vmem>>, vector<1x9x32xbf16>
    %11 = vector.shape_cast %10 : vector<1x9x32xbf16> to vector<9x32xbf16>
    %cst_11 = arith.constant dense<0.000000e+00> : vector<1024x32xf32>
    %12 = tpu.matmul %9, %11, %cst_11 {dimension_numbers = #tpu.dot_dimension_numbers<[1], [0], [0], [1], [0, 0, 1, 1], [], []>} : vector<1024x9xbf16>, vector<9x32xbf16>, vector<1024x32xf32> -> vector<1024x32xf32>
    %13 = arith.addf %8, %12 : vector<1024x32xf32>
    %c0_12 = arith.constant 0 : index
    %c0_13 = arith.constant 0 : index
    %14 = vector.load %arg3[%c0_12, %c0_13] : memref<1x32xf32, #tpu.memory_space<vmem>>, vector<1x32xf32>
    %15 = vector.broadcast %14 : vector<1x32xf32> to vector<1024x32xf32>
    %16 = arith.addf %13, %15 : vector<1024x32xf32>
    %cst_14 = arith.constant 0.000000e+00 : f32
    %17 = vector.broadcast %cst_14 : f32 to vector<1024x32xf32>
    %18 = arith.maximumf %16, %17 : vector<1024x32xf32>
    %19 = arith.truncf %18 : vector<1024x32xf32> to vector<1024x32xbf16>
    %c0_15 = arith.constant 0 : index
    %c0_16 = arith.constant 0 : index
    %20 = vector.load %arg4[%c0_15, %c0_16] : memref<1024x32xbf16, #tpu.memory_space<vmem>>, vector<1024x32xbf16>
    tpu.vector_store %arg4[%c0_15, %c0_16], %19 {strides = array<i32>} : memref<1024x32xbf16, #tpu.memory_space<vmem>>, vector<1024x32xbf16>,
    return
  }
  func.func @transform_0(%arg0: i32) -> (i32, i32) {
    %c0_i32 = arith.constant 0 : i32
    %c0_i32_0 = arith.constant 0 : i32
    return %arg0, %c0_i32 : i32, i32
  }
  func.func @transform_1(%arg0: i32) -> (i32, i32, i32) {
    %c0_i32 = arith.constant 0 : i32
    %c0_i32_0 = arith.constant 0 : i32
    %c0_i32_1 = arith.constant 0 : i32
    %c0_i32_2 = arith.constant 0 : i32
    return %c0_i32, %c0_i32_0, %c0_i32_1 : i32, i32, i32
  }
  func.func @transform_2(%arg0: i32) -> (i32, i32) {
    %c0_i32 = arith.constant 0 : i32
    %c0_i32_0 = arith.constant 0 : i32
    %c0_i32_1 = arith.constant 0 : i32
    return %c0_i32, %c0_i32_0 : i32, i32
  }
  func.func @transform_3(%arg0: i32) -> (i32, i32) {
    %c0_i32 = arith.constant 0 : i32
    %c0_i32_0 = arith.constant 0 : i32
    return %arg0, %c0_i32 : i32, i32
  }
}

module attributes {stable_mosaic.version = 11 : i64} {
  func.func @_pool_kernel(%arg0: i32, %arg1: memref<32x2x16x64xbf16, #tpu.memory_space<vmem>>, %arg2: memref<32x16x32xbf16, #tpu.memory_space<vmem>>) attributes {dimension_semantics = [#tpu.dimension_semantics<parallel>], iteration_bounds = array<i64: 1>, scalar_prefetch = 0 : i64, scratch_operands = 0 : i64, tpu.core_type = #tpu.core_type<tc>, window_params = [{transform_indices = @transform_0, window_bounds = array<i64: 32, 2, 16, 64>}, {transform_indices = @transform_1, window_bounds = array<i64: 32, 16, 32>}]} {
    %c0 = arith.constant 0 : index
    %c0_0 = arith.constant 0 : index
    %c0_1 = arith.constant 0 : index
    %c0_2 = arith.constant 0 : index
    %0 = vector.load %arg1[%c0, %c0_0, %c0_1, %c0_2] : memref<32x2x16x64xbf16, #tpu.memory_space<vmem>>, vector<32x2x16x64xbf16>
    %1 = vector.extract_strided_slice %0 {offsets = [0, 0, 0, 0], sizes = [32, 1, 16, 64], strides = [1, 1, 1, 1]} : vector<32x2x16x64xbf16> to vector<32x1x16x64xbf16>
    %2 = vector.shape_cast %1 : vector<32x1x16x64xbf16> to vector<32x16x64xbf16>
    %3 = vector.extract_strided_slice %0 {offsets = [0, 1, 0, 0], sizes = [32, 1, 16, 64], strides = [1, 1, 1, 1]} : vector<32x2x16x64xbf16> to vector<32x1x16x64xbf16>
    %4 = vector.shape_cast %3 : vector<32x1x16x64xbf16> to vector<32x16x64xbf16>
    %5 = arith.maximumf %2, %4 : vector<32x16x64xbf16>
    %6 = vector.extract_strided_slice %5 {offsets = [0, 0, 0], sizes = [32, 16, 32], strides = [1, 1, 1]} : vector<32x16x64xbf16> to vector<32x16x32xbf16>
    %7 = vector.extract_strided_slice %5 {offsets = [0, 0, 32], sizes = [32, 16, 32], strides = [1, 1, 1]} : vector<32x16x64xbf16> to vector<32x16x32xbf16>
    %8 = arith.maximumf %6, %7 : vector<32x16x32xbf16>
    %c0_3 = arith.constant 0 : index
    %c0_4 = arith.constant 0 : index
    %c0_5 = arith.constant 0 : index
    %9 = vector.load %arg2[%c0_3, %c0_4, %c0_5] : memref<32x16x32xbf16, #tpu.memory_space<vmem>>, vector<32x16x32xbf16>
    tpu.vector_store %arg2[%c0_3, %c0_4, %c0_5], %8 {strides = array<i32>} : memref<32x16x32xbf16, #tpu.memory_space<vmem>>, vector<32x16x32xbf16>,
    return
  }
  func.func @transform_0(%arg0: i32) -> (i32, i32, i32, i32) {
    %c0_i32 = arith.constant 0 : i32
    %c0_i32_0 = arith.constant 0 : i32
    %c0_i32_1 = arith.constant 0 : i32
    %c0_i32_2 = arith.constant 0 : i32
    return %arg0, %c0_i32, %c0_i32_0, %c0_i32_1 : i32, i32, i32, i32
  }
  func.func @transform_1(%arg0: i32) -> (i32, i32, i32) {
    %c0_i32 = arith.constant 0 : i32
    %c0_i32_0 = arith.constant 0 : i32
    %c0_i32_1 = arith.constant 0 : i32
    return %arg0, %c0_i32, %c0_i32_0 : i32, i32, i32
  }
}

module attributes {stable_mosaic.version = 11 : i64} {
  func.func @_conv3x3_kernel(%arg0: i32, %arg1: memref<288x96xbf16, #tpu.memory_space<vmem>>, %arg2: memref<3x96x64xbf16, #tpu.memory_space<vmem>>, %arg3: memref<1x64xf32, #tpu.memory_space<vmem>>, %arg4: memref<256x64xbf16, #tpu.memory_space<vmem>>) attributes {dimension_semantics = [#tpu.dimension_semantics<parallel>], iteration_bounds = array<i64: 2>, scalar_prefetch = 0 : i64, scratch_operands = 0 : i64, tpu.core_type = #tpu.core_type<tc>, window_params = [{transform_indices = @transform_0, window_bounds = array<i64: 288, 96>}, {pipeline_mode = #tpu.pipeline_mode<synchronous>, transform_indices = @transform_1, window_bounds = array<i64: 3, 96, 64>}, {pipeline_mode = #tpu.pipeline_mode<synchronous>, transform_indices = @transform_2, window_bounds = array<i64: 1, 64>}, {transform_indices = @transform_3, window_bounds = array<i64: 256, 64>}]} {
    %c0 = arith.constant 0 : index
    %c0_0 = arith.constant 0 : index
    %0 = vector.load %arg1[%c0, %c0_0] : memref<288x96xbf16, #tpu.memory_space<vmem>>, vector<256x96xbf16>
    %c0_1 = arith.constant 0 : index
    %c0_2 = arith.constant 0 : index
    %c0_3 = arith.constant 0 : index
    %1 = vector.load %arg2[%c0_1, %c0_2, %c0_3] : memref<3x96x64xbf16, #tpu.memory_space<vmem>>, vector<1x96x64xbf16>
    %2 = vector.shape_cast %1 : vector<1x96x64xbf16> to vector<96x64xbf16>
    %cst = arith.constant dense<0.000000e+00> : vector<256x64xf32>
    %3 = tpu.matmul %0, %2, %cst {dimension_numbers = #tpu.dot_dimension_numbers<[1], [0], [0], [1], [0, 0, 1, 1], [], []>} : vector<256x96xbf16>, vector<96x64xbf16>, vector<256x64xf32> -> vector<256x64xf32>
    %c16 = arith.constant 16 : index
    %c0_4 = arith.constant 0 : index
    %4 = vector.load %arg1[%c16, %c0_4] : memref<288x96xbf16, #tpu.memory_space<vmem>>, vector<256x96xbf16>
    %c1 = arith.constant 1 : index
    %c0_5 = arith.constant 0 : index
    %c0_6 = arith.constant 0 : index
    %5 = vector.load %arg2[%c1, %c0_5, %c0_6] : memref<3x96x64xbf16, #tpu.memory_space<vmem>>, vector<1x96x64xbf16>
    %6 = vector.shape_cast %5 : vector<1x96x64xbf16> to vector<96x64xbf16>
    %cst_7 = arith.constant dense<0.000000e+00> : vector<256x64xf32>
    %7 = tpu.matmul %4, %6, %cst_7 {dimension_numbers = #tpu.dot_dimension_numbers<[1], [0], [0], [1], [0, 0, 1, 1], [], []>} : vector<256x96xbf16>, vector<96x64xbf16>, vector<256x64xf32> -> vector<256x64xf32>
    %8 = arith.addf %3, %7 : vector<256x64xf32>
    %c32 = arith.constant 32 : index
    %c0_8 = arith.constant 0 : index
    %9 = vector.load %arg1[%c32, %c0_8] : memref<288x96xbf16, #tpu.memory_space<vmem>>, vector<256x96xbf16>
    %c2 = arith.constant 2 : index
    %c0_9 = arith.constant 0 : index
    %c0_10 = arith.constant 0 : index
    %10 = vector.load %arg2[%c2, %c0_9, %c0_10] : memref<3x96x64xbf16, #tpu.memory_space<vmem>>, vector<1x96x64xbf16>
    %11 = vector.shape_cast %10 : vector<1x96x64xbf16> to vector<96x64xbf16>
    %cst_11 = arith.constant dense<0.000000e+00> : vector<256x64xf32>
    %12 = tpu.matmul %9, %11, %cst_11 {dimension_numbers = #tpu.dot_dimension_numbers<[1], [0], [0], [1], [0, 0, 1, 1], [], []>} : vector<256x96xbf16>, vector<96x64xbf16>, vector<256x64xf32> -> vector<256x64xf32>
    %13 = arith.addf %8, %12 : vector<256x64xf32>
    %c0_12 = arith.constant 0 : index
    %c0_13 = arith.constant 0 : index
    %14 = vector.load %arg3[%c0_12, %c0_13] : memref<1x64xf32, #tpu.memory_space<vmem>>, vector<1x64xf32>
    %15 = vector.broadcast %14 : vector<1x64xf32> to vector<256x64xf32>
    %16 = arith.addf %13, %15 : vector<256x64xf32>
    %cst_14 = arith.constant 0.000000e+00 : f32
    %17 = vector.broadcast %cst_14 : f32 to vector<256x64xf32>
    %18 = arith.maximumf %16, %17 : vector<256x64xf32>
    %19 = arith.truncf %18 : vector<256x64xf32> to vector<256x64xbf16>
    %c0_15 = arith.constant 0 : index
    %c0_16 = arith.constant 0 : index
    %20 = vector.load %arg4[%c0_15, %c0_16] : memref<256x64xbf16, #tpu.memory_space<vmem>>, vector<256x64xbf16>
    tpu.vector_store %arg4[%c0_15, %c0_16], %19 {strides = array<i32>} : memref<256x64xbf16, #tpu.memory_space<vmem>>, vector<256x64xbf16>,
    return
  }
  func.func @transform_0(%arg0: i32) -> (i32, i32) {
    %c0_i32 = arith.constant 0 : i32
    %c0_i32_0 = arith.constant 0 : i32
    return %arg0, %c0_i32 : i32, i32
  }
  func.func @transform_1(%arg0: i32) -> (i32, i32, i32) {
    %c0_i32 = arith.constant 0 : i32
    %c0_i32_0 = arith.constant 0 : i32
    %c0_i32_1 = arith.constant 0 : i32
    %c0_i32_2 = arith.constant 0 : i32
    return %c0_i32, %c0_i32_0, %c0_i32_1 : i32, i32, i32
  }
  func.func @transform_2(%arg0: i32) -> (i32, i32) {
    %c0_i32 = arith.constant 0 : i32
    %c0_i32_0 = arith.constant 0 : i32
    %c0_i32_1 = arith.constant 0 : i32
    return %c0_i32, %c0_i32_0 : i32, i32
  }
  func.func @transform_3(%arg0: i32) -> (i32, i32) {
    %c0_i32 = arith.constant 0 : i32
    %c0_i32_0 = arith.constant 0 : i32
    return %arg0, %c0_i32 : i32, i32
  }
}

module attributes {stable_mosaic.version = 11 : i64} {
  func.func @_pool_kernel(%arg0: i32, %arg1: memref<16x2x8x128xbf16, #tpu.memory_space<vmem>>, %arg2: memref<16x8x64xbf16, #tpu.memory_space<vmem>>) attributes {dimension_semantics = [#tpu.dimension_semantics<parallel>], iteration_bounds = array<i64: 1>, scalar_prefetch = 0 : i64, scratch_operands = 0 : i64, tpu.core_type = #tpu.core_type<tc>, window_params = [{transform_indices = @transform_0, window_bounds = array<i64: 16, 2, 8, 128>}, {transform_indices = @transform_1, window_bounds = array<i64: 16, 8, 64>}]} {
    %c0 = arith.constant 0 : index
    %c0_0 = arith.constant 0 : index
    %c0_1 = arith.constant 0 : index
    %c0_2 = arith.constant 0 : index
    %0 = vector.load %arg1[%c0, %c0_0, %c0_1, %c0_2] : memref<16x2x8x128xbf16, #tpu.memory_space<vmem>>, vector<16x2x8x128xbf16>
    %1 = vector.extract_strided_slice %0 {offsets = [0, 0, 0, 0], sizes = [16, 1, 8, 128], strides = [1, 1, 1, 1]} : vector<16x2x8x128xbf16> to vector<16x1x8x128xbf16>
    %2 = vector.shape_cast %1 : vector<16x1x8x128xbf16> to vector<16x8x128xbf16>
    %3 = vector.extract_strided_slice %0 {offsets = [0, 1, 0, 0], sizes = [16, 1, 8, 128], strides = [1, 1, 1, 1]} : vector<16x2x8x128xbf16> to vector<16x1x8x128xbf16>
    %4 = vector.shape_cast %3 : vector<16x1x8x128xbf16> to vector<16x8x128xbf16>
    %5 = arith.maximumf %2, %4 : vector<16x8x128xbf16>
    %6 = vector.extract_strided_slice %5 {offsets = [0, 0, 0], sizes = [16, 8, 64], strides = [1, 1, 1]} : vector<16x8x128xbf16> to vector<16x8x64xbf16>
    %7 = vector.extract_strided_slice %5 {offsets = [0, 0, 64], sizes = [16, 8, 64], strides = [1, 1, 1]} : vector<16x8x128xbf16> to vector<16x8x64xbf16>
    %8 = arith.maximumf %6, %7 : vector<16x8x64xbf16>
    %c0_3 = arith.constant 0 : index
    %c0_4 = arith.constant 0 : index
    %c0_5 = arith.constant 0 : index
    %9 = vector.load %arg2[%c0_3, %c0_4, %c0_5] : memref<16x8x64xbf16, #tpu.memory_space<vmem>>, vector<16x8x64xbf16>
    tpu.vector_store %arg2[%c0_3, %c0_4, %c0_5], %8 {strides = array<i32>} : memref<16x8x64xbf16, #tpu.memory_space<vmem>>, vector<16x8x64xbf16>,
    return
  }
  func.func @transform_0(%arg0: i32) -> (i32, i32, i32, i32) {
    %c0_i32 = arith.constant 0 : i32
    %c0_i32_0 = arith.constant 0 : i32
    %c0_i32_1 = arith.constant 0 : i32
    %c0_i32_2 = arith.constant 0 : i32
    return %arg0, %c0_i32, %c0_i32_0, %c0_i32_1 : i32, i32, i32, i32
  }
  func.func @transform_1(%arg0: i32) -> (i32, i32, i32) {
    %c0_i32 = arith.constant 0 : i32
    %c0_i32_0 = arith.constant 0 : i32
    %c0_i32_1 = arith.constant 0 : i32
    return %arg0, %c0_i32, %c0_i32_0 : i32, i32, i32
  }
}

module attributes {stable_mosaic.version = 11 : i64} {
  func.func @_conv3x3_kernel(%arg0: i32, %arg1: memref<160x192xbf16, #tpu.memory_space<vmem>>, %arg2: memref<3x192x64xbf16, #tpu.memory_space<vmem>>, %arg3: memref<1x64xf32, #tpu.memory_space<vmem>>, %arg4: memref<128x64xbf16, #tpu.memory_space<vmem>>) attributes {dimension_semantics = [#tpu.dimension_semantics<parallel>], iteration_bounds = array<i64: 2>, scalar_prefetch = 0 : i64, scratch_operands = 0 : i64, tpu.core_type = #tpu.core_type<tc>, window_params = [{transform_indices = @transform_0, window_bounds = array<i64: 160, 192>}, {pipeline_mode = #tpu.pipeline_mode<synchronous>, transform_indices = @transform_1, window_bounds = array<i64: 3, 192, 64>}, {pipeline_mode = #tpu.pipeline_mode<synchronous>, transform_indices = @transform_2, window_bounds = array<i64: 1, 64>}, {transform_indices = @transform_3, window_bounds = array<i64: 128, 64>}]} {
    %c0 = arith.constant 0 : index
    %c0_0 = arith.constant 0 : index
    %0 = vector.load %arg1[%c0, %c0_0] : memref<160x192xbf16, #tpu.memory_space<vmem>>, vector<128x192xbf16>
    %c0_1 = arith.constant 0 : index
    %c0_2 = arith.constant 0 : index
    %c0_3 = arith.constant 0 : index
    %1 = vector.load %arg2[%c0_1, %c0_2, %c0_3] : memref<3x192x64xbf16, #tpu.memory_space<vmem>>, vector<1x192x64xbf16>
    %2 = vector.shape_cast %1 : vector<1x192x64xbf16> to vector<192x64xbf16>
    %cst = arith.constant dense<0.000000e+00> : vector<128x64xf32>
    %3 = tpu.matmul %0, %2, %cst {dimension_numbers = #tpu.dot_dimension_numbers<[1], [0], [0], [1], [0, 0, 1, 1], [], []>} : vector<128x192xbf16>, vector<192x64xbf16>, vector<128x64xf32> -> vector<128x64xf32>
    %c16 = arith.constant 16 : index
    %c0_4 = arith.constant 0 : index
    %4 = vector.load %arg1[%c16, %c0_4] : memref<160x192xbf16, #tpu.memory_space<vmem>>, vector<128x192xbf16>
    %c1 = arith.constant 1 : index
    %c0_5 = arith.constant 0 : index
    %c0_6 = arith.constant 0 : index
    %5 = vector.load %arg2[%c1, %c0_5, %c0_6] : memref<3x192x64xbf16, #tpu.memory_space<vmem>>, vector<1x192x64xbf16>
    %6 = vector.shape_cast %5 : vector<1x192x64xbf16> to vector<192x64xbf16>
    %cst_7 = arith.constant dense<0.000000e+00> : vector<128x64xf32>
    %7 = tpu.matmul %4, %6, %cst_7 {dimension_numbers = #tpu.dot_dimension_numbers<[1], [0], [0], [1], [0, 0, 1, 1], [], []>} : vector<128x192xbf16>, vector<192x64xbf16>, vector<128x64xf32> -> vector<128x64xf32>
    %8 = arith.addf %3, %7 : vector<128x64xf32>
    %c32 = arith.constant 32 : index
    %c0_8 = arith.constant 0 : index
    %9 = vector.load %arg1[%c32, %c0_8] : memref<160x192xbf16, #tpu.memory_space<vmem>>, vector<128x192xbf16>
    %c2 = arith.constant 2 : index
    %c0_9 = arith.constant 0 : index
    %c0_10 = arith.constant 0 : index
    %10 = vector.load %arg2[%c2, %c0_9, %c0_10] : memref<3x192x64xbf16, #tpu.memory_space<vmem>>, vector<1x192x64xbf16>
    %11 = vector.shape_cast %10 : vector<1x192x64xbf16> to vector<192x64xbf16>
    %cst_11 = arith.constant dense<0.000000e+00> : vector<128x64xf32>
    %12 = tpu.matmul %9, %11, %cst_11 {dimension_numbers = #tpu.dot_dimension_numbers<[1], [0], [0], [1], [0, 0, 1, 1], [], []>} : vector<128x192xbf16>, vector<192x64xbf16>, vector<128x64xf32> -> vector<128x64xf32>
    %13 = arith.addf %8, %12 : vector<128x64xf32>
    %c0_12 = arith.constant 0 : index
    %c0_13 = arith.constant 0 : index
    %14 = vector.load %arg3[%c0_12, %c0_13] : memref<1x64xf32, #tpu.memory_space<vmem>>, vector<1x64xf32>
    %15 = vector.broadcast %14 : vector<1x64xf32> to vector<128x64xf32>
    %16 = arith.addf %13, %15 : vector<128x64xf32>
    %cst_14 = arith.constant 0.000000e+00 : f32
    %17 = vector.broadcast %cst_14 : f32 to vector<128x64xf32>
    %18 = arith.maximumf %16, %17 : vector<128x64xf32>
    %19 = arith.truncf %18 : vector<128x64xf32> to vector<128x64xbf16>
    %c0_15 = arith.constant 0 : index
    %c0_16 = arith.constant 0 : index
    %20 = vector.load %arg4[%c0_15, %c0_16] : memref<128x64xbf16, #tpu.memory_space<vmem>>, vector<128x64xbf16>
    tpu.vector_store %arg4[%c0_15, %c0_16], %19 {strides = array<i32>} : memref<128x64xbf16, #tpu.memory_space<vmem>>, vector<128x64xbf16>,
    return
  }
  func.func @transform_0(%arg0: i32) -> (i32, i32) {
    %c0_i32 = arith.constant 0 : i32
    %c0_i32_0 = arith.constant 0 : i32
    return %arg0, %c0_i32 : i32, i32
  }
  func.func @transform_1(%arg0: i32) -> (i32, i32, i32) {
    %c0_i32 = arith.constant 0 : i32
    %c0_i32_0 = arith.constant 0 : i32
    %c0_i32_1 = arith.constant 0 : i32
    %c0_i32_2 = arith.constant 0 : i32
    return %c0_i32, %c0_i32_0, %c0_i32_1 : i32, i32, i32
  }
  func.func @transform_2(%arg0: i32) -> (i32, i32) {
    %c0_i32 = arith.constant 0 : i32
    %c0_i32_0 = arith.constant 0 : i32
    %c0_i32_1 = arith.constant 0 : i32
    return %c0_i32, %c0_i32_0 : i32, i32
  }
  func.func @transform_3(%arg0: i32) -> (i32, i32) {
    %c0_i32 = arith.constant 0 : i32
    %c0_i32_0 = arith.constant 0 : i32
    return %arg0, %c0_i32 : i32, i32
  }
}

module attributes {stable_mosaic.version = 11 : i64} {
  func.func @_pool_kernel(%arg0: i32, %arg1: memref<8x2x4x128xbf16, #tpu.memory_space<vmem>>, %arg2: memref<8x4x64xbf16, #tpu.memory_space<vmem>>) attributes {dimension_semantics = [#tpu.dimension_semantics<parallel>], iteration_bounds = array<i64: 1>, scalar_prefetch = 0 : i64, scratch_operands = 0 : i64, tpu.core_type = #tpu.core_type<tc>, window_params = [{transform_indices = @transform_0, window_bounds = array<i64: 8, 2, 4, 128>}, {transform_indices = @transform_1, window_bounds = array<i64: 8, 4, 64>}]} {
    %c0 = arith.constant 0 : index
    %c0_0 = arith.constant 0 : index
    %c0_1 = arith.constant 0 : index
    %c0_2 = arith.constant 0 : index
    %0 = vector.load %arg1[%c0, %c0_0, %c0_1, %c0_2] : memref<8x2x4x128xbf16, #tpu.memory_space<vmem>>, vector<8x2x4x128xbf16>
    %1 = vector.extract_strided_slice %0 {offsets = [0, 0, 0, 0], sizes = [8, 1, 4, 128], strides = [1, 1, 1, 1]} : vector<8x2x4x128xbf16> to vector<8x1x4x128xbf16>
    %2 = vector.shape_cast %1 : vector<8x1x4x128xbf16> to vector<8x4x128xbf16>
    %3 = vector.extract_strided_slice %0 {offsets = [0, 1, 0, 0], sizes = [8, 1, 4, 128], strides = [1, 1, 1, 1]} : vector<8x2x4x128xbf16> to vector<8x1x4x128xbf16>
    %4 = vector.shape_cast %3 : vector<8x1x4x128xbf16> to vector<8x4x128xbf16>
    %5 = arith.maximumf %2, %4 : vector<8x4x128xbf16>
    %6 = vector.extract_strided_slice %5 {offsets = [0, 0, 0], sizes = [8, 4, 64], strides = [1, 1, 1]} : vector<8x4x128xbf16> to vector<8x4x64xbf16>
    %7 = vector.extract_strided_slice %5 {offsets = [0, 0, 64], sizes = [8, 4, 64], strides = [1, 1, 1]} : vector<8x4x128xbf16> to vector<8x4x64xbf16>
    %8 = arith.maximumf %6, %7 : vector<8x4x64xbf16>
    %c0_3 = arith.constant 0 : index
    %c0_4 = arith.constant 0 : index
    %c0_5 = arith.constant 0 : index
    %9 = vector.load %arg2[%c0_3, %c0_4, %c0_5] : memref<8x4x64xbf16, #tpu.memory_space<vmem>>, vector<8x4x64xbf16>
    tpu.vector_store %arg2[%c0_3, %c0_4, %c0_5], %8 {strides = array<i32>} : memref<8x4x64xbf16, #tpu.memory_space<vmem>>, vector<8x4x64xbf16>,
    return
  }
  func.func @transform_0(%arg0: i32) -> (i32, i32, i32, i32) {
    %c0_i32 = arith.constant 0 : i32
    %c0_i32_0 = arith.constant 0 : i32
    %c0_i32_1 = arith.constant 0 : i32
    %c0_i32_2 = arith.constant 0 : i32
    return %arg0, %c0_i32, %c0_i32_0, %c0_i32_1 : i32, i32, i32, i32
  }
  func.func @transform_1(%arg0: i32) -> (i32, i32, i32) {
    %c0_i32 = arith.constant 0 : i32
    %c0_i32_0 = arith.constant 0 : i32
    %c0_i32_1 = arith.constant 0 : i32
    return %arg0, %c0_i32, %c0_i32_0 : i32, i32, i32
  }
}

module attributes {stable_mosaic.version = 11 : i64} {
  func.func @_mm_bias_act_kernel(%arg0: i32, %arg1: i32, %arg2: memref<16x1024xbf16, #tpu.memory_space<vmem>>, %arg3: memref<1024x256xbf16, #tpu.memory_space<vmem>>, %arg4: memref<1x256xf32, #tpu.memory_space<vmem>>, %arg5: memref<16x256xbf16, #tpu.memory_space<vmem>>) attributes {dimension_semantics = [#tpu.dimension_semantics<parallel>, #tpu.dimension_semantics<parallel>], iteration_bounds = array<i64: 1, 2>, scalar_prefetch = 0 : i64, scratch_operands = 0 : i64, tpu.core_type = #tpu.core_type<tc>, window_params = [{transform_indices = @transform_0, window_bounds = array<i64: 16, 1024>}, {transform_indices = @transform_1, window_bounds = array<i64: 1024, 256>}, {transform_indices = @transform_2, window_bounds = array<i64: 1, 256>}, {transform_indices = @transform_3, window_bounds = array<i64: 16, 256>}]} {
    %c0 = arith.constant 0 : index
    %c0_0 = arith.constant 0 : index
    %0 = vector.load %arg2[%c0, %c0_0] : memref<16x1024xbf16, #tpu.memory_space<vmem>>, vector<16x1024xbf16>
    %c0_1 = arith.constant 0 : index
    %c0_2 = arith.constant 0 : index
    %1 = vector.load %arg3[%c0_1, %c0_2] : memref<1024x256xbf16, #tpu.memory_space<vmem>>, vector<1024x256xbf16>
    %cst = arith.constant dense<0.000000e+00> : vector<16x256xf32>
    %2 = tpu.matmul %0, %1, %cst {dimension_numbers = #tpu.dot_dimension_numbers<[1], [0], [0], [1], [0, 0, 1, 1], [], []>} : vector<16x1024xbf16>, vector<1024x256xbf16>, vector<16x256xf32> -> vector<16x256xf32>
    %c0_3 = arith.constant 0 : index
    %c0_4 = arith.constant 0 : index
    %3 = vector.load %arg4[%c0_3, %c0_4] : memref<1x256xf32, #tpu.memory_space<vmem>>, vector<1x256xf32>
    %4 = vector.broadcast %3 : vector<1x256xf32> to vector<16x256xf32>
    %5 = arith.addf %2, %4 : vector<16x256xf32>
    %cst_5 = arith.constant 0.000000e+00 : f32
    %6 = vector.broadcast %cst_5 : f32 to vector<16x256xf32>
    %7 = arith.maximumf %5, %6 : vector<16x256xf32>
    %8 = arith.truncf %7 : vector<16x256xf32> to vector<16x256xbf16>
    %c0_6 = arith.constant 0 : index
    %c0_7 = arith.constant 0 : index
    %9 = vector.load %arg5[%c0_6, %c0_7] : memref<16x256xbf16, #tpu.memory_space<vmem>>, vector<16x256xbf16>
    tpu.vector_store %arg5[%c0_6, %c0_7], %8 {strides = array<i32>} : memref<16x256xbf16, #tpu.memory_space<vmem>>, vector<16x256xbf16>,
    return
  }
  func.func @transform_0(%arg0: i32, %arg1: i32) -> (i32, i32) {
    %c0_i32 = arith.constant 0 : i32
    %c0_i32_0 = arith.constant 0 : i32
    return %arg0, %c0_i32 : i32, i32
  }
  func.func @transform_1(%arg0: i32, %arg1: i32) -> (i32, i32) {
    %c0_i32 = arith.constant 0 : i32
    %c0_i32_0 = arith.constant 0 : i32
    return %c0_i32, %arg1 : i32, i32
  }
  func.func @transform_2(%arg0: i32, %arg1: i32) -> (i32, i32) {
    %c0_i32 = arith.constant 0 : i32
    %c0_i32_0 = arith.constant 0 : i32
    return %c0_i32, %arg1 : i32, i32
  }
  func.func @transform_3(%arg0: i32, %arg1: i32) -> (i32, i32) {
    %c0_i32 = arith.constant 0 : i32
    return %arg0, %arg1 : i32, i32
  }
}

module attributes {stable_mosaic.version = 11 : i64} {
  func.func @_mm_bias_act_kernel(%arg0: i32, %arg1: i32, %arg2: memref<16x512xbf16, #tpu.memory_space<vmem>>, %arg3: memref<512x10xbf16, #tpu.memory_space<vmem>>, %arg4: memref<1x10xf32, #tpu.memory_space<vmem>>, %arg5: memref<16x10xf32, #tpu.memory_space<vmem>>) attributes {dimension_semantics = [#tpu.dimension_semantics<parallel>, #tpu.dimension_semantics<parallel>], iteration_bounds = array<i64: 1, 1>, scalar_prefetch = 0 : i64, scratch_operands = 0 : i64, tpu.core_type = #tpu.core_type<tc>, window_params = [{transform_indices = @transform_0, window_bounds = array<i64: 16, 512>}, {transform_indices = @transform_1, window_bounds = array<i64: 512, 10>}, {transform_indices = @transform_2, window_bounds = array<i64: 1, 10>}, {transform_indices = @transform_3, window_bounds = array<i64: 16, 10>}]} {
    %c0 = arith.constant 0 : index
    %c0_0 = arith.constant 0 : index
    %0 = vector.load %arg2[%c0, %c0_0] : memref<16x512xbf16, #tpu.memory_space<vmem>>, vector<16x512xbf16>
    %c0_1 = arith.constant 0 : index
    %c0_2 = arith.constant 0 : index
    %1 = vector.load %arg3[%c0_1, %c0_2] : memref<512x10xbf16, #tpu.memory_space<vmem>>, vector<512x10xbf16>
    %cst = arith.constant dense<0.000000e+00> : vector<16x10xf32>
    %2 = tpu.matmul %0, %1, %cst {dimension_numbers = #tpu.dot_dimension_numbers<[1], [0], [0], [1], [0, 0, 1, 1], [], []>} : vector<16x512xbf16>, vector<512x10xbf16>, vector<16x10xf32> -> vector<16x10xf32>
    %c0_3 = arith.constant 0 : index
    %c0_4 = arith.constant 0 : index
    %3 = vector.load %arg4[%c0_3, %c0_4] : memref<1x10xf32, #tpu.memory_space<vmem>>, vector<1x10xf32>
    %4 = vector.broadcast %3 : vector<1x10xf32> to vector<16x10xf32>
    %5 = arith.addf %2, %4 : vector<16x10xf32>
    %c0_5 = arith.constant 0 : index
    %c0_6 = arith.constant 0 : index
    %6 = vector.load %arg5[%c0_5, %c0_6] : memref<16x10xf32, #tpu.memory_space<vmem>>, vector<16x10xf32>
    tpu.vector_store %arg5[%c0_5, %c0_6], %5 {strides = array<i32>} : memref<16x10xf32, #tpu.memory_space<vmem>>, vector<16x10xf32>,
    return
  }
  func.func @transform_0(%arg0: i32, %arg1: i32) -> (i32, i32) {
    %c0_i32 = arith.constant 0 : i32
    %c0_i32_0 = arith.constant 0 : i32
    return %arg0, %c0_i32 : i32, i32
  }
  func.func @transform_1(%arg0: i32, %arg1: i32) -> (i32, i32) {
    %c0_i32 = arith.constant 0 : i32
    %c0_i32_0 = arith.constant 0 : i32
    return %c0_i32, %arg1 : i32, i32
  }
  func.func @transform_2(%arg0: i32, %arg1: i32) -> (i32, i32) {
    %c0_i32 = arith.constant 0 : i32
    %c0_i32_0 = arith.constant 0 : i32
    return %c0_i32, %arg1 : i32, i32
  }
  func.func @transform_3(%arg0: i32, %arg1: i32) -> (i32, i32) {
    %c0_i32 = arith.constant 0 : i32
    return %arg0, %arg1 : i32, i32
  }
}

</mosaic_0001>

<bundles_post_ra>
// kernel: adam_only_cnn_forward.9
= control target key start
LH: loop header
LB: loop body
LE: loop exit
PB: predicated region body
PF: predicated region fallthrough
CT: control target
= control target key end

     0   :  { %s590_s22 = smov 96   ;;  %vm520_vm0 = vcmask 257024   ;;  %s1561_s0 = inlined_call_operand.vmem [shape: bf16[32,2,16,64], index: 0, kind: input, shape index: {}]   ;;  %s1562_s1 = inlined_call_operand.vmem [shape: bf16[32,16,32], index: 1, kind: output, shape index: {}]  }
   0x1   :  { %v12_v0 = vld [vmem:[%s1561_s0 + $0x10] sm:$0xf]  ;;  %v14_v1 = vld [vmem:[%s1561_s0 + $0x18] sm:$0xf]  ;;  %v8_v2 = vld [vmem:[%s1561_s0] sm:$0xf] }
   0x2   :  { %v610_v3 = vmax.bf16 %v14_v1, %v12_v0  ;;  %v10_v4 = vld [vmem:[%s1561_s0 + $0x8] sm:$0xf]  ;;  %v13_v5 = vld [vmem:[%s1561_s0 + $0x14] sm:$0xf]  ;;  %v15_v6 = vld [vmem:[%s1561_s0 + $0x1c] sm:$0xf] }
   0x3   :  { %v621_v7 = vmax.bf16 %v10_v4, %v8_v2  ;;  %v9_v8 = vld [vmem:[%s1561_s0 + $0x4] sm:$0xf]  ;;  %v11_v9 = vld [vmem:[%s1561_s0 + $0xc] sm:$0xf]  ;;  %v631_v10 = vmax.bf16 %v15_v6, %v13_v5  ;;  %v16_v14 = vld [vmem:[%s1561_s0 + $0x20] sm:$0xf] }
   0x4   :  { %268 = vrot.lane.b32.xlu1 %v610_v3, %s590_s22  ;;  %v635_v11 = vmax.bf16 %v11_v9, %v9_v8  ;;  %v17_v12 = vld [vmem:[%s1561_s0 + $0x24] sm:$0xf]  ;;  %v19_v13 = vld [vmem:[%s1561_s0 + $0x2c] sm:$0xf]  ;;  %v18_v15 = vld [vmem:[%s1561_s0 + $0x28] sm:$0xf] }
   0x5   :  { %264 = vrot.lane.b32.xlu0 %v621_v7, %s590_s22  ;;  %v651_v16 = vmax.bf16 %v19_v13, %v17_v12  ;;  %v655_v17 = vmax.bf16 %v18_v15, %v16_v14  ;;  %v21_v18 = vld [vmem:[%s1561_s0 + $0x34] sm:$0xf]  ;;  %v23_v19 = vld [vmem:[%s1561_s0 + $0x3c] sm:$0xf]  ;;  %v20_v20 = vld [vmem:[%s1561_s0 + $0x30] sm:$0xf] }
   0x6   :  { %v22_v21 = vld [vmem:[%s1561_s0 + $0x38] sm:$0xf]  ;;  %v671_v22 = vmax.bf16 %v23_v19, %v21_v18  ;;  %v25_v24 = vld [vmem:[%s1561_s0 + $0x44] sm:$0xf]  ;;  %v27_v25 = vld [vmem:[%s1561_s0 + $0x4c] sm:$0xf] }
   0x7   :  { %v675_v23 = vmax.bf16 %v22_v21, %v20_v20  ;;  %v24_v26 = vld [vmem:[%s1561_s0 + $0x40] sm:$0xf]  ;;  %v26_v27 = vld [vmem:[%s1561_s0 + $0x48] sm:$0xf]  ;;  %v691_v28 = vmax.bf16 %v27_v25, %v25_v24  ;;  %v29_v30 = vld [vmem:[%s1561_s0 + $0x54] sm:$0xf] }
   0x8   :  { %270 = vrot.lane.b32.xlu1 %v631_v10, %s590_s22  ;;  %v695_v29 = vmax.bf16 %v26_v27, %v24_v26  ;;  %v31_v31 = vld [vmem:[%s1561_s0 + $0x5c] sm:$0xf]  ;;  %v28_v32 = vld [vmem:[%s1561_s0 + $0x50] sm:$0xf]  ;;  %v30_v33 = vld [vmem:[%s1561_s0 + $0x58] sm:$0xf] }
   0x9   :  { %266 = vrot.lane.b32.xlu0 %v635_v11, %s590_s22  ;;  %v711_v34 = vmax.bf16 %v31_v31, %v29_v30  ;;  %v715_v35 = vmax.bf16 %v30_v33, %v28_v32  ;;  %v33_v36 = vld [vmem:[%s1561_s0 + $0x64] sm:$0xf]  ;;  %v35_v37 = vld [vmem:[%s1561_s0 + $0x6c] sm:$0xf]  ;;  %v32_v38 = vld [vmem:[%s1561_s0 + $0x60] sm:$0xf] }
   0xa   :  { %v34_v39 = vld [vmem:[%s1561_s0 + $0x68] sm:$0xf]  ;;  %v731_v40 = vmax.bf16 %v35_v37, %v33_v36  ;;  %v37_v42 = vld [vmem:[%s1561_s0 + $0x74] sm:$0xf]  ;;  %v39_v43 = vld [vmem:[%s1561_s0 + $0x7c] sm:$0xf] }
   0xb   :  { %v735_v41 = vmax.bf16 %v34_v39, %v32_v38  ;;  %v36_v44 = vld [vmem:[%s1561_s0 + $0x70] sm:$0xf]  ;;  %v38_v45 = vld [vmem:[%s1561_s0 + $0x78] sm:$0xf]  ;;  %v751_v46 = vmax.bf16 %v39_v43, %v37_v42  ;;  %v41_v48 = vld [vmem:[%s1561_s0 + $0x84] sm:$0xf] }
   0xc   :  { %274 = vrot.lane.b32.xlu1 %v651_v16, %s590_s22  ;;  %v755_v47 = vmax.bf16 %v38_v45, %v36_v44  ;;  %v43_v49 = vld [vmem:[%s1561_s0 + $0x8c] sm:$0xf]  ;;  %v40_v50 = vld [vmem:[%s1561_s0 + $0x80] sm:$0xf]  ;;  %v42_v51 = vld [vmem:[%s1561_s0 + $0x88] sm:$0xf] }
   0xd   :  { %272 = vrot.lane.b32.xlu0 %v655_v17, %s590_s22  ;;  %v771_v52 = vmax.bf16 %v43_v49, %v41_v48  ;;  %v775_v53 = vmax.bf16 %v42_v51, %v40_v50  ;;  %v45_v54 = vld [vmem:[%s1561_s0 + $0x94] sm:$0xf]  ;;  %v47_v55 = vld [vmem:[%s1561_s0 + $0x9c] sm:$0xf]  ;;  %v44_v56 = vld [vmem:[%s1561_s0 + $0x90] sm:$0xf] }
   0xe   :  { %v46_v57 = vld [vmem:[%s1561_s0 + $0x98] sm:$0xf]  ;;  %v791_v58 = vmax.bf16 %v47_v55, %v45_v54  ;;  %v49_v60 = vld [vmem:[%s1561_s0 + $0xa4] sm:$0xf]  ;;  %v51_v61 = vld [vmem:[%s1561_s0 + $0xac] sm:$0xf] }
   0xf   :  { %v795_v59 = vmax.bf16 %v46_v57, %v44_v56  ;;  %v48_v62 = vld [vmem:[%s1561_s0 + $0xa0] sm:$0xf]  ;;  %v50_v63 = vld [vmem:[%s1561_s0 + $0xa8] sm:$0xf]  ;;  %v811_v0 = vmax.bf16 %v51_v61, %v49_v60  ;;  %v53_v2 = vld [vmem:[%s1561_s0 + $0xb4] sm:$0xf] }
  0x10   :  { %278 = vrot.lane.b32.xlu1 %v671_v22, %s590_s22  ;;  %v815_v1 = vmax.bf16 %v50_v63, %v48_v62  ;;  %v55_v4 = vld [vmem:[%s1561_s0 + $0xbc] sm:$0xf]  ;;  %v52_v5 = vld [vmem:[%s1561_s0 + $0xb0] sm:$0xf]  ;;  %v54_v6 = vld [vmem:[%s1561_s0 + $0xb8] sm:$0xf] }
  0x11   :  { %276 = vrot.lane.b32.xlu0 %v675_v23, %s590_s22  ;;  %v831_v8 = vmax.bf16 %v55_v4, %v53_v2  ;;  %v835_v9 = vmax.bf16 %v54_v6, %v52_v5  ;;  %v57_v12 = vld [vmem:[%s1561_s0 + $0xc4] sm:$0xf]  ;;  %v59_v13 = vld [vmem:[%s1561_s0 + $0xcc] sm:$0xf]  ;;  %v56_v14 = vld [vmem:[%s1561_s0 + $0xc0] sm:$0xf] }
  0x12   :  { %v58_v15 = vld [vmem:[%s1561_s0 + $0xc8] sm:$0xf]  ;;  %v851_v18 = vmax.bf16 %v59_v13, %v57_v12  ;;  %v61_v20 = vld [vmem:[%s1561_s0 + $0xd4] sm:$0xf]  ;;  %v63_v21 = vld [vmem:[%s1561_s0 + $0xdc] sm:$0xf] }
  0x13   :  { %v855_v19 = vmax.bf16 %v58_v15, %v56_v14  ;;  %v60_v24 = vld [vmem:[%s1561_s0 + $0xd0] sm:$0xf]  ;;  %v62_v25 = vld [vmem:[%s1561_s0 + $0xd8] sm:$0xf]  ;;  %v871_v26 = vmax.bf16 %v63_v21, %v61_v20  ;;  %v65_v30 = vld [vmem:[%s1561_s0 + $0xe4] sm:$0xf] }
  0x14   :  { %282 = vrot.lane.b32.xlu1 %v691_v28, %s590_s22  ;;  %v875_v27 = vmax.bf16 %v62_v25, %v60_v24  ;;  %v67_v31 = vld [vmem:[%s1561_s0 + $0xec] sm:$0xf]  ;;  %v64_v32 = vld [vmem:[%s1561_s0 + $0xe0] sm:$0xf]  ;;  %v66_v33 = vld [vmem:[%s1561_s0 + $0xe8] sm:$0xf] }
  0x15   :  { %280 = vrot.lane.b32.xlu0 %v695_v29, %s590_s22  ;;  %v891_v36 = vmax.bf16 %v67_v31, %v65_v30  ;;  %v895_v37 = vmax.bf16 %v66_v33, %v64_v32  ;;  %v69_v38 = vld [vmem:[%s1561_s0 + $0xf4] sm:$0xf]  ;;  %v71_v39 = vld [vmem:[%s1561_s0 + $0xfc] sm:$0xf]  ;;  %v68_v42 = vld [vmem:[%s1561_s0 + $0xf0] sm:$0xf] }
  0x16   :  { %v70_v43 = vld [vmem:[%s1561_s0 + $0xf8] sm:$0xf]  ;;  %v911_v44 = vmax.bf16 %v71_v39, %v69_v38  ;;  %v73_v48 = vld [vmem:[%s1561_s0 + $0x104] sm:$0xf]  ;;  %v75_v49 = vld [vmem:[%s1561_s0 + $0x10c] sm:$0xf] }
  0x17   :  { %v915_v45 = vmax.bf16 %v70_v43, %v68_v42  ;;  %v72_v50 = vld [vmem:[%s1561_s0 + $0x100] sm:$0xf]  ;;  %v74_v51 = vld [vmem:[%s1561_s0 + $0x108] sm:$0xf]  ;;  %v931_v54 = vmax.bf16 %v75_v49, %v73_v48  ;;  %v77_v56 = vld [vmem:[%s1561_s0 + $0x114] sm:$0xf] }
  0x18   :  { %286 = vrot.lane.b32.xlu1 %v711_v34, %s590_s22  ;;  %v935_v55 = vmax.bf16 %v74_v51, %v72_v50  ;;  %v79_v57 = vld [vmem:[%s1561_s0 + $0x11c] sm:$0xf]  ;;  %v76_v60 = vld [vmem:[%s1561_s0 + $0x110] sm:$0xf]  ;;  %v78_v61 = vld [vmem:[%s1561_s0 + $0x118] sm:$0xf] }
  0x19   :  { %284 = vrot.lane.b32.xlu0 %v715_v35, %s590_s22  ;;  %v951_v62 = vmax.bf16 %v79_v57, %v77_v56  ;;  %v955_v63 = vmax.bf16 %v78_v61, %v76_v60  ;;  %v81_v2 = vld [vmem:[%s1561_s0 + $0x124] sm:$0xf]  ;;  %v83_v4 = vld [vmem:[%s1561_s0 + $0x12c] sm:$0xf]  ;;  %v80_v5 = vld [vmem:[%s1561_s0 + $0x120] sm:$0xf] }
  0x1a   :  { %v82_v6 = vld [vmem:[%s1561_s0 + $0x128] sm:$0xf]  ;;  %v971_v12 = vmax.bf16 %v83_v4, %v81_v2  ;;  %v85_v14 = vld [vmem:[%s1561_s0 + $0x134] sm:$0xf]  ;;  %v87_v15 = vld [vmem:[%s1561_s0 + $0x13c] sm:$0xf] }
  0x1b   :  { %v975_v13 = vmax.bf16 %v82_v6, %v80_v5  ;;  %v84_v20 = vld [vmem:[%s1561_s0 + $0x130] sm:$0xf]  ;;  %v86_v21 = vld [vmem:[%s1561_s0 + $0x138] sm:$0xf]  ;;  %v991_v24 = vmax.bf16 %v87_v15, %v85_v14  ;;  %v89_v30 = vld [vmem:[%s1561_s0 + $0x144] sm:$0xf] }
  0x1c   :  { %290 = vrot.lane.b32.xlu1 %v731_v40, %s590_s22  ;;  %v995_v25 = vmax.bf16 %v86_v21, %v84_v20  ;;  %v91_v31 = vld [vmem:[%s1561_s0 + $0x14c] sm:$0xf]  ;;  %v88_v32 = vld [vmem:[%s1561_s0 + $0x140] sm:$0xf]  ;;  %v90_v33 = vld [vmem:[%s1561_s0 + $0x148] sm:$0xf] }
  0x1d   :  { %288 = vrot.lane.b32.xlu0 %v735_v41, %s590_s22  ;;  %v1011_v38 = vmax.bf16 %v91_v31, %v89_v30  ;;  %v1015_v39 = vmax.bf16 %v90_v33, %v88_v32  ;;  %v93_v42 = vld [vmem:[%s1561_s0 + $0x154] sm:$0xf]  ;;  %v95_v43 = vld [vmem:[%s1561_s0 + $0x15c] sm:$0xf]  ;;  %v92_v48 = vld [vmem:[%s1561_s0 + $0x150] sm:$0xf] }
  0x1e   :  { %v94_v49 = vld [vmem:[%s1561_s0 + $0x158] sm:$0xf]  ;;  %v1031_v50 = vmax.bf16 %v95_v43, %v93_v42  ;;  %v97_v56 = vld [vmem:[%s1561_s0 + $0x164] sm:$0xf]  ;;  %v99_v57 = vld [vmem:[%s1561_s0 + $0x16c] sm:$0xf] }
  0x1f   :  { %v1035_v51 = vmax.bf16 %v94_v49, %v92_v48  ;;  %v96_v60 = vld [vmem:[%s1561_s0 + $0x160] sm:$0xf]  ;;  %v98_v61 = vld [vmem:[%s1561_s0 + $0x168] sm:$0xf]  ;;  %v1051_v2 = vmax.bf16 %v99_v57, %v97_v56  ;;  %v101_v5 = vld [vmem:[%s1561_s0 + $0x174] sm:$0xf] }
  0x20   :  { %294 = vrot.lane.b32.xlu1 %v751_v46, %s590_s22  ;;  %v1055_v4 = vmax.bf16 %v98_v61, %v96_v60  ;;  %v103_v6 = vld [vmem:[%s1561_s0 + $0x17c] sm:$0xf]  ;;  %v100_v14 = vld [vmem:[%s1561_s0 + $0x170] sm:$0xf]  ;;  %v102_v15 = vld [vmem:[%s1561_s0 + $0x178] sm:$0xf] }
  0x21   :  { %292 = vrot.lane.b32.xlu0 %v755_v47, %s590_s22  ;;  %v1071_v20 = vmax.bf16 %v103_v6, %v101_v5  ;;  %v1075_v21 = vmax.bf16 %v102_v15, %v100_v14  ;;  %v105_v30 = vld [vmem:[%s1561_s0 + $0x184] sm:$0xf]  ;;  %v107_v31 = vld [vmem:[%s1561_s0 + $0x18c] sm:$0xf]  ;;  %v104_v32 = vld [vmem:[%s1561_s0 + $0x180] sm:$0xf] }
  0x22   :  { %v106_v33 = vld [vmem:[%s1561_s0 + $0x188] sm:$0xf]  ;;  %v1091_v42 = vmax.bf16 %v107_v31, %v105_v30  ;;  %v109_v48 = vld [vmem:[%s1561_s0 + $0x194] sm:$0xf]  ;;  %v111_v49 = vld [vmem:[%s1561_s0 + $0x19c] sm:$0xf] }
  0x23   :  { %v1095_v43 = vmax.bf16 %v106_v33, %v104_v32  ;;  %v108_v56 = vld [vmem:[%s1561_s0 + $0x190] sm:$0xf]  ;;  %v110_v57 = vld [vmem:[%s1561_s0 + $0x198] sm:$0xf]  ;;  %v1111_v60 = vmax.bf16 %v111_v49, %v109_v48  ;;  %v113_v5 = vld [vmem:[%s1561_s0 + $0x1a4] sm:$0xf] }
  0x24   :  { %298 = vrot.lane.b32.xlu1 %v771_v52, %s590_s22  ;;  %v1115_v61 = vmax.bf16 %v110_v57, %v108_v56  ;;  %v115_v6 = vld [vmem:[%s1561_s0 + $0x1ac] sm:$0xf]  ;;  %v112_v14 = vld [vmem:[%s1561_s0 + $0x1a0] sm:$0xf]  ;;  %v114_v15 = vld [vmem:[%s1561_s0 + $0x1a8] sm:$0xf] }
  0x25   :  { %296 = vrot.lane.b32.xlu0 %v775_v53, %s590_s22  ;;  %v1131_v30 = vmax.bf16 %v115_v6, %v113_v5  ;;  %v1135_v31 = vmax.bf16 %v114_v15, %v112_v14  ;;  %v117_v32 = vld [vmem:[%s1561_s0 + $0x1b4] sm:$0xf]  ;;  %v119_v33 = vld [vmem:[%s1561_s0 + $0x1bc] sm:$0xf]  ;;  %v116_v48 = vld [vmem:[%s1561_s0 + $0x1b0] sm:$0xf] }
  0x26   :  { %v118_v49 = vld [vmem:[%s1561_s0 + $0x1b8] sm:$0xf]  ;;  %v1151_v56 = vmax.bf16 %v119_v33, %v117_v32  ;;  %v121_v5 = vld [vmem:[%s1561_s0 + $0x1c4] sm:$0xf]  ;;  %v123_v6 = vld [vmem:[%s1561_s0 + $0x1cc] sm:$0xf] }
  0x27   :  { %1569 = vst [vmem:[#allocation2_spill] sm:$0xff] %v1131_v30  ;;  %1570 = vst [vmem:[#allocation3_spill] sm:$0xff] %v1135_v31  ;;  %v1155_v57 = vmax.bf16 %v118_v49, %v116_v48  ;;  %v120_v14 = vld [vmem:[%s1561_s0 + $0x1c0] sm:$0xf]  ;;  %v122_v15 = vld [vmem:[%s1561_s0 + $0x1c8] sm:$0xf]  ;;  %v1171_v32 = vmax.bf16 %v123_v6, %v121_v5 }
  0x28   :  { %302 = vrot.lane.b32.xlu1 %v791_v58, %s590_s22  ;;  %1571 = vst [vmem:[#allocation4_spill] sm:$0xff] %v1151_v56  ;;  %v1175_v33 = vmax.bf16 %v122_v15, %v120_v14  ;;  %v125_v48 = vld [vmem:[%s1561_s0 + $0x1d4] sm:$0xf]  ;;  %v127_v49 = vld [vmem:[%s1561_s0 + $0x1dc] sm:$0xf] }
  0x29   :  { %300 = vrot.lane.b32.xlu0 %v795_v59, %s590_s22  ;;  %1572 = vst [vmem:[#allocation5_spill] sm:$0xff] %v1155_v57  ;;  %1573 = vst [vmem:[#allocation6_spill] sm:$0xff] %v1171_v32  ;;  %v126_v5 = vld [vmem:[%s1561_s0 + $0x1d8] sm:$0xf]  ;;  %v1191_v6 = vmax.bf16 %v127_v49, %v125_v48  ;;  %v129_v15 = vld [vmem:[%s1561_s0 + $0x1e4] sm:$0xf] }
  0x2a   :  { %1574 = vst [vmem:[#allocation7_spill] sm:$0xff] %v1175_v33  ;;  %v128_v48 = vld [vmem:[%s1561_s0 + $0x1e0] sm:$0xf]  ;;  %v130_v49 = vld [vmem:[%s1561_s0 + $0x1e8] sm:$0xf] }
  0x2c   :  { %306 = vrot.lane.b32.xlu1 %v811_v0, %s590_s22 }
  0x2d   :  { %304 = vrot.lane.b32.xlu0 %v815_v1, %s590_s22 }
  0x30   :  { %310 = vrot.lane.b32.xlu1 %v831_v8, %s590_s22 }
  0x31   :  { %308 = vrot.lane.b32.xlu0 %v835_v9, %s590_s22 }
  0x34   :  { %314 = vrot.lane.b32.xlu1 %v851_v18, %s590_s22 }
  0x35   :  { %312 = vrot.lane.b32.xlu0 %v855_v19, %s590_s22 }
  0x38   :  { %318 = vrot.lane.b32.xlu1 %v871_v26, %s590_s22 }
  0x39   :  { %316 = vrot.lane.b32.xlu0 %v875_v27, %s590_s22 }
  0x3c   :  { %322 = vrot.lane.b32.xlu1 %v891_v36, %s590_s22 }
  0x3d   :  { %320 = vrot.lane.b32.xlu0 %v895_v37, %s590_s22 }
  0x40   :  { %326 = vrot.lane.b32.xlu1 %v911_v44, %s590_s22 }
  0x41   :  { %324 = vrot.lane.b32.xlu0 %v915_v45, %s590_s22 }
  0x44   :  { %330 = vrot.lane.b32.xlu1 %v931_v54, %s590_s22 }
  0x45   :  { %328 = vrot.lane.b32.xlu0 %v935_v55, %s590_s22 }
  0x48   :  { %334 = vrot.lane.b32.xlu1 %v951_v62, %s590_s22 }
  0x49   :  { %332 = vrot.lane.b32.xlu0 %v955_v63, %s590_s22 }
  0x4c   :  { %338 = vrot.lane.b32.xlu1 %v971_v12, %s590_s22 }
  0x4d   :  { %336 = vrot.lane.b32.xlu0 %v975_v13, %s590_s22 }
  0x50   :  { %342 = vrot.lane.b32.xlu1 %v991_v24, %s590_s22 }
  0x51   :  { %340 = vrot.lane.b32.xlu0 %v995_v25, %s590_s22 }
  0x54   :  { %346 = vrot.lane.b32.xlu1 %v1011_v38, %s590_s22 }
  0x55   :  { %344 = vrot.lane.b32.xlu0 %v1015_v39, %s590_s22 }
  0x58   :  { %350 = vrot.lane.b32.xlu1 %v1031_v50, %s590_s22 }
  0x59   :  { %348 = vrot.lane.b32.xlu0 %v1035_v51, %s590_s22 }
  0x5c   :  { %354 = vrot.lane.b32.xlu1 %v1051_v2, %s590_s22 }
  0x5d   :  { %352 = vrot.lane.b32.xlu0 %v1055_v4, %s590_s22 }
  0x60   :  { %358 = vrot.lane.b32.xlu1 %v1071_v20, %s590_s22 }
  0x61   :  { %356 = vrot.lane.b32.xlu0 %v1075_v21, %s590_s22 }
  0x64   :  { %362 = vrot.lane.b32.xlu1 %v1091_v42, %s590_s22 }
  0x65   :  { %360 = vrot.lane.b32.xlu0 %v1095_v43, %s590_s22 }
  0x68   :  { %366 = vrot.lane.b32.xlu1 %v1111_v60, %s590_s22 }
  0x69   :  { %364 = vrot.lane.b32.xlu0 %v1115_v61, %s590_s22 }
  0x6c   :  { %370 = vrot.lane.b32.xlu1 %v1131_v30, %s590_s22  ;;  %v1221_v30 = vmax.bf16 %v130_v49, %v128_v48 }
  0x6d   :  { %368 = vrot.lane.b32.xlu0 %v1135_v31, %s590_s22  ;;  %v124_v31 = vld [vmem:[%s1561_s0 + $0x1d0] sm:$0xf] }
  0x6e   :  { %v1195_v14 = vmax.bf16 %v126_v5, %v124_v31 }
  0x70   :  { %374 = vrot.lane.b32.xlu1 %v1151_v56, %s590_s22 }
  0x71   :  { %372 = vrot.lane.b32.xlu0 %v1155_v57, %s590_s22  ;;  %v131_v57 = vld [vmem:[%s1561_s0 + $0x1ec] sm:$0xf] }
  0x74   :  { %378 = vrot.lane.b32.xlu1 %v1171_v32, %s590_s22  ;;  %v1213_v32 = vmax.bf16 %v131_v57, %v129_v15  ;;  %v132_v57 = vld [vmem:[%s1561_s0 + $0x1f0] sm:$0xf]  ;;  %v134_v15 = vld [vmem:[%s1561_s0 + $0x1f8] sm:$0xf] }
  0x75   :  { %376 = vrot.lane.b32.xlu0 %v1175_v33, %s590_s22 }
  0x76   :  { %v269_v56 = vpop.permute.xlu1 %268 }
  0x77   :  { %v458_v31 = vmax.bf16 %v269_v56, %v610_v3  ;;  %v265_v5 = vpop.permute.xlu0 %264  ;;  %v133_v3 = vld [vmem:[%s1561_s0 + $0x1f4] sm:$0xf] }
  0x78   :  { %v456_v33 = vmax.bf16 %v265_v5, %v621_v7  ;;  %382 = vrot.lane.b32.xlu1 %v1191_v6, %s590_s22  ;;  %v135_v7 = vld [vmem:[%s1561_s0 + $0x1fc] sm:$0xf] }
  0x79   :  { %523 = vst.msk [vmem:[%s1562_s1 + $0x8] sm:$0xf] %vm520_vm0, %v458_v31  ;;  %380 = vrot.lane.b32.xlu0 %v1195_v14, %s590_s22  ;;  %v1243_v5 = vmax.bf16 %v135_v7, %v133_v3 }
  0x7a   :  { %521 = vst.msk [vmem:[%s1562_s1] sm:$0xf] %vm520_vm0, %v456_v33  ;;  %v271_v56 = vpop.permute.xlu1 %270  ;;  %v1251_v33 = vmax.bf16 %v134_v15, %v132_v57 }
  0x7b   :  { %v459_v48 = vmax.bf16 %v271_v56, %v631_v10  ;;  %v267_v49 = vpop.permute.xlu0 %266 }
  0x7c   :  { %v457_v31 = vmax.bf16 %v267_v49, %v635_v11  ;;  %386 = vrot.lane.b32.xlu1 %v1213_v32, %s590_s22 }
  0x7d   :  { %524 = vst.msk [vmem:[%s1562_s1 + $0xc] sm:$0xf] %vm520_vm0, %v459_v48  ;;  %384 = vrot.lane.b32.xlu0 %v1221_v30, %s590_s22 }
  0x7e   :  { %522 = vst.msk [vmem:[%s1562_s1 + $0x4] sm:$0xf] %vm520_vm0, %v457_v31  ;;  %v275_v10 = vpop.permute.xlu1 %274 }
  0x7f   :  { %v461_v11 = vmax.bf16 %v275_v10, %v651_v16  ;;  %v273_v3 = vpop.permute.xlu0 %272 }
  0x80   :  { %v460_v7 = vmax.bf16 %v273_v3, %v655_v17  ;;  %390 = vrot.lane.b32.xlu1 %v1243_v5, %s590_s22 }
  0x81   :  { %526 = vst.msk [vmem:[%s1562_s1 + $0x14] sm:$0xf] %vm520_vm0, %v461_v11  ;;  %388 = vrot.lane.b32.xlu0 %v1251_v33, %s590_s22 }
  0x82   :  { %525 = vst.msk [vmem:[%s1562_s1 + $0x10] sm:$0xf] %vm520_vm0, %v460_v7  ;;  %v279_v16 = vpop.permute.xlu1 %278 }
  0x83   :  { %v463_v56 = vmax.bf16 %v279_v16, %v671_v22  ;;  %v277_v17 = vpop.permute.xlu0 %276 }
  0x84   :  { %v462_v57 = vmax.bf16 %v277_v17, %v675_v23 }
  0x85   :  { %528 = vst.msk [vmem:[%s1562_s1 + $0x1c] sm:$0xf] %vm520_vm0, %v463_v56 }
  0x86   :  { %527 = vst.msk [vmem:[%s1562_s1 + $0x18] sm:$0xf] %vm520_vm0, %v462_v57  ;;  %v283_v15 = vpop.permute.xlu1 %282 }
  0x87   :  { %v465_v48 = vmax.bf16 %v283_v15, %v691_v28  ;;  %v281_v49 = vpop.permute.xlu0 %280 }
  0x88   :  { %v464_v31 = vmax.bf16 %v281_v49, %v695_v29 }
  0x89   :  { %530 = vst.msk [vmem:[%s1562_s1 + $0x24] sm:$0xf] %vm520_vm0, %v465_v48 }
  0x8a   :  { %529 = vst.msk [vmem:[%s1562_s1 + $0x20] sm:$0xf] %vm520_vm0, %v464_v31  ;;  %v287_v22 = vpop.permute.xlu1 %286 }
  0x8b   :  { %v467_v23 = vmax.bf16 %v287_v22, %v711_v34  ;;  %v285_v10 = vpop.permute.xlu0 %284 }
  0x8c   :  { %v466_v11 = vmax.bf16 %v285_v10, %v715_v35 }
  0x8d   :  { %532 = vst.msk [vmem:[%s1562_s1 + $0x2c] sm:$0xf] %vm520_vm0, %v467_v23 }
  0x8e   :  { %531 = vst.msk [vmem:[%s1562_s1 + $0x28] sm:$0xf] %vm520_vm0, %v466_v11  ;;  %v291_v28 = vpop.permute.xlu1 %290 }
  0x8f   :  { %v469_v29 = vmax.bf16 %v291_v28, %v731_v40  ;;  %v289_v3 = vpop.permute.xlu0 %288 }
  0x90   :  { %v468_v7 = vmax.bf16 %v289_v3, %v735_v41 }
  0x91   :  { %534 = vst.msk [vmem:[%s1562_s1 + $0x34] sm:$0xf] %vm520_vm0, %v469_v29 }
  0x92   :  { %533 = vst.msk [vmem:[%s1562_s1 + $0x30] sm:$0xf] %vm520_vm0, %v468_v7  ;;  %v295_v34 = vpop.permute.xlu1 %294 }
  0x93   :  { %v471_v35 = vmax.bf16 %v295_v34, %v751_v46  ;;  %v293_v16 = vpop.permute.xlu0 %292 }
  0x94   :  { %v470_v56 = vmax.bf16 %v293_v16, %v755_v47 }
  0x95   :  { %536 = vst.msk [vmem:[%s1562_s1 + $0x3c] sm:$0xf] %vm520_vm0, %v471_v35 }
  0x96   :  { %535 = vst.msk [vmem:[%s1562_s1 + $0x38] sm:$0xf] %vm520_vm0, %v470_v56  ;;  %v299_v40 = vpop.permute.xlu1 %298 }
  0x97   :  { %v473_v41 = vmax.bf16 %v299_v40, %v771_v52  ;;  %v297_v17 = vpop.permute.xlu0 %296 }
  0x98   :  { %v472_v57 = vmax.bf16 %v297_v17, %v775_v53 }
  0x99   :  { %538 = vst.msk [vmem:[%s1562_s1 + $0x44] sm:$0xf] %vm520_vm0, %v473_v41 }
  0x9a   :  { %537 = vst.msk [vmem:[%s1562_s1 + $0x40] sm:$0xf] %vm520_vm0, %v472_v57  ;;  %v303_v46 = vpop.permute.xlu1 %302 }
  0x9b   :  { %v475_v47 = vmax.bf16 %v303_v46, %v791_v58  ;;  %v301_v15 = vpop.permute.xlu0 %300 }
  0x9c   :  { %v474_v48 = vmax.bf16 %v301_v15, %v795_v59 }
  0x9d   :  { %540 = vst.msk [vmem:[%s1562_s1 + $0x4c] sm:$0xf] %vm520_vm0, %v475_v47 }
  0x9e   :  { %539 = vst.msk [vmem:[%s1562_s1 + $0x48] sm:$0xf] %vm520_vm0, %v474_v48  ;;  %v307_v52 = vpop.permute.xlu1 %306 }
  0x9f   :  { %v477_v53 = vmax.bf16 %v307_v52, %v811_v0  ;;  %v305_v49 = vpop.permute.xlu0 %304 }
  0xa0   :  { %v476_v31 = vmax.bf16 %v305_v49, %v815_v1 }
  0xa1   :  { %542 = vst.msk [vmem:[%s1562_s1 + $0x54] sm:$0xf] %vm520_vm0, %v477_v53 }
  0xa2   :  { %541 = vst.msk [vmem:[%s1562_s1 + $0x50] sm:$0xf] %vm520_vm0, %v476_v31  ;;  %v311_v58 = vpop.permute.xlu1 %310 }
  0xa3   :  { %v479_v59 = vmax.bf16 %v311_v58, %v831_v8  ;;  %v309_v22 = vpop.permute.xlu0 %308 }
  0xa4   :  { %v478_v23 = vmax.bf16 %v309_v22, %v835_v9 }
  0xa5   :  { %544 = vst.msk [vmem:[%s1562_s1 + $0x5c] sm:$0xf] %vm520_vm0, %v479_v59 }
  0xa6   :  { %543 = vst.msk [vmem:[%s1562_s1 + $0x58] sm:$0xf] %vm520_vm0, %v478_v23  ;;  %v315_v0 = vpop.permute.xlu1 %314 }
  0xa7   :  { %v481_v1 = vmax.bf16 %v315_v0, %v851_v18  ;;  %v313_v10 = vpop.permute.xlu0 %312 }
  0xa8   :  { %v480_v11 = vmax.bf16 %v313_v10, %v855_v19 }
  0xa9   :  { %546 = vst.msk [vmem:[%s1562_s1 + $0x64] sm:$0xf] %vm520_vm0, %v481_v1 }
  0xaa   :  { %545 = vst.msk [vmem:[%s1562_s1 + $0x60] sm:$0xf] %vm520_vm0, %v480_v11  ;;  %v319_v8 = vpop.permute.xlu1 %318 }
  0xab   :  { %v483_v9 = vmax.bf16 %v319_v8, %v871_v26  ;;  %v317_v28 = vpop.permute.xlu0 %316  ;;  %v1576_v8 = vld [vmem:[#allocation3_spill] sm:$0xff] }
  0xac   :  { %v482_v29 = vmax.bf16 %v317_v28, %v875_v27 }
  0xad   :  { %548 = vst.msk [vmem:[%s1562_s1 + $0x6c] sm:$0xf] %vm520_vm0, %v483_v9 }
  0xae   :  { %547 = vst.msk [vmem:[%s1562_s1 + $0x68] sm:$0xf] %vm520_vm0, %v482_v29  ;;  %v323_v18 = vpop.permute.xlu1 %322 }
  0xaf   :  { %v485_v19 = vmax.bf16 %v323_v18, %v891_v36  ;;  %v321_v3 = vpop.permute.xlu0 %320  ;;  %v1578_v18 = vld [vmem:[#allocation5_spill] sm:$0xff] }
  0xb0   :  { %v484_v7 = vmax.bf16 %v321_v3, %v895_v37 }
  0xb1   :  { %550 = vst.msk [vmem:[%s1562_s1 + $0x74] sm:$0xf] %vm520_vm0, %v485_v19 }
  0xb2   :  { %549 = vst.msk [vmem:[%s1562_s1 + $0x70] sm:$0xf] %vm520_vm0, %v484_v7  ;;  %v327_v26 = vpop.permute.xlu1 %326  ;;  %v1579_v7 = vld [vmem:[#allocation6_spill] sm:$0xff] }
  0xb3   :  { %v487_v27 = vmax.bf16 %v327_v26, %v911_v44  ;;  %v325_v34 = vpop.permute.xlu0 %324 }
  0xb4   :  { %v486_v35 = vmax.bf16 %v325_v34, %v915_v45  ;;  %v1580_v34 = vld [vmem:[#allocation7_spill] sm:$0xff] }
  0xb5   :  { %552 = vst.msk [vmem:[%s1562_s1 + $0x7c] sm:$0xf] %vm520_vm0, %v487_v27 }
  0xb6   :  { %551 = vst.msk [vmem:[%s1562_s1 + $0x78] sm:$0xf] %vm520_vm0, %v486_v35  ;;  %v331_v36 = vpop.permute.xlu1 %330 }
  0xb7   :  { %v489_v37 = vmax.bf16 %v331_v36, %v931_v54  ;;  %v329_v16 = vpop.permute.xlu0 %328 }
  0xb8   :  { %v488_v56 = vmax.bf16 %v329_v16, %v935_v55 }
  0xb9   :  { %554 = vst.msk [vmem:[%s1562_s1 + $0x84] sm:$0xf] %vm520_vm0, %v489_v37 }
  0xba   :  { %553 = vst.msk [vmem:[%s1562_s1 + $0x80] sm:$0xf] %vm520_vm0, %v488_v56  ;;  %v335_v44 = vpop.permute.xlu1 %334 }
  0xbb   :  { %v491_v45 = vmax.bf16 %v335_v44, %v951_v62  ;;  %v333_v40 = vpop.permute.xlu0 %332 }
  0xbc   :  { %v490_v41 = vmax.bf16 %v333_v40, %v955_v63 }
  0xbd   :  { %556 = vst.msk [vmem:[%s1562_s1 + $0x8c] sm:$0xf] %vm520_vm0, %v491_v45 }
  0xbe   :  { %555 = vst.msk [vmem:[%s1562_s1 + $0x88] sm:$0xf] %vm520_vm0, %v490_v41  ;;  %v339_v54 = vpop.permute.xlu1 %338 }
  0xbf   :  { %v493_v55 = vmax.bf16 %v339_v54, %v971_v12  ;;  %v337_v17 = vpop.permute.xlu0 %336 }
  0xc0   :  { %v492_v57 = vmax.bf16 %v337_v17, %v975_v13 }
  0xc1   :  { %558 = vst.msk [vmem:[%s1562_s1 + $0x94] sm:$0xf] %vm520_vm0, %v493_v55 }
  0xc2   :  { %557 = vst.msk [vmem:[%s1562_s1 + $0x90] sm:$0xf] %vm520_vm0, %v492_v57  ;;  %v343_v62 = vpop.permute.xlu1 %342 }
  0xc3   :  { %v495_v63 = vmax.bf16 %v343_v62, %v991_v24  ;;  %v341_v46 = vpop.permute.xlu0 %340 }
  0xc4   :  { %v494_v47 = vmax.bf16 %v341_v46, %v995_v25 }
  0xc5   :  { %560 = vst.msk [vmem:[%s1562_s1 + $0x9c] sm:$0xf] %vm520_vm0, %v495_v63 }
  0xc6   :  { %559 = vst.msk [vmem:[%s1562_s1 + $0x98] sm:$0xf] %vm520_vm0, %v494_v47  ;;  %v347_v12 = vpop.permute.xlu1 %346 }
  0xc7   :  { %v497_v13 = vmax.bf16 %v347_v12, %v1011_v38  ;;  %v345_v15 = vpop.permute.xlu0 %344 }
  0xc8   :  { %v496_v48 = vmax.bf16 %v345_v15, %v1015_v39 }
  0xc9   :  { %562 = vst.msk [vmem:[%s1562_s1 + $0xa4] sm:$0xf] %vm520_vm0, %v497_v13 }
  0xca   :  { %561 = vst.msk [vmem:[%s1562_s1 + $0xa0] sm:$0xf] %vm520_vm0, %v496_v48  ;;  %v351_v24 = vpop.permute.xlu1 %350 }
  0xcb   :  { %v499_v25 = vmax.bf16 %v351_v24, %v1031_v50  ;;  %v349_v52 = vpop.permute.xlu0 %348 }
  0xcc   :  { %v498_v53 = vmax.bf16 %v349_v52, %v1035_v51 }
  0xcd   :  { %564 = vst.msk [vmem:[%s1562_s1 + $0xac] sm:$0xf] %vm520_vm0, %v499_v25 }
  0xce   :  { %563 = vst.msk [vmem:[%s1562_s1 + $0xa8] sm:$0xf] %vm520_vm0, %v498_v53  ;;  %v355_v38 = vpop.permute.xlu1 %354 }
  0xcf   :  { %v501_v39 = vmax.bf16 %v355_v38, %v1051_v2  ;;  %v353_v49 = vpop.permute.xlu0 %352 }
  0xd0   :  { %v500_v31 = vmax.bf16 %v353_v49, %v1055_v4 }
  0xd1   :  { %566 = vst.msk [vmem:[%s1562_s1 + $0xb4] sm:$0xf] %vm520_vm0, %v501_v39 }
  0xd2   :  { %565 = vst.msk [vmem:[%s1562_s1 + $0xb0] sm:$0xf] %vm520_vm0, %v500_v31  ;;  %v359_v50 = vpop.permute.xlu1 %358 }
  0xd3   :  { %v503_v51 = vmax.bf16 %v359_v50, %v1071_v20  ;;  %v357_v58 = vpop.permute.xlu0 %356 }
  0xd4   :  { %v502_v59 = vmax.bf16 %v357_v58, %v1075_v21 }
  0xd5   :  { %568 = vst.msk [vmem:[%s1562_s1 + $0xbc] sm:$0xf] %vm520_vm0, %v503_v51 }
  0xd6   :  { %567 = vst.msk [vmem:[%s1562_s1 + $0xb8] sm:$0xf] %vm520_vm0, %v502_v59  ;;  %v363_v2 = vpop.permute.xlu1 %362 }
  0xd7   :  { %v505_v4 = vmax.bf16 %v363_v2, %v1091_v42  ;;  %v361_v22 = vpop.permute.xlu0 %360 }
  0xd8   :  { %v504_v23 = vmax.bf16 %v361_v22, %v1095_v43  ;;  %v1575_v43 = vld [vmem:[#allocation2_spill] sm:$0xff] }
  0xd9   :  { %570 = vst.msk [vmem:[%s1562_s1 + $0xc4] sm:$0xf] %vm520_vm0, %v505_v4 }
  0xda   :  { %569 = vst.msk [vmem:[%s1562_s1 + $0xc0] sm:$0xf] %vm520_vm0, %v504_v23  ;;  %v367_v20 = vpop.permute.xlu1 %366 }
  0xdb   :  { %v507_v21 = vmax.bf16 %v367_v20, %v1111_v60  ;;  %v365_v0 = vpop.permute.xlu0 %364 }
  0xdc   :  { %v506_v1 = vmax.bf16 %v365_v0, %v1115_v61  ;;  %v1577_v61 = vld [vmem:[#allocation4_spill] sm:$0xff] }
  0xdd   :  { %572 = vst.msk [vmem:[%s1562_s1 + $0xcc] sm:$0xf] %vm520_vm0, %v507_v21 }
  0xde   :  { %571 = vst.msk [vmem:[%s1562_s1 + $0xc8] sm:$0xf] %vm520_vm0, %v506_v1  ;;  %v371_v42 = vpop.permute.xlu1 %370 }
  0xdf   :  { %v509_v10 = vmax.bf16 %v371_v42, %v1575_v43  ;;  %v369_v11 = vpop.permute.xlu0 %368 }
  0xe0   :  { %v508_v9 = vmax.bf16 %v369_v11, %v1576_v8 }
  0xe1   :  { %574 = vst.msk [vmem:[%s1562_s1 + $0xd4] sm:$0xf] %vm520_vm0, %v509_v10 }
  0xe2   :  { %573 = vst.msk [vmem:[%s1562_s1 + $0xd0] sm:$0xf] %vm520_vm0, %v508_v9  ;;  %v375_v60 = vpop.permute.xlu1 %374 }
  0xe3   :  { %v511_v28 = vmax.bf16 %v375_v60, %v1577_v61  ;;  %v373_v29 = vpop.permute.xlu0 %372 }
  0xe4   :  { %v510_v19 = vmax.bf16 %v373_v29, %v1578_v18 }
  0xe5   :  { %576 = vst.msk [vmem:[%s1562_s1 + $0xdc] sm:$0xf] %vm520_vm0, %v511_v28 }
  0xe6   :  { %575 = vst.msk [vmem:[%s1562_s1 + $0xd8] sm:$0xf] %vm520_vm0, %v510_v19  ;;  %v379_v3 = vpop.permute.xlu1 %378 }
  0xe7   :  { %v513_v26 = vmax.bf16 %v379_v3, %v1579_v7  ;;  %v377_v27 = vpop.permute.xlu0 %376 }
  0xe8   :  { %v512_v35 = vmax.bf16 %v377_v27, %v1580_v34 }
  0xe9   :  { %578 = vst.msk [vmem:[%s1562_s1 + $0xe4] sm:$0xf] %vm520_vm0, %v513_v26 }
  0xea   :  { %577 = vst.msk [vmem:[%s1562_s1 + $0xe0] sm:$0xf] %vm520_vm0, %v512_v35  ;;  %v383_v36 = vpop.permute.xlu1 %382 }
  0xeb   :  { %v515_v37 = vmax.bf16 %v383_v36, %v1191_v6  ;;  %v381_v16 = vpop.permute.xlu0 %380 }
  0xec   :  { %v514_v56 = vmax.bf16 %v381_v16, %v1195_v14 }
  0xed   :  { %580 = vst.msk [vmem:[%s1562_s1 + $0xec] sm:$0xf] %vm520_vm0, %v515_v37 }
  0xee   :  { %579 = vst.msk [vmem:[%s1562_s1 + $0xe8] sm:$0xf] %vm520_vm0, %v514_v56  ;;  %v387_v44 = vpop.permute.xlu1 %386 }
  0xef   :  { %v517_v45 = vmax.bf16 %v387_v44, %v1213_v32  ;;  %v385_v40 = vpop.permute.xlu0 %384 }
  0xf0   :  { %v516_v41 = vmax.bf16 %v385_v40, %v1221_v30 }
  0xf1   :  { %582 = vst.msk [vmem:[%s1562_s1 + $0xf4] sm:$0xf] %vm520_vm0, %v517_v45 }
  0xf2   :  { %581 = vst.msk [vmem:[%s1562_s1 + $0xf0] sm:$0xf] %vm520_vm0, %v516_v41  ;;  %v391_v6 = vpop.permute.xlu1 %390 }
  0xf3   :  { %v519_v14 = vmax.bf16 %v391_v6, %v1243_v5  ;;  %v389_v54 = vpop.permute.xlu0 %388 }
  0xf4   :  { %v518_v55 = vmax.bf16 %v389_v54, %v1251_v33 }
  0xf5   :  { %584 = vst.msk [vmem:[%s1562_s1 + $0xfc] sm:$0xf] %vm520_vm0, %v519_v14 }
  0xf6   :  { %583 = vst.msk [vmem:[%s1562_s1 + $0xf8] sm:$0xf] %vm520_vm0, %v518_v55 }

// kernel: adam_only_cnn_forward.11
= control target key start
LH: loop header
LB: loop body
LE: loop exit
PB: predicated region body
PF: predicated region fallthrough
CT: control target
= control target key end

     0   :  { %s158_s22 = smov 64   ;;  %vm136_vm0 = vcmask 519168   ;;  %s369_s0 = inlined_call_operand.vmem [shape: bf16[16,2,8,128], index: 0, kind: input, shape index: {}]   ;;  %s370_s1 = inlined_call_operand.vmem [shape: bf16[16,8,64], index: 1, kind: output, shape index: {}]  }
   0x1   :  { %v12_v0 = vld [vmem:[%s369_s0 + $0x10] sm:$0xf]  ;;  %v13_v1 = vld [vmem:[%s369_s0 + $0x14] sm:$0xf]  ;;  %v8_v2 = vld [vmem:[%s369_s0] sm:$0xf] }
   0x2   :  { %v178_v3 = vmax.bf16 %v13_v1, %v12_v0  ;;  %v9_v4 = vld [vmem:[%s369_s0 + $0x4] sm:$0xf]  ;;  %v14_v5 = vld [vmem:[%s369_s0 + $0x18] sm:$0xf]  ;;  %v15_v6 = vld [vmem:[%s369_s0 + $0x1c] sm:$0xf] }
   0x3   :  { %v189_v7 = vmax.bf16 %v9_v4, %v8_v2  ;;  %v10_v8 = vld [vmem:[%s369_s0 + $0x8] sm:$0xf]  ;;  %v11_v9 = vld [vmem:[%s369_s0 + $0xc] sm:$0xf]  ;;  %v199_v10 = vmax.bf16 %v15_v6, %v14_v5  ;;  %v16_v14 = vld [vmem:[%s369_s0 + $0x20] sm:$0xf] }
   0x4   :  { %76 = vrot.lane.b32.xlu1 %v178_v3, %s158_s22  ;;  %v203_v11 = vmax.bf16 %v11_v9, %v10_v8  ;;  %v18_v12 = vld [vmem:[%s369_s0 + $0x28] sm:$0xf]  ;;  %v19_v13 = vld [vmem:[%s369_s0 + $0x2c] sm:$0xf]  ;;  %v17_v15 = vld [vmem:[%s369_s0 + $0x24] sm:$0xf] }
   0x5   :  { %72 = vrot.lane.b32.xlu0 %v189_v7, %s158_s22  ;;  %v219_v16 = vmax.bf16 %v19_v13, %v18_v12  ;;  %v223_v17 = vmax.bf16 %v17_v15, %v16_v14  ;;  %v22_v18 = vld [vmem:[%s369_s0 + $0x38] sm:$0xf]  ;;  %v23_v19 = vld [vmem:[%s369_s0 + $0x3c] sm:$0xf]  ;;  %v20_v20 = vld [vmem:[%s369_s0 + $0x30] sm:$0xf] }
   0x6   :  { %v21_v21 = vld [vmem:[%s369_s0 + $0x34] sm:$0xf]  ;;  %v47_v22 = vmax.bf16 %v23_v19, %v22_v18  ;;  %v26_v24 = vld [vmem:[%s369_s0 + $0x48] sm:$0xf]  ;;  %v27_v25 = vld [vmem:[%s369_s0 + $0x4c] sm:$0xf] }
   0x7   :  { %v46_v23 = vmax.bf16 %v21_v21, %v20_v20  ;;  %v24_v26 = vld [vmem:[%s369_s0 + $0x40] sm:$0xf]  ;;  %v25_v27 = vld [vmem:[%s369_s0 + $0x44] sm:$0xf]  ;;  %v49_v28 = vmax.bf16 %v27_v25, %v26_v24  ;;  %v30_v30 = vld [vmem:[%s369_s0 + $0x58] sm:$0xf] }
   0x8   :  { %78 = vrot.lane.b32.xlu1 %v199_v10, %s158_s22  ;;  %v48_v29 = vmax.bf16 %v25_v27, %v24_v26  ;;  %v31_v31 = vld [vmem:[%s369_s0 + $0x5c] sm:$0xf]  ;;  %v28_v32 = vld [vmem:[%s369_s0 + $0x50] sm:$0xf]  ;;  %v29_v33 = vld [vmem:[%s369_s0 + $0x54] sm:$0xf] }
   0x9   :  { %74 = vrot.lane.b32.xlu0 %v203_v11, %s158_s22  ;;  %v51_v34 = vmax.bf16 %v31_v31, %v30_v30  ;;  %v50_v35 = vmax.bf16 %v29_v33, %v28_v32  ;;  %v34_v36 = vld [vmem:[%s369_s0 + $0x68] sm:$0xf]  ;;  %v35_v37 = vld [vmem:[%s369_s0 + $0x6c] sm:$0xf]  ;;  %v32_v38 = vld [vmem:[%s369_s0 + $0x60] sm:$0xf] }
   0xa   :  { %v33_v39 = vld [vmem:[%s369_s0 + $0x64] sm:$0xf]  ;;  %v53_v40 = vmax.bf16 %v35_v37, %v34_v36  ;;  %v38_v42 = vld [vmem:[%s369_s0 + $0x78] sm:$0xf]  ;;  %v39_v43 = vld [vmem:[%s369_s0 + $0x7c] sm:$0xf] }
   0xb   :  { %v52_v41 = vmax.bf16 %v33_v39, %v32_v38  ;;  %v36_v44 = vld [vmem:[%s369_s0 + $0x70] sm:$0xf]  ;;  %v37_v45 = vld [vmem:[%s369_s0 + $0x74] sm:$0xf]  ;;  %v55_v46 = vmax.bf16 %v39_v43, %v38_v42 }
   0xc   :  { %82 = vrot.lane.b32.xlu1 %v219_v16, %s158_s22  ;;  %v54_v47 = vmax.bf16 %v37_v45, %v36_v44 }
   0xd   :  { %80 = vrot.lane.b32.xlu0 %v223_v17, %s158_s22 }
  0x10   :  { %86 = vrot.lane.b32.xlu1 %v47_v22, %s158_s22 }
  0x11   :  { %84 = vrot.lane.b32.xlu0 %v46_v23, %s158_s22 }
  0x14   :  { %90 = vrot.lane.b32.xlu1 %v49_v28, %s158_s22 }
  0x15   :  { %88 = vrot.lane.b32.xlu0 %v48_v29, %s158_s22 }
  0x18   :  { %94 = vrot.lane.b32.xlu1 %v51_v34, %s158_s22 }
  0x19   :  { %92 = vrot.lane.b32.xlu0 %v50_v35, %s158_s22 }
  0x1c   :  { %98 = vrot.lane.b32.xlu1 %v53_v40, %s158_s22 }
  0x1d   :  { %96 = vrot.lane.b32.xlu0 %v52_v41, %s158_s22 }
  0x20   :  { %102 = vrot.lane.b32.xlu1 %v55_v46, %s158_s22 }
  0x21   :  { %100 = vrot.lane.b32.xlu0 %v54_v47, %s158_s22 }
  0x76   :  { %v77_v48 = vpop.permute.xlu1 %76 }
  0x77   :  { %v122_v49 = vmax.bf16 %v77_v48, %v178_v3  ;;  %v73_v50 = vpop.permute.xlu0 %72 }
  0x78   :  { %v120_v51 = vmax.bf16 %v73_v50, %v189_v7 }
  0x79   :  { %139 = vst.msk [vmem:[%s370_s1 + $0x8] sm:$0xf] %vm136_vm0, %v122_v49 }
  0x7a   :  { %137 = vst.msk [vmem:[%s370_s1] sm:$0xf] %vm136_vm0, %v120_v51  ;;  %v79_v52 = vpop.permute.xlu1 %78 }
  0x7b   :  { %v123_v53 = vmax.bf16 %v79_v52, %v199_v10  ;;  %v75_v54 = vpop.permute.xlu0 %74 }
  0x7c   :  { %v121_v55 = vmax.bf16 %v75_v54, %v203_v11 }
  0x7d   :  { %140 = vst.msk [vmem:[%s370_s1 + $0xc] sm:$0xf] %vm136_vm0, %v123_v53 }
  0x7e   :  { %138 = vst.msk [vmem:[%s370_s1 + $0x4] sm:$0xf] %vm136_vm0, %v121_v55  ;;  %v83_v56 = vpop.permute.xlu1 %82 }
  0x7f   :  { %v125_v57 = vmax.bf16 %v83_v56, %v219_v16  ;;  %v81_v58 = vpop.permute.xlu0 %80 }
  0x80   :  { %v124_v59 = vmax.bf16 %v81_v58, %v223_v17 }
  0x81   :  { %142 = vst.msk [vmem:[%s370_s1 + $0x14] sm:$0xf] %vm136_vm0, %v125_v57 }
  0x82   :  { %141 = vst.msk [vmem:[%s370_s1 + $0x10] sm:$0xf] %vm136_vm0, %v124_v59  ;;  %v87_v60 = vpop.permute.xlu1 %86 }
  0x83   :  { %v127_v61 = vmax.bf16 %v87_v60, %v47_v22  ;;  %v85_v62 = vpop.permute.xlu0 %84 }
  0x84   :  { %v126_v63 = vmax.bf16 %v85_v62, %v46_v23 }
  0x85   :  { %144 = vst.msk [vmem:[%s370_s1 + $0x1c] sm:$0xf] %vm136_vm0, %v127_v61 }
  0x86   :  { %143 = vst.msk [vmem:[%s370_s1 + $0x18] sm:$0xf] %vm136_vm0, %v126_v63  ;;  %v91_v0 = vpop.permute.xlu1 %90 }
  0x87   :  { %v129_v1 = vmax.bf16 %v91_v0, %v49_v28  ;;  %v89_v2 = vpop.permute.xlu0 %88 }
  0x88   :  { %v128_v3 = vmax.bf16 %v89_v2, %v48_v29 }
  0x89   :  { %146 = vst.msk [vmem:[%s370_s1 + $0x24] sm:$0xf] %vm136_vm0, %v129_v1 }
  0x8a   :  { %145 = vst.msk [vmem:[%s370_s1 + $0x20] sm:$0xf] %vm136_vm0, %v128_v3  ;;  %v95_v4 = vpop.permute.xlu1 %94 }
  0x8b   :  { %v131_v5 = vmax.bf16 %v95_v4, %v51_v34  ;;  %v93_v6 = vpop.permute.xlu0 %92 }
  0x8c   :  { %v130_v7 = vmax.bf16 %v93_v6, %v50_v35 }
  0x8d   :  { %148 = vst.msk [vmem:[%s370_s1 + $0x2c] sm:$0xf] %vm136_vm0, %v131_v5 }
  0x8e   :  { %147 = vst.msk [vmem:[%s370_s1 + $0x28] sm:$0xf] %vm136_vm0, %v130_v7  ;;  %v99_v8 = vpop.permute.xlu1 %98 }
  0x8f   :  { %v133_v9 = vmax.bf16 %v99_v8, %v53_v40  ;;  %v97_v10 = vpop.permute.xlu0 %96 }
  0x90   :  { %v132_v11 = vmax.bf16 %v97_v10, %v52_v41 }
  0x91   :  { %150 = vst.msk [vmem:[%s370_s1 + $0x34] sm:$0xf] %vm136_vm0, %v133_v9 }
  0x92   :  { %149 = vst.msk [vmem:[%s370_s1 + $0x30] sm:$0xf] %vm136_vm0, %v132_v11  ;;  %v103_v12 = vpop.permute.xlu1 %102 }
  0x93   :  { %v135_v13 = vmax.bf16 %v103_v12, %v55_v46  ;;  %v101_v14 = vpop.permute.xlu0 %100 }
  0x94   :  { %v134_v15 = vmax.bf16 %v101_v14, %v54_v47 }
  0x95   :  { %152 = vst.msk [vmem:[%s370_s1 + $0x3c] sm:$0xf] %vm136_vm0, %v135_v13 }
  0x96   :  { %151 = vst.msk [vmem:[%s370_s1 + $0x38] sm:$0xf] %vm136_vm0, %v134_v15 }

// kernel: adam_only_cnn_forward.10
= control target key start
LH: loop header
LB: loop body
LE: loop exit
PB: predicated region body
PF: predicated region fallthrough
CT: control target
= control target key end

     0   :  { %s2014_s12 = smov 0   ;;  %s2302_s0 = inlined_call_operand.vmem [shape: bf16[576,96], index: 0, kind: input, shape index: {}]   ;;  %s2303_s1 = inlined_call_operand.vmem [shape: bf16[3,96,64], index: 1, kind: input, shape index: {}]   ;;  %s2304_s2 = inlined_call_operand.vmem [shape: f32[1,64], index: 2, kind: input, shape index: {}]   ;;  %s2305_s3 = inlined_call_operand.vmem [shape: bf16[512,64], index: 3, kind: output, shape index: {}]  }
   0x1 LB: > { %s1455_s13 = sadd.s32 4294967295, %s1992_s12   ;;  %p1459_p0 = scmp.ge.s32.totalorder %s1992_s12, 1  ;;  %s1992_s12 = sphi %s2014_s12, %s13_s12  }
   0x2   : > { %p138_p1 = scmp.lt.s32.totalorder %s1992_s12, 3 }
   0x4   : > { %p139_p2 = pnand %p1459_p0, %p138_p1 }
   0x5   : > { %v1935_v0 = vld [vmem:[%s2303_s1 + $0x30] sm:$0xff] (!%p139_p2)   ;;  %s162_s16 = smul.u32 (!%p139_p2), 36, %s1455_s13  ;;  %v1936_v1 = vld [vmem:[%s2303_s1] sm:$0xff] (!%p139_p2)   ;;  %v1937_v2 = vld [vmem:[%s2303_s1 + $0x38] sm:$0xff] (!%p139_p2)   ;;  %vm350_vm0 = vcmask (!%p139_p2), 785408   ;;  %s1461_s30 = sshll.u32 (!%p139_p2), %s1455_s13, 5 }
   0x6   : > { %142 = sbr.rel (%p139_p2) target bundleno = 343 (0x157), region = 32  ;;  %1719 = vmatprep.subr.bf16.mxu1 (!%p139_p2), %v1935_v0  ;;  %1763 = vmatprep.subr.bf16.mxu0 (!%p139_p2), %v1936_v1  ;;  %v1938_v3 = vld [vmem:[%s2303_s1 + $0x8] sm:$0xff] (!%p139_p2)   ;;  %v1939_v4 = vld [vmem:[%s2303_s1 + $0x40] sm:$0xff] (!%p139_p2)   ;;  %v1940_v5 = vld [vmem:[%s2303_s1 + $0x10] sm:$0xff] (!%p139_p2)   ;;  %p169_p4 = scmp.lt.s32.totalorder (!%p139_p2), %s1461_s30, 63  ;;  %vm1366_vm1 = vcmask (!%p139_p2), 519168  }
   0x7   : > { %p163_p3 = scmp.lt.s32.totalorder (!%p139_p2), %s162_s16, 71  ;;  %1720 = vmatpush3.bf16.msra.mxu1 (!%p139_p2), %v1935_v0  ;;  %1764 = vmatpush3.bf16.msra.mxu0 (!%p139_p2), %v1936_v1  ;;  %v1941_v6 = vld [vmem:[%s2303_s1 + $0x48] sm:$0xff] (!%p139_p2)   ;;  %v1942_v7 = vld [vmem:[%s2303_s1 + $0x18] sm:$0xff] (!%p139_p2)   ;;  %v1943_v8 = vld [vmem:[%s2303_s1 + $0x50] sm:$0xff] (!%p139_p2)  }
   0x8   : > { %1721 = vmatprep.subr.bf16.mxu1 (!%p139_p2), %v1937_v2  ;;  %1765 = vmatprep.subr.bf16.mxu0 (!%p139_p2), %v1938_v3  ;;  %v2059_v9 = vld [vmem:[%s2303_s1 + $0x20] sm:$0xff] (!%p139_p2)   ;;  %v1945_v12 = vld [vmem:[%s2303_s1 + $0x58] sm:$0xff] (!%p139_p2)   ;;  %v1946_v13 = vld [vmem:[%s2303_s1 + $0x28] sm:$0xff] (!%p139_p2)  }
   0x9   : > { %v1950_v14 = vld [vmem:[%s2303_s1 + $0x60] sm:$0xff] (!%p139_p2)   ;;  %v1951_v17 = vld [vmem:[%s2303_s1 + $0x68] sm:$0xff] (!%p139_p2)   ;;  %v1954_v18 = vld [vmem:[%s2303_s1 + $0x70] sm:$0xff] (!%p139_p2)  }
   0xa   : > { %v1957_v21 = vld [vmem:[%s2303_s1 + $0x78] sm:$0xff] (!%p139_p2)   ;;  %v1958_v22 = vld [vmem:[%s2303_s1 + $0x80] sm:$0xff] (!%p139_p2)   ;;  %v1961_v25 = vld [vmem:[%s2303_s1 + $0x88] sm:$0xff] (!%p139_p2)  }
   0xb   : > { %1722 = vmatpush3.bf16.msra.mxu1 (!%p139_p2), %v1937_v2  ;;  %1766 = vmatpush3.bf16.msra.mxu0 (!%p139_p2), %v1938_v3 }
   0xc   : > { %1723 = vmatprep.subr.bf16.mxu1 (!%p139_p2), %v1939_v4  ;;  %1767 = vmatprep.subr.bf16.mxu0 (!%p139_p2), %v1940_v5 }
   0xd   : > { %s2307_s16 = smov (!%p163_p3, %s162_s16), 71  ;;  %s2309_s30 = smov (!%p169_p4, %s1461_s30), 63 }
   0xe   : > { %s1460_s27 = sshll.u32 %s2307_s16, 2  ;;  %s1462_s6 = sshll.u32 %s2309_s30, 2 }
   0xf   : > { %s2051_s7 = scalar_lea.vmem %s2302_s0, %s1460_s27  ;;  %1724 = vmatpush3.bf16.msra.mxu1 %v1939_v4  ;;  %1768 = vmatpush3.bf16.msra.mxu0 %v1940_v5  ;;  %v2189_v4 = vld [vmem:[%s2304_s2] ss:$0 sm:$0xff]  ;;  %s2197_s8 = scalar_lea.vmem %s2305_s3, %s1462_s6 }
  0x10   : > { %1725 = vmatprep.subr.bf16.mxu1 %v1941_v6  ;;  %v1947_v10 = vld [vmem:[%s2051_s7 + $0x8] sm:$0xff]   ;;  %1769 = vmatprep.subr.bf16.mxu0 %v1942_v7  ;;  %v1948_v11 = vld [vmem:[%s2051_s7] sm:$0xff]   ;;  %v1949_v15 = vld [vmem:[%s2051_s7 + $0x10] sm:$0xff]  }
  0x11   : > { %1731 = vmatprep.mubr.msk.bf16.mxu1 %vm350_vm0, %v1947_v10  ;;  %1775 = vmatprep.mubr.msk.bf16.mxu0 %vm350_vm0, %v1948_v11  ;;  %v1952_v16 = vld [vmem:[%s2051_s7 + $0x18] sm:$0xff]   ;;  %v1953_v19 = vld [vmem:[%s2051_s7 + $0x20] sm:$0xff]   ;;  %v1955_v20 = vld [vmem:[%s2051_s7 + $0x28] sm:$0xff]  }
  0x12   : > { %v1956_v23 = vld [vmem:[%s2051_s7 + $0x30] sm:$0xff]   ;;  %v1959_v24 = vld [vmem:[%s2051_s7 + $0x38] sm:$0xff]   ;;  %v1960_v26 = vld [vmem:[%s2051_s7 + $0x40] sm:$0xff]  }
  0x13   : > { %1726 = vmatpush3.bf16.msra.mxu1 %v1941_v6  ;;  %1770 = vmatpush3.bf16.msra.mxu0 %v1942_v7  ;;  %v1962_v27 = vld [vmem:[%s2051_s7 + $0x48] sm:$0xff]   ;;  %v1963_v28 = vld [vmem:[%s2051_s7 + $0x10] sm:$0xff]   ;;  %v1965_v30 = vld [vmem:[%s2051_s7 + $0x18] sm:$0xff]  }
  0x14   : > { %1727 = vmatprep.subr.bf16.mxu1 %v1943_v8  ;;  %1771 = vmatprep.subr.bf16.mxu0 %v2059_v9  ;;  %v1964_v29 = vld [vmem:[%s2051_s7 + $0x50] sm:$0xff]   ;;  %v1966_v31 = vld [vmem:[%s2051_s7 + $0x58] sm:$0xff]   ;;  %v1967_v32 = vld [vmem:[%s2051_s7 + $0x20] sm:$0xff]  }
  0x15   : > { %v1968_v33 = vld [vmem:[%s2051_s7 + $0x60] sm:$0xff]   ;;  %v1969_v34 = vld [vmem:[%s2051_s7 + $0x28] sm:$0xff]   ;;  %v1971_v36 = vld [vmem:[%s2051_s7 + $0x30] sm:$0xff]  }
  0x16   : > { %v1970_v35 = vld [vmem:[%s2051_s7 + $0x68] sm:$0xff]   ;;  %v1972_v37 = vld [vmem:[%s2051_s7 + $0x70] sm:$0xff]   ;;  %v1973_v38 = vld [vmem:[%s2051_s7 + $0x38] sm:$0xff]  }
  0x17   : > { %1728 = vmatpush3.bf16.msra.mxu1 %v1943_v8  ;;  %1772 = vmatpush3.bf16.msra.mxu0 %v2059_v9  ;;  %v1974_v39 = vld [vmem:[%s2051_s7 + $0x78] sm:$0xff]   ;;  %v1975_v40 = vld [vmem:[%s2051_s7 + $0x40] sm:$0xff]   ;;  %v1977_v42 = vld [vmem:[%s2051_s7 + $0x48] sm:$0xff]  }
  0x18   : > { %1729 = vmatprep.subr.bf16.mxu1 %v1945_v12  ;;  %1773 = vmatprep.subr.bf16.mxu0 %v1946_v13  ;;  %v1976_v41 = vld [vmem:[%s2051_s7 + $0x80] sm:$0xff]   ;;  %v1978_v43 = vld [vmem:[%s2051_s7 + $0x50] sm:$0xff]   ;;  %v1979_v44 = vld [vmem:[%s2051_s7 + $0x58] sm:$0xff]  }
  0x19   : > { %v1980_v45 = vld [vmem:[%s2051_s7 + $0x60] sm:$0xff]   ;;  %v1981_v46 = vld [vmem:[%s2051_s7 + $0x68] sm:$0xff]   ;;  %v1982_v47 = vld [vmem:[%s2051_s7 + $0x70] sm:$0xff]  }
  0x1a   : > { %v1983_v48 = vld [vmem:[%s2051_s7 + $0x78] sm:$0xff]   ;;  %v1984_v49 = vld [vmem:[%s2051_s7 + $0x80] sm:$0xff]   ;;  %v1985_v50 = vld [vmem:[%s2051_s7 + $0x88] sm:$0xff]  }
  0x1b   : > { %1730 = vmatpush3.bf16.msra.mxu1 %v1945_v12  ;;  %1774 = vmatpush3.bf16.msra.mxu0 %v1946_v13 }
  0x1c   : > { %1851 = vmatprep.subr.bf16.mxu1 %v1936_v1  ;;  %1807 = vmatprep.subr.bf16.mxu0 %v1950_v14 }
  0x1e   : > { %1732 = vmatmul.mubr.msk.bf16.vlgmr.msra.gmra.mrb[0].mxu1 %vm350_vm0, %v1949_v15  ;;  %1776 = vmatmul.mubr.msk.bf16.vlgmr.msra.gmra.mrb[0].mxu0 %vm350_vm0, %v1947_v10 }
  0x1f   : > { %1857 = vmatpush3.bf16.msra.mxu1 %v1936_v1  ;;  %1808 = vmatpush3.bf16.msra.mxu0 %v1950_v14 }
  0x20   : > { %1735 = vmatprep.mubr.msk.bf16.mxu1 %vm350_vm0, %v1952_v16  ;;  %1809 = vmatprep.subr.bf16.mxu0 %v1951_v17 }
  0x21   : > { %1779 = vmatprep.mubr.msk.bf16.mxu0 %vm350_vm0, %v1949_v15  ;;  %1852 = vmatprep.subr.bf16.mxu1 %v1938_v3 }
  0x23   : > { %1858 = vmatpush3.bf16.msra.mxu1 %v1938_v3  ;;  %1810 = vmatpush3.bf16.msra.mxu0 %v1951_v17 }
  0x24   : > { %1853 = vmatprep.subr.bf16.mxu1 %v1940_v5  ;;  %1811 = vmatprep.subr.bf16.mxu0 %v1954_v18 }
  0x26   : > { %1736 = vmatmul.mubr.msk.bf16.gmra.mrb[4].mxu1 %vm350_vm0, %v1953_v19  ;;  %1780 = vmatmul.mubr.msk.bf16.gmra.mrb[4].mxu0 %vm350_vm0, %v1952_v16 }
  0x27   : > { %1739 = vmatprep.mubr.msk.bf16.mxu1 %vm350_vm0, %v1955_v20  ;;  %1812 = vmatpush3.bf16.msra.mxu0 %v1954_v18 }
  0x28   : > { %1783 = vmatprep.mubr.msk.bf16.mxu0 %vm350_vm0, %v1953_v19  ;;  %1813 = vmatprep.subr.bf16.mxu0 %v1957_v21 }
  0x29   : > { %1859 = vmatpush3.bf16.msra.mxu1 %v1940_v5 }
  0x2a   : > { %1854 = vmatprep.subr.bf16.mxu1 %v1942_v7 }
  0x2b   : > { %1814 = vmatpush3.bf16.msra.mxu0 %v1957_v21 }
  0x2c   : > { %1815 = vmatprep.subr.bf16.mxu0 %v1958_v22 }
  0x2d   : > { %1860 = vmatpush3.bf16.msra.mxu1 %v1942_v7 }
  0x2e   : > { %1740 = vmatmul.mubr.msk.bf16.gmra.mrb[8].mxu1 %vm350_vm0, %v1956_v23  ;;  %1855 = vmatprep.subr.bf16.mxu1 %v2059_v9 }
  0x2f   : > { %1784 = vmatmul.mubr.msk.bf16.gmra.mrb[8].mxu0 %vm350_vm0, %v1955_v20  ;;  %1743 = vmatprep.mubr.msk.bf16.mxu1 %vm350_vm0, %v1959_v24 }
  0x30   : > { %1787 = vmatprep.mubr.msk.bf16.mxu0 %vm350_vm0, %v1956_v23  ;;  %1816 = vmatpush3.bf16.msra.mxu0 %v1958_v22 }
  0x31   : > { %1817 = vmatprep.subr.bf16.mxu0 %v1961_v25  ;;  %1861 = vmatpush3.bf16.msra.mxu1 %v2059_v9 }
  0x32   : > { %1856 = vmatprep.subr.bf16.mxu1 %v1946_v13 }
  0x34   : > { %1818 = vmatpush3.bf16.msra.mxu0 %v1961_v25 }
  0x35   : > { %1862 = vmatpush3.bf16.msra.mxu1 %v1946_v13 }
  0x36   : > { %1744 = vmatmul.mubr.msk.bf16.gmra.mrb[12].mxu1 %vm350_vm0, %v1960_v26 }
  0x37   : > { %1788 = vmatmul.mubr.msk.bf16.gmra.mrb[12].mxu0 %vm350_vm0, %v1959_v24  ;;  %1747 = vmatprep.mubr.msk.bf16.mxu1 %vm350_vm0, %v1962_v27 }
  0x38   : > { %1819 = vmatprep.mubr.msk.bf16.mxu0 %vm350_vm0, %v1963_v28 }
  0x3e   : > { %1748 = vmatmul.mubr.msk.bf16.gmra.mrb[16].mxu1 %vm350_vm0, %v1964_v29 }
  0x3f   : > { %1820 = vmatmul.mubr.msk.bf16.vlgmr.msra.gmra.mrb[0].mxu0 %vm350_vm0, %v1965_v30  ;;  %1751 = vmatprep.mubr.msk.bf16.mxu1 %vm350_vm0, %v1966_v31 }
  0x40   : > { %1823 = vmatprep.mubr.msk.bf16.mxu0 %vm350_vm0, %v1967_v32 }
  0x46   : > { %1752 = vmatmul.mubr.msk.bf16.gmra.mrb[20].mxu1 %vm350_vm0, %v1968_v33 }
  0x47   : > { %1824 = vmatmul.mubr.msk.bf16.gmra.mrb[4].mxu0 %vm350_vm0, %v1969_v34  ;;  %1755 = vmatprep.mubr.msk.bf16.mxu1 %vm350_vm0, %v1970_v35 }
  0x48   : > { %1827 = vmatprep.mubr.msk.bf16.mxu0 %vm350_vm0, %v1971_v36 }
  0x4e   : > { %1756 = vmatmul.mubr.msk.bf16.gmra.mrb[24].mxu1 %vm350_vm0, %v1972_v37 }
  0x4f   : > { %1828 = vmatmul.mubr.msk.bf16.gmra.mrb[8].mxu0 %vm350_vm0, %v1973_v38  ;;  %1759 = vmatprep.mubr.msk.bf16.mxu1 %vm350_vm0, %v1974_v39 }
  0x50   : > { %1831 = vmatprep.mubr.msk.bf16.mxu0 %vm350_vm0, %v1975_v40 }
  0x56   : > { %1760 = vmatmul.mubr.msk.bf16.gmra.mrb[28].mxu1 %vm350_vm0, %v1976_v41 }
  0x57   : > { %1832 = vmatmul.mubr.msk.bf16.gmra.mrb[12].mxu0 %vm350_vm0, %v1977_v42  ;;  %1791 = vmatprep.mubr.msk.bf16.mxu1 %vm350_vm0, %v1960_v26 }
  0x58   : > { %1835 = vmatprep.mubr.msk.bf16.mxu0 %vm350_vm0, %v1978_v43 }
  0x5e   : > { %1792 = vmatmul.mubr.msk.bf16.vlgmr.msra.gmra.mrb[16].mxu1 %vm350_vm0, %v1962_v27 }
  0x5f   : > { %1836 = vmatmul.mubr.msk.bf16.gmra.mrb[16].mxu0 %vm350_vm0, %v1979_v44  ;;  %1795 = vmatprep.mubr.msk.bf16.mxu1 %vm350_vm0, %v1964_v29 }
  0x60   : > { %1839 = vmatprep.mubr.msk.bf16.mxu0 %vm350_vm0, %v1980_v45 }
  0x66   : > { %1796 = vmatmul.mubr.msk.bf16.gmra.mrb[20].mxu1 %vm350_vm0, %v1966_v31 }
  0x67   : > { %1840 = vmatmul.mubr.msk.bf16.gmra.mrb[20].mxu0 %vm350_vm0, %v1981_v46  ;;  %1799 = vmatprep.mubr.msk.bf16.mxu1 %vm350_vm0, %v1968_v33 }
  0x68   : > { %1843 = vmatprep.mubr.msk.bf16.mxu0 %vm350_vm0, %v1982_v47 }
  0x6e   : > { %1800 = vmatmul.mubr.msk.bf16.gmra.mrb[24].mxu1 %vm350_vm0, %v1970_v35 }
  0x6f   : > { %1844 = vmatmul.mubr.msk.bf16.gmra.mrb[24].mxu0 %vm350_vm0, %v1983_v48  ;;  %1803 = vmatprep.mubr.msk.bf16.mxu1 %vm350_vm0, %v1972_v37 }
  0x70   : > { %1847 = vmatprep.mubr.msk.bf16.mxu0 %vm350_vm0, %v1984_v49 }
  0x76   : > { %1804 = vmatmul.mubr.msk.bf16.gmra.mrb[28].mxu1 %vm350_vm0, %v1974_v39 }
  0x77   : > { %1848 = vmatmul.mubr.msk.bf16.gmra.mrb[28].mxu0 %vm350_vm0, %v1985_v50 }
  0xf1   : > { %v1733_v51 = vpop.f32.mrb[0].mxu1 }
  0xf2   : > { %v433_v52 = vpop.f32.mrb[1].mxu1 }
  0xf3   : > { %v1734_v53 = vpop.f32.mrb[2].mxu1 }
  0xf4   : > { %v436_v54 = vpop.f32.mrb[3].mxu1 }
  0xf9   : > { %v1737_v55 = vpop.f32.mrb[4].mxu1 }
  0xfa   : > { %v449_v56 = vpop.f32.mrb[5].mxu1 }
  0xfb   : > { %v1738_v57 = vpop.f32.mrb[6].mxu1 }
  0xfc   : > { %v452_v58 = vpop.f32.mrb[7].mxu1 }
 0x101   : > { %v1741_v59 = vpop.f32.mrb[8].mxu1 }
 0x102   : > { %v2170_v60 = vpop.f32.mrb[9].mxu1 }
 0x103   : > { %v2172_v61 = vpop.f32.mrb[10].mxu1 }
 0x104   : > { %v2174_v62 = vpop.f32.mrb[11].mxu1 }
 0x109   : > { %v2176_v63 = vpop.f32.mrb[12].mxu1 }
 0x10a   : > { %v2178_v0 = vpop.f32.mrb[13].mxu1 }
 0x10b   : > { %v2182_v1 = vpop.f32.mrb[14].mxu1 }
 0x10c   : > { %v2184_v2 = vpop.f32.mrb[15].mxu1 }
 0x112   : > { %v1821_v3 = vpop.f32.mrb[0].mxu0 }
 0x113   : > { %v1863_v5 = vadd.f32 %v1821_v3, %v1733_v51  ;;  %v1008_v6 = vpop.f32.mrb[1].mxu0 }
 0x114   : > { %v1864_v7 = vadd.f32 %v1008_v6, %v433_v52  ;;  %v1822_v8 = vpop.f32.mrb[2].mxu0 }
 0x115   : > { %v1176_v9 = vadd.f32 %v1863_v5, %v2189_v4  ;;  %v1865_v10 = vadd.f32 %v1822_v8, %v1734_v53  ;;  %v1011_v11 = vpop.f32.mrb[3].mxu0 }
 0x116   : > { %v1174_v12 = vadd.f32 %v1864_v7, %v2189_v4  ;;  %v1866_v13 = vadd.f32 %v1011_v11, %v436_v54 }
 0x117   : > { %v1208_v14 = vmax.f32 %v1176_v9, 0.0  ;;  %v1177_v15 = vadd.f32 %v1865_v10, %v2189_v4 }
 0x118   : > { %v1206_v16 = vmax.f32 %v1174_v12, 0.0  ;;  %v1175_v17 = vadd.f32 %v1866_v13, %v2189_v4 }
 0x119   : > { %v1623_v18 = vpack.c.bf16 %v1208_v14, %v1208_v14  ;;  %v1209_v19 = vmax.f32 %v1177_v15, 0.0 }
 0x11a   : > { %v1621_v20 = vpack.c.bf16 %v1206_v16, %v1206_v16  ;;  %v1207_v21 = vmax.f32 %v1175_v17, 0.0  ;;  %v1825_v22 = vpop.f32.mrb[4].mxu0 }
 0x11b   : > { %1369 = vst.msk [vmem:[%s2197_s8 + $0x8] sm:$0xf] %vm1366_vm1, %v1623_v18  ;;  %v1624_v23 = vpack.c.bf16 %v1209_v19, %v1209_v19  ;;  %v1867_v24 = vadd.f32 %v1825_v22, %v1737_v55  ;;  %v1024_v25 = vpop.f32.mrb[5].mxu0 }
 0x11c   : > { %1367 = vst.msk [vmem:[%s2197_s8] sm:$0xf] %vm1366_vm1, %v1621_v20  ;;  %v1622_v26 = vpack.c.bf16 %v1207_v21, %v1207_v21  ;;  %v1868_v27 = vadd.f32 %v1024_v25, %v449_v56  ;;  %v1826_v28 = vpop.f32.mrb[6].mxu0 }
 0x11d   : > { %1370 = vst.msk [vmem:[%s2197_s8 + $0xc] sm:$0xf] %vm1366_vm1, %v1624_v23  ;;  %v1180_v29 = vadd.f32 %v1867_v24, %v2189_v4  ;;  %v1869_v30 = vadd.f32 %v1826_v28, %v1738_v57  ;;  %v1027_v31 = vpop.f32.mrb[7].mxu0 }
 0x11e   : > { %1368 = vst.msk [vmem:[%s2197_s8 + $0x4] sm:$0xf] %vm1366_vm1, %v1622_v26  ;;  %v1178_v32 = vadd.f32 %v1868_v27, %v2189_v4  ;;  %v1870_v33 = vadd.f32 %v1027_v31, %v452_v58 }
 0x11f   : > { %v1212_v34 = vmax.f32 %v1180_v29, 0.0  ;;  %v1181_v35 = vadd.f32 %v1869_v30, %v2189_v4 }
 0x120   : > { %v1210_v36 = vmax.f32 %v1178_v32, 0.0  ;;  %v1179_v37 = vadd.f32 %v1870_v33, %v2189_v4 }
 0x121   : > { %v1627_v38 = vpack.c.bf16 %v1212_v34, %v1212_v34  ;;  %v1213_v39 = vmax.f32 %v1181_v35, 0.0 }
 0x122   : > { %v1625_v40 = vpack.c.bf16 %v1210_v36, %v1210_v36  ;;  %v1211_v41 = vmax.f32 %v1179_v37, 0.0  ;;  %v1829_v42 = vpop.f32.mrb[8].mxu0 }
 0x123   : > { %1373 = vst.msk [vmem:[%s2197_s8 + $0x18] sm:$0xf] %vm1366_vm1, %v1627_v38  ;;  %v1628_v43 = vpack.c.bf16 %v1213_v39, %v1213_v39  ;;  %v1871_v44 = vadd.f32 %v1829_v42, %v1741_v59  ;;  %v1040_v45 = vpop.f32.mrb[9].mxu0 }
 0x124   : > { %1371 = vst.msk [vmem:[%s2197_s8 + $0x10] sm:$0xf] %vm1366_vm1, %v1625_v40  ;;  %v1626_v46 = vpack.c.bf16 %v1211_v41, %v1211_v41  ;;  %v1872_v47 = vadd.f32 %v1040_v45, %v2170_v60  ;;  %v1830_v48 = vpop.f32.mrb[10].mxu0 }
 0x125   : > { %1374 = vst.msk [vmem:[%s2197_s8 + $0x1c] sm:$0xf] %vm1366_vm1, %v1628_v43  ;;  %v1184_v49 = vadd.f32 %v1871_v44, %v2189_v4  ;;  %v1873_v50 = vadd.f32 %v1830_v48, %v2172_v61  ;;  %v1043_v51 = vpop.f32.mrb[11].mxu0 }
 0x126   : > { %1372 = vst.msk [vmem:[%s2197_s8 + $0x14] sm:$0xf] %vm1366_vm1, %v1626_v46  ;;  %v1182_v52 = vadd.f32 %v1872_v47, %v2189_v4  ;;  %v1874_v53 = vadd.f32 %v1043_v51, %v2174_v62 }
 0x127   : > { %v1216_v54 = vmax.f32 %v1184_v49, 0.0  ;;  %v1185_v55 = vadd.f32 %v1873_v50, %v2189_v4 }
 0x128   : > { %v1214_v56 = vmax.f32 %v1182_v52, 0.0  ;;  %v1183_v57 = vadd.f32 %v1874_v53, %v2189_v4 }
 0x129   : > { %v1631_v58 = vpack.c.bf16 %v1216_v54, %v1216_v54  ;;  %v1217_v59 = vmax.f32 %v1185_v55, 0.0 }
 0x12a   : > { %v1629_v60 = vpack.c.bf16 %v1214_v56, %v1214_v56  ;;  %v1215_v61 = vmax.f32 %v1183_v57, 0.0  ;;  %v1833_v3 = vpop.f32.mrb[12].mxu0 }
 0x12b   : > { %1377 = vst.msk [vmem:[%s2197_s8 + $0x28] sm:$0xf] %vm1366_vm1, %v1631_v58  ;;  %v1632_v5 = vpack.c.bf16 %v1217_v59, %v1217_v59  ;;  %v1875_v6 = vadd.f32 %v1833_v3, %v2176_v63  ;;  %v1056_v7 = vpop.f32.mrb[13].mxu0 }
 0x12c   : > { %1375 = vst.msk [vmem:[%s2197_s8 + $0x20] sm:$0xf] %vm1366_vm1, %v1629_v60  ;;  %v1630_v62 = vpack.c.bf16 %v1215_v61, %v1215_v61  ;;  %v1876_v8 = vadd.f32 %v1056_v7, %v2178_v0  ;;  %v1834_v9 = vpop.f32.mrb[14].mxu0 }
 0x12d   : > { %1378 = vst.msk [vmem:[%s2197_s8 + $0x2c] sm:$0xf] %vm1366_vm1, %v1632_v5  ;;  %v1188_v10 = vadd.f32 %v1875_v6, %v2189_v4  ;;  %v1877_v11 = vadd.f32 %v1834_v9, %v2182_v1  ;;  %v1059_v12 = vpop.f32.mrb[15].mxu0 }
 0x12e   : > { %1376 = vst.msk [vmem:[%s2197_s8 + $0x24] sm:$0xf] %vm1366_vm1, %v1630_v62  ;;  %v1186_v13 = vadd.f32 %v1876_v8, %v2189_v4  ;;  %v1878_v63 = vadd.f32 %v1059_v12, %v2184_v2 }
 0x12f   : > { %v1220_v14 = vmax.f32 %v1188_v10, 0.0  ;;  %v1189_v15 = vadd.f32 %v1877_v11, %v2189_v4 }
 0x130   : > { %v1218_v0 = vmax.f32 %v1186_v13, 0.0  ;;  %v1187_v16 = vadd.f32 %v1878_v63, %v2189_v4 }
 0x131   : > { %v1635_v17 = vpack.c.bf16 %v1220_v14, %v1220_v14  ;;  %v1221_v18 = vmax.f32 %v1189_v15, 0.0  ;;  %v1793_v19 = vpop.f32.mrb[16].mxu1 }
 0x132   : > { %v1633_v1 = vpack.c.bf16 %v1218_v0, %v1218_v0  ;;  %v1219_v20 = vmax.f32 %v1187_v16, 0.0  ;;  %v1837_v21 = vpop.f32.mrb[16].mxu0  ;;  %v702_v22 = vpop.f32.mrb[17].mxu1 }
 0x133   : > { %1381 = vst.msk [vmem:[%s2197_s8 + $0x38] sm:$0xf] %vm1366_vm1, %v1635_v17  ;;  %v1636_v23 = vpack.c.bf16 %v1221_v18, %v1221_v18  ;;  %v1879_v2 = vadd.f32 %v1837_v21, %v1793_v19  ;;  %v1072_v24 = vpop.f32.mrb[17].mxu0  ;;  %v1794_v25 = vpop.f32.mrb[18].mxu1 }
 0x134   : > { %1379 = vst.msk [vmem:[%s2197_s8 + $0x30] sm:$0xf] %vm1366_vm1, %v1633_v1  ;;  %v1634_v26 = vpack.c.bf16 %v1219_v20, %v1219_v20  ;;  %v1880_v27 = vadd.f32 %v1072_v24, %v702_v22  ;;  %v1838_v28 = vpop.f32.mrb[18].mxu0  ;;  %v705_v29 = vpop.f32.mrb[19].mxu1 }
 0x135   : > { %1382 = vst.msk [vmem:[%s2197_s8 + $0x3c] sm:$0xf] %vm1366_vm1, %v1636_v23  ;;  %v1192_v30 = vadd.f32 %v1879_v2, %v2189_v4  ;;  %v1881_v31 = vadd.f32 %v1838_v28, %v1794_v25  ;;  %v1075_v32 = vpop.f32.mrb[19].mxu0 }
 0x136   : > { %1380 = vst.msk [vmem:[%s2197_s8 + $0x34] sm:$0xf] %vm1366_vm1, %v1634_v26  ;;  %v1190_v33 = vadd.f32 %v1880_v27, %v2189_v4  ;;  %v1882_v34 = vadd.f32 %v1075_v32, %v705_v29 }
 0x137   : > { %v1224_v35 = vmax.f32 %v1192_v30, 0.0  ;;  %v1193_v36 = vadd.f32 %v1881_v31, %v2189_v4 }
 0x138   : > { %v1222_v37 = vmax.f32 %v1190_v33, 0.0  ;;  %v1191_v38 = vadd.f32 %v1882_v34, %v2189_v4 }
 0x139   : > { %v1639_v39 = vpack.c.bf16 %v1224_v35, %v1224_v35  ;;  %v1225_v40 = vmax.f32 %v1193_v36, 0.0  ;;  %v1797_v41 = vpop.f32.mrb[20].mxu1 }
 0x13a   : > { %v1637_v42 = vpack.c.bf16 %v1222_v37, %v1222_v37  ;;  %v1223_v43 = vmax.f32 %v1191_v38, 0.0  ;;  %v1841_v44 = vpop.f32.mrb[20].mxu0  ;;  %v718_v45 = vpop.f32.mrb[21].mxu1 }
 0x13b   : > { %1385 = vst.msk [vmem:[%s2197_s8 + $0x48] sm:$0xf] %vm1366_vm1, %v1639_v39  ;;  %v1640_v46 = vpack.c.bf16 %v1225_v40, %v1225_v40  ;;  %v1883_v47 = vadd.f32 %v1841_v44, %v1797_v41  ;;  %v1088_v48 = vpop.f32.mrb[21].mxu0  ;;  %v1798_v49 = vpop.f32.mrb[22].mxu1 }
 0x13c   : > { %1383 = vst.msk [vmem:[%s2197_s8 + $0x40] sm:$0xf] %vm1366_vm1, %v1637_v42  ;;  %v1638_v50 = vpack.c.bf16 %v1223_v43, %v1223_v43  ;;  %v1884_v51 = vadd.f32 %v1088_v48, %v718_v45  ;;  %v1842_v52 = vpop.f32.mrb[22].mxu0  ;;  %v721_v53 = vpop.f32.mrb[23].mxu1 }
 0x13d   : > { %1386 = vst.msk [vmem:[%s2197_s8 + $0x4c] sm:$0xf] %vm1366_vm1, %v1640_v46  ;;  %v1196_v54 = vadd.f32 %v1883_v47, %v2189_v4  ;;  %v1885_v55 = vadd.f32 %v1842_v52, %v1798_v49  ;;  %v1091_v56 = vpop.f32.mrb[23].mxu0 }
 0x13e   : > { %1384 = vst.msk [vmem:[%s2197_s8 + $0x44] sm:$0xf] %vm1366_vm1, %v1638_v50  ;;  %v1194_v57 = vadd.f32 %v1884_v51, %v2189_v4  ;;  %v1886_v58 = vadd.f32 %v1091_v56, %v721_v53 }
 0x13f   : > { %v1228_v59 = vmax.f32 %v1196_v54, 0.0  ;;  %v1197_v60 = vadd.f32 %v1885_v55, %v2189_v4 }
 0x140   : > { %v1226_v61 = vmax.f32 %v1194_v57, 0.0  ;;  %v1195_v3 = vadd.f32 %v1886_v58, %v2189_v4 }
 0x141   : > { %v1643_v5 = vpack.c.bf16 %v1228_v59, %v1228_v59  ;;  %v1229_v6 = vmax.f32 %v1197_v60, 0.0  ;;  %v1801_v7 = vpop.f32.mrb[24].mxu1 }
 0x142   : > { %v1641_v62 = vpack.c.bf16 %v1226_v61, %v1226_v61  ;;  %v1227_v8 = vmax.f32 %v1195_v3, 0.0  ;;  %v1845_v9 = vpop.f32.mrb[24].mxu0  ;;  %v734_v10 = vpop.f32.mrb[25].mxu1 }
 0x143   : > { %1389 = vst.msk [vmem:[%s2197_s8 + $0x58] sm:$0xf] %vm1366_vm1, %v1643_v5  ;;  %v1644_v11 = vpack.c.bf16 %v1229_v6, %v1229_v6  ;;  %v1887_v12 = vadd.f32 %v1845_v9, %v1801_v7  ;;  %v1104_v13 = vpop.f32.mrb[25].mxu0  ;;  %v1802_v63 = vpop.f32.mrb[26].mxu1 }
 0x144   : > { %1387 = vst.msk [vmem:[%s2197_s8 + $0x50] sm:$0xf] %vm1366_vm1, %v1641_v62  ;;  %v1642_v14 = vpack.c.bf16 %v1227_v8, %v1227_v8  ;;  %v1888_v15 = vadd.f32 %v1104_v13, %v734_v10  ;;  %v1846_v0 = vpop.f32.mrb[26].mxu0  ;;  %v737_v16 = vpop.f32.mrb[27].mxu1 }
 0x145   : > { %1390 = vst.msk [vmem:[%s2197_s8 + $0x5c] sm:$0xf] %vm1366_vm1, %v1644_v11  ;;  %v1200_v17 = vadd.f32 %v1887_v12, %v2189_v4  ;;  %v1889_v18 = vadd.f32 %v1846_v0, %v1802_v63  ;;  %v1107_v19 = vpop.f32.mrb[27].mxu0 }
 0x146   : > { %1388 = vst.msk [vmem:[%s2197_s8 + $0x54] sm:$0xf] %vm1366_vm1, %v1642_v14  ;;  %v1198_v1 = vadd.f32 %v1888_v15, %v2189_v4  ;;  %v1890_v20 = vadd.f32 %v1107_v19, %v737_v16 }
 0x147   : > { %v1232_v21 = vmax.f32 %v1200_v17, 0.0  ;;  %v1201_v22 = vadd.f32 %v1889_v18, %v2189_v4 }
 0x148   : > { %v1230_v23 = vmax.f32 %v1198_v1, 0.0  ;;  %v1199_v2 = vadd.f32 %v1890_v20, %v2189_v4 }
 0x149   : > { %v1647_v24 = vpack.c.bf16 %v1232_v21, %v1232_v21  ;;  %v1233_v25 = vmax.f32 %v1201_v22, 0.0  ;;  %v1805_v26 = vpop.f32.mrb[28].mxu1 }
 0x14a   : > { %v1645_v27 = vpack.c.bf16 %v1230_v23, %v1230_v23  ;;  %v1231_v28 = vmax.f32 %v1199_v2, 0.0  ;;  %v1849_v29 = vpop.f32.mrb[28].mxu0  ;;  %v750_v30 = vpop.f32.mrb[29].mxu1 }
 0x14b   : > { %1393 = vst.msk [vmem:[%s2197_s8 + $0x68] sm:$0xf] %vm1366_vm1, %v1647_v24  ;;  %v1648_v31 = vpack.c.bf16 %v1233_v25, %v1233_v25  ;;  %v1891_v32 = vadd.f32 %v1849_v29, %v1805_v26  ;;  %v1120_v33 = vpop.f32.mrb[29].mxu0  ;;  %v1806_v34 = vpop.f32.mrb[30].mxu1 }
 0x14c   : > { %1391 = vst.msk [vmem:[%s2197_s8 + $0x60] sm:$0xf] %vm1366_vm1, %v1645_v27  ;;  %v1646_v35 = vpack.c.bf16 %v1231_v28, %v1231_v28  ;;  %v1892_v36 = vadd.f32 %v1120_v33, %v750_v30  ;;  %v1850_v37 = vpop.f32.mrb[30].mxu0  ;;  %v753_v38 = vpop.f32.mrb[31].mxu1 }
 0x14d   : > { %1394 = vst.msk [vmem:[%s2197_s8 + $0x6c] sm:$0xf] %vm1366_vm1, %v1648_v31  ;;  %v1204_v39 = vadd.f32 %v1891_v32, %v2189_v4  ;;  %v1893_v40 = vadd.f32 %v1850_v37, %v1806_v34  ;;  %v1123_v41 = vpop.f32.mrb[31].mxu0 }
 0x14e   : > { %1392 = vst.msk [vmem:[%s2197_s8 + $0x64] sm:$0xf] %vm1366_vm1, %v1646_v35  ;;  %v1202_v42 = vadd.f32 %v1892_v36, %v2189_v4  ;;  %v1894_v43 = vadd.f32 %v1123_v41, %v753_v38 }
 0x14f   : > { %v1236_v44 = vmax.f32 %v1204_v39, 0.0  ;;  %v1205_v45 = vadd.f32 %v1893_v40, %v2189_v4 }
 0x150   : > { %v1234_v46 = vmax.f32 %v1202_v42, 0.0  ;;  %v1203_v47 = vadd.f32 %v1894_v43, %v2189_v4 }
 0x151   : > { %v1651_v48 = vpack.c.bf16 %v1236_v44, %v1236_v44  ;;  %v1237_v49 = vmax.f32 %v1205_v45, 0.0 }
 0x152   : > { %v1649_v50 = vpack.c.bf16 %v1234_v46, %v1234_v46  ;;  %v1235_v51 = vmax.f32 %v1203_v47, 0.0 }
 0x153   : > { %1397 = vst.msk [vmem:[%s2197_s8 + $0x78] sm:$0xf] %vm1366_vm1, %v1651_v48  ;;  %v1652_v52 = vpack.c.bf16 %v1237_v49, %v1237_v49 }
 0x154   : > { %1395 = vst.msk [vmem:[%s2197_s8 + $0x70] sm:$0xf] %vm1366_vm1, %v1649_v50  ;;  %v1650_v53 = vpack.c.bf16 %v1235_v51, %v1235_v51 }
 0x155   : > { %1398 = vst.msk [vmem:[%s2197_s8 + $0x7c] sm:$0xf] %vm1366_vm1, %v1652_v52 }
 0x156   : > { %1396 = vst.msk [vmem:[%s2197_s8 + $0x74] sm:$0xf] %vm1366_vm1, %v1650_v53 }
 0x157 PF: > { %s13_s12 = sadd.s32 1, %s1992_s12  }
 0x158   : > { %p10_p5 = scmp.ge.s32.totalorder %s13_s12, 4  }
 0x15a   :  { %12 = sbr.rel (!%p10_p5) target bundleno = 1 (0x1), region = 64 }

// kernel: adam_only_cnn_forward.8
= control target key start
LH: loop header
LB: loop body
LE: loop exit
PB: predicated region body
PF: predicated region fallthrough
CT: control target
= control target key end

     0   :  { %s5846_s12 = smov 0   ;;  %s6916_s0 = inlined_call_operand.vmem [shape: bf16[2176,9], index: 0, kind: input, shape index: {}]   ;;  %s6917_s1 = inlined_call_operand.vmem [shape: bf16[3,9,32], index: 1, kind: input, shape index: {}]   ;;  %s6918_s2 = inlined_call_operand.vmem [shape: f32[1,32], index: 2, kind: input, shape index: {}]   ;;  %s6919_s3 = inlined_call_operand.vmem [shape: bf16[2048,32], index: 3, kind: output, shape index: {}]  }
   0x1 LB: > { %s4235_s13 = sadd.s32 4294967295, %s5823_s12   ;;  %p4239_p0 = scmp.ge.s32.totalorder %s5823_s12, 1  ;;  %s5823_s12 = sphi %s5846_s12, %s13_s12  }
   0x2   : > { %p138_p1 = scmp.lt.s32.totalorder %s5823_s12, 3 }
   0x4   : > { %p139_p2 = pnand %p4239_p0, %p138_p1 }
   0x6   : > { %142 = sbr.rel (%p139_p2) target bundleno = 623 (0x26f), region = 32 }
   0xd   : > { %v5683_v0 = vld [vmem:[%s6917_s1 + $0x8] sm:$0x1f]   ;;  %vm830_vm0 = vcmask 1043456   ;;  %vm831_vm1 = vcmask 1044480   ;;  %v5684_v1 = vld [vmem:[%s6917_s1] sm:$0x1f]  }
   0xe   : > { %s162_s18 = smul.u32 136, %s4235_s13  ;;  %v5825_v2 = vmov 65535   ;;  %v5687_v5 = vld [vmem:[%s6917_s1 + $0x10] sm:$0x1f]   ;;  %vm637_vm2 = vcmask 72704   ;;  %s4241_s25 = sshll.u32 %s4235_s13, 7 }
   0xf   : > { %v832_v3 = vsel %vm830_vm0, 4294967295, %v5825_v2  ;;  %p169_p4 = scmp.lt.s32.totalorder %s4241_s25, 255  ;;  %vm4050_vm3 = vcmask 257024  }
  0x10   : > { %v833_v4 = vsel %vm831_vm1, %v832_v3, 0  ;;  %p163_p3 = scmp.lt.s32.totalorder %s162_s18, 271 }
  0x11   : > { %v835_v6 = vand.u32 %v5683_v0, %v833_v4  ;;  %v1404_v7 = vand.u32 %v5684_v1, %v833_v4  ;;  %v2600_v8 = vand.u32 %v5687_v5, %v833_v4  ;;  %s6967_s25 = smov (!%p169_p4, %s4241_s25), 255 }
  0x12   : > { %s6965_s18 = smov (!%p163_p3, %s162_s18), 271  ;;  %s4242_s28 = sshll.u32 %s6967_s25, 2 }
  0x13   : > { %5026 = vmatprep.subr.bf16.mxu1 %v835_v6  ;;  %5156 = vmatprep.subr.bf16.mxu0 %v1404_v7  ;;  %s4240_s21 = sshll.u32 %s6965_s18, 2  ;;  %s6436_s4 = scalar_lea.vmem %s6919_s3, %s4242_s28 }
  0x14   : > { %5027 = vmatpush3.bf16.msra.mxu1 %v835_v6  ;;  %5157 = vmatpush3.bf16.msra.mxu0 %v1404_v7  ;;  %s5868_s24 = scalar_lea.vmem %s6916_s0, %s4240_s21 }
  0x15   : > { %5416 = vmatprep.subr.bf16.mxu1 %v1404_v7  ;;  %5286 = vmatprep.subr.bf16.mxu0 %v2600_v8  ;;  %v5685_v9 = vld [vmem:[%s5868_s24 + $0x10] sm:$0xff]   ;;  %v5686_v10 = vld [vmem:[%s5868_s24] sm:$0xff]   ;;  %v5688_v11 = vld [vmem:[%s5868_s24 + $0x18] sm:$0xff]  }
  0x16   : > { %5028 = vmatprep.mubr.msk.bf16.mxu1 %vm637_vm2, %v5685_v9  ;;  %5158 = vmatprep.mubr.msk.bf16.mxu0 %vm637_vm2, %v5686_v10  ;;  %v5689_v12 = vld [vmem:[%s5868_s24 + $0x8] sm:$0xff]   ;;  %v5690_v13 = vld [vmem:[%s5868_s24 + $0x20] sm:$0xff]   ;;  %v5692_v15 = vld [vmem:[%s5868_s24 + $0x30] sm:$0xff]  }
  0x17   : > { %5029 = vmatmul.mubr.msk.bf16.vlgmr.msra.gmra.mrb[0].mxu1 %vm637_vm2, %v5688_v11  ;;  %5159 = vmatmul.mubr.msk.bf16.vlgmr.msra.gmra.mrb[0].mxu0 %vm637_vm2, %v5689_v12  ;;  %v5691_v14 = vld [vmem:[%s5868_s24 + $0x28] sm:$0xff]   ;;  %v5693_v16 = vld [vmem:[%s5868_s24 + $0x38] sm:$0xff]   ;;  %v5694_v17 = vld [vmem:[%s5868_s24 + $0x40] sm:$0xff]  }
  0x18   : > { %5417 = vmatpush3.bf16.msra.mxu1 %v1404_v7  ;;  %5287 = vmatpush3.bf16.msra.mxu0 %v2600_v8  ;;  %v5695_v18 = vld [vmem:[%s5868_s24 + $0x48] sm:$0xff]   ;;  %v5696_v19 = vld [vmem:[%s5868_s24 + $0x50] sm:$0xff]   ;;  %v5697_v20 = vld [vmem:[%s5868_s24 + $0x58] sm:$0xff]  }
  0x19   : > { %5032 = vmatprep.mubr.msk.bf16.mxu1 %vm637_vm2, %v5690_v13  ;;  %5162 = vmatprep.mubr.msk.bf16.mxu0 %vm637_vm2, %v5685_v9  ;;  %v5698_v21 = vld [vmem:[%s5868_s24 + $0x60] sm:$0xff]   ;;  %v5699_v22 = vld [vmem:[%s5868_s24 + $0x68] sm:$0xff]   ;;  %v5700_v23 = vld [vmem:[%s5868_s24 + $0x70] sm:$0xff]  }
  0x1a   : > { %v5701_v24 = vld [vmem:[%s5868_s24 + $0x78] sm:$0xff]   ;;  %v5702_v25 = vld [vmem:[%s5868_s24 + $0x80] sm:$0xff]   ;;  %v5703_v26 = vld [vmem:[%s5868_s24 + $0x88] sm:$0xff]  }
  0x1b   : > { %v5704_v27 = vld [vmem:[%s5868_s24 + $0x90] sm:$0xff]   ;;  %v5705_v28 = vld [vmem:[%s5868_s24 + $0x98] sm:$0xff]   ;;  %v5706_v29 = vld [vmem:[%s5868_s24 + $0xa0] sm:$0xff]  }
  0x1c   : > { %v5707_v30 = vld [vmem:[%s5868_s24 + $0xa8] sm:$0xff]   ;;  %v5708_v31 = vld [vmem:[%s5868_s24 + $0xb0] sm:$0xff]   ;;  %v5709_v32 = vld [vmem:[%s5868_s24 + $0xb8] sm:$0xff]  }
  0x1d   : > { %v5710_v33 = vld [vmem:[%s5868_s24 + $0xc0] sm:$0xff]   ;;  %v5711_v34 = vld [vmem:[%s5868_s24 + $0xc8] sm:$0xff]   ;;  %v5712_v35 = vld [vmem:[%s5868_s24 + $0xd0] sm:$0xff]  }
  0x1e   : > { %v5713_v36 = vld [vmem:[%s5868_s24 + $0xd8] sm:$0xff]   ;;  %v5714_v37 = vld [vmem:[%s5868_s24 + $0xe0] sm:$0xff]   ;;  %v5715_v38 = vld [vmem:[%s5868_s24 + $0xe8] sm:$0xff]  }
  0x1f   : > { %5033 = vmatmul.mubr.msk.bf16.gmra.mrb[4].mxu1 %vm637_vm2, %v5691_v14  ;;  %5163 = vmatmul.mubr.msk.bf16.gmra.mrb[4].mxu0 %vm637_vm2, %v5688_v11  ;;  %v5716_v39 = vld [vmem:[%s5868_s24 + $0xf0] sm:$0xff]   ;;  %v5717_v40 = vld [vmem:[%s5868_s24 + $0xf8] sm:$0xff]   ;;  %v5961_v41 = vld [vmem:[%s5868_s24 + $0x100] sm:$0xff]  }
  0x20   : > { %5036 = vmatprep.mubr.msk.bf16.mxu1 %vm637_vm2, %v5692_v15  ;;  %5166 = vmatprep.mubr.msk.bf16.mxu0 %vm637_vm2, %v5690_v13  ;;  %v5969_v42 = vld [vmem:[%s5868_s24 + $0x108] sm:$0xff]   ;;  %v5972_v43 = vld [vmem:[%s5868_s24 + $0x110] sm:$0xff]   ;;  %v5721_v44 = vld [vmem:[%s5868_s24 + $0x20] sm:$0xff]  }
  0x21   : > { %v5982_v45 = vld [vmem:[%s5868_s24 + $0x118] sm:$0xff]   ;;  %v5723_v46 = vld [vmem:[%s5868_s24 + $0x28] sm:$0xff]   ;;  %v5986_v47 = vld [vmem:[%s5868_s24 + $0x120] sm:$0xff]  }
  0x22   : > { %v5725_v48 = vld [vmem:[%s5868_s24 + $0x30] sm:$0xff]   ;;  %v5996_v49 = vld [vmem:[%s5868_s24 + $0x128] sm:$0xff]   ;;  %v5727_v50 = vld [vmem:[%s5868_s24 + $0x38] sm:$0xff]  }
  0x23   : > { %v6000_v51 = vld [vmem:[%s5868_s24 + $0x130] sm:$0xff]   ;;  %v5729_v52 = vld [vmem:[%s5868_s24 + $0x40] sm:$0xff]   ;;  %v6010_v53 = vld [vmem:[%s5868_s24 + $0x138] sm:$0xff]  }
  0x24   : > { %v5731_v54 = vld [vmem:[%s5868_s24 + $0x48] sm:$0xff]   ;;  %v6014_v55 = vld [vmem:[%s5868_s24 + $0x140] sm:$0xff]   ;;  %v5733_v56 = vld [vmem:[%s5868_s24 + $0x50] sm:$0xff]  }
  0x25   : > { %v6024_v57 = vld [vmem:[%s5868_s24 + $0x148] sm:$0xff]   ;;  %v5735_v58 = vld [vmem:[%s5868_s24 + $0x58] sm:$0xff]   ;;  %v6028_v59 = vld [vmem:[%s5868_s24 + $0x150] sm:$0xff]  }
  0x26   : > { %v5737_v60 = vld [vmem:[%s5868_s24 + $0x60] sm:$0xff]   ;;  %v6038_v61 = vld [vmem:[%s5868_s24 + $0x158] sm:$0xff]   ;;  %v5739_v62 = vld [vmem:[%s5868_s24 + $0x68] sm:$0xff]  }
  0x27   : > { %5037 = vmatmul.mubr.msk.bf16.gmra.mrb[8].mxu1 %vm637_vm2, %v5693_v16  ;;  %5167 = vmatmul.mubr.msk.bf16.gmra.mrb[8].mxu0 %vm637_vm2, %v5691_v14  ;;  %v6042_v63 = vld [vmem:[%s5868_s24 + $0x160] sm:$0xff]   ;;  %v5741_v0 = vld [vmem:[%s5868_s24 + $0x70] sm:$0xff]   ;;  %v6052_v1 = vld [vmem:[%s5868_s24 + $0x168] sm:$0xff]  }
  0x28   : > { %5040 = vmatprep.mubr.msk.bf16.mxu1 %vm637_vm2, %v5694_v17  ;;  %5170 = vmatprep.mubr.msk.bf16.mxu0 %vm637_vm2, %v5692_v15  ;;  %v5743_v2 = vld [vmem:[%s5868_s24 + $0x78] sm:$0xff]   ;;  %v6056_v3 = vld [vmem:[%s5868_s24 + $0x170] sm:$0xff]   ;;  %v5745_v4 = vld [vmem:[%s5868_s24 + $0x80] sm:$0xff]  }
  0x29   : > { %v6066_v5 = vld [vmem:[%s5868_s24 + $0x178] sm:$0xff]   ;;  %v5747_v6 = vld [vmem:[%s5868_s24 + $0x88] sm:$0xff]   ;;  %v6070_v7 = vld [vmem:[%s5868_s24 + $0x180] sm:$0xff]  }
  0x2a   : > { %v5749_v8 = vld [vmem:[%s5868_s24 + $0x90] sm:$0xff]   ;;  %v6080_v9 = vld [vmem:[%s5868_s24 + $0x188] sm:$0xff]   ;;  %v5751_v10 = vld [vmem:[%s5868_s24 + $0x98] sm:$0xff]  }
  0x2b   : > { %v6084_v11 = vld [vmem:[%s5868_s24 + $0x190] sm:$0xff]   ;;  %v5753_v12 = vld [vmem:[%s5868_s24 + $0xa0] sm:$0xff]   ;;  %v6094_v13 = vld [vmem:[%s5868_s24 + $0x198] sm:$0xff]  }
  0x2c   : > { %v5755_v14 = vld [vmem:[%s5868_s24 + $0xa8] sm:$0xff]   ;;  %v6098_v15 = vld [vmem:[%s5868_s24 + $0x1a0] sm:$0xff]  }
  0x2f   : > { %5041 = vmatmul.mubr.msk.bf16.gmra.mrb[12].mxu1 %vm637_vm2, %v5695_v18  ;;  %5171 = vmatmul.mubr.msk.bf16.gmra.mrb[12].mxu0 %vm637_vm2, %v5693_v16  ;;  %v5757_v16 = vld [vmem:[%s5868_s24 + $0xb0] sm:$0xff]  }
  0x30   : > { %5044 = vmatprep.mubr.msk.bf16.mxu1 %vm637_vm2, %v5696_v19  ;;  %5174 = vmatprep.mubr.msk.bf16.mxu0 %vm637_vm2, %v5694_v17  ;;  %v6108_v17 = vld [vmem:[%s5868_s24 + $0x1a8] sm:$0xff]  }
  0x37   : > { %5045 = vmatmul.mubr.msk.bf16.gmra.mrb[16].mxu1 %vm637_vm2, %v5697_v20  ;;  %5175 = vmatmul.mubr.msk.bf16.gmra.mrb[16].mxu0 %vm637_vm2, %v5695_v18  ;;  %v5759_v18 = vld [vmem:[%s5868_s24 + $0xb8] sm:$0xff]  }
  0x38   : > { %5048 = vmatprep.mubr.msk.bf16.mxu1 %vm637_vm2, %v5698_v21  ;;  %5178 = vmatprep.mubr.msk.bf16.mxu0 %vm637_vm2, %v5696_v19  ;;  %v6112_v19 = vld [vmem:[%s5868_s24 + $0x1b0] sm:$0xff]  }
  0x3f   : > { %5049 = vmatmul.mubr.msk.bf16.gmra.mrb[20].mxu1 %vm637_vm2, %v5699_v22  ;;  %5179 = vmatmul.mubr.msk.bf16.gmra.mrb[20].mxu0 %vm637_vm2, %v5697_v20  ;;  %v5761_v20 = vld [vmem:[%s5868_s24 + $0xc0] sm:$0xff]  }
  0x40   : > { %5052 = vmatprep.mubr.msk.bf16.mxu1 %vm637_vm2, %v5700_v23  ;;  %5182 = vmatprep.mubr.msk.bf16.mxu0 %vm637_vm2, %v5698_v21  ;;  %v6122_v21 = vld [vmem:[%s5868_s24 + $0x1b8] sm:$0xff]  }
  0x47   : > { %5053 = vmatmul.mubr.msk.bf16.gmra.mrb[24].mxu1 %vm637_vm2, %v5701_v24  ;;  %5183 = vmatmul.mubr.msk.bf16.gmra.mrb[24].mxu0 %vm637_vm2, %v5699_v22  ;;  %v5763_v22 = vld [vmem:[%s5868_s24 + $0xc8] sm:$0xff]  }
  0x48   : > { %5056 = vmatprep.mubr.msk.bf16.mxu1 %vm637_vm2, %v5702_v25  ;;  %5186 = vmatprep.mubr.msk.bf16.mxu0 %vm637_vm2, %v5700_v23  ;;  %v6126_v23 = vld [vmem:[%s5868_s24 + $0x1c0] sm:$0xff]  }
  0x4f   : > { %5057 = vmatmul.mubr.msk.bf16.gmra.mrb[28].mxu1 %vm637_vm2, %v5703_v26  ;;  %5187 = vmatmul.mubr.msk.bf16.gmra.mrb[28].mxu0 %vm637_vm2, %v5701_v24  ;;  %v5765_v24 = vld [vmem:[%s5868_s24 + $0xd0] sm:$0xff]  }
  0x50   : > { %5060 = vmatprep.mubr.msk.bf16.mxu1 %vm637_vm2, %v5704_v27  ;;  %5190 = vmatprep.mubr.msk.bf16.mxu0 %vm637_vm2, %v5702_v25 }
  0x57   : > { %5061 = vmatmul.mubr.msk.bf16.gmra.mrb[32].mxu1 %vm637_vm2, %v5705_v28  ;;  %5191 = vmatmul.mubr.msk.bf16.gmra.mrb[32].mxu0 %vm637_vm2, %v5703_v26 }
  0x58   : > { %5064 = vmatprep.mubr.msk.bf16.mxu1 %vm637_vm2, %v5706_v29  ;;  %5194 = vmatprep.mubr.msk.bf16.mxu0 %vm637_vm2, %v5704_v27  ;;  %v6140_v27 = vld [vmem:[%s5868_s24 + $0x1c8] sm:$0xff]  }
  0x5f   : > { %5065 = vmatmul.mubr.msk.bf16.gmra.mrb[36].mxu1 %vm637_vm2, %v5707_v30  ;;  %5195 = vmatmul.mubr.msk.bf16.gmra.mrb[36].mxu0 %vm637_vm2, %v5705_v28 }
  0x60   : > { %5068 = vmatprep.mubr.msk.bf16.mxu1 %vm637_vm2, %v5708_v31  ;;  %5198 = vmatprep.mubr.msk.bf16.mxu0 %vm637_vm2, %v5706_v29  ;;  %v5767_v29 = vld [vmem:[%s5868_s24 + $0xd8] sm:$0xff]  }
  0x67   : > { %5069 = vmatmul.mubr.msk.bf16.gmra.mrb[40].mxu1 %vm637_vm2, %v5709_v32  ;;  %5199 = vmatmul.mubr.msk.bf16.gmra.mrb[40].mxu0 %vm637_vm2, %v5707_v30  ;;  %v6146_v30 = vld [vmem:[%s5868_s24 + $0x1d0] sm:$0xff]  }
  0x68   : > { %5072 = vmatprep.mubr.msk.bf16.mxu1 %vm637_vm2, %v5710_v33  ;;  %5202 = vmatprep.mubr.msk.bf16.mxu0 %vm637_vm2, %v5708_v31 }
  0x6f   : > { %5073 = vmatmul.mubr.msk.bf16.gmra.mrb[44].mxu1 %vm637_vm2, %v5711_v34  ;;  %5203 = vmatmul.mubr.msk.bf16.gmra.mrb[44].mxu0 %vm637_vm2, %v5709_v32  ;;  %v5769_v32 = vld [vmem:[%s5868_s24 + $0xe0] sm:$0xff]  }
  0x70   : > { %5076 = vmatprep.mubr.msk.bf16.mxu1 %vm637_vm2, %v5712_v35  ;;  %5206 = vmatprep.mubr.msk.bf16.mxu0 %vm637_vm2, %v5710_v33 }
  0x77   : > { %5077 = vmatmul.mubr.msk.bf16.gmra.mrb[48].mxu1 %vm637_vm2, %v5713_v36  ;;  %5207 = vmatmul.mubr.msk.bf16.gmra.mrb[48].mxu0 %vm637_vm2, %v5711_v34 }
  0x78   : > { %5080 = vmatprep.mubr.msk.bf16.mxu1 %vm637_vm2, %v5714_v37  ;;  %5210 = vmatprep.mubr.msk.bf16.mxu0 %vm637_vm2, %v5712_v35  ;;  %v6162_v35 = vld [vmem:[%s5868_s24 + $0x1d8] sm:$0xff]  }
  0x7f   : > { %5081 = vmatmul.mubr.msk.bf16.gmra.mrb[52].mxu1 %vm637_vm2, %v5715_v38  ;;  %5211 = vmatmul.mubr.msk.bf16.gmra.mrb[52].mxu0 %vm637_vm2, %v5713_v36 }
  0x80   : > { %5084 = vmatprep.mubr.msk.bf16.mxu1 %vm637_vm2, %v5716_v39  ;;  %5214 = vmatprep.mubr.msk.bf16.mxu0 %vm637_vm2, %v5714_v37  ;;  %v5771_v37 = vld [vmem:[%s5868_s24 + $0xe8] sm:$0xff]  }
  0x87   : > { %5085 = vmatmul.mubr.msk.bf16.gmra.mrb[56].mxu1 %vm637_vm2, %v5717_v40  ;;  %5215 = vmatmul.mubr.msk.bf16.gmra.mrb[56].mxu0 %vm637_vm2, %v5715_v38  ;;  %v6168_v38 = vld [vmem:[%s5868_s24 + $0x1e0] sm:$0xff]  }
  0x88   : > { %5088 = vmatprep.mubr.msk.bf16.mxu1 %vm637_vm2, %v5961_v41  ;;  %5218 = vmatprep.mubr.msk.bf16.mxu0 %vm637_vm2, %v5716_v39 }
  0x8f   : > { %5089 = vmatmul.mubr.msk.bf16.gmra.mrb[60].mxu1 %vm637_vm2, %v5969_v42  ;;  %5219 = vmatmul.mubr.msk.bf16.gmra.mrb[60].mxu0 %vm637_vm2, %v5717_v40  ;;  %v5773_v40 = vld [vmem:[%s5868_s24 + $0xf0] sm:$0xff]  }
  0x90   : > { %5092 = vmatprep.mubr.msk.bf16.mxu1 %vm637_vm2, %v5972_v43  ;;  %5288 = vmatprep.mubr.msk.bf16.mxu0 %vm637_vm2, %v5721_v44 }
  0x97   : > { %5093 = vmatmul.mubr.msk.bf16.gmra.mrb[64].mxu1 %vm637_vm2, %v5982_v45  ;;  %5289 = vmatmul.mubr.msk.bf16.vlgmr.msra.gmra.mrb[0].mxu0 %vm637_vm2, %v5723_v46 }
  0x98   : > { %5096 = vmatprep.mubr.msk.bf16.mxu1 %vm637_vm2, %v5986_v47  ;;  %5292 = vmatprep.mubr.msk.bf16.mxu0 %vm637_vm2, %v5725_v48  ;;  %v6184_v48 = vld [vmem:[%s5868_s24 + $0x1e8] sm:$0xff]  }
  0x9f   : > { %5097 = vmatmul.mubr.msk.bf16.gmra.mrb[68].mxu1 %vm637_vm2, %v5996_v49  ;;  %5293 = vmatmul.mubr.msk.bf16.gmra.mrb[4].mxu0 %vm637_vm2, %v5727_v50 }
  0xa0   : > { %5100 = vmatprep.mubr.msk.bf16.mxu1 %vm637_vm2, %v6000_v51  ;;  %5296 = vmatprep.mubr.msk.bf16.mxu0 %vm637_vm2, %v5729_v52  ;;  %v5775_v52 = vld [vmem:[%s5868_s24 + $0xf8] sm:$0xff]  }
  0xa7   : > { %5101 = vmatmul.mubr.msk.bf16.gmra.mrb[72].mxu1 %vm637_vm2, %v6010_v53  ;;  %5297 = vmatmul.mubr.msk.bf16.gmra.mrb[8].mxu0 %vm637_vm2, %v5731_v54  ;;  %v6190_v54 = vld [vmem:[%s5868_s24 + $0x1f0] sm:$0xff]  }
  0xa8   : > { %5104 = vmatprep.mubr.msk.bf16.mxu1 %vm637_vm2, %v6014_v55  ;;  %5300 = vmatprep.mubr.msk.bf16.mxu0 %vm637_vm2, %v5733_v56 }
  0xaf   : > { %5105 = vmatmul.mubr.msk.bf16.gmra.mrb[76].mxu1 %vm637_vm2, %v6024_v57  ;;  %5301 = vmatmul.mubr.msk.bf16.gmra.mrb[12].mxu0 %vm637_vm2, %v5735_v58  ;;  %v5777_v58 = vld [vmem:[%s5868_s24 + $0x100] sm:$0xff]  }
  0xb0   : > { %5108 = vmatprep.mubr.msk.bf16.mxu1 %vm637_vm2, %v6028_v59  ;;  %5304 = vmatprep.mubr.msk.bf16.mxu0 %vm637_vm2, %v5737_v60 }
  0xb7   : > { %5109 = vmatmul.mubr.msk.bf16.gmra.mrb[80].mxu1 %vm637_vm2, %v6038_v61  ;;  %5305 = vmatmul.mubr.msk.bf16.gmra.mrb[16].mxu0 %vm637_vm2, %v5739_v62 }
  0xb8   : > { %5112 = vmatprep.mubr.msk.bf16.mxu1 %vm637_vm2, %v6042_v63  ;;  %5308 = vmatprep.mubr.msk.bf16.mxu0 %vm637_vm2, %v5741_v0  ;;  %v6206_v0 = vld [vmem:[%s5868_s24 + $0x1f8] sm:$0xff]  }
  0xbf   : > { %5113 = vmatmul.mubr.msk.bf16.gmra.mrb[84].mxu1 %vm637_vm2, %v6052_v1  ;;  %5309 = vmatmul.mubr.msk.bf16.gmra.mrb[20].mxu0 %vm637_vm2, %v5743_v2 }
  0xc0   : > { %5116 = vmatprep.mubr.msk.bf16.mxu1 %vm637_vm2, %v6056_v3  ;;  %5312 = vmatprep.mubr.msk.bf16.mxu0 %vm637_vm2, %v5745_v4  ;;  %v5779_v4 = vld [vmem:[%s5868_s24 + $0x108] sm:$0xff]  }
  0xc7   : > { %5117 = vmatmul.mubr.msk.bf16.gmra.mrb[88].mxu1 %vm637_vm2, %v6066_v5  ;;  %5313 = vmatmul.mubr.msk.bf16.gmra.mrb[24].mxu0 %vm637_vm2, %v5747_v6  ;;  %v5780_v6 = vld [vmem:[%s5868_s24 + $0x200] sm:$0xff]  }
  0xc8   : > { %5120 = vmatprep.mubr.msk.bf16.mxu1 %vm637_vm2, %v6070_v7  ;;  %5316 = vmatprep.mubr.msk.bf16.mxu0 %vm637_vm2, %v5749_v8 }
  0xcf   : > { %5121 = vmatmul.mubr.msk.bf16.gmra.mrb[92].mxu1 %vm637_vm2, %v6080_v9  ;;  %5317 = vmatmul.mubr.msk.bf16.gmra.mrb[28].mxu0 %vm637_vm2, %v5751_v10  ;;  %v5781_v10 = vld [vmem:[%s5868_s24 + $0x110] sm:$0xff]  }
  0xd0   : > { %5124 = vmatprep.mubr.msk.bf16.mxu1 %vm637_vm2, %v6084_v11  ;;  %5320 = vmatprep.mubr.msk.bf16.mxu0 %vm637_vm2, %v5753_v12 }
  0xd7   : > { %5125 = vmatmul.mubr.msk.bf16.gmra.mrb[96].mxu1 %vm637_vm2, %v6094_v13  ;;  %5321 = vmatmul.mubr.msk.bf16.gmra.mrb[32].mxu0 %vm637_vm2, %v5755_v14 }
  0xd8   : > { %5128 = vmatprep.mubr.msk.bf16.mxu1 %vm637_vm2, %v6098_v15  ;;  %5324 = vmatprep.mubr.msk.bf16.mxu0 %vm637_vm2, %v5757_v16  ;;  %v5782_v16 = vld [vmem:[%s5868_s24 + $0x208] sm:$0xff]  }
  0xdf   : > { %5129 = vmatmul.mubr.msk.bf16.gmra.mrb[100].mxu1 %vm637_vm2, %v6108_v17  ;;  %5325 = vmatmul.mubr.msk.bf16.gmra.mrb[36].mxu0 %vm637_vm2, %v5759_v18 }
  0xe0   : > { %5132 = vmatprep.mubr.msk.bf16.mxu1 %vm637_vm2, %v6112_v19  ;;  %5328 = vmatprep.mubr.msk.bf16.mxu0 %vm637_vm2, %v5761_v20  ;;  %v5783_v20 = vld [vmem:[%s5868_s24 + $0x118] sm:$0xff]  }
  0xe7   : > { %5133 = vmatmul.mubr.msk.bf16.gmra.mrb[104].mxu1 %vm637_vm2, %v6122_v21  ;;  %5329 = vmatmul.mubr.msk.bf16.gmra.mrb[40].mxu0 %vm637_vm2, %v5763_v22 }
  0xe8   : > { %5136 = vmatprep.mubr.msk.bf16.mxu1 %vm637_vm2, %v6126_v23  ;;  %5332 = vmatprep.mubr.msk.bf16.mxu0 %vm637_vm2, %v5765_v24  ;;  %v5784_v24 = vld [vmem:[%s5868_s24 + $0x120] sm:$0xff]  }
  0xea   : > { %v6135_v25 = vpop.f32.mrb[0].mxu1 }
  0xeb   : > { %v6137_v26 = vpop.f32.mrb[1].mxu1 }
  0xec   : > { %v6142_v28 = vpop.f32.mrb[2].mxu1 }
  0xed   : > { %v6148_v31 = vpop.f32.mrb[3].mxu1 }
  0xef   : > { %5137 = vmatmul.mubr.msk.bf16.gmra.mrb[108].mxu1 %vm637_vm2, %v6140_v27  ;;  %5333 = vmatmul.mubr.msk.bf16.gmra.mrb[44].mxu0 %vm637_vm2, %v5767_v29 }
  0xf0   : > { %5140 = vmatprep.mubr.msk.bf16.mxu1 %vm637_vm2, %v6146_v30  ;;  %5336 = vmatprep.mubr.msk.bf16.mxu0 %vm637_vm2, %v5769_v32 }
  0xf2   : > { %v6157_v33 = vpop.f32.mrb[4].mxu1 }
  0xf3   : > { %v6159_v34 = vpop.f32.mrb[5].mxu1 }
  0xf4   : > { %v6164_v36 = vpop.f32.mrb[6].mxu1 }
  0xf5   : > { %v6170_v39 = vpop.f32.mrb[7].mxu1 }
  0xf7   : > { %5141 = vmatmul.mubr.msk.bf16.gmra.mrb[112].mxu1 %vm637_vm2, %v6162_v35  ;;  %5337 = vmatmul.mubr.msk.bf16.gmra.mrb[48].mxu0 %vm637_vm2, %v5771_v37 }
  0xf8   : > { %5144 = vmatprep.mubr.msk.bf16.mxu1 %vm637_vm2, %v6168_v38  ;;  %5340 = vmatprep.mubr.msk.bf16.mxu0 %vm637_vm2, %v5773_v40  ;;  %v5785_v40 = vld [vmem:[%s5868_s24 + $0x128] sm:$0xff]  }
  0xfa   : > { %v6179_v44 = vpop.f32.mrb[8].mxu1 }
  0xfb   : > { %v6181_v46 = vpop.f32.mrb[9].mxu1 }
  0xfc   : > { %v6186_v50 = vpop.f32.mrb[10].mxu1 }
  0xfd   : > { %v6192_v56 = vpop.f32.mrb[11].mxu1 }
  0xff   : > { %5145 = vmatmul.mubr.msk.bf16.gmra.mrb[116].mxu1 %vm637_vm2, %v6184_v48  ;;  %5341 = vmatmul.mubr.msk.bf16.gmra.mrb[52].mxu0 %vm637_vm2, %v5775_v52 }
 0x100   : > { %5148 = vmatprep.mubr.msk.bf16.mxu1 %vm637_vm2, %v6190_v54  ;;  %5344 = vmatprep.mubr.msk.bf16.mxu0 %vm637_vm2, %v5777_v58  ;;  %v5786_v58 = vld [vmem:[%s5868_s24 + $0x130] sm:$0xff]  }
 0x102   : > { %v6201_v60 = vpop.f32.mrb[12].mxu1 }
 0x103   : > { %v6203_v62 = vpop.f32.mrb[13].mxu1 }
 0x104   : > { %v6208_v2 = vpop.f32.mrb[14].mxu1 }
 0x105   : > { %v6212_v8 = vpop.f32.mrb[15].mxu1 }
 0x107   : > { %5149 = vmatmul.mubr.msk.bf16.gmra.mrb[120].mxu1 %vm637_vm2, %v6206_v0  ;;  %5345 = vmatmul.mubr.msk.bf16.gmra.mrb[56].mxu0 %vm637_vm2, %v5779_v4 }
 0x108   : > { %5152 = vmatprep.mubr.msk.bf16.mxu1 %vm637_vm2, %v5780_v6  ;;  %5348 = vmatprep.mubr.msk.bf16.mxu0 %vm637_vm2, %v5781_v10  ;;  %v5787_v10 = vld [vmem:[%s5868_s24 + $0x138] sm:$0xff]  }
 0x10a   : > { %v6220_v12 = vpop.f32.mrb[16].mxu1 }
 0x10b   : > { %v6222_v14 = vpop.f32.mrb[17].mxu1 }
 0x10c   : > { %v6225_v18 = vpop.f32.mrb[18].mxu1 }
 0x10d   : > { %v6228_v22 = vpop.f32.mrb[19].mxu1 }
 0x10f   : > { %5153 = vmatmul.mubr.msk.bf16.gmra.mrb[124].mxu1 %vm637_vm2, %v5782_v16  ;;  %5349 = vmatmul.mubr.msk.bf16.gmra.mrb[60].mxu0 %vm637_vm2, %v5783_v20  ;;  %v5788_v20 = vld [vmem:[%s5868_s24 + $0x140] sm:$0xff]  }
 0x110   : > { %5222 = vmatprep.mubr.msk.bf16.mxu1 %vm637_vm2, %v5961_v41  ;;  %5352 = vmatprep.mubr.msk.bf16.mxu0 %vm637_vm2, %v5784_v24 }
 0x112   : > { %v6236_v29 = vpop.f32.mrb[20].mxu1 }
 0x113   : > { %v6238_v32 = vpop.f32.mrb[21].mxu1 }
 0x114   : > { %v6240_v37 = vpop.f32.mrb[22].mxu1 }
 0x115   : > { %v6243_v52 = vpop.f32.mrb[23].mxu1 }
 0x117   : > { %5223 = vmatmul.mubr.msk.bf16.vlgmr.msra.gmra.mrb[64].mxu1 %vm637_vm2, %v5969_v42  ;;  %5353 = vmatmul.mubr.msk.bf16.gmra.mrb[64].mxu0 %vm637_vm2, %v5785_v40  ;;  %v5789_v40 = vld [vmem:[%s5868_s24 + $0x148] sm:$0xff]  }
 0x118   : > { %5226 = vmatprep.mubr.msk.bf16.mxu1 %vm637_vm2, %v5972_v43  ;;  %5356 = vmatprep.mubr.msk.bf16.mxu0 %vm637_vm2, %v5786_v58 }
 0x11a   : > { %v6252_v41 = vpop.f32.mrb[24].mxu1 }
 0x11b   : > { %v6254_v4 = vpop.f32.mrb[25].mxu1 }
 0x11c   : > { %v6256_v6 = vpop.f32.mrb[26].mxu1 }
 0x11d   : > { %v6259_v16 = vpop.f32.mrb[27].mxu1 }
 0x11e   : > { %6920 = vst [vmem:[#allocation2_spill] sm:$0xff] %v6259_v16  ;;  %v5790_v16 = vld [vmem:[%s5868_s24 + $0x150] sm:$0xff]  }
 0x11f   : > { %5227 = vmatmul.mubr.msk.bf16.gmra.mrb[68].mxu1 %vm637_vm2, %v5982_v45  ;;  %5357 = vmatmul.mubr.msk.bf16.gmra.mrb[68].mxu0 %vm637_vm2, %v5787_v10 }
 0x120   : > { %5230 = vmatprep.mubr.msk.bf16.mxu1 %vm637_vm2, %v5986_v47  ;;  %5360 = vmatprep.mubr.msk.bf16.mxu0 %vm637_vm2, %v5788_v20  ;;  %v5791_v20 = vld [vmem:[%s5868_s24 + $0x158] sm:$0xff]  }
 0x122   : > { %v6268_v42 = vpop.f32.mrb[28].mxu1 }
 0x123   : > { %v6270_v43 = vpop.f32.mrb[29].mxu1 }
 0x124   : > { %v6272_v24 = vpop.f32.mrb[30].mxu1 }
 0x125   : > { %6921 = vst [vmem:[#allocation3_spill] sm:$0xff] %v6272_v24  ;;  %v6275_v58 = vpop.f32.mrb[31].mxu1  ;;  %v5792_v24 = vld [vmem:[%s5868_s24 + $0x160] sm:$0xff]  }
 0x126   : > { %6922 = vst [vmem:[#allocation4_spill] sm:$0xff] %v6275_v58 }
 0x127   : > { %5231 = vmatmul.mubr.msk.bf16.gmra.mrb[72].mxu1 %vm637_vm2, %v5996_v49  ;;  %5361 = vmatmul.mubr.msk.bf16.gmra.mrb[72].mxu0 %vm637_vm2, %v5789_v40  ;;  %v5793_v40 = vld [vmem:[%s5868_s24 + $0x168] sm:$0xff]  }
 0x128   : > { %5234 = vmatprep.mubr.msk.bf16.mxu1 %vm637_vm2, %v6000_v51  ;;  %5364 = vmatprep.mubr.msk.bf16.mxu0 %vm637_vm2, %v5790_v16 }
 0x12a   : > { %v6284_v45 = vpop.f32.mrb[32].mxu1 }
 0x12b   : > { %v6286_v47 = vpop.f32.mrb[33].mxu1 }
 0x12c   : > { %v6288_v10 = vpop.f32.mrb[34].mxu1 }
 0x12d   : > { %6923 = vst [vmem:[#allocation5_spill] sm:$0xff] %v6288_v10  ;;  %v6291_v58 = vpop.f32.mrb[35].mxu1  ;;  %v5794_v10 = vld [vmem:[%s5868_s24 + $0x170] sm:$0xff]  }
 0x12e   : > { %6924 = vst [vmem:[#allocation6_spill] sm:$0xff] %v6291_v58 }
 0x12f   : > { %5235 = vmatmul.mubr.msk.bf16.gmra.mrb[76].mxu1 %vm637_vm2, %v6010_v53  ;;  %5365 = vmatmul.mubr.msk.bf16.gmra.mrb[76].mxu0 %vm637_vm2, %v5791_v20  ;;  %v5795_v20 = vld [vmem:[%s5868_s24 + $0x178] sm:$0xff]  }
 0x130   : > { %5238 = vmatprep.mubr.msk.bf16.mxu1 %vm637_vm2, %v6014_v55  ;;  %5368 = vmatprep.mubr.msk.bf16.mxu0 %vm637_vm2, %v5792_v24 }
 0x132   : > { %v6300_v49 = vpop.f32.mrb[36].mxu1 }
 0x133   : > { %v6302_v51 = vpop.f32.mrb[37].mxu1 }
 0x134   : > { %v6304_v16 = vpop.f32.mrb[38].mxu1 }
 0x135   : > { %6925 = vst [vmem:[#allocation7_spill] sm:$0xff] %v6304_v16  ;;  %v6307_v58 = vpop.f32.mrb[39].mxu1  ;;  %v5796_v16 = vld [vmem:[%s5868_s24 + $0x180] sm:$0xff]  }
 0x136   : > { %6926 = vst [vmem:[#allocation8_spill] sm:$0xff] %v6307_v58 }
 0x137   : > { %5239 = vmatmul.mubr.msk.bf16.gmra.mrb[80].mxu1 %vm637_vm2, %v6024_v57  ;;  %5369 = vmatmul.mubr.msk.bf16.gmra.mrb[80].mxu0 %vm637_vm2, %v5793_v40  ;;  %v5797_v40 = vld [vmem:[%s5868_s24 + $0x188] sm:$0xff]  }
 0x138   : > { %5242 = vmatprep.mubr.msk.bf16.mxu1 %vm637_vm2, %v6028_v59  ;;  %5372 = vmatprep.mubr.msk.bf16.mxu0 %vm637_vm2, %v5794_v10 }
 0x13a   : > { %v6316_v53 = vpop.f32.mrb[40].mxu1 }
 0x13b   : > { %v6318_v55 = vpop.f32.mrb[41].mxu1 }
 0x13c   : > { %v6320_v24 = vpop.f32.mrb[42].mxu1 }
 0x13d   : > { %6927 = vst [vmem:[#allocation9_spill] sm:$0xff] %v6320_v24  ;;  %v6323_v58 = vpop.f32.mrb[43].mxu1  ;;  %v5798_v24 = vld [vmem:[%s5868_s24 + $0x190] sm:$0xff]  }
 0x13e   : > { %6928 = vst [vmem:[#allocation10_spill] sm:$0xff] %v6323_v58 }
 0x13f   : > { %5243 = vmatmul.mubr.msk.bf16.gmra.mrb[84].mxu1 %vm637_vm2, %v6038_v61  ;;  %5373 = vmatmul.mubr.msk.bf16.gmra.mrb[84].mxu0 %vm637_vm2, %v5795_v20  ;;  %v5799_v20 = vld [vmem:[%s5868_s24 + $0x198] sm:$0xff]  }
 0x140   : > { %5246 = vmatprep.mubr.msk.bf16.mxu1 %vm637_vm2, %v6042_v63  ;;  %5376 = vmatprep.mubr.msk.bf16.mxu0 %vm637_vm2, %v5796_v16 }
 0x142   : > { %v6332_v57 = vpop.f32.mrb[44].mxu1 }
 0x143   : > { %v6334_v59 = vpop.f32.mrb[45].mxu1 }
 0x144   : > { %v6336_v10 = vpop.f32.mrb[46].mxu1 }
 0x145   : > { %6929 = vst [vmem:[#allocation11_spill] sm:$0xff] %v6336_v10  ;;  %v6339_v58 = vpop.f32.mrb[47].mxu1  ;;  %v5800_v10 = vld [vmem:[%s5868_s24 + $0x1a0] sm:$0xff]  }
 0x146   : > { %6930 = vst [vmem:[#allocation12_spill] sm:$0xff] %v6339_v58 }
 0x147   : > { %5247 = vmatmul.mubr.msk.bf16.gmra.mrb[88].mxu1 %vm637_vm2, %v6052_v1  ;;  %5377 = vmatmul.mubr.msk.bf16.gmra.mrb[88].mxu0 %vm637_vm2, %v5797_v40  ;;  %v5801_v40 = vld [vmem:[%s5868_s24 + $0x1a8] sm:$0xff]  }
 0x148   : > { %5250 = vmatprep.mubr.msk.bf16.mxu1 %vm637_vm2, %v6056_v3  ;;  %5380 = vmatprep.mubr.msk.bf16.mxu0 %vm637_vm2, %v5798_v24 }
 0x14a   : > { %v6348_v61 = vpop.f32.mrb[48].mxu1 }
 0x14b   : > { %v6350_v63 = vpop.f32.mrb[49].mxu1 }
 0x14c   : > { %v6352_v16 = vpop.f32.mrb[50].mxu1 }
 0x14d   : > { %6931 = vst [vmem:[#allocation13_spill] sm:$0xff] %v6352_v16  ;;  %v6355_v58 = vpop.f32.mrb[51].mxu1  ;;  %v5802_v16 = vld [vmem:[%s5868_s24 + $0x1b0] sm:$0xff]  }
 0x14e   : > { %6932 = vst [vmem:[#allocation14_spill] sm:$0xff] %v6355_v58 }
 0x14f   : > { %5251 = vmatmul.mubr.msk.bf16.gmra.mrb[92].mxu1 %vm637_vm2, %v6066_v5  ;;  %5381 = vmatmul.mubr.msk.bf16.gmra.mrb[92].mxu0 %vm637_vm2, %v5799_v20  ;;  %v5803_v20 = vld [vmem:[%s5868_s24 + $0x1b8] sm:$0xff]  }
 0x150   : > { %5254 = vmatprep.mubr.msk.bf16.mxu1 %vm637_vm2, %v6070_v7  ;;  %5384 = vmatprep.mubr.msk.bf16.mxu0 %vm637_vm2, %v5800_v10 }
 0x152   : > { %v6364_v1 = vpop.f32.mrb[52].mxu1 }
 0x153   : > { %v6366_v3 = vpop.f32.mrb[53].mxu1 }
 0x154   : > { %v6368_v24 = vpop.f32.mrb[54].mxu1 }
 0x155   : > { %v6371_v58 = vpop.f32.mrb[55].mxu1 }
 0x156   : > { %6933 = vst [vmem:[#allocation15_spill] sm:$0xff] %v6371_v58 }
 0x157   : > { %5255 = vmatmul.mubr.msk.bf16.gmra.mrb[96].mxu1 %vm637_vm2, %v6080_v9  ;;  %5385 = vmatmul.mubr.msk.bf16.gmra.mrb[96].mxu0 %vm637_vm2, %v5801_v40  ;;  %v5804_v9 = vld [vmem:[%s5868_s24 + $0x1c0] sm:$0xff]  }
 0x158   : > { %5258 = vmatprep.mubr.msk.bf16.mxu1 %vm637_vm2, %v6084_v11  ;;  %5388 = vmatprep.mubr.msk.bf16.mxu0 %vm637_vm2, %v5802_v16 }
 0x15a   : > { %v6380_v5 = vpop.f32.mrb[56].mxu1 }
 0x15b   : > { %6934 = vst [vmem:[#allocation16_spill] sm:$0xff] %v6380_v5  ;;  %v6382_v7 = vpop.f32.mrb[57].mxu1 }
 0x15c   : > { %6935 = vst [vmem:[#allocation17_spill] sm:$0xff] %v6382_v7  ;;  %v6384_v10 = vpop.f32.mrb[58].mxu1 }
 0x15d   : > { %6936 = vst [vmem:[#allocation18_spill] sm:$0xff] %v6384_v10  ;;  %v6387_v58 = vpop.f32.mrb[59].mxu1 }
 0x15e   : > { %6937 = vst [vmem:[#allocation19_spill] sm:$0xff] %v6387_v58  ;;  %v5805_v58 = vld [vmem:[%s5868_s24 + $0x1c8] sm:$0xff]  }
 0x15f   : > { %5259 = vmatmul.mubr.msk.bf16.gmra.mrb[100].mxu1 %vm637_vm2, %v6094_v13  ;;  %5389 = vmatmul.mubr.msk.bf16.gmra.mrb[100].mxu0 %vm637_vm2, %v5803_v20  ;;  %v5806_v13 = vld [vmem:[%s5868_s24 + $0x1d0] sm:$0xff]   ;;  %v6417_v20 = vld [vmem:[%s6918_s2] ss:$0 sm:$0xff] }
 0x160   : > { %5262 = vmatprep.mubr.msk.bf16.mxu1 %vm637_vm2, %v6098_v15  ;;  %5392 = vmatprep.mubr.msk.bf16.mxu0 %vm637_vm2, %v5804_v9 }
 0x162   : > { %v6396_v11 = vpop.f32.mrb[60].mxu1 }
 0x163   : > { %6938 = vst [vmem:[#allocation20_spill] sm:$0xff] %v6396_v11  ;;  %v6398_v16 = vpop.f32.mrb[61].mxu1 }
 0x164   : > { %6939 = vst [vmem:[#allocation21_spill] sm:$0xff] %v6398_v16  ;;  %v6402_v40 = vpop.f32.mrb[62].mxu1 }
 0x165   : > { %6940 = vst [vmem:[#allocation22_spill] sm:$0xff] %v6402_v40  ;;  %v6405_v10 = vpop.f32.mrb[63].mxu1  ;;  %v5807_v40 = vld [vmem:[%s5868_s24 + $0x1d8] sm:$0xff]  }
 0x166   : > { %6941 = vst [vmem:[#allocation23_spill] sm:$0xff] %v6405_v10 }
 0x167   : > { %5263 = vmatmul.mubr.msk.bf16.gmra.mrb[104].mxu1 %vm637_vm2, %v6108_v17  ;;  %5393 = vmatmul.mubr.msk.bf16.gmra.mrb[104].mxu0 %vm637_vm2, %v5805_v58  ;;  %v5808_v58 = vld [vmem:[%s5868_s24 + $0x1e0] sm:$0xff]  }
 0x168   : > { %5266 = vmatprep.mubr.msk.bf16.mxu1 %vm637_vm2, %v6112_v19  ;;  %5396 = vmatprep.mubr.msk.bf16.mxu0 %vm637_vm2, %v5806_v13 }
 0x16a   : > { %v5290_v15 = vpop.f32.mrb[0].mxu0 }
 0x16b   : > { %v5418_v9 = vadd.f32 %v5290_v15, %v6135_v25  ;;  %v2636_v10 = vpop.f32.mrb[1].mxu0 }
 0x16c   : > { %v5419_v17 = vadd.f32 %v2636_v10, %v6137_v26  ;;  %v5291_v16 = vpop.f32.mrb[2].mxu0 }
 0x16d   : > { %v3284_v19 = vadd.f32 %v5418_v9, %v6417_v20  ;;  %v5420_v13 = vadd.f32 %v5291_v16, %v6142_v28  ;;  %v2639_v11 = vpop.f32.mrb[3].mxu0 }
 0x16e   : > { %v3282_v7 = vadd.f32 %v5419_v17, %v6417_v20  ;;  %v5421_v5 = vadd.f32 %v2639_v11, %v6148_v31  ;;  %v5809_v17 = vld [vmem:[%s5868_s24 + $0x1e8] sm:$0xff]  }
 0x16f   : > { %5267 = vmatmul.mubr.msk.bf16.gmra.mrb[108].mxu1 %vm637_vm2, %v6122_v21  ;;  %v3412_v25 = vmax.f32 %v3284_v19, 0.0  ;;  %v3285_v15 = vadd.f32 %v5420_v13, %v6417_v20  ;;  %5397 = vmatmul.mubr.msk.bf16.gmra.mrb[108].mxu0 %vm637_vm2, %v5807_v40  ;;  %v5810_v19 = vld [vmem:[%s5868_s24 + $0x1f0] sm:$0xff]  }
 0x170   : > { %5270 = vmatprep.mubr.msk.bf16.mxu1 %vm637_vm2, %v6126_v23  ;;  %v3410_v26 = vmax.f32 %v3282_v7, 0.0  ;;  %v3283_v21 = vadd.f32 %v5421_v5, %v6417_v20  ;;  %5400 = vmatprep.mubr.msk.bf16.mxu0 %vm637_vm2, %v5808_v58 }
 0x171   : > { %v4705_v28 = vpack.c.bf16 %v3412_v25, %v3412_v25  ;;  %v3413_v31 = vmax.f32 %v3285_v15, 0.0 }
 0x172   : > { %v4703_v10 = vpack.c.bf16 %v3410_v26, %v3410_v26  ;;  %v3411_v11 = vmax.f32 %v3283_v21, 0.0  ;;  %v5294_v23 = vpop.f32.mrb[4].mxu0 }
 0x173   : > { %4053 = vst.msk [vmem:[%s6436_s4 + $0x8] sm:$0xf] %vm4050_vm3, %v4705_v28  ;;  %v4706_v16 = vpack.c.bf16 %v3413_v31, %v3413_v31  ;;  %v5422_v40 = vadd.f32 %v5294_v23, %v6157_v33  ;;  %v2652_v9 = vpop.f32.mrb[5].mxu0 }
 0x174   : > { %4051 = vst.msk [vmem:[%s6436_s4] sm:$0xf] %vm4050_vm3, %v4703_v10  ;;  %v4704_v5 = vpack.c.bf16 %v3411_v11, %v3411_v11  ;;  %v5423_v7 = vadd.f32 %v2652_v9, %v6159_v34  ;;  %v5295_v58 = vpop.f32.mrb[6].mxu0 }
 0x175   : > { %4054 = vst.msk [vmem:[%s6436_s4 + $0xc] sm:$0xf] %vm4050_vm3, %v4706_v16  ;;  %v3288_v13 = vadd.f32 %v5422_v40, %v6417_v20  ;;  %v5424_v25 = vadd.f32 %v5295_v58, %v6164_v36  ;;  %v2655_v15 = vpop.f32.mrb[7].mxu0 }
 0x176   : > { %4052 = vst.msk [vmem:[%s6436_s4 + $0x4] sm:$0xf] %vm4050_vm3, %v4704_v5  ;;  %v3286_v33 = vadd.f32 %v5423_v7, %v6417_v20  ;;  %v5425_v26 = vadd.f32 %v2655_v15, %v6170_v39  ;;  %v5812_v7 = vld [vmem:[%s5868_s24 + $0x200] sm:$0xff]  }
 0x177   : > { %5271 = vmatmul.mubr.msk.bf16.gmra.mrb[112].mxu1 %vm637_vm2, %v6140_v27  ;;  %v3416_v34 = vmax.f32 %v3288_v13, 0.0  ;;  %v3289_v21 = vadd.f32 %v5424_v25, %v6417_v20  ;;  %5401 = vmatmul.mubr.msk.bf16.gmra.mrb[112].mxu0 %vm637_vm2, %v5809_v17 }
 0x178   : > { %5274 = vmatprep.mubr.msk.bf16.mxu1 %vm637_vm2, %v6146_v30  ;;  %v3414_v36 = vmax.f32 %v3286_v33, 0.0  ;;  %v3287_v28 = vadd.f32 %v5425_v26, %v6417_v20  ;;  %5404 = vmatprep.mubr.msk.bf16.mxu0 %vm637_vm2, %v5810_v19  ;;  %v5811_v30 = vld [vmem:[%s5868_s24 + $0x1f8] sm:$0xff]  }
 0x179   : > { %v4709_v39 = vpack.c.bf16 %v3416_v34, %v3416_v34  ;;  %v3417_v31 = vmax.f32 %v3289_v21, 0.0 }
 0x17a   : > { %v4707_v27 = vpack.c.bf16 %v3414_v36, %v3414_v36  ;;  %v3415_v10 = vmax.f32 %v3287_v28, 0.0  ;;  %v5298_v11 = vpop.f32.mrb[8].mxu0 }
 0x17b   : > { %4057 = vst.msk [vmem:[%s6436_s4 + $0x18] sm:$0xf] %vm4050_vm3, %v4709_v39  ;;  %v4710_v23 = vpack.c.bf16 %v3417_v31, %v3417_v31  ;;  %v5426_v16 = vadd.f32 %v5298_v11, %v6179_v44  ;;  %v2668_v40 = vpop.f32.mrb[9].mxu0  ;;  %v5814_v11 = vld [vmem:[%s5868_s24 + $0x210] sm:$0xff]  }
 0x17c   : > { %4055 = vst.msk [vmem:[%s6436_s4 + $0x10] sm:$0xf] %vm4050_vm3, %v4707_v27  ;;  %v4708_v9 = vpack.c.bf16 %v3415_v10, %v3415_v10  ;;  %v5427_v17 = vadd.f32 %v2668_v40, %v6181_v46  ;;  %v5299_v5 = vpop.f32.mrb[10].mxu0 }
 0x17d   : > { %4058 = vst.msk [vmem:[%s6436_s4 + $0x1c] sm:$0xf] %vm4050_vm3, %v4710_v23  ;;  %v3292_v58 = vadd.f32 %v5426_v16, %v6417_v20  ;;  %v5428_v19 = vadd.f32 %v5299_v5, %v6186_v50  ;;  %v2671_v13 = vpop.f32.mrb[11].mxu0 }
 0x17e   : > { %4056 = vst.msk [vmem:[%s6436_s4 + $0x14] sm:$0xf] %vm4050_vm3, %v4708_v9  ;;  %v3290_v44 = vadd.f32 %v5427_v17, %v6417_v20  ;;  %v5429_v25 = vadd.f32 %v2671_v13, %v6192_v56 }
 0x17f   : > { %5275 = vmatmul.mubr.msk.bf16.gmra.mrb[116].mxu1 %vm637_vm2, %v6162_v35  ;;  %v3420_v46 = vmax.f32 %v3292_v58, 0.0  ;;  %v3293_v15 = vadd.f32 %v5428_v19, %v6417_v20  ;;  %5405 = vmatmul.mubr.msk.bf16.gmra.mrb[116].mxu0 %vm637_vm2, %v5811_v30 }
 0x180   : > { %5278 = vmatprep.mubr.msk.bf16.mxu1 %vm637_vm2, %v6168_v38  ;;  %v3418_v50 = vmax.f32 %v3290_v44, 0.0  ;;  %v3291_v33 = vadd.f32 %v5429_v25, %v6417_v20  ;;  %5408 = vmatprep.mubr.msk.bf16.mxu0 %vm637_vm2, %v5812_v7  ;;  %v5813_v38 = vld [vmem:[%s5868_s24 + $0x208] sm:$0xff]   ;;  %v5815_v25 = vld [vmem:[%s5868_s24 + $0x218] sm:$0xff]  }
 0x181   : > { %v4713_v56 = vpack.c.bf16 %v3420_v46, %v3420_v46  ;;  %v3421_v26 = vmax.f32 %v3293_v15, 0.0 }
 0x182   : > { %v4711_v35 = vpack.c.bf16 %v3418_v50, %v3418_v50  ;;  %v3419_v34 = vmax.f32 %v3291_v33, 0.0  ;;  %v5302_v21 = vpop.f32.mrb[12].mxu0 }
 0x183   : > { %4061 = vst.msk [vmem:[%s6436_s4 + $0x28] sm:$0xf] %vm4050_vm3, %v4713_v56  ;;  %v4714_v36 = vpack.c.bf16 %v3421_v26, %v3421_v26  ;;  %v5430_v28 = vadd.f32 %v5302_v21, %v6201_v60  ;;  %v2684_v39 = vpop.f32.mrb[13].mxu0 }
 0x184   : > { %4059 = vst.msk [vmem:[%s6436_s4 + $0x20] sm:$0xf] %vm4050_vm3, %v4711_v35  ;;  %v4712_v31 = vpack.c.bf16 %v3419_v34, %v3419_v34  ;;  %v5431_v27 = vadd.f32 %v2684_v39, %v6203_v62  ;;  %v5303_v10 = vpop.f32.mrb[14].mxu0 }
 0x185   : > { %4062 = vst.msk [vmem:[%s6436_s4 + $0x2c] sm:$0xf] %vm4050_vm3, %v4714_v36  ;;  %v3296_v23 = vadd.f32 %v5430_v28, %v6417_v20  ;;  %v5432_v16 = vadd.f32 %v5303_v10, %v6208_v2  ;;  %v2687_v40 = vpop.f32.mrb[15].mxu0 }
 0x186   : > { %4060 = vst.msk [vmem:[%s6436_s4 + $0x24] sm:$0xf] %vm4050_vm3, %v4712_v31  ;;  %v3294_v60 = vadd.f32 %v5431_v27, %v6417_v20  ;;  %v5433_v30 = vadd.f32 %v2687_v40, %v6212_v8 }
 0x187   : > { %5279 = vmatmul.mubr.msk.bf16.gmra.mrb[120].mxu1 %vm637_vm2, %v6184_v48  ;;  %v3424_v62 = vmax.f32 %v3296_v23, 0.0  ;;  %v3297_v9 = vadd.f32 %v5432_v16, %v6417_v20  ;;  %5409 = vmatmul.mubr.msk.bf16.gmra.mrb[120].mxu0 %vm637_vm2, %v5813_v38 }
 0x188   : > { %5282 = vmatprep.mubr.msk.bf16.mxu1 %vm637_vm2, %v6190_v54  ;;  %v3422_v2 = vmax.f32 %v3294_v60, 0.0  ;;  %v3295_v17 = vadd.f32 %v5433_v30, %v6417_v20  ;;  %5412 = vmatprep.mubr.msk.bf16.mxu0 %vm637_vm2, %v5814_v11 }
 0x189   : > { %v4717_v8 = vpack.c.bf16 %v3424_v62, %v3424_v62  ;;  %v3425_v5 = vmax.f32 %v3297_v9, 0.0 }
 0x18a   : > { %v4715_v7 = vpack.c.bf16 %v3422_v2, %v3422_v2  ;;  %v3423_v48 = vmax.f32 %v3295_v17, 0.0  ;;  %v5306_v58 = vpop.f32.mrb[16].mxu0 }
 0x18b   : > { %4065 = vst.msk [vmem:[%s6436_s4 + $0x38] sm:$0xf] %vm4050_vm3, %v4717_v8  ;;  %v4718_v19 = vpack.c.bf16 %v3425_v5, %v3425_v5  ;;  %v5434_v13 = vadd.f32 %v5306_v58, %v6220_v12  ;;  %v2700_v44 = vpop.f32.mrb[17].mxu0 }
 0x18c   : > { %4063 = vst.msk [vmem:[%s6436_s4 + $0x30] sm:$0xf] %vm4050_vm3, %v4715_v7  ;;  %v4716_v54 = vpack.c.bf16 %v3423_v48, %v3423_v48  ;;  %v5435_v46 = vadd.f32 %v2700_v44, %v6222_v14  ;;  %v5307_v15 = vpop.f32.mrb[18].mxu0 }
 0x18d   : > { %4066 = vst.msk [vmem:[%s6436_s4 + $0x3c] sm:$0xf] %vm4050_vm3, %v4718_v19  ;;  %v3300_v50 = vadd.f32 %v5434_v13, %v6417_v20  ;;  %v5436_v33 = vadd.f32 %v5307_v15, %v6225_v18  ;;  %v2703_v56 = vpop.f32.mrb[19].mxu0 }
 0x18e   : > { %4064 = vst.msk [vmem:[%s6436_s4 + $0x34] sm:$0xf] %vm4050_vm3, %v4716_v54  ;;  %v3298_v12 = vadd.f32 %v5435_v46, %v6417_v20  ;;  %v5437_v26 = vadd.f32 %v2703_v56, %v6228_v22  ;;  %v6942_v46 = vld [vmem:[#allocation2_spill] sm:$0xff] }
 0x18f   : > { %5283 = vmatmul.mubr.msk.bf16.gmra.mrb[124].mxu1 %vm637_vm2, %v6206_v0  ;;  %v3428_v14 = vmax.f32 %v3300_v50, 0.0  ;;  %v3301_v35 = vadd.f32 %v5436_v33, %v6417_v20  ;;  %5413 = vmatmul.mubr.msk.bf16.gmra.mrb[124].mxu0 %vm637_vm2, %v5815_v25 }
 0x190   : > { %v3426_v34 = vmax.f32 %v3298_v12, 0.0  ;;  %v3299_v18 = vadd.f32 %v5437_v26, %v6417_v20 }
 0x191   : > { %v4721_v21 = vpack.c.bf16 %v3428_v14, %v3428_v14  ;;  %v3429_v36 = vmax.f32 %v3301_v35, 0.0 }
 0x192   : > { %v4719_v28 = vpack.c.bf16 %v3426_v34, %v3426_v34  ;;  %v3427_v39 = vmax.f32 %v3299_v18, 0.0  ;;  %v5310_v38 = vpop.f32.mrb[20].mxu0 }
 0x193   : > { %4069 = vst.msk [vmem:[%s6436_s4 + $0x48] sm:$0xf] %vm4050_vm3, %v4721_v21  ;;  %v4722_v22 = vpack.c.bf16 %v3429_v36, %v3429_v36  ;;  %v5438_v0 = vadd.f32 %v5310_v38, %v6236_v29  ;;  %v2716_v31 = vpop.f32.mrb[21].mxu0 }
 0x194   : > { %4067 = vst.msk [vmem:[%s6436_s4 + $0x40] sm:$0xf] %vm4050_vm3, %v4719_v28  ;;  %v4720_v27 = vpack.c.bf16 %v3427_v39, %v3427_v39  ;;  %v5439_v10 = vadd.f32 %v2716_v31, %v6238_v32  ;;  %v5311_v11 = vpop.f32.mrb[22].mxu0 }
 0x195   : > { %4070 = vst.msk [vmem:[%s6436_s4 + $0x4c] sm:$0xf] %vm4050_vm3, %v4722_v22  ;;  %v3304_v23 = vadd.f32 %v5438_v0, %v6417_v20  ;;  %v5440_v16 = vadd.f32 %v5311_v11, %v6240_v37  ;;  %v2719_v40 = vpop.f32.mrb[23].mxu0  ;;  %v6943_v22 = vld [vmem:[#allocation3_spill] sm:$0xff] }
 0x196   : > { %4068 = vst.msk [vmem:[%s6436_s4 + $0x44] sm:$0xf] %vm4050_vm3, %v4720_v27  ;;  %v3302_v29 = vadd.f32 %v5439_v10, %v6417_v20  ;;  %v5441_v60 = vadd.f32 %v2719_v40, %v6243_v52  ;;  %v6944_v27 = vld [vmem:[#allocation4_spill] sm:$0xff] }
 0x197   : > { %v3432_v30 = vmax.f32 %v3304_v23, 0.0  ;;  %v3305_v62 = vadd.f32 %v5440_v16, %v6417_v20 }
 0x198   : > { %v3430_v32 = vmax.f32 %v3302_v29, 0.0  ;;  %v3303_v9 = vadd.f32 %v5441_v60, %v6417_v20 }
 0x199   : > { %v4725_v2 = vpack.c.bf16 %v3432_v30, %v3432_v30  ;;  %v3433_v17 = vmax.f32 %v3305_v62, 0.0 }
 0x19a   : > { %v4723_v8 = vpack.c.bf16 %v3430_v32, %v3430_v32  ;;  %v3431_v37 = vmax.f32 %v3303_v9, 0.0  ;;  %v5314_v5 = vpop.f32.mrb[24].mxu0 }
 0x19b   : > { %4073 = vst.msk [vmem:[%s6436_s4 + $0x58] sm:$0xf] %vm4050_vm3, %v4725_v2  ;;  %v4726_v7 = vpack.c.bf16 %v3433_v17, %v3433_v17  ;;  %v5442_v48 = vadd.f32 %v5314_v5, %v6252_v41  ;;  %v2732_v58 = vpop.f32.mrb[25].mxu0 }
 0x19c   : > { %4071 = vst.msk [vmem:[%s6436_s4 + $0x50] sm:$0xf] %vm4050_vm3, %v4723_v8  ;;  %v4724_v52 = vpack.c.bf16 %v3431_v37, %v3431_v37  ;;  %v5443_v19 = vadd.f32 %v2732_v58, %v6254_v4  ;;  %v5315_v13 = vpop.f32.mrb[26].mxu0 }
 0x19d   : > { %4074 = vst.msk [vmem:[%s6436_s4 + $0x5c] sm:$0xf] %vm4050_vm3, %v4726_v7  ;;  %v3308_v44 = vadd.f32 %v5442_v48, %v6417_v20  ;;  %v5444_v25 = vadd.f32 %v5315_v13, %v6256_v6  ;;  %v2735_v54 = vpop.f32.mrb[27].mxu0  ;;  %v6945_v7 = vld [vmem:[#allocation5_spill] sm:$0xff] }
 0x19e   : > { %4072 = vst.msk [vmem:[%s6436_s4 + $0x54] sm:$0xf] %vm4050_vm3, %v4724_v52  ;;  %v3306_v41 = vadd.f32 %v5443_v19, %v6417_v20  ;;  %v5445_v15 = vadd.f32 %v2735_v54, %v6942_v46  ;;  %v6946_v52 = vld [vmem:[#allocation6_spill] sm:$0xff] }
 0x19f   : > { %v3436_v50 = vmax.f32 %v3308_v44, 0.0  ;;  %v3309_v33 = vadd.f32 %v5444_v25, %v6417_v20 }
 0x1a0   : > { %v3434_v4 = vmax.f32 %v3306_v41, 0.0  ;;  %v3307_v56 = vadd.f32 %v5445_v15, %v6417_v20 }
 0x1a1   : > { %v4729_v12 = vpack.c.bf16 %v3436_v50, %v3436_v50  ;;  %v3437_v26 = vmax.f32 %v3309_v33, 0.0 }
 0x1a2   : > { %v4727_v14 = vpack.c.bf16 %v3434_v4, %v3434_v4  ;;  %v3435_v6 = vmax.f32 %v3307_v56, 0.0  ;;  %v5318_v35 = vpop.f32.mrb[28].mxu0 }
 0x1a3   : > { %4077 = vst.msk [vmem:[%s6436_s4 + $0x68] sm:$0xf] %vm4050_vm3, %v4729_v12  ;;  %v4730_v34 = vpack.c.bf16 %v3437_v26, %v3437_v26  ;;  %v5446_v18 = vadd.f32 %v5318_v35, %v6268_v42  ;;  %v2748_v21 = vpop.f32.mrb[29].mxu0  ;;  %v6947_v35 = vld [vmem:[#allocation7_spill] sm:$0xff] }
 0x1a4   : > { %4075 = vst.msk [vmem:[%s6436_s4 + $0x60] sm:$0xf] %vm4050_vm3, %v4727_v14  ;;  %v4728_v36 = vpack.c.bf16 %v3435_v6, %v3435_v6  ;;  %v5447_v28 = vadd.f32 %v2748_v21, %v6270_v43  ;;  %v5319_v39 = vpop.f32.mrb[30].mxu0  ;;  %v6948_v21 = vld [vmem:[#allocation8_spill] sm:$0xff] }
 0x1a5   : > { %4078 = vst.msk [vmem:[%s6436_s4 + $0x6c] sm:$0xf] %vm4050_vm3, %v4730_v34  ;;  %v3312_v38 = vadd.f32 %v5446_v18, %v6417_v20  ;;  %v5448_v0 = vadd.f32 %v5319_v39, %v6943_v22  ;;  %v2751_v31 = vpop.f32.mrb[31].mxu0 }
 0x1a6   : > { %4076 = vst.msk [vmem:[%s6436_s4 + $0x64] sm:$0xf] %vm4050_vm3, %v4728_v36  ;;  %v3310_v42 = vadd.f32 %v5447_v28, %v6417_v20  ;;  %v5449_v10 = vadd.f32 %v2751_v31, %v6944_v27 }
 0x1a7   : > { %v3440_v11 = vmax.f32 %v3312_v38, 0.0  ;;  %v3313_v23 = vadd.f32 %v5448_v0, %v6417_v20 }
 0x1a8   : > { %v3438_v43 = vmax.f32 %v3310_v42, 0.0  ;;  %v3311_v16 = vadd.f32 %v5449_v10, %v6417_v20 }
 0x1a9   : > { %v4733_v40 = vpack.c.bf16 %v3440_v11, %v3440_v11  ;;  %v3441_v29 = vmax.f32 %v3313_v23, 0.0 }
 0x1aa   : > { %v4731_v60 = vpack.c.bf16 %v3438_v43, %v3438_v43  ;;  %v3439_v30 = vmax.f32 %v3311_v16, 0.0  ;;  %v5322_v62 = vpop.f32.mrb[32].mxu0 }
 0x1ab   : > { %4081 = vst.msk [vmem:[%s6436_s4 + $0x78] sm:$0xf] %vm4050_vm3, %v4733_v40  ;;  %v4734_v32 = vpack.c.bf16 %v3441_v29, %v3441_v29  ;;  %v5450_v9 = vadd.f32 %v5322_v62, %v6284_v45  ;;  %v2764_v2 = vpop.f32.mrb[33].mxu0 }
 0x1ac   : > { %4079 = vst.msk [vmem:[%s6436_s4 + $0x70] sm:$0xf] %vm4050_vm3, %v4731_v60  ;;  %v4732_v17 = vpack.c.bf16 %v3439_v30, %v3439_v30  ;;  %v5451_v8 = vadd.f32 %v2764_v2, %v6286_v47  ;;  %v5323_v37 = vpop.f32.mrb[34].mxu0  ;;  %v6949_v60 = vld [vmem:[#allocation9_spill] sm:$0xff] }
 0x1ad   : > { %4082 = vst.msk [vmem:[%s6436_s4 + $0x7c] sm:$0xf] %vm4050_vm3, %v4734_v32  ;;  %v3316_v5 = vadd.f32 %v5450_v9, %v6417_v20  ;;  %v5452_v48 = vadd.f32 %v5323_v37, %v6945_v7  ;;  %v2767_v58 = vpop.f32.mrb[35].mxu0  ;;  %v6950_v32 = vld [vmem:[#allocation10_spill] sm:$0xff] }
 0x1ae   : > { %4080 = vst.msk [vmem:[%s6436_s4 + $0x74] sm:$0xf] %vm4050_vm3, %v4732_v17  ;;  %v3314_v45 = vadd.f32 %v5451_v8, %v6417_v20  ;;  %v5453_v19 = vadd.f32 %v2767_v58, %v6946_v52 }
 0x1af   : > { %v3444_v13 = vmax.f32 %v3316_v5, 0.0  ;;  %v3317_v44 = vadd.f32 %v5452_v48, %v6417_v20 }
 0x1b0   : > { %v3442_v47 = vmax.f32 %v3314_v45, 0.0  ;;  %v3315_v25 = vadd.f32 %v5453_v19, %v6417_v20 }
 0x1b1   : > { %v4737_v54 = vpack.c.bf16 %v3444_v13, %v3444_v13  ;;  %v3445_v41 = vmax.f32 %v3317_v44, 0.0 }
 0x1b2   : > { %v4735_v46 = vpack.c.bf16 %v3442_v47, %v3442_v47  ;;  %v3443_v15 = vmax.f32 %v3315_v25, 0.0  ;;  %v5326_v50 = vpop.f32.mrb[36].mxu0 }
 0x1b3   : > { %4085 = vst.msk [vmem:[%s6436_s4 + $0x88] sm:$0xf] %vm4050_vm3, %v4737_v54  ;;  %v4738_v33 = vpack.c.bf16 %v3445_v41, %v3445_v41  ;;  %v5454_v4 = vadd.f32 %v5326_v50, %v6300_v49  ;;  %v2780_v56 = vpop.f32.mrb[37].mxu0  ;;  %v6951_v54 = vld [vmem:[#allocation11_spill] sm:$0xff] }
 0x1b4   : > { %4083 = vst.msk [vmem:[%s6436_s4 + $0x80] sm:$0xf] %vm4050_vm3, %v4735_v46  ;;  %v4736_v12 = vpack.c.bf16 %v3443_v15, %v3443_v15  ;;  %v5455_v26 = vadd.f32 %v2780_v56, %v6302_v51  ;;  %v5327_v14 = vpop.f32.mrb[38].mxu0  ;;  %v6952_v15 = vld [vmem:[#allocation12_spill] sm:$0xff] }
 0x1b5   : > { %4086 = vst.msk [vmem:[%s6436_s4 + $0x8c] sm:$0xf] %vm4050_vm3, %v4738_v33  ;;  %v3320_v6 = vadd.f32 %v5454_v4, %v6417_v20  ;;  %v5456_v34 = vadd.f32 %v5327_v14, %v6947_v35  ;;  %v2783_v18 = vpop.f32.mrb[39].mxu0 }
 0x1b6   : > { %4084 = vst.msk [vmem:[%s6436_s4 + $0x84] sm:$0xf] %vm4050_vm3, %v4736_v12  ;;  %v3318_v49 = vadd.f32 %v5455_v26, %v6417_v20  ;;  %v5457_v36 = vadd.f32 %v2783_v18, %v6948_v21 }
 0x1b7   : > { %v3448_v28 = vmax.f32 %v3320_v6, 0.0  ;;  %v3321_v39 = vadd.f32 %v5456_v34, %v6417_v20 }
 0x1b8   : > { %v3446_v51 = vmax.f32 %v3318_v49, 0.0  ;;  %v3319_v38 = vadd.f32 %v5457_v36, %v6417_v20 }
 0x1b9   : > { %v4741_v22 = vpack.c.bf16 %v3448_v28, %v3448_v28  ;;  %v3449_v0 = vmax.f32 %v3321_v39, 0.0 }
 0x1ba   : > { %v4739_v31 = vpack.c.bf16 %v3446_v51, %v3446_v51  ;;  %v3447_v42 = vmax.f32 %v3319_v38, 0.0  ;;  %v5330_v27 = vpop.f32.mrb[40].mxu0  ;;  %v6953_v51 = vld [vmem:[#allocation13_spill] sm:$0xff] }
 0x1bb   : > { %4089 = vst.msk [vmem:[%s6436_s4 + $0x98] sm:$0xf] %vm4050_vm3, %v4741_v22  ;;  %v4742_v10 = vpack.c.bf16 %v3449_v0, %v3449_v0  ;;  %v5458_v11 = vadd.f32 %v5330_v27, %v6316_v53  ;;  %v2796_v23 = vpop.f32.mrb[41].mxu0  ;;  %v6954_v0 = vld [vmem:[#allocation14_spill] sm:$0xff] }
 0x1bc   : > { %4087 = vst.msk [vmem:[%s6436_s4 + $0x90] sm:$0xf] %vm4050_vm3, %v4739_v31  ;;  %v4740_v43 = vpack.c.bf16 %v3447_v42, %v3447_v42  ;;  %v5459_v16 = vadd.f32 %v2796_v23, %v6318_v55  ;;  %v5331_v40 = vpop.f32.mrb[42].mxu0 }
 0x1bd   : > { %4090 = vst.msk [vmem:[%s6436_s4 + $0x9c] sm:$0xf] %vm4050_vm3, %v4742_v10  ;;  %v3324_v29 = vadd.f32 %v5458_v11, %v6417_v20  ;;  %v5460_v30 = vadd.f32 %v5331_v40, %v6949_v60  ;;  %v2799_v62 = vpop.f32.mrb[43].mxu0 }
 0x1be   : > { %4088 = vst.msk [vmem:[%s6436_s4 + $0x94] sm:$0xf] %vm4050_vm3, %v4740_v43  ;;  %v3322_v53 = vadd.f32 %v5459_v16, %v6417_v20  ;;  %v5461_v9 = vadd.f32 %v2799_v62, %v6950_v32 }
 0x1bf   : > { %v3452_v2 = vmax.f32 %v3324_v29, 0.0  ;;  %v3325_v17 = vadd.f32 %v5460_v30, %v6417_v20 }
 0x1c0   : > { %v3450_v55 = vmax.f32 %v3322_v53, 0.0  ;;  %v3323_v8 = vadd.f32 %v5461_v9, %v6417_v20 }
 0x1c1   : > { %v4745_v37 = vpack.c.bf16 %v3452_v2, %v3452_v2  ;;  %v3453_v5 = vmax.f32 %v3325_v17, 0.0 }
 0x1c2   : > { %v4743_v7 = vpack.c.bf16 %v3450_v55, %v3450_v55  ;;  %v3451_v48 = vmax.f32 %v3323_v8, 0.0  ;;  %v5334_v58 = vpop.f32.mrb[44].mxu0  ;;  %v6955_v55 = vld [vmem:[#allocation15_spill] sm:$0xff] }
 0x1c3   : > { %4093 = vst.msk [vmem:[%s6436_s4 + $0xa8] sm:$0xf] %vm4050_vm3, %v4745_v37  ;;  %v4746_v45 = vpack.c.bf16 %v3453_v5, %v3453_v5  ;;  %v5462_v52 = vadd.f32 %v5334_v58, %v6332_v57  ;;  %v2812_v19 = vpop.f32.mrb[45].mxu0 }
 0x1c4   : > { %4091 = vst.msk [vmem:[%s6436_s4 + $0xa0] sm:$0xf] %vm4050_vm3, %v4743_v7  ;;  %v4744_v13 = vpack.c.bf16 %v3451_v48, %v3451_v48  ;;  %v5463_v44 = vadd.f32 %v2812_v19, %v6334_v59  ;;  %v5335_v47 = vpop.f32.mrb[46].mxu0 }
 0x1c5   : > { %4094 = vst.msk [vmem:[%s6436_s4 + $0xac] sm:$0xf] %vm4050_vm3, %v4746_v45  ;;  %v3328_v25 = vadd.f32 %v5462_v52, %v6417_v20  ;;  %v5464_v41 = vadd.f32 %v5335_v47, %v6951_v54  ;;  %v2815_v46 = vpop.f32.mrb[47].mxu0  ;;  %v6957_v54 = vld [vmem:[#allocation17_spill] sm:$0xff] }
 0x1c6   : > { %4092 = vst.msk [vmem:[%s6436_s4 + $0xa4] sm:$0xf] %vm4050_vm3, %v4744_v13  ;;  %v3326_v57 = vadd.f32 %v5463_v44, %v6417_v20  ;;  %v5465_v50 = vadd.f32 %v2815_v46, %v6952_v15  ;;  %v6956_v13 = vld [vmem:[#allocation16_spill] sm:$0xff]  ;;  %v6958_v15 = vld [vmem:[#allocation18_spill] sm:$0xff] }
 0x1c7   : > { %v3456_v33 = vmax.f32 %v3328_v25, 0.0  ;;  %v3329_v4 = vadd.f32 %v5464_v41, %v6417_v20 }
 0x1c8   : > { %v3454_v59 = vmax.f32 %v3326_v57, 0.0  ;;  %v3327_v56 = vadd.f32 %v5465_v50, %v6417_v20 }
 0x1c9   : > { %v4749_v12 = vpack.c.bf16 %v3456_v33, %v3456_v33  ;;  %v3457_v26 = vmax.f32 %v3329_v4, 0.0 }
 0x1ca   : > { %v4747_v14 = vpack.c.bf16 %v3454_v59, %v3454_v59  ;;  %v3455_v6 = vmax.f32 %v3327_v56, 0.0  ;;  %v5338_v35 = vpop.f32.mrb[48].mxu0  ;;  %v6959_v59 = vld [vmem:[#allocation19_spill] sm:$0xff] }
 0x1cb   : > { %4097 = vst.msk [vmem:[%s6436_s4 + $0xb8] sm:$0xf] %vm4050_vm3, %v4749_v12  ;;  %v4750_v34 = vpack.c.bf16 %v3457_v26, %v3457_v26  ;;  %v5466_v18 = vadd.f32 %v5338_v35, %v6348_v61  ;;  %v2828_v49 = vpop.f32.mrb[49].mxu0 }
 0x1cc   : > { %4095 = vst.msk [vmem:[%s6436_s4 + $0xb0] sm:$0xf] %vm4050_vm3, %v4747_v14  ;;  %v4748_v21 = vpack.c.bf16 %v3455_v6, %v3455_v6  ;;  %v5467_v36 = vadd.f32 %v2828_v49, %v6350_v63  ;;  %v5339_v28 = vpop.f32.mrb[50].mxu0 }
 0x1cd   : > { %4098 = vst.msk [vmem:[%s6436_s4 + $0xbc] sm:$0xf] %vm4050_vm3, %v4750_v34  ;;  %v3332_v39 = vadd.f32 %v5466_v18, %v6417_v20  ;;  %v5468_v38 = vadd.f32 %v5339_v28, %v6953_v51  ;;  %v2831_v22 = vpop.f32.mrb[51].mxu0  ;;  %v6960_v28 = vld [vmem:[#allocation20_spill] sm:$0xff] }
 0x1ce   : > { %4096 = vst.msk [vmem:[%s6436_s4 + $0xb4] sm:$0xf] %vm4050_vm3, %v4748_v21  ;;  %v3330_v61 = vadd.f32 %v5467_v36, %v6417_v20  ;;  %v5469_v31 = vadd.f32 %v2831_v22, %v6954_v0  ;;  %v6961_v22 = vld [vmem:[#allocation21_spill] sm:$0xff] }
 0x1cf   : > { %v3460_v42 = vmax.f32 %v3332_v39, 0.0  ;;  %v3333_v27 = vadd.f32 %v5468_v38, %v6417_v20 }
 0x1d0   : > { %v3458_v63 = vmax.f32 %v3330_v61, 0.0  ;;  %v3331_v10 = vadd.f32 %v5469_v31, %v6417_v20 }
 0x1d1   : > { %v4753_v11 = vpack.c.bf16 %v3460_v42, %v3460_v42  ;;  %v3461_v23 = vmax.f32 %v3333_v27, 0.0  ;;  %v6962_v42 = vld [vmem:[#allocation22_spill] sm:$0xff] }
 0x1d2   : > { %v4751_v43 = vpack.c.bf16 %v3458_v63, %v3458_v63  ;;  %v3459_v16 = vmax.f32 %v3331_v10, 0.0  ;;  %v5342_v40 = vpop.f32.mrb[52].mxu0 }
 0x1d3   : > { %4101 = vst.msk [vmem:[%s6436_s4 + $0xc8] sm:$0xf] %vm4050_vm3, %v4753_v11  ;;  %v4754_v29 = vpack.c.bf16 %v3461_v23, %v3461_v23  ;;  %v5470_v60 = vadd.f32 %v5342_v40, %v6364_v1  ;;  %v2844_v30 = vpop.f32.mrb[53].mxu0  ;;  %v6963_v11 = vld [vmem:[#allocation23_spill] sm:$0xff] }
 0x1d4   : > { %4099 = vst.msk [vmem:[%s6436_s4 + $0xc0] sm:$0xf] %vm4050_vm3, %v4751_v43  ;;  %v4752_v62 = vpack.c.bf16 %v3459_v16, %v3459_v16  ;;  %v5471_v53 = vadd.f32 %v2844_v30, %v6366_v3  ;;  %v5343_v32 = vpop.f32.mrb[54].mxu0 }
 0x1d5   : > { %4102 = vst.msk [vmem:[%s6436_s4 + $0xcc] sm:$0xf] %vm4050_vm3, %v4754_v29  ;;  %v3336_v9 = vadd.f32 %v5470_v60, %v6417_v20  ;;  %v5472_v2 = vadd.f32 %v5343_v32, %v6368_v24  ;;  %v2847_v17 = vpop.f32.mrb[55].mxu0 }
 0x1d6   : > { %4100 = vst.msk [vmem:[%s6436_s4 + $0xc4] sm:$0xf] %vm4050_vm3, %v4752_v62  ;;  %v3334_v1 = vadd.f32 %v5471_v53, %v6417_v20  ;;  %v5473_v8 = vadd.f32 %v2847_v17, %v6955_v55 }
 0x1d7   : > { %v3464_v37 = vmax.f32 %v3336_v9, 0.0  ;;  %v3337_v5 = vadd.f32 %v5472_v2, %v6417_v20 }
 0x1d8   : > { %v3462_v3 = vmax.f32 %v3334_v1, 0.0  ;;  %v3335_v7 = vadd.f32 %v5473_v8, %v6417_v20 }
 0x1d9   : > { %v4757_v48 = vpack.c.bf16 %v3464_v37, %v3464_v37  ;;  %v3465_v58 = vmax.f32 %v3337_v5, 0.0 }
 0x1da   : > { %v4755_v45 = vpack.c.bf16 %v3462_v3, %v3462_v3  ;;  %v3463_v24 = vmax.f32 %v3335_v7, 0.0  ;;  %v5346_v52 = vpop.f32.mrb[56].mxu0 }
 0x1db   : > { %4105 = vst.msk [vmem:[%s6436_s4 + $0xd8] sm:$0xf] %vm4050_vm3, %v4757_v48  ;;  %v4758_v19 = vpack.c.bf16 %v3465_v58, %v3465_v58  ;;  %v5474_v44 = vadd.f32 %v5346_v52, %v6956_v13  ;;  %v2860_v47 = vpop.f32.mrb[57].mxu0 }
 0x1dc   : > { %4103 = vst.msk [vmem:[%s6436_s4 + $0xd0] sm:$0xf] %vm4050_vm3, %v4755_v45  ;;  %v4756_v25 = vpack.c.bf16 %v3463_v24, %v3463_v24  ;;  %v5475_v41 = vadd.f32 %v2860_v47, %v6957_v54  ;;  %v5347_v46 = vpop.f32.mrb[58].mxu0 }
 0x1dd   : > { %4106 = vst.msk [vmem:[%s6436_s4 + $0xdc] sm:$0xf] %vm4050_vm3, %v4758_v19  ;;  %v3340_v57 = vadd.f32 %v5474_v44, %v6417_v20  ;;  %v5476_v50 = vadd.f32 %v5347_v46, %v6958_v15  ;;  %v2863_v33 = vpop.f32.mrb[59].mxu0 }
 0x1de   : > { %4104 = vst.msk [vmem:[%s6436_s4 + $0xd4] sm:$0xf] %vm4050_vm3, %v4756_v25  ;;  %v3338_v4 = vadd.f32 %v5475_v41, %v6417_v20  ;;  %v5477_v56 = vadd.f32 %v2863_v33, %v6959_v59 }
 0x1df   : > { %v3468_v12 = vmax.f32 %v3340_v57, 0.0  ;;  %v3341_v26 = vadd.f32 %v5476_v50, %v6417_v20 }
 0x1e0   : > { %v3466_v14 = vmax.f32 %v3338_v4, 0.0  ;;  %v3339_v6 = vadd.f32 %v5477_v56, %v6417_v20 }
 0x1e1   : > { %v4761_v35 = vpack.c.bf16 %v3468_v12, %v3468_v12  ;;  %v3469_v34 = vmax.f32 %v3341_v26, 0.0 }
 0x1e2   : > { %v4759_v18 = vpack.c.bf16 %v3466_v14, %v3466_v14  ;;  %v3467_v49 = vmax.f32 %v3339_v6, 0.0  ;;  %v5350_v21 = vpop.f32.mrb[60].mxu0 }
 0x1e3   : > { %4109 = vst.msk [vmem:[%s6436_s4 + $0xe8] sm:$0xf] %vm4050_vm3, %v4761_v35  ;;  %v4762_v36 = vpack.c.bf16 %v3469_v34, %v3469_v34  ;;  %v5478_v39 = vadd.f32 %v5350_v21, %v6960_v28  ;;  %v2876_v51 = vpop.f32.mrb[61].mxu0 }
 0x1e4   : > { %4107 = vst.msk [vmem:[%s6436_s4 + $0xe0] sm:$0xf] %vm4050_vm3, %v4759_v18  ;;  %v4760_v38 = vpack.c.bf16 %v3467_v49, %v3467_v49  ;;  %v5479_v61 = vadd.f32 %v2876_v51, %v6961_v22  ;;  %v5351_v0 = vpop.f32.mrb[62].mxu0 }
 0x1e5   : > { %4110 = vst.msk [vmem:[%s6436_s4 + $0xec] sm:$0xf] %vm4050_vm3, %v4762_v36  ;;  %v3344_v31 = vadd.f32 %v5478_v39, %v6417_v20  ;;  %v5480_v27 = vadd.f32 %v5351_v0, %v6962_v42  ;;  %v2879_v63 = vpop.f32.mrb[63].mxu0 }
 0x1e6   : > { %4108 = vst.msk [vmem:[%s6436_s4 + $0xe4] sm:$0xf] %vm4050_vm3, %v4760_v38  ;;  %v3342_v10 = vadd.f32 %v5479_v61, %v6417_v20  ;;  %v5481_v23 = vadd.f32 %v2879_v63, %v6963_v11 }
 0x1e7   : > { %v3472_v43 = vmax.f32 %v3344_v31, 0.0  ;;  %v3345_v16 = vadd.f32 %v5480_v27, %v6417_v20 }
 0x1e8   : > { %v3470_v40 = vmax.f32 %v3342_v10, 0.0  ;;  %v3343_v29 = vadd.f32 %v5481_v23, %v6417_v20 }
 0x1e9   : > { %v4765_v60 = vpack.c.bf16 %v3472_v43, %v3472_v43  ;;  %v3473_v30 = vmax.f32 %v3345_v16, 0.0 }
 0x1ea   : > { %v5224_v62 = vpop.f32.mrb[64].mxu1  ;;  %v4763_v53 = vpack.c.bf16 %v3470_v40, %v3470_v40  ;;  %v3471_v32 = vmax.f32 %v3343_v29, 0.0  ;;  %v5354_v9 = vpop.f32.mrb[64].mxu0 }
 0x1eb   : > { %v1696_v2 = vpop.f32.mrb[65].mxu1  ;;  %4113 = vst.msk [vmem:[%s6436_s4 + $0xf8] sm:$0xf] %vm4050_vm3, %v4765_v60  ;;  %v4766_v17 = vpack.c.bf16 %v3473_v30, %v3473_v30  ;;  %v5482_v1 = vadd.f32 %v5354_v9, %v5224_v62  ;;  %v2892_v55 = vpop.f32.mrb[65].mxu0 }
 0x1ec   : > { %v5225_v8 = vpop.f32.mrb[66].mxu1  ;;  %4111 = vst.msk [vmem:[%s6436_s4 + $0xf0] sm:$0xf] %vm4050_vm3, %v4763_v53  ;;  %v4764_v37 = vpack.c.bf16 %v3471_v32, %v3471_v32  ;;  %v5483_v5 = vadd.f32 %v2892_v55, %v1696_v2  ;;  %v5355_v3 = vpop.f32.mrb[66].mxu0 }
 0x1ed   : > { %v1699_v7 = vpop.f32.mrb[67].mxu1  ;;  %4114 = vst.msk [vmem:[%s6436_s4 + $0xfc] sm:$0xf] %vm4050_vm3, %v4766_v17  ;;  %v3348_v48 = vadd.f32 %v5482_v1, %v6417_v20  ;;  %v5484_v58 = vadd.f32 %v5355_v3, %v5225_v8  ;;  %v2895_v45 = vpop.f32.mrb[67].mxu0 }
 0x1ee   : > { %4112 = vst.msk [vmem:[%s6436_s4 + $0xf4] sm:$0xf] %vm4050_vm3, %v4764_v37  ;;  %v3346_v24 = vadd.f32 %v5483_v5, %v6417_v20  ;;  %v5485_v52 = vadd.f32 %v2895_v45, %v1699_v7 }
 0x1ef   : > { %v3476_v19 = vmax.f32 %v3348_v48, 0.0  ;;  %v3349_v13 = vadd.f32 %v5484_v58, %v6417_v20 }
 0x1f0   : > { %v3474_v44 = vmax.f32 %v3346_v24, 0.0  ;;  %v3347_v47 = vadd.f32 %v5485_v52, %v6417_v20 }
 0x1f1   : > { %v4769_v25 = vpack.c.bf16 %v3476_v19, %v3476_v19  ;;  %v3477_v54 = vmax.f32 %v3349_v13, 0.0 }
 0x1f2   : > { %v5228_v41 = vpop.f32.mrb[68].mxu1  ;;  %v4767_v46 = vpack.c.bf16 %v3474_v44, %v3474_v44  ;;  %v3475_v57 = vmax.f32 %v3347_v47, 0.0  ;;  %v5358_v15 = vpop.f32.mrb[68].mxu0 }
 0x1f3   : > { %v1712_v50 = vpop.f32.mrb[69].mxu1  ;;  %4117 = vst.msk [vmem:[%s6436_s4 + $0x108] sm:$0xf] %vm4050_vm3, %v4769_v25  ;;  %v4770_v33 = vpack.c.bf16 %v3477_v54, %v3477_v54  ;;  %v5486_v4 = vadd.f32 %v5358_v15, %v5228_v41  ;;  %v2908_v59 = vpop.f32.mrb[69].mxu0 }
 0x1f4   : > { %v5229_v56 = vpop.f32.mrb[70].mxu1  ;;  %4115 = vst.msk [vmem:[%s6436_s4 + $0x100] sm:$0xf] %vm4050_vm3, %v4767_v46  ;;  %v4768_v12 = vpack.c.bf16 %v3475_v57, %v3475_v57  ;;  %v5487_v26 = vadd.f32 %v2908_v59, %v1712_v50  ;;  %v5359_v14 = vpop.f32.mrb[70].mxu0  ;;  %v6757_v50 = vld [vmem:[%s6918_s2] ss:$0 sm:$0xff] }
 0x1f5   : > { %v1715_v6 = vpop.f32.mrb[71].mxu1  ;;  %4118 = vst.msk [vmem:[%s6436_s4 + $0x10c] sm:$0xf] %vm4050_vm3, %v4770_v33  ;;  %v3352_v35 = vadd.f32 %v5486_v4, %v6417_v20  ;;  %v5488_v34 = vadd.f32 %v5359_v14, %v5229_v56  ;;  %v2911_v18 = vpop.f32.mrb[71].mxu0 }
 0x1f6   : > { %4116 = vst.msk [vmem:[%s6436_s4 + $0x104] sm:$0xf] %vm4050_vm3, %v4768_v12  ;;  %v3350_v49 = vadd.f32 %v5487_v26, %v6417_v20  ;;  %v5489_v21 = vadd.f32 %v2911_v18, %v1715_v6 }
 0x1f7   : > { %v3480_v36 = vmax.f32 %v3352_v35, 0.0  ;;  %v3353_v28 = vadd.f32 %v5488_v34, %v6417_v20 }
 0x1f8   : > { %v3478_v39 = vmax.f32 %v3350_v49, 0.0  ;;  %v3351_v51 = vadd.f32 %v5489_v21, %v6417_v20 }
 0x1f9   : > { %v4773_v38 = vpack.c.bf16 %v3480_v36, %v3480_v36  ;;  %v3481_v22 = vmax.f32 %v3353_v28, 0.0 }
 0x1fa   : > { %v5232_v61 = vpop.f32.mrb[72].mxu1  ;;  %v4771_v0 = vpack.c.bf16 %v3478_v39, %v3478_v39  ;;  %v3479_v31 = vmax.f32 %v3351_v51, 0.0  ;;  %v5362_v42 = vpop.f32.mrb[72].mxu0 }
 0x1fb   : > { %v1728_v27 = vpop.f32.mrb[73].mxu1  ;;  %4121 = vst.msk [vmem:[%s6436_s4 + $0x118] sm:$0xf] %vm4050_vm3, %v4773_v38  ;;  %v4774_v63 = vpack.c.bf16 %v3481_v22, %v3481_v22  ;;  %v5490_v10 = vadd.f32 %v5362_v42, %v5232_v61  ;;  %v2924_v11 = vpop.f32.mrb[73].mxu0 }
 0x1fc   : > { %v5233_v23 = vpop.f32.mrb[74].mxu1  ;;  %4119 = vst.msk [vmem:[%s6436_s4 + $0x110] sm:$0xf] %vm4050_vm3, %v4771_v0  ;;  %v4772_v43 = vpack.c.bf16 %v3479_v31, %v3479_v31  ;;  %v5491_v16 = vadd.f32 %v2924_v11, %v1728_v27  ;;  %v5363_v40 = vpop.f32.mrb[74].mxu0 }
 0x1fd   : > { %v1731_v29 = vpop.f32.mrb[75].mxu1  ;;  %4122 = vst.msk [vmem:[%s6436_s4 + $0x11c] sm:$0xf] %vm4050_vm3, %v4774_v63  ;;  %v3356_v60 = vadd.f32 %v5490_v10, %v6417_v20  ;;  %v5492_v30 = vadd.f32 %v5363_v40, %v5233_v23  ;;  %v2927_v62 = vpop.f32.mrb[75].mxu0 }
 0x1fe   : > { %4120 = vst.msk [vmem:[%s6436_s4 + $0x114] sm:$0xf] %vm4050_vm3, %v4772_v43  ;;  %v3354_v53 = vadd.f32 %v5491_v16, %v6417_v20  ;;  %v5493_v32 = vadd.f32 %v2927_v62, %v1731_v29 }
 0x1ff   : > { %v3484_v9 = vmax.f32 %v3356_v60, 0.0  ;;  %v3357_v2 = vadd.f32 %v5492_v30, %v6417_v20 }
 0x200   : > { %v3482_v17 = vmax.f32 %v3354_v53, 0.0  ;;  %v3355_v1 = vadd.f32 %v5493_v32, %v6417_v20 }
 0x201   : > { %v4777_v55 = vpack.c.bf16 %v3484_v9, %v3484_v9  ;;  %v3485_v8 = vmax.f32 %v3357_v2, 0.0 }
 0x202   : > { %v5236_v37 = vpop.f32.mrb[76].mxu1  ;;  %v4775_v5 = vpack.c.bf16 %v3482_v17, %v3482_v17  ;;  %v3483_v3 = vmax.f32 %v3355_v1, 0.0  ;;  %v5366_v7 = vpop.f32.mrb[76].mxu0 }
 0x203   : > { %v1744_v48 = vpop.f32.mrb[77].mxu1  ;;  %4125 = vst.msk [vmem:[%s6436_s4 + $0x128] sm:$0xf] %vm4050_vm3, %v4777_v55  ;;  %v4778_v58 = vpack.c.bf16 %v3485_v8, %v3485_v8  ;;  %v5494_v45 = vadd.f32 %v5366_v7, %v5236_v37  ;;  %v2940_v24 = vpop.f32.mrb[77].mxu0 }
 0x204   : > { %v5237_v52 = vpop.f32.mrb[78].mxu1  ;;  %4123 = vst.msk [vmem:[%s6436_s4 + $0x120] sm:$0xf] %vm4050_vm3, %v4775_v5  ;;  %v4776_v19 = vpack.c.bf16 %v3483_v3, %v3483_v3  ;;  %v5495_v13 = vadd.f32 %v2940_v24, %v1744_v48  ;;  %v5367_v44 = vpop.f32.mrb[78].mxu0 }
 0x205   : > { %v1747_v47 = vpop.f32.mrb[79].mxu1  ;;  %4126 = vst.msk [vmem:[%s6436_s4 + $0x12c] sm:$0xf] %vm4050_vm3, %v4778_v58  ;;  %v3360_v25 = vadd.f32 %v5494_v45, %v6417_v20  ;;  %v5496_v54 = vadd.f32 %v5367_v44, %v5237_v52  ;;  %v2943_v41 = vpop.f32.mrb[79].mxu0 }
 0x206   : > { %4124 = vst.msk [vmem:[%s6436_s4 + $0x124] sm:$0xf] %vm4050_vm3, %v4776_v19  ;;  %v3358_v46 = vadd.f32 %v5495_v13, %v6417_v20  ;;  %v5497_v57 = vadd.f32 %v2943_v41, %v1747_v47 }
 0x207   : > { %v3488_v15 = vmax.f32 %v3360_v25, 0.0  ;;  %v3361_v33 = vadd.f32 %v6757_v50, %v5496_v54 }
 0x208   : > { %v3486_v4 = vmax.f32 %v3358_v46, 0.0  ;;  %v3359_v59 = vadd.f32 %v6757_v50, %v5497_v57 }
 0x209   : > { %v4781_v56 = vpack.c.bf16 %v3488_v15, %v3488_v15  ;;  %v3489_v12 = vmax.f32 %v3361_v33, 0.0 }
 0x20a   : > { %v5240_v26 = vpop.f32.mrb[80].mxu1  ;;  %v4779_v14 = vpack.c.bf16 %v3486_v4, %v3486_v4  ;;  %v3487_v6 = vmax.f32 %v3359_v59, 0.0  ;;  %v5370_v20 = vpop.f32.mrb[80].mxu0 }
 0x20b   : > { %v1760_v35 = vpop.f32.mrb[81].mxu1  ;;  %4129 = vst.msk [vmem:[%s6436_s4 + $0x138] sm:$0xf] %vm4050_vm3, %v4781_v56  ;;  %v4782_v34 = vpack.c.bf16 %v3489_v12, %v3489_v12  ;;  %v5498_v18 = vadd.f32 %v5370_v20, %v5240_v26  ;;  %v2956_v49 = vpop.f32.mrb[81].mxu0 }
 0x20c   : > { %v5241_v21 = vpop.f32.mrb[82].mxu1  ;;  %4127 = vst.msk [vmem:[%s6436_s4 + $0x130] sm:$0xf] %vm4050_vm3, %v4779_v14  ;;  %v4780_v36 = vpack.c.bf16 %v3487_v6, %v3487_v6  ;;  %v5499_v28 = vadd.f32 %v2956_v49, %v1760_v35  ;;  %v5371_v39 = vpop.f32.mrb[82].mxu0 }
 0x20d   : > { %v1763_v51 = vpop.f32.mrb[83].mxu1  ;;  %4130 = vst.msk [vmem:[%s6436_s4 + $0x13c] sm:$0xf] %vm4050_vm3, %v4782_v34  ;;  %v3364_v38 = vadd.f32 %v6757_v50, %v5498_v18  ;;  %v5500_v22 = vadd.f32 %v5371_v39, %v5241_v21  ;;  %v2959_v61 = vpop.f32.mrb[83].mxu0 }
 0x20e   : > { %4128 = vst.msk [vmem:[%s6436_s4 + $0x134] sm:$0xf] %vm4050_vm3, %v4780_v36  ;;  %v3362_v0 = vadd.f32 %v6757_v50, %v5499_v28  ;;  %v5501_v31 = vadd.f32 %v2959_v61, %v1763_v51 }
 0x20f   : > { %v3492_v42 = vmax.f32 %v3364_v38, 0.0  ;;  %v3365_v27 = vadd.f32 %v6757_v50, %v5500_v22 }
 0x210   : > { %v3490_v63 = vmax.f32 %v3362_v0, 0.0  ;;  %v3363_v10 = vadd.f32 %v6757_v50, %v5501_v31 }
 0x211   : > { %v4785_v11 = vpack.c.bf16 %v3492_v42, %v3492_v42  ;;  %v3493_v23 = vmax.f32 %v3365_v27, 0.0 }
 0x212   : > { %v5244_v43 = vpop.f32.mrb[84].mxu1  ;;  %v4783_v16 = vpack.c.bf16 %v3490_v63, %v3490_v63  ;;  %v3491_v40 = vmax.f32 %v3363_v10, 0.0  ;;  %v5374_v29 = vpop.f32.mrb[84].mxu0 }
 0x213   : > { %v1776_v60 = vpop.f32.mrb[85].mxu1  ;;  %4133 = vst.msk [vmem:[%s6436_s4 + $0x148] sm:$0xf] %vm4050_vm3, %v4785_v11  ;;  %v4786_v30 = vpack.c.bf16 %v3493_v23, %v3493_v23  ;;  %v5502_v62 = vadd.f32 %v5374_v29, %v5244_v43  ;;  %v2972_v53 = vpop.f32.mrb[85].mxu0 }
 0x214   : > { %v5245_v32 = vpop.f32.mrb[86].mxu1  ;;  %4131 = vst.msk [vmem:[%s6436_s4 + $0x140] sm:$0xf] %vm4050_vm3, %v4783_v16  ;;  %v4784_v9 = vpack.c.bf16 %v3491_v40, %v3491_v40  ;;  %v5503_v2 = vadd.f32 %v2972_v53, %v1776_v60  ;;  %v5375_v17 = vpop.f32.mrb[86].mxu0 }
 0x215   : > { %v1779_v1 = vpop.f32.mrb[87].mxu1  ;;  %4134 = vst.msk [vmem:[%s6436_s4 + $0x14c] sm:$0xf] %vm4050_vm3, %v4786_v30  ;;  %v3368_v55 = vadd.f32 %v6757_v50, %v5502_v62  ;;  %v5504_v8 = vadd.f32 %v5375_v17, %v5245_v32  ;;  %v2975_v37 = vpop.f32.mrb[87].mxu0 }
 0x216   : > { %4132 = vst.msk [vmem:[%s6436_s4 + $0x144] sm:$0xf] %vm4050_vm3, %v4784_v9  ;;  %v3366_v5 = vadd.f32 %v6757_v50, %v5503_v2  ;;  %v5505_v3 = vadd.f32 %v2975_v37, %v1779_v1 }
 0x217   : > { %v3496_v7 = vmax.f32 %v3368_v55, 0.0  ;;  %v3369_v48 = vadd.f32 %v6757_v50, %v5504_v8 }
 0x218   : > { %v3494_v58 = vmax.f32 %v3366_v5, 0.0  ;;  %v3367_v45 = vadd.f32 %v6757_v50, %v5505_v3 }
 0x219   : > { %v4789_v24 = vpack.c.bf16 %v3496_v7, %v3496_v7  ;;  %v3497_v52 = vmax.f32 %v3369_v48, 0.0 }
 0x21a   : > { %v5248_v19 = vpop.f32.mrb[88].mxu1  ;;  %v4787_v13 = vpack.c.bf16 %v3494_v58, %v3494_v58  ;;  %v3495_v44 = vmax.f32 %v3367_v45, 0.0  ;;  %v5378_v47 = vpop.f32.mrb[88].mxu0 }
 0x21b   : > { %v1792_v25 = vpop.f32.mrb[89].mxu1  ;;  %4137 = vst.msk [vmem:[%s6436_s4 + $0x158] sm:$0xf] %vm4050_vm3, %v4789_v24  ;;  %v4790_v54 = vpack.c.bf16 %v3497_v52, %v3497_v52  ;;  %v5506_v41 = vadd.f32 %v5378_v47, %v5248_v19  ;;  %v2988_v46 = vpop.f32.mrb[89].mxu0 }
 0x21c   : > { %v5249_v57 = vpop.f32.mrb[90].mxu1  ;;  %4135 = vst.msk [vmem:[%s6436_s4 + $0x150] sm:$0xf] %vm4050_vm3, %v4787_v13  ;;  %v4788_v15 = vpack.c.bf16 %v3495_v44, %v3495_v44  ;;  %v5507_v33 = vadd.f32 %v2988_v46, %v1792_v25  ;;  %v5379_v4 = vpop.f32.mrb[90].mxu0 }
 0x21d   : > { %v1795_v59 = vpop.f32.mrb[91].mxu1  ;;  %4138 = vst.msk [vmem:[%s6436_s4 + $0x15c] sm:$0xf] %vm4050_vm3, %v4790_v54  ;;  %v3372_v56 = vadd.f32 %v6757_v50, %v5506_v41  ;;  %v5508_v12 = vadd.f32 %v5379_v4, %v5249_v57  ;;  %v2991_v26 = vpop.f32.mrb[91].mxu0 }
 0x21e   : > { %4136 = vst.msk [vmem:[%s6436_s4 + $0x154] sm:$0xf] %vm4050_vm3, %v4788_v15  ;;  %v3370_v14 = vadd.f32 %v6757_v50, %v5507_v33  ;;  %v5509_v6 = vadd.f32 %v2991_v26, %v1795_v59 }
 0x21f   : > { %v3500_v20 = vmax.f32 %v3372_v56, 0.0  ;;  %v3373_v35 = vadd.f32 %v6757_v50, %v5508_v12 }
 0x220   : > { %v3498_v34 = vmax.f32 %v3370_v14, 0.0  ;;  %v3371_v18 = vadd.f32 %v6757_v50, %v5509_v6 }
 0x221   : > { %v4793_v49 = vpack.c.bf16 %v3500_v20, %v3500_v20  ;;  %v3501_v21 = vmax.f32 %v3373_v35, 0.0 }
 0x222   : > { %v5252_v36 = vpop.f32.mrb[92].mxu1  ;;  %v4791_v28 = vpack.c.bf16 %v3498_v34, %v3498_v34  ;;  %v3499_v39 = vmax.f32 %v3371_v18, 0.0  ;;  %v5382_v51 = vpop.f32.mrb[92].mxu0 }
 0x223   : > { %v1808_v38 = vpop.f32.mrb[93].mxu1  ;;  %4141 = vst.msk [vmem:[%s6436_s4 + $0x168] sm:$0xf] %vm4050_vm3, %v4793_v49  ;;  %v4794_v22 = vpack.c.bf16 %v3501_v21, %v3501_v21  ;;  %v5510_v61 = vadd.f32 %v5382_v51, %v5252_v36  ;;  %v3004_v0 = vpop.f32.mrb[93].mxu0 }
 0x224   : > { %v5253_v31 = vpop.f32.mrb[94].mxu1  ;;  %4139 = vst.msk [vmem:[%s6436_s4 + $0x160] sm:$0xf] %vm4050_vm3, %v4791_v28  ;;  %v4792_v42 = vpack.c.bf16 %v3499_v39, %v3499_v39  ;;  %v5511_v27 = vadd.f32 %v3004_v0, %v1808_v38  ;;  %v5383_v63 = vpop.f32.mrb[94].mxu0 }
 0x225   : > { %v1811_v10 = vpop.f32.mrb[95].mxu1  ;;  %4142 = vst.msk [vmem:[%s6436_s4 + $0x16c] sm:$0xf] %vm4050_vm3, %v4794_v22  ;;  %v3376_v11 = vadd.f32 %v6757_v50, %v5510_v61  ;;  %v5512_v23 = vadd.f32 %v5383_v63, %v5253_v31  ;;  %v3007_v43 = vpop.f32.mrb[95].mxu0 }
 0x226   : > { %4140 = vst.msk [vmem:[%s6436_s4 + $0x164] sm:$0xf] %vm4050_vm3, %v4792_v42  ;;  %v3374_v16 = vadd.f32 %v6757_v50, %v5511_v27  ;;  %v5513_v40 = vadd.f32 %v3007_v43, %v1811_v10 }
 0x227   : > { %v3504_v29 = vmax.f32 %v3376_v11, 0.0  ;;  %v3377_v60 = vadd.f32 %v6757_v50, %v5512_v23 }
 0x228   : > { %v3502_v30 = vmax.f32 %v3374_v16, 0.0  ;;  %v3375_v62 = vadd.f32 %v6757_v50, %v5513_v40 }
 0x229   : > { %v4797_v53 = vpack.c.bf16 %v3504_v29, %v3504_v29  ;;  %v3505_v32 = vmax.f32 %v3377_v60, 0.0 }
 0x22a   : > { %v5256_v9 = vpop.f32.mrb[96].mxu1  ;;  %v4795_v2 = vpack.c.bf16 %v3502_v30, %v3502_v30  ;;  %v3503_v17 = vmax.f32 %v3375_v62, 0.0  ;;  %v5386_v1 = vpop.f32.mrb[96].mxu0 }
 0x22b   : > { %v1824_v55 = vpop.f32.mrb[97].mxu1  ;;  %4145 = vst.msk [vmem:[%s6436_s4 + $0x178] sm:$0xf] %vm4050_vm3, %v4797_v53  ;;  %v4798_v8 = vpack.c.bf16 %v3505_v32, %v3505_v32  ;;  %v5514_v37 = vadd.f32 %v5386_v1, %v5256_v9  ;;  %v3020_v5 = vpop.f32.mrb[97].mxu0 }
 0x22c   : > { %v5257_v3 = vpop.f32.mrb[98].mxu1  ;;  %4143 = vst.msk [vmem:[%s6436_s4 + $0x170] sm:$0xf] %vm4050_vm3, %v4795_v2  ;;  %v4796_v7 = vpack.c.bf16 %v3503_v17, %v3503_v17  ;;  %v5515_v48 = vadd.f32 %v3020_v5, %v1824_v55  ;;  %v5387_v58 = vpop.f32.mrb[98].mxu0 }
 0x22d   : > { %v1827_v45 = vpop.f32.mrb[99].mxu1  ;;  %4146 = vst.msk [vmem:[%s6436_s4 + $0x17c] sm:$0xf] %vm4050_vm3, %v4798_v8  ;;  %v3380_v24 = vadd.f32 %v6757_v50, %v5514_v37  ;;  %v5516_v52 = vadd.f32 %v5387_v58, %v5257_v3  ;;  %v3023_v19 = vpop.f32.mrb[99].mxu0 }
 0x22e   : > { %4144 = vst.msk [vmem:[%s6436_s4 + $0x174] sm:$0xf] %vm4050_vm3, %v4796_v7  ;;  %v3378_v13 = vadd.f32 %v6757_v50, %v5515_v48  ;;  %v5517_v44 = vadd.f32 %v3023_v19, %v1827_v45 }
 0x22f   : > { %v3508_v47 = vmax.f32 %v3380_v24, 0.0  ;;  %v3381_v25 = vadd.f32 %v6757_v50, %v5516_v52 }
 0x230   : > { %v3506_v54 = vmax.f32 %v3378_v13, 0.0  ;;  %v3379_v41 = vadd.f32 %v6757_v50, %v5517_v44 }
 0x231   : > { %v4801_v46 = vpack.c.bf16 %v3508_v47, %v3508_v47  ;;  %v3509_v57 = vmax.f32 %v3381_v25, 0.0 }
 0x232   : > { %v5260_v15 = vpop.f32.mrb[100].mxu1  ;;  %v4799_v33 = vpack.c.bf16 %v3506_v54, %v3506_v54  ;;  %v3507_v4 = vmax.f32 %v3379_v41, 0.0  ;;  %v5390_v59 = vpop.f32.mrb[100].mxu0 }
 0x233   : > { %v1840_v56 = vpop.f32.mrb[101].mxu1  ;;  %4149 = vst.msk [vmem:[%s6436_s4 + $0x188] sm:$0xf] %vm4050_vm3, %v4801_v46  ;;  %v4802_v12 = vpack.c.bf16 %v3509_v57, %v3509_v57  ;;  %v5518_v26 = vadd.f32 %v5390_v59, %v5260_v15  ;;  %v3036_v14 = vpop.f32.mrb[101].mxu0 }
 0x234   : > { %v5261_v6 = vpop.f32.mrb[102].mxu1  ;;  %4147 = vst.msk [vmem:[%s6436_s4 + $0x180] sm:$0xf] %vm4050_vm3, %v4799_v33  ;;  %v4800_v20 = vpack.c.bf16 %v3507_v4, %v3507_v4  ;;  %v5519_v35 = vadd.f32 %v3036_v14, %v1840_v56  ;;  %v5391_v34 = vpop.f32.mrb[102].mxu0 }
 0x235   : > { %v1843_v18 = vpop.f32.mrb[103].mxu1  ;;  %4150 = vst.msk [vmem:[%s6436_s4 + $0x18c] sm:$0xf] %vm4050_vm3, %v4802_v12  ;;  %v3384_v49 = vadd.f32 %v6757_v50, %v5518_v26  ;;  %v5520_v21 = vadd.f32 %v5391_v34, %v5261_v6  ;;  %v3039_v36 = vpop.f32.mrb[103].mxu0 }
 0x236   : > { %4148 = vst.msk [vmem:[%s6436_s4 + $0x184] sm:$0xf] %vm4050_vm3, %v4800_v20  ;;  %v3382_v28 = vadd.f32 %v6757_v50, %v5519_v35  ;;  %v5521_v39 = vadd.f32 %v3039_v36, %v1843_v18 }
 0x237   : > { %v3512_v51 = vmax.f32 %v3384_v49, 0.0  ;;  %v3385_v38 = vadd.f32 %v6757_v50, %v5520_v21 }
 0x238   : > { %v3510_v22 = vmax.f32 %v3382_v28, 0.0  ;;  %v3383_v61 = vadd.f32 %v6757_v50, %v5521_v39 }
 0x239   : > { %v4805_v0 = vpack.c.bf16 %v3512_v51, %v3512_v51  ;;  %v3513_v31 = vmax.f32 %v3385_v38, 0.0 }
 0x23a   : > { %v5264_v42 = vpop.f32.mrb[104].mxu1  ;;  %v4803_v27 = vpack.c.bf16 %v3510_v22, %v3510_v22  ;;  %v3511_v63 = vmax.f32 %v3383_v61, 0.0  ;;  %v5394_v10 = vpop.f32.mrb[104].mxu0 }
 0x23b   : > { %v1856_v11 = vpop.f32.mrb[105].mxu1  ;;  %4153 = vst.msk [vmem:[%s6436_s4 + $0x198] sm:$0xf] %vm4050_vm3, %v4805_v0  ;;  %v4806_v23 = vpack.c.bf16 %v3513_v31, %v3513_v31  ;;  %v5522_v43 = vadd.f32 %v5394_v10, %v5264_v42  ;;  %v3052_v16 = vpop.f32.mrb[105].mxu0 }
 0x23c   : > { %v5265_v40 = vpop.f32.mrb[106].mxu1  ;;  %4151 = vst.msk [vmem:[%s6436_s4 + $0x190] sm:$0xf] %vm4050_vm3, %v4803_v27  ;;  %v4804_v29 = vpack.c.bf16 %v3511_v63, %v3511_v63  ;;  %v5523_v60 = vadd.f32 %v3052_v16, %v1856_v11  ;;  %v5395_v30 = vpop.f32.mrb[106].mxu0 }
 0x23d   : > { %v1859_v62 = vpop.f32.mrb[107].mxu1  ;;  %4154 = vst.msk [vmem:[%s6436_s4 + $0x19c] sm:$0xf] %vm4050_vm3, %v4806_v23  ;;  %v3388_v53 = vadd.f32 %v6757_v50, %v5522_v43  ;;  %v5524_v32 = vadd.f32 %v5395_v30, %v5265_v40  ;;  %v3055_v9 = vpop.f32.mrb[107].mxu0 }
 0x23e   : > { %4152 = vst.msk [vmem:[%s6436_s4 + $0x194] sm:$0xf] %vm4050_vm3, %v4804_v29  ;;  %v3386_v2 = vadd.f32 %v6757_v50, %v5523_v60  ;;  %v5525_v17 = vadd.f32 %v3055_v9, %v1859_v62 }
 0x23f   : > { %v3516_v1 = vmax.f32 %v3388_v53, 0.0  ;;  %v3389_v55 = vadd.f32 %v6757_v50, %v5524_v32 }
 0x240   : > { %v3514_v8 = vmax.f32 %v3386_v2, 0.0  ;;  %v3387_v37 = vadd.f32 %v6757_v50, %v5525_v17 }
 0x241   : > { %v4809_v5 = vpack.c.bf16 %v3516_v1, %v3516_v1  ;;  %v3517_v3 = vmax.f32 %v3389_v55, 0.0 }
 0x242   : > { %v5268_v7 = vpop.f32.mrb[108].mxu1  ;;  %v4807_v48 = vpack.c.bf16 %v3514_v8, %v3514_v8  ;;  %v3515_v58 = vmax.f32 %v3387_v37, 0.0  ;;  %v5398_v45 = vpop.f32.mrb[108].mxu0 }
 0x243   : > { %v1872_v24 = vpop.f32.mrb[109].mxu1  ;;  %4157 = vst.msk [vmem:[%s6436_s4 + $0x1a8] sm:$0xf] %vm4050_vm3, %v4809_v5  ;;  %v4810_v52 = vpack.c.bf16 %v3517_v3, %v3517_v3  ;;  %v5526_v19 = vadd.f32 %v5398_v45, %v5268_v7  ;;  %v3068_v13 = vpop.f32.mrb[109].mxu0 }
 0x244   : > { %v5269_v44 = vpop.f32.mrb[110].mxu1  ;;  %4155 = vst.msk [vmem:[%s6436_s4 + $0x1a0] sm:$0xf] %vm4050_vm3, %v4807_v48  ;;  %v4808_v47 = vpack.c.bf16 %v3515_v58, %v3515_v58  ;;  %v5527_v25 = vadd.f32 %v3068_v13, %v1872_v24  ;;  %v5399_v54 = vpop.f32.mrb[110].mxu0 }
 0x245   : > { %v1875_v41 = vpop.f32.mrb[111].mxu1  ;;  %4158 = vst.msk [vmem:[%s6436_s4 + $0x1ac] sm:$0xf] %vm4050_vm3, %v4810_v52  ;;  %v3392_v46 = vadd.f32 %v6757_v50, %v5526_v19  ;;  %v5528_v57 = vadd.f32 %v5399_v54, %v5269_v44  ;;  %v3071_v15 = vpop.f32.mrb[111].mxu0 }
 0x246   : > { %4156 = vst.msk [vmem:[%s6436_s4 + $0x1a4] sm:$0xf] %vm4050_vm3, %v4808_v47  ;;  %v3390_v33 = vadd.f32 %v6757_v50, %v5527_v25  ;;  %v5529_v4 = vadd.f32 %v3071_v15, %v1875_v41 }
 0x247   : > { %v3520_v59 = vmax.f32 %v3392_v46, 0.0  ;;  %v3393_v56 = vadd.f32 %v6757_v50, %v5528_v57 }
 0x248   : > { %v3518_v12 = vmax.f32 %v3390_v33, 0.0  ;;  %v3391_v26 = vadd.f32 %v6757_v50, %v5529_v4 }
 0x249   : > { %v4813_v14 = vpack.c.bf16 %v3520_v59, %v3520_v59  ;;  %v3521_v6 = vmax.f32 %v3393_v56, 0.0 }
 0x24a   : > { %v5272_v20 = vpop.f32.mrb[112].mxu1  ;;  %v4811_v35 = vpack.c.bf16 %v3518_v12, %v3518_v12  ;;  %v3519_v34 = vmax.f32 %v3391_v26, 0.0  ;;  %v5402_v18 = vpop.f32.mrb[112].mxu0 }
 0x24b   : > { %v1888_v49 = vpop.f32.mrb[113].mxu1  ;;  %4161 = vst.msk [vmem:[%s6436_s4 + $0x1b8] sm:$0xf] %vm4050_vm3, %v4813_v14  ;;  %v4814_v21 = vpack.c.bf16 %v3521_v6, %v3521_v6  ;;  %v5530_v36 = vadd.f32 %v5402_v18, %v5272_v20  ;;  %v3084_v28 = vpop.f32.mrb[113].mxu0 }
 0x24c   : > { %v5273_v39 = vpop.f32.mrb[114].mxu1  ;;  %4159 = vst.msk [vmem:[%s6436_s4 + $0x1b0] sm:$0xf] %vm4050_vm3, %v4811_v35  ;;  %v4812_v51 = vpack.c.bf16 %v3519_v34, %v3519_v34  ;;  %v5531_v38 = vadd.f32 %v3084_v28, %v1888_v49  ;;  %v5403_v22 = vpop.f32.mrb[114].mxu0 }
 0x24d   : > { %v1891_v61 = vpop.f32.mrb[115].mxu1  ;;  %4162 = vst.msk [vmem:[%s6436_s4 + $0x1bc] sm:$0xf] %vm4050_vm3, %v4814_v21  ;;  %v3396_v0 = vadd.f32 %v6757_v50, %v5530_v36  ;;  %v5532_v31 = vadd.f32 %v5403_v22, %v5273_v39  ;;  %v3087_v42 = vpop.f32.mrb[115].mxu0 }
 0x24e   : > { %4160 = vst.msk [vmem:[%s6436_s4 + $0x1b4] sm:$0xf] %vm4050_vm3, %v4812_v51  ;;  %v3394_v27 = vadd.f32 %v6757_v50, %v5531_v38  ;;  %v5533_v63 = vadd.f32 %v3087_v42, %v1891_v61 }
 0x24f   : > { %v3524_v10 = vmax.f32 %v3396_v0, 0.0  ;;  %v3397_v11 = vadd.f32 %v6757_v50, %v5532_v31 }
 0x250   : > { %v3522_v23 = vmax.f32 %v3394_v27, 0.0  ;;  %v3395_v43 = vadd.f32 %v6757_v50, %v5533_v63 }
 0x251   : > { %v4817_v16 = vpack.c.bf16 %v3524_v10, %v3524_v10  ;;  %v3525_v40 = vmax.f32 %v3397_v11, 0.0 }
 0x252   : > { %v5276_v29 = vpop.f32.mrb[116].mxu1  ;;  %v4815_v60 = vpack.c.bf16 %v3522_v23, %v3522_v23  ;;  %v3523_v30 = vmax.f32 %v3395_v43, 0.0  ;;  %v5406_v62 = vpop.f32.mrb[116].mxu0 }
 0x253   : > { %v1904_v53 = vpop.f32.mrb[117].mxu1  ;;  %4165 = vst.msk [vmem:[%s6436_s4 + $0x1c8] sm:$0xf] %vm4050_vm3, %v4817_v16  ;;  %v4818_v32 = vpack.c.bf16 %v3525_v40, %v3525_v40  ;;  %v5534_v9 = vadd.f32 %v5406_v62, %v5276_v29  ;;  %v3100_v2 = vpop.f32.mrb[117].mxu0 }
 0x254   : > { %v5277_v17 = vpop.f32.mrb[118].mxu1  ;;  %4163 = vst.msk [vmem:[%s6436_s4 + $0x1c0] sm:$0xf] %vm4050_vm3, %v4815_v60  ;;  %v4816_v1 = vpack.c.bf16 %v3523_v30, %v3523_v30  ;;  %v5535_v55 = vadd.f32 %v3100_v2, %v1904_v53  ;;  %v5407_v8 = vpop.f32.mrb[118].mxu0 }
 0x255   : > { %v1907_v37 = vpop.f32.mrb[119].mxu1  ;;  %4166 = vst.msk [vmem:[%s6436_s4 + $0x1cc] sm:$0xf] %vm4050_vm3, %v4818_v32  ;;  %v3400_v5 = vadd.f32 %v6757_v50, %v5534_v9  ;;  %v5536_v3 = vadd.f32 %v5407_v8, %v5277_v17  ;;  %v3103_v7 = vpop.f32.mrb[119].mxu0 }
 0x256   : > { %4164 = vst.msk [vmem:[%s6436_s4 + $0x1c4] sm:$0xf] %vm4050_vm3, %v4816_v1  ;;  %v3398_v48 = vadd.f32 %v6757_v50, %v5535_v55  ;;  %v5537_v58 = vadd.f32 %v3103_v7, %v1907_v37 }
 0x257   : > { %v3528_v45 = vmax.f32 %v3400_v5, 0.0  ;;  %v3401_v24 = vadd.f32 %v6757_v50, %v5536_v3 }
 0x258   : > { %v3526_v52 = vmax.f32 %v3398_v48, 0.0  ;;  %v3399_v19 = vadd.f32 %v6757_v50, %v5537_v58 }
 0x259   : > { %v4821_v13 = vpack.c.bf16 %v3528_v45, %v3528_v45  ;;  %v3529_v44 = vmax.f32 %v3401_v24, 0.0 }
 0x25a   : > { %v5280_v47 = vpop.f32.mrb[120].mxu1  ;;  %v4819_v25 = vpack.c.bf16 %v3526_v52, %v3526_v52  ;;  %v3527_v54 = vmax.f32 %v3399_v19, 0.0  ;;  %v5410_v41 = vpop.f32.mrb[120].mxu0 }
 0x25b   : > { %v1920_v46 = vpop.f32.mrb[121].mxu1  ;;  %4169 = vst.msk [vmem:[%s6436_s4 + $0x1d8] sm:$0xf] %vm4050_vm3, %v4821_v13  ;;  %v4822_v57 = vpack.c.bf16 %v3529_v44, %v3529_v44  ;;  %v5538_v15 = vadd.f32 %v5410_v41, %v5280_v47  ;;  %v3116_v33 = vpop.f32.mrb[121].mxu0 }
 0x25c   : > { %v5281_v4 = vpop.f32.mrb[122].mxu1  ;;  %4167 = vst.msk [vmem:[%s6436_s4 + $0x1d0] sm:$0xf] %vm4050_vm3, %v4819_v25  ;;  %v4820_v59 = vpack.c.bf16 %v3527_v54, %v3527_v54  ;;  %v5539_v56 = vadd.f32 %v3116_v33, %v1920_v46  ;;  %v5411_v12 = vpop.f32.mrb[122].mxu0 }
 0x25d   : > { %v1923_v26 = vpop.f32.mrb[123].mxu1  ;;  %4170 = vst.msk [vmem:[%s6436_s4 + $0x1dc] sm:$0xf] %vm4050_vm3, %v4822_v57  ;;  %v3404_v14 = vadd.f32 %v6757_v50, %v5538_v15  ;;  %v5540_v6 = vadd.f32 %v5411_v12, %v5281_v4  ;;  %v3119_v20 = vpop.f32.mrb[123].mxu0 }
 0x25e   : > { %4168 = vst.msk [vmem:[%s6436_s4 + $0x1d4] sm:$0xf] %vm4050_vm3, %v4820_v59  ;;  %v3402_v35 = vadd.f32 %v6757_v50, %v5539_v56  ;;  %v5541_v34 = vadd.f32 %v3119_v20, %v1923_v26 }
 0x25f   : > { %v3532_v18 = vmax.f32 %v3404_v14, 0.0  ;;  %v3405_v49 = vadd.f32 %v6757_v50, %v5540_v6 }
 0x260   : > { %v3530_v21 = vmax.f32 %v3402_v35, 0.0  ;;  %v3403_v36 = vadd.f32 %v6757_v50, %v5541_v34 }
 0x261   : > { %v4825_v28 = vpack.c.bf16 %v3532_v18, %v3532_v18  ;;  %v3533_v39 = vmax.f32 %v3405_v49, 0.0 }
 0x262   : > { %v5284_v51 = vpop.f32.mrb[124].mxu1  ;;  %v4823_v38 = vpack.c.bf16 %v3530_v21, %v3530_v21  ;;  %v3531_v22 = vmax.f32 %v3403_v36, 0.0  ;;  %v5414_v61 = vpop.f32.mrb[124].mxu0 }
 0x263   : > { %v1936_v0 = vpop.f32.mrb[125].mxu1  ;;  %4173 = vst.msk [vmem:[%s6436_s4 + $0x1e8] sm:$0xf] %vm4050_vm3, %v4825_v28  ;;  %v4826_v31 = vpack.c.bf16 %v3533_v39, %v3533_v39  ;;  %v5542_v42 = vadd.f32 %v5414_v61, %v5284_v51  ;;  %v3132_v27 = vpop.f32.mrb[125].mxu0 }
 0x264   : > { %v5285_v63 = vpop.f32.mrb[126].mxu1  ;;  %4171 = vst.msk [vmem:[%s6436_s4 + $0x1e0] sm:$0xf] %vm4050_vm3, %v4823_v38  ;;  %v4824_v10 = vpack.c.bf16 %v3531_v22, %v3531_v22  ;;  %v5543_v11 = vadd.f32 %v3132_v27, %v1936_v0  ;;  %v5415_v23 = vpop.f32.mrb[126].mxu0 }
 0x265   : > { %v1939_v43 = vpop.f32.mrb[127].mxu1  ;;  %4174 = vst.msk [vmem:[%s6436_s4 + $0x1ec] sm:$0xf] %vm4050_vm3, %v4826_v31  ;;  %v3408_v16 = vadd.f32 %v6757_v50, %v5542_v42  ;;  %v5544_v40 = vadd.f32 %v5415_v23, %v5285_v63  ;;  %v3135_v29 = vpop.f32.mrb[127].mxu0 }
 0x266   : > { %4172 = vst.msk [vmem:[%s6436_s4 + $0x1e4] sm:$0xf] %vm4050_vm3, %v4824_v10  ;;  %v3406_v60 = vadd.f32 %v6757_v50, %v5543_v11  ;;  %v5545_v30 = vadd.f32 %v3135_v29, %v1939_v43 }
 0x267   : > { %v3536_v62 = vmax.f32 %v3408_v16, 0.0  ;;  %v3409_v53 = vadd.f32 %v6757_v50, %v5544_v40 }
 0x268   : > { %v3534_v32 = vmax.f32 %v3406_v60, 0.0  ;;  %v3407_v9 = vadd.f32 %v6757_v50, %v5545_v30 }
 0x269   : > { %v4829_v2 = vpack.c.bf16 %v3536_v62, %v3536_v62  ;;  %v3537_v17 = vmax.f32 %v3409_v53, 0.0 }
 0x26a   : > { %v4827_v1 = vpack.c.bf16 %v3534_v32, %v3534_v32  ;;  %v3535_v55 = vmax.f32 %v3407_v9, 0.0 }
 0x26b   : > { %4177 = vst.msk [vmem:[%s6436_s4 + $0x1f8] sm:$0xf] %vm4050_vm3, %v4829_v2  ;;  %v4830_v8 = vpack.c.bf16 %v3537_v17, %v3537_v17 }
 0x26c   : > { %4175 = vst.msk [vmem:[%s6436_s4 + $0x1f0] sm:$0xf] %vm4050_vm3, %v4827_v1  ;;  %v4828_v37 = vpack.c.bf16 %v3535_v55, %v3535_v55 }
 0x26d   : > { %4178 = vst.msk [vmem:[%s6436_s4 + $0x1fc] sm:$0xf] %vm4050_vm3, %v4830_v8 }
 0x26e   : > { %4176 = vst.msk [vmem:[%s6436_s4 + $0x1f4] sm:$0xf] %vm4050_vm3, %v4828_v37 }
 0x26f PF: > { %s13_s12 = sadd.s32 1, %s5823_s12  }
 0x270   : > { %p10_p5 = scmp.ge.s32.totalorder %s13_s12, 4  }
 0x272   :  { %12 = sbr.rel (!%p10_p5) target bundleno = 1 (0x1), region = 64 }

// kernel: adam_only_cnn_forward.13
= control target key start
LH: loop header
LB: loop body
LE: loop exit
PB: predicated region body
PF: predicated region fallthrough
CT: control target
= control target key end

     0   :  { %s86_s22 = smov 64   ;;  %vm72_vm0 = vcmask 517120   ;;  %s177_s0 = inlined_call_operand.vmem [shape: bf16[8,2,4,128], index: 0, kind: input, shape index: {}]   ;;  %s178_s1 = inlined_call_operand.vmem [shape: bf16[8,4,64], index: 1, kind: output, shape index: {}]  }
   0x1   :  { %v12_v0 = vld [vmem:[%s177_s0 + $0x8] sm:$0x3]  ;;  %v13_v1 = vld [vmem:[%s177_s0 + $0xa] sm:$0x3]  ;;  %v8_v2 = vld [vmem:[%s177_s0] sm:$0x3] }
   0x2   :  { %v26_v3 = vmax.bf16 %v13_v1, %v12_v0  ;;  %v9_v4 = vld [vmem:[%s177_s0 + $0x2] sm:$0x3]  ;;  %v14_v5 = vld [vmem:[%s177_s0 + $0xc] sm:$0x3]  ;;  %v15_v6 = vld [vmem:[%s177_s0 + $0xe] sm:$0x3] }
   0x3   :  { %v24_v7 = vmax.bf16 %v9_v4, %v8_v2  ;;  %v10_v8 = vld [vmem:[%s177_s0 + $0x4] sm:$0x3]  ;;  %v11_v9 = vld [vmem:[%s177_s0 + $0x6] sm:$0x3]  ;;  %v27_v10 = vmax.bf16 %v15_v6, %v14_v5  ;;  %v18_v12 = vld [vmem:[%s177_s0 + $0x14] sm:$0x3] }
   0x4   :  { %44 = vrot.lane.b32.xlu1 %v26_v3, %s86_s22  ;;  %v25_v11 = vmax.bf16 %v11_v9, %v10_v8  ;;  %v19_v13 = vld [vmem:[%s177_s0 + $0x16] sm:$0x3]  ;;  %v16_v14 = vld [vmem:[%s177_s0 + $0x10] sm:$0x3]  ;;  %v17_v15 = vld [vmem:[%s177_s0 + $0x12] sm:$0x3] }
   0x5   :  { %40 = vrot.lane.b32.xlu0 %v24_v7, %s86_s22  ;;  %v29_v16 = vmax.bf16 %v19_v13, %v18_v12  ;;  %v28_v17 = vmax.bf16 %v17_v15, %v16_v14  ;;  %v22_v18 = vld [vmem:[%s177_s0 + $0x1c] sm:$0x3]  ;;  %v23_v19 = vld [vmem:[%s177_s0 + $0x1e] sm:$0x3]  ;;  %v20_v20 = vld [vmem:[%s177_s0 + $0x18] sm:$0x3] }
   0x6   :  { %v21_v21 = vld [vmem:[%s177_s0 + $0x1a] sm:$0x3]  ;;  %v31_v22 = vmax.bf16 %v23_v19, %v22_v18 }
   0x7   :  { %v30_v23 = vmax.bf16 %v21_v21, %v20_v20 }
   0x8   :  { %46 = vrot.lane.b32.xlu1 %v27_v10, %s86_s22 }
   0x9   :  { %42 = vrot.lane.b32.xlu0 %v25_v11, %s86_s22 }
   0xc   :  { %50 = vrot.lane.b32.xlu1 %v29_v16, %s86_s22 }
   0xd   :  { %48 = vrot.lane.b32.xlu0 %v28_v17, %s86_s22 }
  0x10   :  { %54 = vrot.lane.b32.xlu1 %v31_v22, %s86_s22 }
  0x11   :  { %52 = vrot.lane.b32.xlu0 %v30_v23, %s86_s22 }
  0x76   :  { %v45_v24 = vpop.permute.xlu1 %44 }
  0x77   :  { %v66_v25 = vmax.bf16 %v45_v24, %v26_v3  ;;  %v41_v26 = vpop.permute.xlu0 %40 }
  0x78   :  { %v64_v27 = vmax.bf16 %v41_v26, %v24_v7 }
  0x79   :  { %75 = vst.msk [vmem:[%s178_s1 + $0x4] sm:$0x3] %vm72_vm0, %v66_v25 }
  0x7a   :  { %73 = vst.msk [vmem:[%s178_s1] sm:$0x3] %vm72_vm0, %v64_v27  ;;  %v47_v28 = vpop.permute.xlu1 %46 }
  0x7b   :  { %v67_v29 = vmax.bf16 %v47_v28, %v27_v10  ;;  %v43_v30 = vpop.permute.xlu0 %42 }
  0x7c   :  { %v65_v31 = vmax.bf16 %v43_v30, %v25_v11 }
  0x7d   :  { %76 = vst.msk [vmem:[%s178_s1 + $0x6] sm:$0x3] %vm72_vm0, %v67_v29 }
  0x7e   :  { %74 = vst.msk [vmem:[%s178_s1 + $0x2] sm:$0x3] %vm72_vm0, %v65_v31  ;;  %v51_v32 = vpop.permute.xlu1 %50 }
  0x7f   :  { %v69_v33 = vmax.bf16 %v51_v32, %v29_v16  ;;  %v49_v34 = vpop.permute.xlu0 %48 }
  0x80   :  { %v68_v35 = vmax.bf16 %v49_v34, %v28_v17 }
  0x81   :  { %78 = vst.msk [vmem:[%s178_s1 + $0xa] sm:$0x3] %vm72_vm0, %v69_v33 }
  0x82   :  { %77 = vst.msk [vmem:[%s178_s1 + $0x8] sm:$0x3] %vm72_vm0, %v68_v35  ;;  %v55_v36 = vpop.permute.xlu1 %54 }
  0x83   :  { %v71_v37 = vmax.bf16 %v55_v36, %v31_v22  ;;  %v53_v38 = vpop.permute.xlu0 %52 }
  0x84   :  { %v70_v39 = vmax.bf16 %v53_v38, %v30_v23 }
  0x85   :  { %80 = vst.msk [vmem:[%s178_s1 + $0xe] sm:$0x3] %vm72_vm0, %v71_v37 }
  0x86   :  { %79 = vst.msk [vmem:[%s178_s1 + $0xc] sm:$0x3] %vm72_vm0, %v70_v39 }

// kernel: adam_only_cnn_forward.12
= control target key start
LH: loop header
LB: loop body
LE: loop exit
PB: predicated region body
PF: predicated region fallthrough
CT: control target
= control target key end

     0   :  { %s1505_s12 = smov 0   ;;  %s1860_s0 = inlined_call_operand.vmem [shape: bf16[320,192], index: 0, kind: input, shape index: {}]   ;;  %s1861_s1 = inlined_call_operand.vmem [shape: bf16[3,192,64], index: 1, kind: input, shape index: {}]   ;;  %s1862_s2 = inlined_call_operand.vmem [shape: f32[1,64], index: 2, kind: input, shape index: {}]   ;;  %s1863_s3 = inlined_call_operand.vmem [shape: bf16[256,64], index: 3, kind: output, shape index: {}]  }
   0x1 LB: > { %s1190_s13 = sadd.s32 4294967295, %s1482_s12   ;;  %p1194_p0 = scmp.ge.s32.totalorder %s1482_s12, 1  ;;  %s1482_s12 = sphi %s1505_s12, %s13_s12  }
   0x2   : > { %p139_p1 = scmp.lt.s32.totalorder %s1482_s12, 3 }
   0x4   : > { %p140_p2 = pnand %p1194_p0, %p139_p1 }
   0x5   : > { %v1410_v0 = vld [vmem:[%s1861_s1 + $0x60] sm:$0xff] (!%p140_p2)   ;;  %v1484_v1 = vmov (!%p140_p2), 0   ;;  %v1412_v3 = vld [vmem:[%s1861_s1 + $0x68] sm:$0xff] (!%p140_p2)   ;;  %v1414_v5 = vld [vmem:[%s1861_s1 + $0x70] sm:$0xff] (!%p140_p2)   ;;  %s164_s26 = smul.u32 (!%p140_p2), 20, %s1190_s13  ;;  %vm389_vm0 = vcmask (!%p140_p2), 523264  }
   0x6   : > { %143 = sbr.rel (%p140_p2) target bundleno = 365 (0x16d), region = 32  ;;  %414 = vmatprep.subr.bf16.mxu0 (!%p140_p2), %v1484_v1  ;;  %595 = vmatprep.subr.bf16.mxu1 (!%p140_p2), %v1484_v1  ;;  %v1411_v2 = vld [vmem:[%s1861_s1] sm:$0xff] (!%p140_p2)   ;;  %v1413_v4 = vld [vmem:[%s1861_s1 + $0x8] sm:$0xff] (!%p140_p2)   ;;  %v1415_v6 = vld [vmem:[%s1861_s1 + $0x10] sm:$0xff] (!%p140_p2)   ;;  %vm1117_vm1 = vcmask (!%p140_p2), 519168  }
   0x7   : > { %415 = vmatpush1.bf16.msra.mxu0 (!%p140_p2), %v1410_v0  ;;  %596 = vmatpush1.bf16.msra.mxu1 (!%p140_p2), %v1411_v2  ;;  %v1416_v7 = vld [vmem:[%s1861_s1 + $0x78] sm:$0xff] (!%p140_p2)   ;;  %p165_p3 = scmp.lt.s32.totalorder (!%p140_p2), %s164_s26, 39  ;;  %v1418_v9 = vld [vmem:[%s1861_s1 + $0x80] sm:$0xff] (!%p140_p2)   ;;  %v1420_v11 = vld [vmem:[%s1861_s1 + $0x88] sm:$0xff] (!%p140_p2)  }
   0x8   : > { %416 = vmatprep.subr.bf16.mxu0 (!%p140_p2), %v1484_v1  ;;  %597 = vmatprep.subr.bf16.mxu1 (!%p140_p2), %v1484_v1  ;;  %v1417_v8 = vld [vmem:[%s1861_s1 + $0x18] sm:$0xff] (!%p140_p2)   ;;  %v1419_v10 = vld [vmem:[%s1861_s1 + $0x20] sm:$0xff] (!%p140_p2)   ;;  %v1421_v12 = vld [vmem:[%s1861_s1 + $0x28] sm:$0xff] (!%p140_p2)  }
   0x9   : > { %v1422_v13 = vld [vmem:[%s1861_s1 + $0x90] sm:$0xff] (!%p140_p2)   ;;  %v1424_v16 = vld [vmem:[%s1861_s1 + $0x98] sm:$0xff] (!%p140_p2)   ;;  %v1426_v19 = vld [vmem:[%s1861_s1 + $0xa0] sm:$0xff] (!%p140_p2)  }
   0xa   : > { %v1423_v14 = vld [vmem:[%s1861_s1 + $0x30] sm:$0xff] (!%p140_p2)   ;;  %v1425_v18 = vld [vmem:[%s1861_s1 + $0x38] sm:$0xff] (!%p140_p2)   ;;  %v1427_v20 = vld [vmem:[%s1861_s1 + $0x40] sm:$0xff] (!%p140_p2)  }
   0xb   : > { %417 = vmatpush1.bf16.msra.mxu0 (!%p140_p2), %v1412_v3  ;;  %598 = vmatpush1.bf16.msra.mxu1 (!%p140_p2), %v1413_v4  ;;  %v1428_v21 = vld [vmem:[%s1861_s1 + $0xa8] sm:$0xff] (!%p140_p2)   ;;  %v1430_v23 = vld [vmem:[%s1861_s1 + $0xb0] sm:$0xff] (!%p140_p2)   ;;  %v1432_v25 = vld [vmem:[%s1861_s1 + $0xb8] sm:$0xff] (!%p140_p2)  }
   0xc   : > { %418 = vmatprep.subr.bf16.mxu0 (!%p140_p2), %v1484_v1  ;;  %599 = vmatprep.subr.bf16.mxu1 (!%p140_p2), %v1484_v1  ;;  %v1429_v22 = vld [vmem:[%s1861_s1 + $0x48] sm:$0xff] (!%p140_p2)   ;;  %v1431_v24 = vld [vmem:[%s1861_s1 + $0x50] sm:$0xff] (!%p140_p2)   ;;  %v1433_v26 = vld [vmem:[%s1861_s1 + $0x58] sm:$0xff] (!%p140_p2)  }
   0xd   : > { %s1865_s26 = smov (!%p165_p3, %s164_s26), 39  ;;  %v1440_v29 = vld [vmem:[%s1861_s1 + $0xc0] sm:$0xff]   ;;  %v1443_v31 = vld [vmem:[%s1861_s1 + $0xc8] sm:$0xff]   ;;  %v1445_v33 = vld [vmem:[%s1861_s1 + $0xd0] sm:$0xff]  }
   0xe   : > { %s1360_s14 = sshll.u32 %s1865_s26, 3  ;;  %v1449_v35 = vld [vmem:[%s1861_s1 + $0xd8] sm:$0xff]   ;;  %v1452_v38 = vld [vmem:[%s1861_s1 + $0xe0] sm:$0xff]   ;;  %v1454_v39 = vld [vmem:[%s1861_s1 + $0xe8] sm:$0xff]  }
   0xf   : > { %419 = vmatpush1.bf16.msra.mxu0 %v1414_v5  ;;  %600 = vmatpush1.bf16.msra.mxu1 %v1415_v6  ;;  %s1569_s19 = scalar_lea.vmem %s1860_s0, %s1360_s14  ;;  %v1458_v42 = vld [vmem:[%s1861_s1 + $0xf0] sm:$0xff]   ;;  %v1461_v43 = vld [vmem:[%s1861_s1 + $0xf8] sm:$0xff]   ;;  %v1463_v46 = vld [vmem:[%s1861_s1 + $0x100] sm:$0xff]  }
  0x10   : > { %420 = vmatprep.subr.bf16.mxu0 %v1484_v1  ;;  %601 = vmatprep.subr.bf16.mxu1 %v1484_v1  ;;  %v1436_v15 = vld [vmem:[%s1569_s19 + $0x14] ss:$8 sps:$4 sm:$0xff]   ;;  %v1439_v17 = vld [vmem:[%s1569_s19 + $0x4] ss:$8 sps:$4 sm:$0xff]   ;;  %v1434_v27 = vld [vmem:[%s1569_s19 + $0x10] ss:$8 sps:$4 sm:$0xff]  }
  0x11   : > { %1251 = vmatprep.mubr.msk.bf16.mxu0 %vm389_vm0, %v1436_v15  ;;  %1273 = vmatprep.mubr.msk.bf16.mxu1 %vm389_vm0, %v1439_v17  ;;  %v1437_v28 = vld [vmem:[%s1569_s19] ss:$8 sps:$4 sm:$0xff]   ;;  %v1628_v30 = vld [vmem:[%s1569_s19 + $0x24] ss:$8 sps:$4 sm:$0xff]   ;;  %v1646_v34 = vld [vmem:[%s1569_s19 + $0x34] ss:$8 sps:$4 sm:$0xff]  }
  0x12   : > { %v1639_v32 = vld [vmem:[%s1569_s19 + $0x20] ss:$8 sps:$4 sm:$0xff]   ;;  %v1659_v36 = vld [vmem:[%s1569_s19 + $0x30] ss:$8 sps:$4 sm:$0xff]   ;;  %v1663_v37 = vld [vmem:[%s1569_s19 + $0x44] ss:$8 sps:$4 sm:$0xff]  }
  0x13   : > { %421 = vmatpush1.bf16.msra.mxu0 %v1416_v7  ;;  %602 = vmatpush1.bf16.msra.mxu1 %v1417_v8  ;;  %v1681_v40 = vld [vmem:[%s1569_s19 + $0x40] ss:$8 sps:$4 sm:$0xff]   ;;  %v1685_v41 = vld [vmem:[%s1569_s19 + $0x54] ss:$8 sps:$4 sm:$0xff]   ;;  %v1457_v44 = vld [vmem:[%s1569_s19 + $0x50] ss:$8 sps:$4 sm:$0xff]  }
  0x14   : > { %422 = vmatprep.subr.bf16.mxu0 %v1484_v1  ;;  %603 = vmatprep.subr.bf16.mxu1 %v1484_v1  ;;  %v1459_v45 = vld [vmem:[%s1569_s19 + $0x64] ss:$8 sps:$4 sm:$0xff]   ;;  %v1462_v48 = vld [vmem:[%s1569_s19 + $0x60] ss:$8 sps:$4 sm:$0xff]   ;;  %v1464_v49 = vld [vmem:[%s1569_s19 + $0x74] ss:$8 sps:$4 sm:$0xff]  }
  0x15   : > { %v1467_v47 = vld [vmem:[%s1861_s1 + $0x108] sm:$0xff]   ;;  %v1470_v50 = vld [vmem:[%s1861_s1 + $0x110] sm:$0xff]   ;;  %v1472_v51 = vld [vmem:[%s1861_s1 + $0x118] sm:$0xff]  }
  0x16   : > { %v1466_v52 = vld [vmem:[%s1569_s19 + $0x70] ss:$8 sps:$4 sm:$0xff]   ;;  %v1468_v53 = vld [vmem:[%s1569_s19 + $0x84] ss:$8 sps:$4 sm:$0xff]   ;;  %v1471_v54 = vld [vmem:[%s1569_s19 + $0x80] ss:$8 sps:$4 sm:$0xff]  }
  0x17   : > { %423 = vmatpush1.bf16.msra.mxu0 %v1418_v9  ;;  %604 = vmatpush1.bf16.msra.mxu1 %v1419_v10  ;;  %v1473_v55 = vld [vmem:[%s1569_s19 + $0x94] ss:$8 sps:$4 sm:$0xff]   ;;  %v1475_v56 = vld [vmem:[%s1569_s19 + $0x90] ss:$8 sps:$4 sm:$0xff]   ;;  %s1197_s19 = sshll.u32 %s1190_s13, 4 }
  0x18   : > { %424 = vmatprep.subr.bf16.mxu0 %v1484_v1  ;;  %605 = vmatprep.subr.bf16.mxu1 %v1484_v1  ;;  %p172_p4 = scmp.lt.s32.totalorder %s1197_s19, 31 }
  0x1a   : > { %s1867_s19 = smov (!%p172_p4, %s1197_s19), 31 }
  0x1b   : > { %425 = vmatpush1.bf16.msra.mxu0 %v1420_v11  ;;  %606 = vmatpush1.bf16.msra.mxu1 %v1421_v12  ;;  %s1198_s13 = sshll.u32 %s1867_s19, 2 }
  0x1c   : > { %426 = vmatprep.subr.bf16.mxu0 %v1484_v1  ;;  %607 = vmatprep.subr.bf16.mxu1 %v1484_v1  ;;  %s1798_s22 = scalar_lea.vmem %s1863_s3, %s1198_s13 }
  0x1f   : > { %427 = vmatpush1.bf16.msra.mxu0 %v1422_v13  ;;  %608 = vmatpush1.bf16.msra.mxu1 %v1423_v14 }
  0x20   : > { %428 = vmatprep.subr.bf16.mxu0 %v1484_v1  ;;  %609 = vmatprep.subr.bf16.mxu1 %v1484_v1 }
  0x23   : > { %429 = vmatpush1.bf16.msra.mxu0 %v1424_v16  ;;  %610 = vmatpush1.bf16.msra.mxu1 %v1425_v18 }
  0x24   : > { %430 = vmatprep.subr.bf16.mxu0 %v1484_v1  ;;  %611 = vmatprep.subr.bf16.mxu1 %v1484_v1 }
  0x27   : > { %431 = vmatpush1.bf16.msra.mxu0 %v1426_v19  ;;  %612 = vmatpush1.bf16.msra.mxu1 %v1427_v20 }
  0x28   : > { %432 = vmatprep.subr.bf16.mxu0 %v1484_v1  ;;  %613 = vmatprep.subr.bf16.mxu1 %v1484_v1 }
  0x2b   : > { %433 = vmatpush1.bf16.msra.mxu0 %v1428_v21  ;;  %614 = vmatpush1.bf16.msra.mxu1 %v1429_v22 }
  0x2c   : > { %434 = vmatprep.subr.bf16.mxu0 %v1484_v1  ;;  %615 = vmatprep.subr.bf16.mxu1 %v1484_v1 }
  0x2f   : > { %435 = vmatpush1.bf16.msra.mxu0 %v1430_v23  ;;  %616 = vmatpush1.bf16.msra.mxu1 %v1431_v24 }
  0x30   : > { %436 = vmatprep.subr.bf16.mxu0 %v1484_v1  ;;  %617 = vmatprep.subr.bf16.mxu1 %v1484_v1 }
  0x33   : > { %437 = vmatpush1.bf16.msra.mxu0 %v1432_v25  ;;  %618 = vmatpush1.bf16.msra.mxu1 %v1433_v26 }
  0x34   : > { %901 = vmatprep.subr.bf16.mxu0 %v1484_v1  ;;  %1377 = vmatprep.subr.bf16.mxu1 %v1484_v1 }
  0x36   : > { %447 = vmatmul.mubr.bf16.vlgmr.msra.gmra.mrb[0].mxu0 %v1434_v27  ;;  %628 = vmatmul.mubr.bf16.vlgmr.msra.gmra.mrb[0].mxu1 %v1437_v28 }
  0x37   : > { %902 = vmatpush1.bf16.msra.mxu0 %v1440_v29  ;;  %1389 = vmatpush1.bf16.msra.mxu1 %v1440_v29 }
  0x38   : > { %903 = vmatprep.subr.bf16.mxu0 %v1484_v1  ;;  %1378 = vmatprep.subr.bf16.mxu1 %v1484_v1 }
  0x39   : > { %1252 = vmatprep.mubr.msk.bf16.mxu0 %vm389_vm0, %v1628_v30  ;;  %1274 = vmatprep.mubr.msk.bf16.mxu1 %vm389_vm0, %v1436_v15 }
  0x3b   : > { %904 = vmatpush1.bf16.msra.mxu0 %v1443_v31  ;;  %1390 = vmatpush1.bf16.msra.mxu1 %v1443_v31 }
  0x3c   : > { %905 = vmatprep.subr.bf16.mxu0 %v1484_v1  ;;  %1379 = vmatprep.subr.bf16.mxu1 %v1484_v1 }
  0x3e   : > { %455 = vmatmul.mubr.bf16.gmra.mrb[4].mxu0 %v1639_v32  ;;  %636 = vmatmul.mubr.bf16.gmra.mrb[4].mxu1 %v1434_v27 }
  0x3f   : > { %906 = vmatpush1.bf16.msra.mxu0 %v1445_v33  ;;  %1391 = vmatpush1.bf16.msra.mxu1 %v1445_v33 }
  0x40   : > { %1253 = vmatprep.mubr.msk.bf16.mxu0 %vm389_vm0, %v1646_v34  ;;  %1275 = vmatprep.mubr.msk.bf16.mxu1 %vm389_vm0, %v1628_v30 }
  0x41   : > { %907 = vmatprep.subr.bf16.mxu0 %v1484_v1  ;;  %1380 = vmatprep.subr.bf16.mxu1 %v1484_v1 }
  0x43   : > { %908 = vmatpush1.bf16.msra.mxu0 %v1449_v35  ;;  %1392 = vmatpush1.bf16.msra.mxu1 %v1449_v35 }
  0x44   : > { %909 = vmatprep.subr.bf16.mxu0 %v1484_v1  ;;  %1381 = vmatprep.subr.bf16.mxu1 %v1484_v1 }
  0x46   : > { %463 = vmatmul.mubr.bf16.gmra.mrb[8].mxu0 %v1659_v36  ;;  %644 = vmatmul.mubr.bf16.gmra.mrb[8].mxu1 %v1639_v32 }
  0x47   : > { %1254 = vmatprep.mubr.msk.bf16.mxu0 %vm389_vm0, %v1663_v37  ;;  %1276 = vmatprep.mubr.msk.bf16.mxu1 %vm389_vm0, %v1646_v34 }
  0x48   : > { %910 = vmatpush1.bf16.msra.mxu0 %v1452_v38  ;;  %1393 = vmatpush1.bf16.msra.mxu1 %v1452_v38 }
  0x49   : > { %911 = vmatprep.subr.bf16.mxu0 %v1484_v1  ;;  %1382 = vmatprep.subr.bf16.mxu1 %v1484_v1 }
  0x4c   : > { %912 = vmatpush1.bf16.msra.mxu0 %v1454_v39  ;;  %1394 = vmatpush1.bf16.msra.mxu1 %v1454_v39 }
  0x4d   : > { %913 = vmatprep.subr.bf16.mxu0 %v1484_v1  ;;  %1383 = vmatprep.subr.bf16.mxu1 %v1484_v1 }
  0x4e   : > { %471 = vmatmul.mubr.bf16.gmra.mrb[12].mxu0 %v1681_v40  ;;  %652 = vmatmul.mubr.bf16.gmra.mrb[12].mxu1 %v1659_v36 }
  0x4f   : > { %1255 = vmatprep.mubr.msk.bf16.mxu0 %vm389_vm0, %v1685_v41  ;;  %1277 = vmatprep.mubr.msk.bf16.mxu1 %vm389_vm0, %v1663_v37 }
  0x50   : > { %914 = vmatpush1.bf16.msra.mxu0 %v1458_v42  ;;  %1395 = vmatpush1.bf16.msra.mxu1 %v1458_v42 }
  0x51   : > { %915 = vmatprep.subr.bf16.mxu0 %v1484_v1  ;;  %1384 = vmatprep.subr.bf16.mxu1 %v1484_v1 }
  0x54   : > { %916 = vmatpush1.bf16.msra.mxu0 %v1461_v43  ;;  %1396 = vmatpush1.bf16.msra.mxu1 %v1461_v43 }
  0x55   : > { %917 = vmatprep.subr.bf16.mxu0 %v1484_v1  ;;  %1385 = vmatprep.subr.bf16.mxu1 %v1484_v1 }
  0x56   : > { %479 = vmatmul.mubr.bf16.gmra.mrb[16].mxu0 %v1457_v44  ;;  %660 = vmatmul.mubr.bf16.gmra.mrb[16].mxu1 %v1681_v40 }
  0x57   : > { %1256 = vmatprep.mubr.msk.bf16.mxu0 %vm389_vm0, %v1459_v45  ;;  %1278 = vmatprep.mubr.msk.bf16.mxu1 %vm389_vm0, %v1685_v41 }
  0x58   : > { %918 = vmatpush1.bf16.msra.mxu0 %v1463_v46  ;;  %1397 = vmatpush1.bf16.msra.mxu1 %v1463_v46 }
  0x59   : > { %919 = vmatprep.subr.bf16.mxu0 %v1484_v1  ;;  %1386 = vmatprep.subr.bf16.mxu1 %v1484_v1 }
  0x5c   : > { %920 = vmatpush1.bf16.msra.mxu0 %v1467_v47  ;;  %1398 = vmatpush1.bf16.msra.mxu1 %v1467_v47 }
  0x5d   : > { %921 = vmatprep.subr.bf16.mxu0 %v1484_v1  ;;  %1387 = vmatprep.subr.bf16.mxu1 %v1484_v1 }
  0x5e   : > { %487 = vmatmul.mubr.bf16.gmra.mrb[20].mxu0 %v1462_v48  ;;  %668 = vmatmul.mubr.bf16.gmra.mrb[20].mxu1 %v1457_v44 }
  0x5f   : > { %1257 = vmatprep.mubr.msk.bf16.mxu0 %vm389_vm0, %v1464_v49  ;;  %1279 = vmatprep.mubr.msk.bf16.mxu1 %vm389_vm0, %v1459_v45 }
  0x60   : > { %922 = vmatpush1.bf16.msra.mxu0 %v1470_v50  ;;  %1399 = vmatpush1.bf16.msra.mxu1 %v1470_v50 }
  0x61   : > { %923 = vmatprep.subr.bf16.mxu0 %v1484_v1  ;;  %1388 = vmatprep.subr.bf16.mxu1 %v1484_v1 }
  0x64   : > { %924 = vmatpush1.bf16.msra.mxu0 %v1472_v51  ;;  %1400 = vmatpush1.bf16.msra.mxu1 %v1472_v51 }
  0x66   : > { %495 = vmatmul.mubr.bf16.gmra.mrb[24].mxu0 %v1466_v52  ;;  %676 = vmatmul.mubr.bf16.gmra.mrb[24].mxu1 %v1462_v48 }
  0x67   : > { %1258 = vmatprep.mubr.msk.bf16.mxu0 %vm389_vm0, %v1468_v53  ;;  %1280 = vmatprep.mubr.msk.bf16.mxu1 %vm389_vm0, %v1464_v49 }
  0x6e   : > { %503 = vmatmul.mubr.bf16.gmra.mrb[28].mxu0 %v1471_v54  ;;  %684 = vmatmul.mubr.bf16.gmra.mrb[28].mxu1 %v1466_v52 }
  0x6f   : > { %1333 = vmatprep.mubr.msk.bf16.mxu0 %vm389_vm0, %v1628_v30  ;;  %1337 = vmatprep.mubr.msk.bf16.mxu1 %vm389_vm0, %v1459_v45 }
  0x76   : > { %934 = vmatmul.mubr.bf16.vlgmr.msra.gmra.mrb[32].mxu0 %v1639_v32  ;;  %966 = vmatmul.mubr.bf16.vlgmr.msra.gmra.mrb[32].mxu1 %v1462_v48 }
  0x77   : > { %1334 = vmatprep.mubr.msk.bf16.mxu0 %vm389_vm0, %v1646_v34  ;;  %1338 = vmatprep.mubr.msk.bf16.mxu1 %vm389_vm0, %v1464_v49 }
  0x7e   : > { %942 = vmatmul.mubr.bf16.gmra.mrb[36].mxu0 %v1659_v36  ;;  %974 = vmatmul.mubr.bf16.gmra.mrb[36].mxu1 %v1466_v52 }
  0x7f   : > { %1335 = vmatprep.mubr.msk.bf16.mxu0 %vm389_vm0, %v1663_v37  ;;  %1339 = vmatprep.mubr.msk.bf16.mxu1 %vm389_vm0, %v1468_v53 }
  0x86   : > { %950 = vmatmul.mubr.bf16.gmra.mrb[40].mxu0 %v1681_v40  ;;  %982 = vmatmul.mubr.bf16.gmra.mrb[40].mxu1 %v1471_v54 }
  0x87   : > { %1336 = vmatprep.mubr.msk.bf16.mxu0 %vm389_vm0, %v1685_v41  ;;  %1340 = vmatprep.mubr.msk.bf16.mxu1 %vm389_vm0, %v1473_v55 }
  0x8e   : > { %958 = vmatmul.mubr.bf16.gmra.mrb[44].mxu0 %v1457_v44  ;;  %990 = vmatmul.mubr.bf16.gmra.mrb[44].mxu1 %v1475_v56 }
 0x109   : > { %v448_v57 = vpop.f32.mrb[0].mxu0  ;;  %v629_v58 = vpop.f32.mrb[0].mxu1 }
 0x10a   : > { %v450_v59 = vpop.f32.mrb[1].mxu0  ;;  %v1755_v60 = vadd.f32 %v629_v58, %v448_v57  ;;  %v631_v61 = vpop.f32.mrb[1].mxu1 }
 0x10b   : > { %v451_v62 = vpop.f32.mrb[2].mxu0  ;;  %v632_v63 = vpop.f32.mrb[2].mxu1 }
 0x10c   : > { %v453_v0 = vpop.f32.mrb[3].mxu0  ;;  %v1757_v1 = vadd.f32 %v632_v63, %v451_v62  ;;  %v634_v2 = vpop.f32.mrb[3].mxu1 }
 0x111   : > { %v456_v3 = vpop.f32.mrb[4].mxu0  ;;  %v637_v4 = vpop.f32.mrb[4].mxu1 }
 0x112   : > { %v458_v5 = vpop.f32.mrb[5].mxu0  ;;  %v1759_v6 = vadd.f32 %v637_v4, %v456_v3  ;;  %v639_v7 = vpop.f32.mrb[5].mxu1 }
 0x113   : > { %v459_v8 = vpop.f32.mrb[6].mxu0  ;;  %v640_v9 = vpop.f32.mrb[6].mxu1 }
 0x114   : > { %v461_v10 = vpop.f32.mrb[7].mxu0  ;;  %v1761_v11 = vadd.f32 %v640_v9, %v459_v8  ;;  %v642_v12 = vpop.f32.mrb[7].mxu1 }
 0x119   : > { %v464_v13 = vpop.f32.mrb[8].mxu0  ;;  %v645_v14 = vpop.f32.mrb[8].mxu1 }
 0x11a   : > { %v466_v15 = vpop.f32.mrb[9].mxu0  ;;  %v1763_v16 = vadd.f32 %v645_v14, %v464_v13  ;;  %v647_v17 = vpop.f32.mrb[9].mxu1  ;;  %v1788_v14 = vld [vmem:[%s1862_s2] ss:$0 sm:$0xff] }
 0x11b   : > { %v467_v18 = vpop.f32.mrb[10].mxu0  ;;  %v648_v19 = vpop.f32.mrb[10].mxu1 }
 0x11c   : > { %v469_v20 = vpop.f32.mrb[11].mxu0  ;;  %v1765_v21 = vadd.f32 %v648_v19, %v467_v18  ;;  %v650_v22 = vpop.f32.mrb[11].mxu1 }
 0x121   : > { %v472_v23 = vpop.f32.mrb[12].mxu0  ;;  %v653_v24 = vpop.f32.mrb[12].mxu1 }
 0x122   : > { %v474_v25 = vpop.f32.mrb[13].mxu0  ;;  %v1767_v26 = vadd.f32 %v653_v24, %v472_v23  ;;  %v655_v27 = vpop.f32.mrb[13].mxu1 }
 0x123   : > { %v475_v28 = vpop.f32.mrb[14].mxu0  ;;  %v656_v29 = vpop.f32.mrb[14].mxu1 }
 0x124   : > { %v477_v30 = vpop.f32.mrb[15].mxu0  ;;  %v1769_v31 = vadd.f32 %v656_v29, %v475_v28  ;;  %v658_v32 = vpop.f32.mrb[15].mxu1 }
 0x129   : > { %v480_v33 = vpop.f32.mrb[16].mxu0  ;;  %v661_v34 = vpop.f32.mrb[16].mxu1 }
 0x12a   : > { %v482_v35 = vpop.f32.mrb[17].mxu0  ;;  %v662_v36 = vadd.f32 %v661_v34, %v480_v33  ;;  %v663_v37 = vpop.f32.mrb[17].mxu1 }
 0x12b   : > { %v483_v38 = vpop.f32.mrb[18].mxu0  ;;  %v664_v39 = vpop.f32.mrb[18].mxu1 }
 0x12c   : > { %v485_v40 = vpop.f32.mrb[19].mxu0  ;;  %v665_v41 = vadd.f32 %v664_v39, %v483_v38  ;;  %v666_v42 = vpop.f32.mrb[19].mxu1 }
 0x131   : > { %v488_v43 = vpop.f32.mrb[20].mxu0  ;;  %v669_v44 = vpop.f32.mrb[20].mxu1 }
 0x132   : > { %v490_v45 = vpop.f32.mrb[21].mxu0  ;;  %v1771_v46 = vadd.f32 %v669_v44, %v488_v43  ;;  %v671_v47 = vpop.f32.mrb[21].mxu1 }
 0x133   : > { %v491_v48 = vpop.f32.mrb[22].mxu0  ;;  %v672_v49 = vpop.f32.mrb[22].mxu1 }
 0x134   : > { %v493_v50 = vpop.f32.mrb[23].mxu0  ;;  %v1773_v51 = vadd.f32 %v672_v49, %v491_v48  ;;  %v674_v52 = vpop.f32.mrb[23].mxu1 }
 0x139   : > { %v496_v53 = vpop.f32.mrb[24].mxu0  ;;  %v677_v54 = vpop.f32.mrb[24].mxu1 }
 0x13a   : > { %v498_v55 = vpop.f32.mrb[25].mxu0  ;;  %v1775_v56 = vadd.f32 %v677_v54, %v496_v53  ;;  %v679_v57 = vpop.f32.mrb[25].mxu1 }
 0x13b   : > { %v499_v58 = vpop.f32.mrb[26].mxu0  ;;  %v680_v59 = vpop.f32.mrb[26].mxu1 }
 0x13c   : > { %v501_v61 = vpop.f32.mrb[27].mxu0  ;;  %v1777_v62 = vadd.f32 %v680_v59, %v499_v58  ;;  %v682_v63 = vpop.f32.mrb[27].mxu1 }
 0x141   : > { %v504_v0 = vpop.f32.mrb[28].mxu0  ;;  %v685_v2 = vpop.f32.mrb[28].mxu1 }
 0x142   : > { %v506_v3 = vpop.f32.mrb[29].mxu0  ;;  %v1781_v4 = vadd.f32 %v685_v2, %v504_v0  ;;  %v687_v5 = vpop.f32.mrb[29].mxu1 }
 0x143   : > { %v507_v7 = vpop.f32.mrb[30].mxu0  ;;  %v688_v8 = vpop.f32.mrb[30].mxu1 }
 0x144   : > { %v509_v9 = vpop.f32.mrb[31].mxu0  ;;  %v1783_v10 = vadd.f32 %v688_v8, %v507_v7  ;;  %v690_v12 = vpop.f32.mrb[31].mxu1 }
 0x149   : > { %v935_v13 = vpop.f32.mrb[32].mxu0  ;;  %v967_v17 = vpop.f32.mrb[32].mxu1 }
 0x14a   : > { %v998_v15 = vadd.f32 %v935_v13, %v1755_v60  ;;  %v937_v18 = vpop.f32.mrb[33].mxu0  ;;  %v1006_v19 = vadd.f32 %v967_v17, %v662_v36  ;;  %v969_v20 = vpop.f32.mrb[33].mxu1 }
 0x14b   : > { %v938_v22 = vpop.f32.mrb[34].mxu0  ;;  %v970_v25 = vpop.f32.mrb[34].mxu1 }
 0x14c   : > { %v1021_v23 = vadd.f32 %v1788_v14, %v998_v15  ;;  %v999_v24 = vadd.f32 %v938_v22, %v1757_v1  ;;  %v940_v27 = vpop.f32.mrb[35].mxu0  ;;  %v1029_v28 = vadd.f32 %v1788_v14, %v1006_v19  ;;  %v1007_v29 = vadd.f32 %v970_v25, %v665_v41  ;;  %v972_v30 = vpop.f32.mrb[35].mxu1 }
 0x14e   : > { %v1037_v32 = vmax.f32 %v1021_v23, 0.0  ;;  %v1022_v33 = vadd.f32 %v1788_v14, %v999_v24  ;;  %v1045_v60 = vmax.f32 %v1029_v28, 0.0  ;;  %v1030_v1 = vadd.f32 %v1788_v14, %v1007_v29 }
 0x150   : > { %v1361_v34 = vpack.c.bf16 %v1037_v32, %v1037_v32  ;;  %v1038_v35 = vmax.f32 %v1022_v33, 0.0  ;;  %v1369_v36 = vpack.c.bf16 %v1045_v60, %v1045_v60  ;;  %v1046_v37 = vmax.f32 %v1030_v1, 0.0 }
 0x151   : > { %v943_v38 = vpop.f32.mrb[36].mxu0  ;;  %v975_v41 = vpop.f32.mrb[36].mxu1 }
 0x152   : > { %1118 = vst.msk [vmem:[%s1798_s22] sm:$0xf] %vm1117_vm1, %v1361_v34  ;;  %v1362_v39 = vpack.c.bf16 %v1038_v35, %v1038_v35  ;;  %v1000_v40 = vadd.f32 %v943_v38, %v1759_v6  ;;  %v945_v42 = vpop.f32.mrb[37].mxu0  ;;  %1126 = vst.msk [vmem:[%s1798_s22 + $0x20] sm:$0xf] %vm1117_vm1, %v1369_v36  ;;  %v1370_v43 = vpack.c.bf16 %v1046_v37, %v1046_v37  ;;  %v977_v45 = vpop.f32.mrb[37].mxu1 }
 0x153   : > { %v1008_v44 = vadd.f32 %v975_v41, %v1771_v46  ;;  %v946_v47 = vpop.f32.mrb[38].mxu0  ;;  %v978_v50 = vpop.f32.mrb[38].mxu1 }
 0x154   : > { %1119 = vst.msk [vmem:[%s1798_s22 + $0x4] sm:$0xf] %vm1117_vm1, %v1362_v39  ;;  %v1023_v48 = vadd.f32 %v1788_v14, %v1000_v40  ;;  %v1001_v49 = vadd.f32 %v946_v47, %v1761_v11  ;;  %v948_v52 = vpop.f32.mrb[39].mxu0  ;;  %1127 = vst.msk [vmem:[%s1798_s22 + $0x24] sm:$0xf] %vm1117_vm1, %v1370_v43  ;;  %v1009_v53 = vadd.f32 %v978_v50, %v1773_v51  ;;  %v980_v54 = vpop.f32.mrb[39].mxu1 }
 0x155   : > { %v1031_v6 = vadd.f32 %v1788_v14, %v1008_v44 }
 0x156   : > { %v1039_v46 = vmax.f32 %v1023_v48, 0.0  ;;  %v1024_v55 = vadd.f32 %v1788_v14, %v1001_v49  ;;  %v1032_v58 = vadd.f32 %v1788_v14, %v1009_v53 }
 0x157   : > { %v1047_v57 = vmax.f32 %v1031_v6, 0.0 }
 0x158   : > { %v1363_v59 = vpack.c.bf16 %v1039_v46, %v1039_v46  ;;  %v1040_v11 = vmax.f32 %v1024_v55, 0.0  ;;  %v1048_v63 = vmax.f32 %v1032_v58, 0.0 }
 0x159   : > { %v1371_v61 = vpack.c.bf16 %v1047_v57, %v1047_v57  ;;  %v951_v0 = vpop.f32.mrb[40].mxu0  ;;  %v983_v3 = vpop.f32.mrb[40].mxu1 }
 0x15a   : > { %1120 = vst.msk [vmem:[%s1798_s22 + $0x8] sm:$0xf] %vm1117_vm1, %v1363_v59  ;;  %v1364_v2 = vpack.c.bf16 %v1040_v11, %v1040_v11  ;;  %v1002_v51 = vadd.f32 %v951_v0, %v1763_v16  ;;  %v953_v5 = vpop.f32.mrb[41].mxu0  ;;  %v1372_v7 = vpack.c.bf16 %v1048_v63, %v1048_v63  ;;  %v1010_v8 = vadd.f32 %v983_v3, %v1775_v56  ;;  %v985_v9 = vpop.f32.mrb[41].mxu1 }
 0x15b   : > { %1128 = vst.msk [vmem:[%s1798_s22 + $0x28] sm:$0xf] %vm1117_vm1, %v1371_v61  ;;  %v954_v12 = vpop.f32.mrb[42].mxu0  ;;  %v986_v17 = vpop.f32.mrb[42].mxu1 }
 0x15c   : > { %1121 = vst.msk [vmem:[%s1798_s22 + $0xc] sm:$0xf] %vm1117_vm1, %v1364_v2  ;;  %v1025_v13 = vadd.f32 %v1788_v14, %v1002_v51  ;;  %v1003_v15 = vadd.f32 %v954_v12, %v1765_v21  ;;  %v956_v18 = vpop.f32.mrb[43].mxu0  ;;  %1129 = vst.msk [vmem:[%s1798_s22 + $0x2c] sm:$0xf] %vm1117_vm1, %v1372_v7  ;;  %v1033_v16 = vadd.f32 %v1788_v14, %v1010_v8  ;;  %v988_v20 = vpop.f32.mrb[43].mxu1 }
 0x15d   : > { %v1011_v19 = vadd.f32 %v986_v17, %v1777_v62 }
 0x15e   : > { %v1041_v56 = vmax.f32 %v1025_v13, 0.0  ;;  %v1026_v22 = vadd.f32 %v1788_v14, %v1003_v15  ;;  %v1049_v23 = vmax.f32 %v1033_v16, 0.0 }
 0x15f   : > { %v1034_v24 = vadd.f32 %v1788_v14, %v1011_v19 }
 0x160   : > { %v1365_v25 = vpack.c.bf16 %v1041_v56, %v1041_v56  ;;  %v1042_v21 = vmax.f32 %v1026_v22, 0.0  ;;  %v1373_v27 = vpack.c.bf16 %v1049_v23, %v1049_v23 }
 0x161   : > { %v1050_v28 = vmax.f32 %v1034_v24, 0.0  ;;  %v959_v29 = vpop.f32.mrb[44].mxu0  ;;  %v991_v32 = vpop.f32.mrb[44].mxu1 }
 0x162   : > { %1122 = vst.msk [vmem:[%s1798_s22 + $0x10] sm:$0xf] %vm1117_vm1, %v1365_v25  ;;  %v1366_v30 = vpack.c.bf16 %v1042_v21, %v1042_v21  ;;  %v1004_v62 = vadd.f32 %v959_v29, %v1767_v26  ;;  %v961_v33 = vpop.f32.mrb[45].mxu0  ;;  %1130 = vst.msk [vmem:[%s1798_s22 + $0x30] sm:$0xf] %vm1117_vm1, %v1373_v27  ;;  %v1012_v1 = vadd.f32 %v991_v32, %v1781_v4  ;;  %v993_v34 = vpop.f32.mrb[45].mxu1 }
 0x163   : > { %v1374_v60 = vpack.c.bf16 %v1050_v28, %v1050_v28  ;;  %v962_v35 = vpop.f32.mrb[46].mxu0  ;;  %v994_v38 = vpop.f32.mrb[46].mxu1 }
 0x164   : > { %1123 = vst.msk [vmem:[%s1798_s22 + $0x14] sm:$0xf] %vm1117_vm1, %v1366_v30  ;;  %v1027_v36 = vadd.f32 %v1788_v14, %v1004_v62  ;;  %v1005_v37 = vadd.f32 %v962_v35, %v1769_v31  ;;  %v964_v39 = vpop.f32.mrb[47].mxu0  ;;  %v1035_v26 = vadd.f32 %v1788_v14, %v1012_v1  ;;  %v1013_v4 = vadd.f32 %v994_v38, %v1783_v10  ;;  %v996_v40 = vpop.f32.mrb[47].mxu1 }
 0x165   : > { %1131 = vst.msk [vmem:[%s1798_s22 + $0x34] sm:$0xf] %vm1117_vm1, %v1374_v60 }
 0x166   : > { %v1043_v41 = vmax.f32 %v1027_v36, 0.0  ;;  %v1028_v42 = vadd.f32 %v1788_v14, %v1005_v37  ;;  %v1051_v43 = vmax.f32 %v1035_v26, 0.0  ;;  %v1036_v44 = vadd.f32 %v1788_v14, %v1013_v4 }
 0x168   : > { %v1367_v45 = vpack.c.bf16 %v1043_v41, %v1043_v41  ;;  %v1044_v31 = vmax.f32 %v1028_v42, 0.0  ;;  %v1375_v47 = vpack.c.bf16 %v1051_v43, %v1051_v43  ;;  %v1052_v48 = vmax.f32 %v1036_v44, 0.0 }
 0x16a   : > { %1124 = vst.msk [vmem:[%s1798_s22 + $0x18] sm:$0xf] %vm1117_vm1, %v1367_v45  ;;  %v1368_v49 = vpack.c.bf16 %v1044_v31, %v1044_v31  ;;  %1132 = vst.msk [vmem:[%s1798_s22 + $0x38] sm:$0xf] %vm1117_vm1, %v1375_v47  ;;  %v1376_v50 = vpack.c.bf16 %v1052_v48, %v1052_v48 }
 0x16c   : > { %1125 = vst.msk [vmem:[%s1798_s22 + $0x1c] sm:$0xf] %vm1117_vm1, %v1368_v49  ;;  %1133 = vst.msk [vmem:[%s1798_s22 + $0x3c] sm:$0xf] %vm1117_vm1, %v1376_v50 }
 0x16d PF: > { %s13_s12 = sadd.s32 1, %s1482_s12  }
 0x16e   : > { %p10_p5 = scmp.ge.s32.totalorder %s13_s12, 4  }
 0x170   :  { %12 = sbr.rel (!%p10_p5) target bundleno = 1 (0x1), region = 64 }

// kernel: adam_only_cnn_forward.15
= control target key start
LH: loop header
LB: loop body
LE: loop exit
PB: predicated region body
PF: predicated region fallthrough
CT: control target
= control target key end

     0   :  { %vm384_vm0 = vcmask 80896   ;;  %s647_s1 = inlined_call_operand.vmem [shape: bf16[512,10], index: 1, kind: input, shape index: {}]   ;;  %s648_s0 = inlined_call_operand.vmem [shape: bf16[16,512], index: 0, kind: input, shape index: {}]   ;;  %s649_s2 = inlined_call_operand.vmem [shape: f32[1,10], index: 2, kind: input, shape index: {}]   ;;  %s650_s3 = inlined_call_operand.vmem [shape: f32[16,10], index: 3, kind: output, shape index: {}]  }
   0x1   :  { %v472_v0 = vld [vmem:[%s647_s1 + $0x40] sm:$0xff]   ;;  %v476_v4 = vld [vmem:[%s647_s1 + $0x48] sm:$0xff]   ;;  %v480_v8 = vld [vmem:[%s647_s1 + $0x50] sm:$0xff]  }
   0x2   :  { %v473_v1 = vld [vmem:[%s647_s1 + $0xc0] sm:$0xff]   ;;  %428 = vmatprep.subr.bf16.mxu0 %v472_v0  ;;  %v477_v5 = vld [vmem:[%s647_s1 + $0xc8] sm:$0xff]   ;;  %v481_v9 = vld [vmem:[%s647_s1 + $0xd0] sm:$0xff]  }
   0x3   :  { %v474_v2 = vld [vmem:[%s647_s1] sm:$0xff]   ;;  %450 = vmatprep.subr.bf16.mxu1 %v473_v1  ;;  %v478_v6 = vld [vmem:[%s647_s1 + $0x8] sm:$0xff]   ;;  %v482_v10 = vld [vmem:[%s647_s1 + $0x10] sm:$0xff]  }
   0x4   :  { %v475_v3 = vld [vmem:[%s647_s1 + $0x80] sm:$0xff]   ;;  %429 = vmatpush3.bf16.msra.mxu0 %v474_v2  ;;  %v479_v7 = vld [vmem:[%s647_s1 + $0x88] sm:$0xff]   ;;  %v483_v11 = vld [vmem:[%s647_s1 + $0x90] sm:$0xff]  }
   0x5   :  { %451 = vmatpush3.bf16.msra.mxu1 %v475_v3  ;;  %430 = vmatprep.subr.bf16.mxu0 %v476_v4  ;;  %v484_v12 = vld [vmem:[%s647_s1 + $0x58] sm:$0xff]   ;;  %v488_v16 = vld [vmem:[%s647_s1 + $0x60] sm:$0xff]   ;;  %v492_v20 = vld [vmem:[%s647_s1 + $0x68] sm:$0xff]  }
   0x6   :  { %452 = vmatprep.subr.bf16.mxu1 %v477_v5  ;;  %v485_v13 = vld [vmem:[%s647_s1 + $0xd8] sm:$0xff]   ;;  %v489_v17 = vld [vmem:[%s647_s1 + $0xe0] sm:$0xff]   ;;  %v493_v21 = vld [vmem:[%s647_s1 + $0xe8] sm:$0xff]  }
   0x7   :  { %v486_v14 = vld [vmem:[%s647_s1 + $0x18] sm:$0xff]   ;;  %v490_v18 = vld [vmem:[%s647_s1 + $0x20] sm:$0xff]   ;;  %v494_v22 = vld [vmem:[%s647_s1 + $0x28] sm:$0xff]  }
   0x8   :  { %431 = vmatpush3.bf16.msra.mxu0 %v478_v6  ;;  %v487_v15 = vld [vmem:[%s647_s1 + $0x98] sm:$0xff]   ;;  %v491_v19 = vld [vmem:[%s647_s1 + $0xa0] sm:$0xff]   ;;  %v495_v23 = vld [vmem:[%s647_s1 + $0xa8] sm:$0xff]  }
   0x9   :  { %453 = vmatpush3.bf16.msra.mxu1 %v479_v7  ;;  %432 = vmatprep.subr.bf16.mxu0 %v480_v8  ;;  %v496_v24 = vld [vmem:[%s647_s1 + $0x70] sm:$0xff]   ;;  %v500_v28 = vld [vmem:[%s647_s1 + $0x78] sm:$0xff]   ;;  %v391_v38 = vld [vmem:[%s649_s2] ss:$0 sm:$0xff] }
   0xa   :  { %454 = vmatprep.subr.bf16.mxu1 %v481_v9  ;;  %v497_v25 = vld [vmem:[%s647_s1 + $0xf0] sm:$0xff]   ;;  %v501_v29 = vld [vmem:[%s647_s1 + $0xf8] sm:$0xff]  }
   0xb   :  { %v498_v26 = vld [vmem:[%s647_s1 + $0x30] sm:$0xff]   ;;  %v502_v30 = vld [vmem:[%s647_s1 + $0x38] sm:$0xff]  }
   0xc   :  { %433 = vmatpush3.bf16.msra.mxu0 %v482_v10  ;;  %v499_v27 = vld [vmem:[%s647_s1 + $0xb0] sm:$0xff]   ;;  %v503_v31 = vld [vmem:[%s647_s1 + $0xb8] sm:$0xff]  }
   0xd   :  { %455 = vmatpush3.bf16.msra.mxu1 %v483_v11  ;;  %434 = vmatprep.subr.bf16.mxu0 %v484_v12  ;;  %v504_v32 = vld [vmem:[%s648_s0] ss:$16 sps:$4 sm:$0xff]   ;;  %v506_v33 = vld [vmem:[%s648_s0 + $0x4] ss:$16 sps:$4 sm:$0xff]   ;;  %v507_v34 = vld [vmem:[%s648_s0 + $0x8] ss:$16 sps:$4 sm:$0xff]  }
   0xe   :  { %456 = vmatprep.subr.bf16.mxu1 %v485_v13  ;;  %v509_v35 = vld [vmem:[%s648_s0 + $0xc] ss:$16 sps:$4 sm:$0xff]   ;;  %334 = vmatprep.mubr.bf16.mxu0 %v506_v33 }
   0xf   :  { %375 = vmatprep.mubr.bf16.mxu1 %v509_v35 }
  0x10   :  { %435 = vmatpush3.bf16.msra.mxu0 %v486_v14 }
  0x11   :  { %457 = vmatpush3.bf16.msra.mxu1 %v487_v15  ;;  %436 = vmatprep.subr.bf16.mxu0 %v488_v16 }
  0x12   :  { %458 = vmatprep.subr.bf16.mxu1 %v489_v17 }
  0x14   :  { %437 = vmatpush3.bf16.msra.mxu0 %v490_v18 }
  0x15   :  { %459 = vmatpush3.bf16.msra.mxu1 %v491_v19  ;;  %438 = vmatprep.subr.bf16.mxu0 %v492_v20 }
  0x16   :  { %460 = vmatprep.subr.bf16.mxu1 %v493_v21 }
  0x18   :  { %439 = vmatpush3.bf16.msra.mxu0 %v494_v22 }
  0x19   :  { %461 = vmatpush3.bf16.msra.mxu1 %v495_v23  ;;  %440 = vmatprep.subr.bf16.mxu0 %v496_v24 }
  0x1a   :  { %462 = vmatprep.subr.bf16.mxu1 %v497_v25 }
  0x1c   :  { %441 = vmatpush3.bf16.msra.mxu0 %v498_v26 }
  0x1d   :  { %463 = vmatpush3.bf16.msra.mxu1 %v499_v27  ;;  %442 = vmatprep.subr.bf16.mxu0 %v500_v28 }
  0x1e   :  { %464 = vmatprep.subr.bf16.mxu1 %v501_v29 }
  0x20   :  { %443 = vmatpush3.bf16.msra.mxu0 %v502_v30 }
  0x21   :  { %465 = vmatpush3.bf16.msra.mxu1 %v503_v31 }
  0x23   :  { %335 = vmatmul.mubr.bf16.vlgmr.msra.gmra.mrb[0].mxu0 %v504_v32 }
  0x24   :  { %376 = vmatmul.mubr.bf16.vlgmr.msra.gmra.mrb[0].mxu1 %v507_v34 }
  0xf6   :  { %v444_v36 = vpop.f32.mrb[0].mxu0 }
  0xf7   :  { %v466_v37 = vpop.f32.mrb[0].mxu1  ;;  %v445_v39 = vpop.f32.mrb[1].mxu0 }
  0xf8   :  { %v446_v40 = vadd.f32 %v445_v39, %v444_v36  ;;  %v467_v41 = vpop.f32.mrb[1].mxu1  ;;  %v447_v42 = vpop.f32.mrb[2].mxu0 }
  0xf9   :  { %v468_v43 = vadd.f32 %v467_v41, %v466_v37  ;;  %v469_v44 = vpop.f32.mrb[2].mxu1  ;;  %v448_v45 = vpop.f32.mrb[3].mxu0 }
  0xfa   :  { %v337_v46 = vadd.f32 %v446_v40, %v391_v38  ;;  %v449_v47 = vadd.f32 %v448_v45, %v447_v42  ;;  %v470_v48 = vpop.f32.mrb[3].mxu1 }
  0xfb   :  { %v471_v49 = vadd.f32 %v470_v48, %v469_v44 }
  0xfc   :  { %v378_v50 = vadd.f32 %v468_v43, %v337_v46  ;;  %v340_v51 = vadd.f32 %v449_v47, %v391_v38 }
  0xfe   :  { %385 = vst.msk [vmem:[%s650_s3] sm:$0xff] %vm384_vm0, %v378_v50  ;;  %v381_v52 = vadd.f32 %v471_v49, %v340_v51 }
 0x100   :  { %386 = vst.msk [vmem:[%s650_s3 + $0x8] sm:$0xff] %vm384_vm0, %v381_v52 }

// kernel: adam_only_cnn_forward.14
= control target key start
LH: loop header
LB: loop body
LE: loop exit
PB: predicated region body
PF: predicated region fallthrough
CT: control target
= control target key end

     0   :  { %s2395_s12 = smov 0   ;;  %s2397_s13 = smov 0   ;;  %s2927_s0 = inlined_call_operand.vmem [shape: bf16[16,1024], index: 0, kind: input, shape index: {}]   ;;  %s2928_s1 = inlined_call_operand.vmem [shape: bf16[1024,512], index: 1, kind: input, shape index: {}]   ;;  %s2929_s2 = inlined_call_operand.vmem [shape: f32[1,512], index: 2, kind: input, shape index: {}]   ;;  %s2930_s3 = inlined_call_operand.vmem [shape: bf16[16,512], index: 3, kind: output, shape index: {}]  }
   0x1   :  { %s2399_s14 = smov 0   ;;  %s2401_s15 = smov 0  }
   0x2   :  { %s2403_s16 = smov 0  }
   0x3 LB: > { %s22_s17 = sadd.s32 1, %s2369_s15  ;;  %s1928_s18 = sadd.s32 4294967295, %s2373_s16   ;;  %s2373_s16 = sphi %s2403_s16, %s13_s16   ;;  %s2369_s15 = sphi %s2401_s15, %s2935_s15   ;;  %s2365_s14 = sphi %s2399_s14, %s2934_s14   ;;  %s2361_s13 = sphi %s2397_s13, %s2933_s13   ;;  %s2357_s12 = sphi %s2395_s12, %s2932_s12  }
   0x4   : > { %p23_p0 = scmp.ge.s32.totalorder %s22_s17, 2  ;;  %p65_p1 = scmp.ne.s32.totalorder %s2361_s13, %s2357_s12 }
   0x5   : > { %p66_p2 = scmp.eq.s32.totalorder %s2373_s16, 0  ;;  %p123_p4 = scmp.eq.s32.totalorder %s1928_s18, 1 }
   0x6   : > { %s2937_s17 = smov (%p23_p0, %s22_s17), 0  ;;  %s58_s20 = sadd.s32 1, %s2361_s13 }
   0x7   : > { %p67_p3 = por %p66_p2, %p65_p1  ;;  %s55_s19 = ssub.s32 %s2369_s15, %s2937_s17 }
   0x8   : > { %p56_p5 = scmp.eq.s32.totalorder %s55_s19, 0  ;;  %p2430_p6 = por %p123_p4, %p65_p1 }
   0x9   : > { %p1932_p7 = scmp.ge.s32.totalorder %s2373_s16, 2 }
   0xa   : > { %s2435_s22 = scalar_select %p56_p5, %s2361_s13, %s58_s20  }
   0xb   : > { %155 = sbr.rel (%p1932_p7) target bundleno = 86 (0x56), region = 20 }
  0x12   : > { %158 = sbr.rel (!%p67_p3) target bundleno = 86 (0x56), region = 24  ;;  %s160_s23 = sand.u32 (%p67_p3), 1, %s2361_s13  }
  0x13   : > { %s2083_s24 = sshll.u32 (%p67_p3), %s2369_s15, 3  ;;  %s1933_s25 = sshll.u32 (%p67_p3), %s160_s23, 10 }
  0x14   : > { %s2443_s28 = scalar_lea.vmem (%p67_p3), %s2928_s1, %s2083_s24  ;;  %s2448_s29 = scalar_lea.vmem (%p67_p3), [#allocation2], %s1933_s25 }
  0x15   : > { %v447_v0 = vld [vmem:[%s2443_s28] sm:$0xff] (%p67_p3)  ;;  %v449_v1 = vld [vmem:[%s2443_s28 + $0x10] sm:$0xff] (%p67_p3) }
  0x16   : > { %v451_v2 = vld [vmem:[%s2443_s28 + $0x20] sm:$0xff] (%p67_p3)  ;;  %448 = vst [vmem:[%s2448_s29] sm:$0xff] (%p67_p3), %v447_v0  ;;  %450 = vst [vmem:[%s2448_s29 + $0x8] sm:$0xff] (%p67_p3), %v449_v1  ;;  %v453_v3 = vld [vmem:[%s2443_s28 + $0x30] sm:$0xff] (%p67_p3) }
  0x17   : > { %452 = vst [vmem:[%s2448_s29 + $0x10] sm:$0xff] (%p67_p3), %v451_v2  ;;  %v455_v4 = vld [vmem:[%s2443_s28 + $0x40] sm:$0xff] (%p67_p3)  ;;  %v457_v5 = vld [vmem:[%s2443_s28 + $0x50] sm:$0xff] (%p67_p3)  ;;  %454 = vst [vmem:[%s2448_s29 + $0x18] sm:$0xff] (%p67_p3), %v453_v3 }
  0x18   : > { %456 = vst [vmem:[%s2448_s29 + $0x20] sm:$0xff] (%p67_p3), %v455_v4  ;;  %458 = vst [vmem:[%s2448_s29 + $0x28] sm:$0xff] (%p67_p3), %v457_v5  ;;  %v459_v6 = vld [vmem:[%s2443_s28 + $0x60] sm:$0xff] (%p67_p3)  ;;  %v461_v7 = vld [vmem:[%s2443_s28 + $0x70] sm:$0xff] (%p67_p3) }
  0x19   : > { %v463_v8 = vld [vmem:[%s2443_s28 + $0x80] sm:$0xff]  ;;  %460 = vst [vmem:[%s2448_s29 + $0x30] sm:$0xff] %v459_v6  ;;  %462 = vst [vmem:[%s2448_s29 + $0x38] sm:$0xff] %v461_v7  ;;  %v465_v9 = vld [vmem:[%s2443_s28 + $0x90] sm:$0xff] }
  0x1a   : > { %464 = vst [vmem:[%s2448_s29 + $0x40] sm:$0xff] %v463_v8  ;;  %v467_v10 = vld [vmem:[%s2443_s28 + $0xa0] sm:$0xff]  ;;  %v469_v11 = vld [vmem:[%s2443_s28 + $0xb0] sm:$0xff]  ;;  %466 = vst [vmem:[%s2448_s29 + $0x48] sm:$0xff] %v465_v9 }
  0x1b   : > { %468 = vst [vmem:[%s2448_s29 + $0x50] sm:$0xff] %v467_v10  ;;  %470 = vst [vmem:[%s2448_s29 + $0x58] sm:$0xff] %v469_v11  ;;  %v471_v12 = vld [vmem:[%s2443_s28 + $0xc0] sm:$0xff]  ;;  %v473_v13 = vld [vmem:[%s2443_s28 + $0xd0] sm:$0xff] }
  0x1c   : > { %v475_v14 = vld [vmem:[%s2443_s28 + $0xe0] sm:$0xff]  ;;  %472 = vst [vmem:[%s2448_s29 + $0x60] sm:$0xff] %v471_v12  ;;  %474 = vst [vmem:[%s2448_s29 + $0x68] sm:$0xff] %v473_v13  ;;  %v477_v15 = vld [vmem:[%s2443_s28 + $0xf0] sm:$0xff] }
  0x1d   : > { %476 = vst [vmem:[%s2448_s29 + $0x70] sm:$0xff] %v475_v14  ;;  %v479_v16 = vld [vmem:[%s2443_s28 + $0x100] sm:$0xff]  ;;  %v481_v17 = vld [vmem:[%s2443_s28 + $0x110] sm:$0xff]  ;;  %478 = vst [vmem:[%s2448_s29 + $0x78] sm:$0xff] %v477_v15 }
  0x1e   : > { %480 = vst [vmem:[%s2448_s29 + $0x80] sm:$0xff] %v479_v16  ;;  %482 = vst [vmem:[%s2448_s29 + $0x88] sm:$0xff] %v481_v17  ;;  %v483_v18 = vld [vmem:[%s2443_s28 + $0x120] sm:$0xff]  ;;  %v485_v19 = vld [vmem:[%s2443_s28 + $0x130] sm:$0xff] }
  0x1f   : > { %v487_v20 = vld [vmem:[%s2443_s28 + $0x140] sm:$0xff]  ;;  %484 = vst [vmem:[%s2448_s29 + $0x90] sm:$0xff] %v483_v18  ;;  %486 = vst [vmem:[%s2448_s29 + $0x98] sm:$0xff] %v485_v19  ;;  %v489_v21 = vld [vmem:[%s2443_s28 + $0x150] sm:$0xff] }
  0x20   : > { %488 = vst [vmem:[%s2448_s29 + $0xa0] sm:$0xff] %v487_v20  ;;  %v491_v22 = vld [vmem:[%s2443_s28 + $0x160] sm:$0xff]  ;;  %v493_v23 = vld [vmem:[%s2443_s28 + $0x170] sm:$0xff]  ;;  %490 = vst [vmem:[%s2448_s29 + $0xa8] sm:$0xff] %v489_v21 }
  0x21   : > { %492 = vst [vmem:[%s2448_s29 + $0xb0] sm:$0xff] %v491_v22  ;;  %494 = vst [vmem:[%s2448_s29 + $0xb8] sm:$0xff] %v493_v23  ;;  %v495_v24 = vld [vmem:[%s2443_s28 + $0x180] sm:$0xff]  ;;  %v497_v25 = vld [vmem:[%s2443_s28 + $0x190] sm:$0xff] }
  0x22   : > { %v499_v26 = vld [vmem:[%s2443_s28 + $0x1a0] sm:$0xff]  ;;  %496 = vst [vmem:[%s2448_s29 + $0xc0] sm:$0xff] %v495_v24  ;;  %498 = vst [vmem:[%s2448_s29 + $0xc8] sm:$0xff] %v497_v25  ;;  %v501_v27 = vld [vmem:[%s2443_s28 + $0x1b0] sm:$0xff] }
  0x23   : > { %500 = vst [vmem:[%s2448_s29 + $0xd0] sm:$0xff] %v499_v26  ;;  %v503_v28 = vld [vmem:[%s2443_s28 + $0x1c0] sm:$0xff]  ;;  %v505_v29 = vld [vmem:[%s2443_s28 + $0x1d0] sm:$0xff]  ;;  %502 = vst [vmem:[%s2448_s29 + $0xd8] sm:$0xff] %v501_v27 }
  0x24   : > { %504 = vst [vmem:[%s2448_s29 + $0xe0] sm:$0xff] %v503_v28  ;;  %506 = vst [vmem:[%s2448_s29 + $0xe8] sm:$0xff] %v505_v29  ;;  %v507_v30 = vld [vmem:[%s2443_s28 + $0x1e0] sm:$0xff]  ;;  %v509_v31 = vld [vmem:[%s2443_s28 + $0x1f0] sm:$0xff] }
  0x25   : > { %v511_v32 = vld [vmem:[%s2443_s28 + $0x200] sm:$0xff]  ;;  %508 = vst [vmem:[%s2448_s29 + $0xf0] sm:$0xff] %v507_v30  ;;  %510 = vst [vmem:[%s2448_s29 + $0xf8] sm:$0xff] %v509_v31  ;;  %v513_v33 = vld [vmem:[%s2443_s28 + $0x210] sm:$0xff] }
  0x26   : > { %512 = vst [vmem:[%s2448_s29 + $0x100] sm:$0xff] %v511_v32  ;;  %v515_v34 = vld [vmem:[%s2443_s28 + $0x220] sm:$0xff]  ;;  %v517_v35 = vld [vmem:[%s2443_s28 + $0x230] sm:$0xff]  ;;  %514 = vst [vmem:[%s2448_s29 + $0x108] sm:$0xff] %v513_v33 }
  0x27   : > { %516 = vst [vmem:[%s2448_s29 + $0x110] sm:$0xff] %v515_v34  ;;  %518 = vst [vmem:[%s2448_s29 + $0x118] sm:$0xff] %v517_v35  ;;  %v519_v36 = vld [vmem:[%s2443_s28 + $0x240] sm:$0xff]  ;;  %v521_v37 = vld [vmem:[%s2443_s28 + $0x250] sm:$0xff] }
  0x28   : > { %v523_v38 = vld [vmem:[%s2443_s28 + $0x260] sm:$0xff]  ;;  %520 = vst [vmem:[%s2448_s29 + $0x120] sm:$0xff] %v519_v36  ;;  %522 = vst [vmem:[%s2448_s29 + $0x128] sm:$0xff] %v521_v37  ;;  %v525_v39 = vld [vmem:[%s2443_s28 + $0x270] sm:$0xff] }
  0x29   : > { %524 = vst [vmem:[%s2448_s29 + $0x130] sm:$0xff] %v523_v38  ;;  %v527_v40 = vld [vmem:[%s2443_s28 + $0x280] sm:$0xff]  ;;  %v529_v41 = vld [vmem:[%s2443_s28 + $0x290] sm:$0xff]  ;;  %526 = vst [vmem:[%s2448_s29 + $0x138] sm:$0xff] %v525_v39 }
  0x2a   : > { %528 = vst [vmem:[%s2448_s29 + $0x140] sm:$0xff] %v527_v40  ;;  %530 = vst [vmem:[%s2448_s29 + $0x148] sm:$0xff] %v529_v41  ;;  %v531_v42 = vld [vmem:[%s2443_s28 + $0x2a0] sm:$0xff]  ;;  %v533_v43 = vld [vmem:[%s2443_s28 + $0x2b0] sm:$0xff] }
  0x2b   : > { %v535_v44 = vld [vmem:[%s2443_s28 + $0x2c0] sm:$0xff]  ;;  %532 = vst [vmem:[%s2448_s29 + $0x150] sm:$0xff] %v531_v42  ;;  %534 = vst [vmem:[%s2448_s29 + $0x158] sm:$0xff] %v533_v43  ;;  %v537_v45 = vld [vmem:[%s2443_s28 + $0x2d0] sm:$0xff] }
  0x2c   : > { %536 = vst [vmem:[%s2448_s29 + $0x160] sm:$0xff] %v535_v44  ;;  %v539_v46 = vld [vmem:[%s2443_s28 + $0x2e0] sm:$0xff]  ;;  %v541_v47 = vld [vmem:[%s2443_s28 + $0x2f0] sm:$0xff]  ;;  %538 = vst [vmem:[%s2448_s29 + $0x168] sm:$0xff] %v537_v45 }
  0x2d   : > { %540 = vst [vmem:[%s2448_s29 + $0x170] sm:$0xff] %v539_v46  ;;  %542 = vst [vmem:[%s2448_s29 + $0x178] sm:$0xff] %v541_v47  ;;  %v543_v48 = vld [vmem:[%s2443_s28 + $0x300] sm:$0xff]  ;;  %v545_v49 = vld [vmem:[%s2443_s28 + $0x310] sm:$0xff] }
  0x2e   : > { %v547_v50 = vld [vmem:[%s2443_s28 + $0x320] sm:$0xff]  ;;  %544 = vst [vmem:[%s2448_s29 + $0x180] sm:$0xff] %v543_v48  ;;  %546 = vst [vmem:[%s2448_s29 + $0x188] sm:$0xff] %v545_v49  ;;  %v549_v51 = vld [vmem:[%s2443_s28 + $0x330] sm:$0xff] }
  0x2f   : > { %548 = vst [vmem:[%s2448_s29 + $0x190] sm:$0xff] %v547_v50  ;;  %v551_v52 = vld [vmem:[%s2443_s28 + $0x340] sm:$0xff]  ;;  %v553_v53 = vld [vmem:[%s2443_s28 + $0x350] sm:$0xff]  ;;  %550 = vst [vmem:[%s2448_s29 + $0x198] sm:$0xff] %v549_v51 }
  0x30   : > { %552 = vst [vmem:[%s2448_s29 + $0x1a0] sm:$0xff] %v551_v52  ;;  %554 = vst [vmem:[%s2448_s29 + $0x1a8] sm:$0xff] %v553_v53  ;;  %v555_v54 = vld [vmem:[%s2443_s28 + $0x360] sm:$0xff]  ;;  %v557_v55 = vld [vmem:[%s2443_s28 + $0x370] sm:$0xff] }
  0x31   : > { %v559_v56 = vld [vmem:[%s2443_s28 + $0x380] sm:$0xff]  ;;  %556 = vst [vmem:[%s2448_s29 + $0x1b0] sm:$0xff] %v555_v54  ;;  %558 = vst [vmem:[%s2448_s29 + $0x1b8] sm:$0xff] %v557_v55  ;;  %v561_v57 = vld [vmem:[%s2443_s28 + $0x390] sm:$0xff] }
  0x32   : > { %560 = vst [vmem:[%s2448_s29 + $0x1c0] sm:$0xff] %v559_v56  ;;  %v563_v58 = vld [vmem:[%s2443_s28 + $0x3a0] sm:$0xff]  ;;  %v565_v59 = vld [vmem:[%s2443_s28 + $0x3b0] sm:$0xff]  ;;  %562 = vst [vmem:[%s2448_s29 + $0x1c8] sm:$0xff] %v561_v57 }
  0x33   : > { %564 = vst [vmem:[%s2448_s29 + $0x1d0] sm:$0xff] %v563_v58  ;;  %566 = vst [vmem:[%s2448_s29 + $0x1d8] sm:$0xff] %v565_v59  ;;  %v567_v60 = vld [vmem:[%s2443_s28 + $0x3c0] sm:$0xff]  ;;  %v569_v61 = vld [vmem:[%s2443_s28 + $0x3d0] sm:$0xff] }
  0x34   : > { %v571_v62 = vld [vmem:[%s2443_s28 + $0x3e0] sm:$0xff]  ;;  %568 = vst [vmem:[%s2448_s29 + $0x1e0] sm:$0xff] %v567_v60  ;;  %570 = vst [vmem:[%s2448_s29 + $0x1e8] sm:$0xff] %v569_v61  ;;  %v573_v63 = vld [vmem:[%s2443_s28 + $0x3f0] sm:$0xff] }
  0x35   : > { %572 = vst [vmem:[%s2448_s29 + $0x1f0] sm:$0xff] %v571_v62  ;;  %v575_v0 = vld [vmem:[%s2443_s28 + $0x400] sm:$0xff]  ;;  %v577_v1 = vld [vmem:[%s2443_s28 + $0x410] sm:$0xff]  ;;  %574 = vst [vmem:[%s2448_s29 + $0x1f8] sm:$0xff] %v573_v63 }
  0x36   : > { %576 = vst [vmem:[%s2448_s29 + $0x200] sm:$0xff] %v575_v0  ;;  %578 = vst [vmem:[%s2448_s29 + $0x208] sm:$0xff] %v577_v1  ;;  %v579_v2 = vld [vmem:[%s2443_s28 + $0x420] sm:$0xff]  ;;  %v581_v3 = vld [vmem:[%s2443_s28 + $0x430] sm:$0xff] }
  0x37   : > { %v583_v4 = vld [vmem:[%s2443_s28 + $0x440] sm:$0xff]  ;;  %580 = vst [vmem:[%s2448_s29 + $0x210] sm:$0xff] %v579_v2  ;;  %582 = vst [vmem:[%s2448_s29 + $0x218] sm:$0xff] %v581_v3  ;;  %v585_v5 = vld [vmem:[%s2443_s28 + $0x450] sm:$0xff] }
  0x38   : > { %584 = vst [vmem:[%s2448_s29 + $0x220] sm:$0xff] %v583_v4  ;;  %v587_v6 = vld [vmem:[%s2443_s28 + $0x460] sm:$0xff]  ;;  %v589_v7 = vld [vmem:[%s2443_s28 + $0x470] sm:$0xff]  ;;  %586 = vst [vmem:[%s2448_s29 + $0x228] sm:$0xff] %v585_v5 }
  0x39   : > { %588 = vst [vmem:[%s2448_s29 + $0x230] sm:$0xff] %v587_v6  ;;  %590 = vst [vmem:[%s2448_s29 + $0x238] sm:$0xff] %v589_v7  ;;  %v591_v8 = vld [vmem:[%s2443_s28 + $0x480] sm:$0xff]  ;;  %v593_v9 = vld [vmem:[%s2443_s28 + $0x490] sm:$0xff] }
  0x3a   : > { %v595_v10 = vld [vmem:[%s2443_s28 + $0x4a0] sm:$0xff]  ;;  %592 = vst [vmem:[%s2448_s29 + $0x240] sm:$0xff] %v591_v8  ;;  %594 = vst [vmem:[%s2448_s29 + $0x248] sm:$0xff] %v593_v9  ;;  %v597_v11 = vld [vmem:[%s2443_s28 + $0x4b0] sm:$0xff] }
  0x3b   : > { %596 = vst [vmem:[%s2448_s29 + $0x250] sm:$0xff] %v595_v10  ;;  %v599_v12 = vld [vmem:[%s2443_s28 + $0x4c0] sm:$0xff]  ;;  %v601_v13 = vld [vmem:[%s2443_s28 + $0x4d0] sm:$0xff]  ;;  %598 = vst [vmem:[%s2448_s29 + $0x258] sm:$0xff] %v597_v11 }
  0x3c   : > { %600 = vst [vmem:[%s2448_s29 + $0x260] sm:$0xff] %v599_v12  ;;  %602 = vst [vmem:[%s2448_s29 + $0x268] sm:$0xff] %v601_v13  ;;  %v603_v14 = vld [vmem:[%s2443_s28 + $0x4e0] sm:$0xff]  ;;  %v605_v15 = vld [vmem:[%s2443_s28 + $0x4f0] sm:$0xff] }
  0x3d   : > { %v607_v16 = vld [vmem:[%s2443_s28 + $0x500] sm:$0xff]  ;;  %604 = vst [vmem:[%s2448_s29 + $0x270] sm:$0xff] %v603_v14  ;;  %606 = vst [vmem:[%s2448_s29 + $0x278] sm:$0xff] %v605_v15  ;;  %v609_v17 = vld [vmem:[%s2443_s28 + $0x510] sm:$0xff] }
  0x3e   : > { %608 = vst [vmem:[%s2448_s29 + $0x280] sm:$0xff] %v607_v16  ;;  %v611_v18 = vld [vmem:[%s2443_s28 + $0x520] sm:$0xff]  ;;  %v613_v19 = vld [vmem:[%s2443_s28 + $0x530] sm:$0xff]  ;;  %610 = vst [vmem:[%s2448_s29 + $0x288] sm:$0xff] %v609_v17 }
  0x3f   : > { %612 = vst [vmem:[%s2448_s29 + $0x290] sm:$0xff] %v611_v18  ;;  %614 = vst [vmem:[%s2448_s29 + $0x298] sm:$0xff] %v613_v19  ;;  %v615_v20 = vld [vmem:[%s2443_s28 + $0x540] sm:$0xff]  ;;  %v617_v21 = vld [vmem:[%s2443_s28 + $0x550] sm:$0xff] }
  0x40   : > { %v619_v22 = vld [vmem:[%s2443_s28 + $0x560] sm:$0xff]  ;;  %616 = vst [vmem:[%s2448_s29 + $0x2a0] sm:$0xff] %v615_v20  ;;  %618 = vst [vmem:[%s2448_s29 + $0x2a8] sm:$0xff] %v617_v21  ;;  %v621_v23 = vld [vmem:[%s2443_s28 + $0x570] sm:$0xff] }
  0x41   : > { %620 = vst [vmem:[%s2448_s29 + $0x2b0] sm:$0xff] %v619_v22  ;;  %v623_v24 = vld [vmem:[%s2443_s28 + $0x580] sm:$0xff]  ;;  %v625_v25 = vld [vmem:[%s2443_s28 + $0x590] sm:$0xff]  ;;  %622 = vst [vmem:[%s2448_s29 + $0x2b8] sm:$0xff] %v621_v23 }
  0x42   : > { %624 = vst [vmem:[%s2448_s29 + $0x2c0] sm:$0xff] %v623_v24  ;;  %626 = vst [vmem:[%s2448_s29 + $0x2c8] sm:$0xff] %v625_v25  ;;  %v627_v26 = vld [vmem:[%s2443_s28 + $0x5a0] sm:$0xff]  ;;  %v629_v27 = vld [vmem:[%s2443_s28 + $0x5b0] sm:$0xff] }
  0x43   : > { %v631_v28 = vld [vmem:[%s2443_s28 + $0x5c0] sm:$0xff]  ;;  %628 = vst [vmem:[%s2448_s29 + $0x2d0] sm:$0xff] %v627_v26  ;;  %630 = vst [vmem:[%s2448_s29 + $0x2d8] sm:$0xff] %v629_v27  ;;  %v633_v29 = vld [vmem:[%s2443_s28 + $0x5d0] sm:$0xff] }
  0x44   : > { %632 = vst [vmem:[%s2448_s29 + $0x2e0] sm:$0xff] %v631_v28  ;;  %v635_v30 = vld [vmem:[%s2443_s28 + $0x5e0] sm:$0xff]  ;;  %v637_v31 = vld [vmem:[%s2443_s28 + $0x5f0] sm:$0xff]  ;;  %634 = vst [vmem:[%s2448_s29 + $0x2e8] sm:$0xff] %v633_v29 }
  0x45   : > { %636 = vst [vmem:[%s2448_s29 + $0x2f0] sm:$0xff] %v635_v30  ;;  %638 = vst [vmem:[%s2448_s29 + $0x2f8] sm:$0xff] %v637_v31  ;;  %v639_v32 = vld [vmem:[%s2443_s28 + $0x600] sm:$0xff]  ;;  %v641_v33 = vld [vmem:[%s2443_s28 + $0x610] sm:$0xff] }
  0x46   : > { %v643_v34 = vld [vmem:[%s2443_s28 + $0x620] sm:$0xff]  ;;  %640 = vst [vmem:[%s2448_s29 + $0x300] sm:$0xff] %v639_v32  ;;  %642 = vst [vmem:[%s2448_s29 + $0x308] sm:$0xff] %v641_v33  ;;  %v645_v35 = vld [vmem:[%s2443_s28 + $0x630] sm:$0xff] }
  0x47   : > { %644 = vst [vmem:[%s2448_s29 + $0x310] sm:$0xff] %v643_v34  ;;  %v647_v36 = vld [vmem:[%s2443_s28 + $0x640] sm:$0xff]  ;;  %v649_v37 = vld [vmem:[%s2443_s28 + $0x650] sm:$0xff]  ;;  %646 = vst [vmem:[%s2448_s29 + $0x318] sm:$0xff] %v645_v35 }
  0x48   : > { %648 = vst [vmem:[%s2448_s29 + $0x320] sm:$0xff] %v647_v36  ;;  %650 = vst [vmem:[%s2448_s29 + $0x328] sm:$0xff] %v649_v37  ;;  %v651_v38 = vld [vmem:[%s2443_s28 + $0x660] sm:$0xff]  ;;  %v653_v39 = vld [vmem:[%s2443_s28 + $0x670] sm:$0xff] }
  0x49   : > { %v655_v40 = vld [vmem:[%s2443_s28 + $0x680] sm:$0xff]  ;;  %652 = vst [vmem:[%s2448_s29 + $0x330] sm:$0xff] %v651_v38  ;;  %654 = vst [vmem:[%s2448_s29 + $0x338] sm:$0xff] %v653_v39  ;;  %v657_v41 = vld [vmem:[%s2443_s28 + $0x690] sm:$0xff] }
  0x4a   : > { %656 = vst [vmem:[%s2448_s29 + $0x340] sm:$0xff] %v655_v40  ;;  %v659_v42 = vld [vmem:[%s2443_s28 + $0x6a0] sm:$0xff]  ;;  %v661_v43 = vld [vmem:[%s2443_s28 + $0x6b0] sm:$0xff]  ;;  %658 = vst [vmem:[%s2448_s29 + $0x348] sm:$0xff] %v657_v41 }
  0x4b   : > { %660 = vst [vmem:[%s2448_s29 + $0x350] sm:$0xff] %v659_v42  ;;  %662 = vst [vmem:[%s2448_s29 + $0x358] sm:$0xff] %v661_v43  ;;  %v663_v44 = vld [vmem:[%s2443_s28 + $0x6c0] sm:$0xff]  ;;  %v665_v45 = vld [vmem:[%s2443_s28 + $0x6d0] sm:$0xff] }
  0x4c   : > { %v667_v46 = vld [vmem:[%s2443_s28 + $0x6e0] sm:$0xff]  ;;  %664 = vst [vmem:[%s2448_s29 + $0x360] sm:$0xff] %v663_v44  ;;  %666 = vst [vmem:[%s2448_s29 + $0x368] sm:$0xff] %v665_v45  ;;  %v669_v47 = vld [vmem:[%s2443_s28 + $0x6f0] sm:$0xff] }
  0x4d   : > { %668 = vst [vmem:[%s2448_s29 + $0x370] sm:$0xff] %v667_v46  ;;  %v671_v48 = vld [vmem:[%s2443_s28 + $0x700] sm:$0xff]  ;;  %v673_v49 = vld [vmem:[%s2443_s28 + $0x710] sm:$0xff]  ;;  %670 = vst [vmem:[%s2448_s29 + $0x378] sm:$0xff] %v669_v47 }
  0x4e   : > { %672 = vst [vmem:[%s2448_s29 + $0x380] sm:$0xff] %v671_v48  ;;  %674 = vst [vmem:[%s2448_s29 + $0x388] sm:$0xff] %v673_v49  ;;  %v675_v50 = vld [vmem:[%s2443_s28 + $0x720] sm:$0xff]  ;;  %v677_v51 = vld [vmem:[%s2443_s28 + $0x730] sm:$0xff] }
  0x4f   : > { %v679_v52 = vld [vmem:[%s2443_s28 + $0x740] sm:$0xff]  ;;  %676 = vst [vmem:[%s2448_s29 + $0x390] sm:$0xff] %v675_v50  ;;  %678 = vst [vmem:[%s2448_s29 + $0x398] sm:$0xff] %v677_v51  ;;  %v681_v53 = vld [vmem:[%s2443_s28 + $0x750] sm:$0xff] }
  0x50   : > { %680 = vst [vmem:[%s2448_s29 + $0x3a0] sm:$0xff] %v679_v52  ;;  %v683_v54 = vld [vmem:[%s2443_s28 + $0x760] sm:$0xff]  ;;  %v685_v55 = vld [vmem:[%s2443_s28 + $0x770] sm:$0xff]  ;;  %682 = vst [vmem:[%s2448_s29 + $0x3a8] sm:$0xff] %v681_v53 }
  0x51   : > { %684 = vst [vmem:[%s2448_s29 + $0x3b0] sm:$0xff] %v683_v54  ;;  %686 = vst [vmem:[%s2448_s29 + $0x3b8] sm:$0xff] %v685_v55  ;;  %v687_v56 = vld [vmem:[%s2443_s28 + $0x780] sm:$0xff]  ;;  %v689_v57 = vld [vmem:[%s2443_s28 + $0x790] sm:$0xff] }
  0x52   : > { %v691_v58 = vld [vmem:[%s2443_s28 + $0x7a0] sm:$0xff]  ;;  %688 = vst [vmem:[%s2448_s29 + $0x3c0] sm:$0xff] %v687_v56  ;;  %690 = vst [vmem:[%s2448_s29 + $0x3c8] sm:$0xff] %v689_v57  ;;  %v693_v59 = vld [vmem:[%s2443_s28 + $0x7b0] sm:$0xff] }
  0x53   : > { %692 = vst [vmem:[%s2448_s29 + $0x3d0] sm:$0xff] %v691_v58  ;;  %v695_v60 = vld [vmem:[%s2443_s28 + $0x7c0] sm:$0xff]  ;;  %v697_v61 = vld [vmem:[%s2443_s28 + $0x7d0] sm:$0xff]  ;;  %694 = vst [vmem:[%s2448_s29 + $0x3d8] sm:$0xff] %v693_v59 }
  0x54   : > { %696 = vst [vmem:[%s2448_s29 + $0x3e0] sm:$0xff] %v695_v60  ;;  %698 = vst [vmem:[%s2448_s29 + $0x3e8] sm:$0xff] %v697_v61  ;;  %v699_v62 = vld [vmem:[%s2443_s28 + $0x7e0] sm:$0xff]  ;;  %v701_v63 = vld [vmem:[%s2443_s28 + $0x7f0] sm:$0xff] }
  0x55   : > { %700 = vst [vmem:[%s2448_s29 + $0x3f0] sm:$0xff] %v699_v62  ;;  %702 = vst [vmem:[%s2448_s29 + $0x3f8] sm:$0xff] %v701_v63 }
  0x56 PF: > { %p1936_p8 = scmp.ge.s32.totalorder %s2373_s16, 1  ;;  %p715_p9 = scmp.lt.s32.totalorder %s2373_s16, 3 }
  0x58   : > { %p716_p10 = pnand %p1936_p8, %p715_p9 }
  0x59   : > { %s722_s30 = sand.u32 (!%p716_p10), 1, %s2357_s12   ;;  %v2709_v0 = vld [vmem:[%s2927_s0] sm:$0xff] (!%p716_p10)  ;;  %v2719_v2 = vld [vmem:[%s2927_s0 + $0x10] sm:$0xff] (!%p716_p10)  ;;  %s1939_s4 = sshll.u32 (!%p716_p10), %s2365_s14, 1 }
  0x5a   : > { %719 = sbr.rel (%p716_p10) target bundleno = 454 (0x1c6), region = 66  ;;  %v2714_v1 = vld [vmem:[%s2927_s0 + $0x20] sm:$0xff] (!%p716_p10)  ;;  %s1937_s10 = sshll.u32 (!%p716_p10), %s722_s30, 10  ;;  %v2730_v5 = vld [vmem:[%s2927_s0 + $0x30] sm:$0xff] (!%p716_p10) }
  0x5b   : > { %v1940_v3 = vcombine.low (!%p716_p10), %v2709_v0, %v2714_v1  ;;  %v1941_v4 = vcombine.high (!%p716_p10), %v2709_v0, %v2714_v1  ;;  %v1944_v6 = vcombine.low (!%p716_p10), %v2719_v2, %v2730_v5  ;;  %v1945_v7 = vcombine.high (!%p716_p10), %v2719_v2, %v2730_v5  ;;  %s2736_s19 = scalar_lea.vmem (!%p716_p10), [#allocation2], %s1937_s10  ;;  %p763_p11 = scmp.lt.s32.totalorder (!%p716_p10), %s1939_s4, 3 }
  0x5c   : > { %v2143_v8 = vld [vmem:[%s2736_s19 + $0x4] ss:$8 sps:$4 sm:$0xff] (!%p716_p10)   ;;  %v2147_v10 = vld [vmem:[%s2736_s19] ss:$8 sps:$4 sm:$0xff] (!%p716_p10)   ;;  %v2149_v12 = vld [vmem:[%s2736_s19 + $0x14] ss:$8 sps:$4 sm:$0xff] (!%p716_p10)  }
  0x5d   : > { %1629 = vmatprep.mubr.bf16.mxu1 (!%p716_p10), %v1941_v4  ;;  %v2145_v9 = vld [vmem:[%s2736_s19 + $0x204] ss:$8 sps:$4 sm:$0xff] (!%p716_p10)   ;;  %1715 = vmatprep.mubr.bf16.mxu0 (!%p716_p10), %v1945_v7  ;;  %v2148_v11 = vld [vmem:[%s2736_s19 + $0x200] ss:$8 sps:$4 sm:$0xff] (!%p716_p10)   ;;  %v2151_v13 = vld [vmem:[%s2736_s19 + $0x214] ss:$8 sps:$4 sm:$0xff] (!%p716_p10)  }
  0x5e   : > { %1597 = vmatprep.subr.bf16.mxu1 (!%p716_p10), %v2143_v8  ;;  %1683 = vmatprep.subr.bf16.mxu0 (!%p716_p10), %v2145_v9  ;;  %v2153_v14 = vld [vmem:[%s2736_s19 + $0x10] ss:$8 sps:$4 sm:$0xff] (!%p716_p10)   ;;  %v2155_v16 = vld [vmem:[%s2736_s19 + $0x24] ss:$8 sps:$4 sm:$0xff] (!%p716_p10)   ;;  %v2159_v18 = vld [vmem:[%s2736_s19 + $0x20] ss:$8 sps:$4 sm:$0xff] (!%p716_p10)  }
  0x5f   : > { %1598 = vmatpush1.bf16.msra.mxu1 (!%p716_p10), %v2147_v10  ;;  %1684 = vmatpush1.bf16.msra.mxu0 (!%p716_p10), %v2148_v11  ;;  %v2154_v15 = vld [vmem:[%s2736_s19 + $0x210] ss:$8 sps:$4 sm:$0xff] (!%p716_p10)   ;;  %v2157_v17 = vld [vmem:[%s2736_s19 + $0x224] ss:$8 sps:$4 sm:$0xff] (!%p716_p10)   ;;  %v2160_v19 = vld [vmem:[%s2736_s19 + $0x220] ss:$8 sps:$4 sm:$0xff] (!%p716_p10)  }
  0x60   : > { %1599 = vmatprep.subr.bf16.mxu1 (!%p716_p10), %v2149_v12  ;;  %1685 = vmatprep.subr.bf16.mxu0 (!%p716_p10), %v2151_v13  ;;  %v2161_v20 = vld [vmem:[%s2736_s19 + $0x34] ss:$8 sps:$4 sm:$0xff] (!%p716_p10)   ;;  %v2165_v22 = vld [vmem:[%s2736_s19 + $0x30] ss:$8 sps:$4 sm:$0xff] (!%p716_p10)   ;;  %v2167_v24 = vld [vmem:[%s2736_s19 + $0x44] ss:$8 sps:$4 sm:$0xff] (!%p716_p10)  }
  0x61   : > { %v2163_v21 = vld [vmem:[%s2736_s19 + $0x234] ss:$8 sps:$4 sm:$0xff]   ;;  %v2166_v23 = vld [vmem:[%s2736_s19 + $0x230] ss:$8 sps:$4 sm:$0xff]   ;;  %v2169_v25 = vld [vmem:[%s2736_s19 + $0x244] ss:$8 sps:$4 sm:$0xff]  }
  0x62   : > { %v2171_v26 = vld [vmem:[%s2736_s19 + $0x40] ss:$8 sps:$4 sm:$0xff]   ;;  %v2173_v28 = vld [vmem:[%s2736_s19 + $0x54] ss:$8 sps:$4 sm:$0xff]   ;;  %v2177_v30 = vld [vmem:[%s2736_s19 + $0x50] ss:$8 sps:$4 sm:$0xff]  }
  0x63   : > { %1600 = vmatpush1.bf16.msra.mxu1 %v2153_v14  ;;  %1686 = vmatpush1.bf16.msra.mxu0 %v2154_v15  ;;  %v2172_v27 = vld [vmem:[%s2736_s19 + $0x240] ss:$8 sps:$4 sm:$0xff]   ;;  %v2175_v29 = vld [vmem:[%s2736_s19 + $0x254] ss:$8 sps:$4 sm:$0xff]   ;;  %v2178_v31 = vld [vmem:[%s2736_s19 + $0x250] ss:$8 sps:$4 sm:$0xff]  }
  0x64   : > { %1601 = vmatprep.subr.bf16.mxu1 %v2155_v16  ;;  %1687 = vmatprep.subr.bf16.mxu0 %v2157_v17  ;;  %v2179_v32 = vld [vmem:[%s2736_s19 + $0x64] ss:$8 sps:$4 sm:$0xff]   ;;  %v2183_v34 = vld [vmem:[%s2736_s19 + $0x60] ss:$8 sps:$4 sm:$0xff]   ;;  %v2185_v36 = vld [vmem:[%s2736_s19 + $0x74] ss:$8 sps:$4 sm:$0xff]  }
  0x65   : > { %v2181_v33 = vld [vmem:[%s2736_s19 + $0x264] ss:$8 sps:$4 sm:$0xff]   ;;  %v2184_v35 = vld [vmem:[%s2736_s19 + $0x260] ss:$8 sps:$4 sm:$0xff]   ;;  %v2187_v37 = vld [vmem:[%s2736_s19 + $0x274] ss:$8 sps:$4 sm:$0xff]  }
  0x66   : > { %v2189_v38 = vld [vmem:[%s2736_s19 + $0x70] ss:$8 sps:$4 sm:$0xff]   ;;  %v2191_v40 = vld [vmem:[%s2736_s19 + $0x84] ss:$8 sps:$4 sm:$0xff]   ;;  %v2195_v42 = vld [vmem:[%s2736_s19 + $0x80] ss:$8 sps:$4 sm:$0xff]  }
  0x67   : > { %1602 = vmatpush1.bf16.msra.mxu1 %v2159_v18  ;;  %1688 = vmatpush1.bf16.msra.mxu0 %v2160_v19  ;;  %v2190_v39 = vld [vmem:[%s2736_s19 + $0x270] ss:$8 sps:$4 sm:$0xff]   ;;  %v2193_v41 = vld [vmem:[%s2736_s19 + $0x284] ss:$8 sps:$4 sm:$0xff]   ;;  %v2196_v43 = vld [vmem:[%s2736_s19 + $0x280] ss:$8 sps:$4 sm:$0xff]  }
  0x68   : > { %1603 = vmatprep.subr.bf16.mxu1 %v2161_v20  ;;  %1689 = vmatprep.subr.bf16.mxu0 %v2163_v21  ;;  %v2197_v44 = vld [vmem:[%s2736_s19 + $0x94] ss:$8 sps:$4 sm:$0xff]   ;;  %v2201_v46 = vld [vmem:[%s2736_s19 + $0x90] ss:$8 sps:$4 sm:$0xff]   ;;  %v2203_v48 = vld [vmem:[%s2736_s19 + $0xa4] ss:$8 sps:$4 sm:$0xff]  }
  0x69   : > { %v2199_v45 = vld [vmem:[%s2736_s19 + $0x294] ss:$8 sps:$4 sm:$0xff]   ;;  %v2202_v47 = vld [vmem:[%s2736_s19 + $0x290] ss:$8 sps:$4 sm:$0xff]   ;;  %v2205_v49 = vld [vmem:[%s2736_s19 + $0x2a4] ss:$8 sps:$4 sm:$0xff]  }
  0x6a   : > { %v2207_v50 = vld [vmem:[%s2736_s19 + $0xa0] ss:$8 sps:$4 sm:$0xff]   ;;  %v2209_v52 = vld [vmem:[%s2736_s19 + $0xb4] ss:$8 sps:$4 sm:$0xff]   ;;  %v2213_v54 = vld [vmem:[%s2736_s19 + $0xb0] ss:$8 sps:$4 sm:$0xff]  }
  0x6b   : > { %1604 = vmatpush1.bf16.msra.mxu1 %v2165_v22  ;;  %1690 = vmatpush1.bf16.msra.mxu0 %v2166_v23  ;;  %v2208_v51 = vld [vmem:[%s2736_s19 + $0x2a0] ss:$8 sps:$4 sm:$0xff]   ;;  %v2211_v53 = vld [vmem:[%s2736_s19 + $0x2b4] ss:$8 sps:$4 sm:$0xff]   ;;  %v2214_v55 = vld [vmem:[%s2736_s19 + $0x2b0] ss:$8 sps:$4 sm:$0xff]  }
  0x6c   : > { %1605 = vmatprep.subr.bf16.mxu1 %v2167_v24  ;;  %1691 = vmatprep.subr.bf16.mxu0 %v2169_v25  ;;  %v2215_v56 = vld [vmem:[%s2736_s19 + $0xc4] ss:$8 sps:$4 sm:$0xff]   ;;  %v2219_v58 = vld [vmem:[%s2736_s19 + $0xc0] ss:$8 sps:$4 sm:$0xff]   ;;  %v2221_v60 = vld [vmem:[%s2736_s19 + $0xd4] ss:$8 sps:$4 sm:$0xff]  }
  0x6d   : > { %v2217_v57 = vld [vmem:[%s2736_s19 + $0x2c4] ss:$8 sps:$4 sm:$0xff]   ;;  %v2220_v59 = vld [vmem:[%s2736_s19 + $0x2c0] ss:$8 sps:$4 sm:$0xff]   ;;  %v2223_v61 = vld [vmem:[%s2736_s19 + $0x2d4] ss:$8 sps:$4 sm:$0xff]  }
  0x6e   : > { %v2225_v62 = vld [vmem:[%s2736_s19 + $0xd0] ss:$8 sps:$4 sm:$0xff]   ;;  %v2227_v4 = vld [vmem:[%s2736_s19 + $0xe4] ss:$8 sps:$4 sm:$0xff]   ;;  %v2231_v8 = vld [vmem:[%s2736_s19 + $0xe0] ss:$8 sps:$4 sm:$0xff]  }
  0x6f   : > { %1606 = vmatpush1.bf16.msra.mxu1 %v2171_v26  ;;  %1692 = vmatpush1.bf16.msra.mxu0 %v2172_v27  ;;  %v2226_v63 = vld [vmem:[%s2736_s19 + $0x2d0] ss:$8 sps:$4 sm:$0xff]   ;;  %v2229_v7 = vld [vmem:[%s2736_s19 + $0x2e4] ss:$8 sps:$4 sm:$0xff]   ;;  %v2232_v9 = vld [vmem:[%s2736_s19 + $0x2e0] ss:$8 sps:$4 sm:$0xff]  }
  0x70   : > { %1607 = vmatprep.subr.bf16.mxu1 %v2173_v28  ;;  %1693 = vmatprep.subr.bf16.mxu0 %v2175_v29  ;;  %v2233_v10 = vld [vmem:[%s2736_s19 + $0xf4] ss:$8 sps:$4 sm:$0xff]   ;;  %v2237_v12 = vld [vmem:[%s2736_s19 + $0xf0] ss:$8 sps:$4 sm:$0xff]   ;;  %v2241_v14 = vld [vmem:[%s2736_s19 + $0x104] ss:$8 sps:$4 sm:$0xff]  }
  0x71   : > { %v2235_v11 = vld [vmem:[%s2736_s19 + $0x2f4] ss:$8 sps:$4 sm:$0xff]   ;;  %v2238_v13 = vld [vmem:[%s2736_s19 + $0x2f0] ss:$8 sps:$4 sm:$0xff]   ;;  %v2244_v15 = vld [vmem:[%s2736_s19 + $0x304] ss:$8 sps:$4 sm:$0xff]  }
  0x72   : > { %v2807_v16 = vld [vmem:[%s2927_s0 + $0x8] sm:$0xff]  ;;  %v2247_v20 = vld [vmem:[%s2736_s19 + $0x114] ss:$8 sps:$4 sm:$0xff]   ;;  %v2245_v23 = vld [vmem:[%s2736_s19 + $0x110] ss:$8 sps:$4 sm:$0xff]   ;;  %s2939_s4 = smov (!%p763_p11, %s1939_s4), 3 }
  0x73   : > { %1608 = vmatpush1.bf16.msra.mxu1 %v2177_v30  ;;  %1694 = vmatpush1.bf16.msra.mxu0 %v2178_v31  ;;  %v2812_v17 = vld [vmem:[%s2927_s0 + $0x28] sm:$0xff]  ;;  %v2250_v21 = vld [vmem:[%s2736_s19 + $0x314] ss:$8 sps:$4 sm:$0xff]   ;;  %v2248_v24 = vld [vmem:[%s2736_s19 + $0x310] ss:$8 sps:$4 sm:$0xff]   ;;  %s765_s7 = scalar_lea.vmem %s2929_s2, %s2939_s4  ;;  %s1938_s8 = sshll.u32 %s722_s30, 4 }
  0x74   : > { %1609 = vmatprep.subr.bf16.mxu1 %v2179_v32  ;;  %1695 = vmatprep.subr.bf16.mxu0 %v2181_v33  ;;  %v2239_v18 = vld [vmem:[%s2736_s19 + $0x100] ss:$8 sps:$4 sm:$0xff]   ;;  %v1943_v22 = vcombine.high %v2807_v16, %v2812_v17  ;;  %v2253_v25 = vld [vmem:[%s2736_s19 + $0x124] ss:$8 sps:$4 sm:$0xff]   ;;  %v2259_v2 = vld [vmem:[%s2736_s19 + $0x134] ss:$8 sps:$4 sm:$0xff]  }
  0x75   : > { %v2242_v19 = vld [vmem:[%s2736_s19 + $0x300] ss:$8 sps:$4 sm:$0xff]   ;;  %v2256_v26 = vld [vmem:[%s2736_s19 + $0x324] ss:$8 sps:$4 sm:$0xff]   ;;  %v2257_v5 = vld [vmem:[%s2736_s19 + $0x130] ss:$8 sps:$4 sm:$0xff]  }
  0x76   : > { %v2251_v0 = vld [vmem:[%s2736_s19 + $0x120] ss:$8 sps:$4 sm:$0xff]   ;;  %v2265_v27 = vld [vmem:[%s2736_s19 + $0x144] ss:$8 sps:$4 sm:$0xff]   ;;  %v2271_v31 = vld [vmem:[%s2736_s19 + $0x154] ss:$8 sps:$4 sm:$0xff]  }
  0x77   : > { %1610 = vmatpush1.bf16.msra.mxu1 %v2183_v34  ;;  %1696 = vmatpush1.bf16.msra.mxu0 %v2184_v35  ;;  %v2254_v1 = vld [vmem:[%s2736_s19 + $0x320] ss:$8 sps:$4 sm:$0xff]   ;;  %v2268_v28 = vld [vmem:[%s2736_s19 + $0x344] ss:$8 sps:$4 sm:$0xff]   ;;  %v2274_v32 = vld [vmem:[%s2736_s19 + $0x354] ss:$8 sps:$4 sm:$0xff]  }
  0x78   : > { %1611 = vmatprep.subr.bf16.mxu1 %v2185_v36  ;;  %1697 = vmatprep.subr.bf16.mxu0 %v2187_v37  ;;  %v2263_v29 = vld [vmem:[%s2736_s19 + $0x140] ss:$8 sps:$4 sm:$0xff]   ;;  %v2269_v33 = vld [vmem:[%s2736_s19 + $0x150] ss:$8 sps:$4 sm:$0xff]   ;;  %v2277_v36 = vld [vmem:[%s2736_s19 + $0x164] ss:$8 sps:$4 sm:$0xff]  }
  0x79   : > { %v2266_v30 = vld [vmem:[%s2736_s19 + $0x340] ss:$8 sps:$4 sm:$0xff]   ;;  %v2846_v34 = vld [vmem:[%s2927_s0 + $0x18] sm:$0xff]  ;;  %v2280_v37 = vld [vmem:[%s2736_s19 + $0x364] ss:$8 sps:$4 sm:$0xff]   ;;  %s753_s9 = scalar_lea.vmem [#allocation3], %s1938_s8 }
  0x7a   : > { %v2272_v35 = vld [vmem:[%s2736_s19 + $0x350] ss:$8 sps:$4 sm:$0xff]   ;;  %s2086_s10 = sshll.u32 (%p2430_p6), %s2365_s14, 3 }
  0x7b   : > { %1612 = vmatpush1.bf16.msra.mxu1 %v2189_v38  ;;  %1698 = vmatpush1.bf16.msra.mxu0 %v2190_v39  ;;  %v2854_v38 = vld [vmem:[%s2927_s0 + $0x38] sm:$0xff]  ;;  %s1799_s11 = scalar_lea.vmem (%p2430_p6), %s2930_s3, %s2086_s10 }
  0x7c   : > { %1613 = vmatprep.subr.bf16.mxu1 %v2191_v40  ;;  %1699 = vmatprep.subr.bf16.mxu0 %v2193_v41  ;;  %v1947_v39 = vcombine.high %v2846_v34, %v2854_v38  ;;  %v2275_v40 = vld [vmem:[%s2736_s19 + $0x160] ss:$8 sps:$4 sm:$0xff]  }
  0x7d   : > { %v2278_v41 = vld [vmem:[%s2736_s19 + $0x360] ss:$8 sps:$4 sm:$0xff]  }
  0x7f   : > { %1614 = vmatpush1.bf16.msra.mxu1 %v2195_v42  ;;  %1700 = vmatpush1.bf16.msra.mxu0 %v2196_v43  ;;  %v2283_v42 = vld [vmem:[%s2736_s19 + $0x174] ss:$8 sps:$4 sm:$0xff]  }
  0x80   : > { %1615 = vmatprep.subr.bf16.mxu1 %v2197_v44  ;;  %1701 = vmatprep.subr.bf16.mxu0 %v2199_v45  ;;  %v2286_v43 = vld [vmem:[%s2736_s19 + $0x374] ss:$8 sps:$4 sm:$0xff]   ;;  %v2281_v44 = vld [vmem:[%s2736_s19 + $0x170] ss:$8 sps:$4 sm:$0xff]  }
  0x81   : > { %v2284_v45 = vld [vmem:[%s2736_s19 + $0x370] ss:$8 sps:$4 sm:$0xff]  }
  0x83   : > { %1616 = vmatpush1.bf16.msra.mxu1 %v2201_v46  ;;  %1702 = vmatpush1.bf16.msra.mxu0 %v2202_v47  ;;  %v2289_v46 = vld [vmem:[%s2736_s19 + $0x184] ss:$8 sps:$4 sm:$0xff]  }
  0x84   : > { %1617 = vmatprep.subr.bf16.mxu1 %v2203_v48  ;;  %1703 = vmatprep.subr.bf16.mxu0 %v2205_v49  ;;  %v2292_v47 = vld [vmem:[%s2736_s19 + $0x384] ss:$8 sps:$4 sm:$0xff]   ;;  %v2287_v48 = vld [vmem:[%s2736_s19 + $0x180] ss:$8 sps:$4 sm:$0xff]  }
  0x85   : > { %v2290_v49 = vld [vmem:[%s2736_s19 + $0x380] ss:$8 sps:$4 sm:$0xff]  }
  0x87   : > { %1618 = vmatpush1.bf16.msra.mxu1 %v2207_v50  ;;  %1704 = vmatpush1.bf16.msra.mxu0 %v2208_v51  ;;  %v2295_v50 = vld [vmem:[%s2736_s19 + $0x194] ss:$8 sps:$4 sm:$0xff]  }
  0x88   : > { %1619 = vmatprep.subr.bf16.mxu1 %v2209_v52  ;;  %1705 = vmatprep.subr.bf16.mxu0 %v2211_v53  ;;  %v2298_v51 = vld [vmem:[%s2736_s19 + $0x394] ss:$8 sps:$4 sm:$0xff]   ;;  %v2293_v52 = vld [vmem:[%s2736_s19 + $0x190] ss:$8 sps:$4 sm:$0xff]  }
  0x89   : > { %v2296_v53 = vld [vmem:[%s2736_s19 + $0x390] ss:$8 sps:$4 sm:$0xff]  }
  0x8b   : > { %1620 = vmatpush1.bf16.msra.mxu1 %v2213_v54  ;;  %1706 = vmatpush1.bf16.msra.mxu0 %v2214_v55  ;;  %v2301_v54 = vld [vmem:[%s2736_s19 + $0x1a4] ss:$8 sps:$4 sm:$0xff]  }
  0x8c   : > { %1621 = vmatprep.subr.bf16.mxu1 %v2215_v56  ;;  %1707 = vmatprep.subr.bf16.mxu0 %v2217_v57  ;;  %v2304_v55 = vld [vmem:[%s2736_s19 + $0x3a4] ss:$8 sps:$4 sm:$0xff]   ;;  %v2299_v56 = vld [vmem:[%s2736_s19 + $0x1a0] ss:$8 sps:$4 sm:$0xff]  }
  0x8d   : > { %v2302_v57 = vld [vmem:[%s2736_s19 + $0x3a0] ss:$8 sps:$4 sm:$0xff]  }
  0x8f   : > { %1622 = vmatpush1.bf16.msra.mxu1 %v2219_v58  ;;  %1708 = vmatpush1.bf16.msra.mxu0 %v2220_v59  ;;  %v2307_v58 = vld [vmem:[%s2736_s19 + $0x1b4] ss:$8 sps:$4 sm:$0xff]  }
  0x90   : > { %1623 = vmatprep.subr.bf16.mxu1 %v2221_v60  ;;  %1709 = vmatprep.subr.bf16.mxu0 %v2223_v61  ;;  %v2310_v59 = vld [vmem:[%s2736_s19 + $0x3b4] ss:$8 sps:$4 sm:$0xff]   ;;  %v2305_v60 = vld [vmem:[%s2736_s19 + $0x1b0] ss:$8 sps:$4 sm:$0xff]  }
  0x91   : > { %v2308_v61 = vld [vmem:[%s2736_s19 + $0x3b0] ss:$8 sps:$4 sm:$0xff]  }
  0x93   : > { %1624 = vmatpush1.bf16.msra.mxu1 %v2225_v62  ;;  %1710 = vmatpush1.bf16.msra.mxu0 %v2226_v63  ;;  %v2313_v62 = vld [vmem:[%s2736_s19 + $0x1c4] ss:$8 sps:$4 sm:$0xff]  }
  0x94   : > { %1625 = vmatprep.subr.bf16.mxu1 %v2227_v4  ;;  %1711 = vmatprep.subr.bf16.mxu0 %v2229_v7  ;;  %v2316_v63 = vld [vmem:[%s2736_s19 + $0x3c4] ss:$8 sps:$4 sm:$0xff]   ;;  %v2311_v4 = vld [vmem:[%s2736_s19 + $0x1c0] ss:$8 sps:$4 sm:$0xff]  }
  0x95   : > { %v2314_v7 = vld [vmem:[%s2736_s19 + $0x3c0] ss:$8 sps:$4 sm:$0xff]  }
  0x97   : > { %1626 = vmatpush1.bf16.msra.mxu1 %v2231_v8  ;;  %1712 = vmatpush1.bf16.msra.mxu0 %v2232_v9  ;;  %v2319_v8 = vld [vmem:[%s2736_s19 + $0x1d4] ss:$8 sps:$4 sm:$0xff]  }
  0x98   : > { %1627 = vmatprep.subr.bf16.mxu1 %v2233_v10  ;;  %1713 = vmatprep.subr.bf16.mxu0 %v2235_v11  ;;  %v2322_v9 = vld [vmem:[%s2736_s19 + $0x3d4] ss:$8 sps:$4 sm:$0xff]   ;;  %v2317_v10 = vld [vmem:[%s2736_s19 + $0x1d0] ss:$8 sps:$4 sm:$0xff]  }
  0x99   : > { %v2320_v11 = vld [vmem:[%s2736_s19 + $0x3d0] ss:$8 sps:$4 sm:$0xff]  }
  0x9b   : > { %1628 = vmatpush1.bf16.msra.mxu1 %v2237_v12  ;;  %1714 = vmatpush1.bf16.msra.mxu0 %v2238_v13  ;;  %v2325_v12 = vld [vmem:[%s2736_s19 + $0x1e4] ss:$8 sps:$4 sm:$0xff]  }
  0x9c   : > { %1640 = vmatprep.subr.bf16.mxu1 %v2241_v14  ;;  %1726 = vmatprep.subr.bf16.mxu0 %v2244_v15  ;;  %v2328_v13 = vld [vmem:[%s2736_s19 + $0x3e4] ss:$8 sps:$4 sm:$0xff]   ;;  %v2323_v14 = vld [vmem:[%s2736_s19 + $0x1e0] ss:$8 sps:$4 sm:$0xff]  }
  0x9d   : > { %v2326_v15 = vld [vmem:[%s2736_s19 + $0x3e0] ss:$8 sps:$4 sm:$0xff]  }
  0x9e   : > { %1630 = vmatmul.mubr.bf16.vlgmr.msra.gmra.mrb[0].mxu1 %v1940_v3  ;;  %1716 = vmatmul.mubr.bf16.vlgmr.msra.gmra.mrb[0].mxu0 %v1944_v6  ;;  %v2262_v3 = vld [vmem:[%s2736_s19 + $0x334] ss:$8 sps:$4 sm:$0xff]   ;;  %v2260_v6 = vld [vmem:[%s2736_s19 + $0x330] ss:$8 sps:$4 sm:$0xff]  }
  0x9f   : > { %1641 = vmatpush1.bf16.msra.mxu1 %v2239_v18  ;;  %1727 = vmatpush1.bf16.msra.mxu0 %v2242_v19  ;;  %v2331_v18 = vld [vmem:[%s2736_s19 + $0x1f4] ss:$8 sps:$4 sm:$0xff]  }
  0xa0   : > { %1642 = vmatprep.subr.bf16.mxu1 %v2247_v20  ;;  %1728 = vmatprep.subr.bf16.mxu0 %v2250_v21  ;;  %v2334_v19 = vld [vmem:[%s2736_s19 + $0x3f4] ss:$8 sps:$4 sm:$0xff]   ;;  %v2329_v20 = vld [vmem:[%s2736_s19 + $0x1f0] ss:$8 sps:$4 sm:$0xff]  }
  0xa1   : > { %1672 = vmatprep.mubr.bf16.mxu1 %v1943_v22  ;;  %1758 = vmatprep.mubr.bf16.mxu0 %v1947_v39  ;;  %v2332_v21 = vld [vmem:[%s2736_s19 + $0x3f0] ss:$8 sps:$4 sm:$0xff]   ;;  %v1942_v22 = vcombine.low %v2807_v16, %v2812_v17 }
  0xa3   : > { %1643 = vmatpush1.bf16.msra.mxu1 %v2245_v23  ;;  %1729 = vmatpush1.bf16.msra.mxu0 %v2248_v24  ;;  %v1946_v23 = vcombine.low %v2846_v34, %v2854_v38  ;;  %v907_v24 = vlaneseq }
  0xa4   : > { %1644 = vmatprep.subr.bf16.mxu1 %v2253_v25  ;;  %1730 = vmatprep.subr.bf16.mxu0 %v2256_v26 }
  0xa5   : > { %v908_v25 = vshrl.u32 %v907_v24, 7 }
  0xa7   : > { %1645 = vmatpush1.bf16.msra.mxu1 %v2251_v0  ;;  %1731 = vmatpush1.bf16.msra.mxu0 %v2254_v1  ;;  %v909_v26 = vsub.s32 0, %v908_v25  ;;  %v905_v0 = vld [vmem:[%s765_s7] sm:$0x3]  ;;  %v913_v16 = vsub.s32 1, %v908_v25 }
  0xa8   : > { %1646 = vmatprep.subr.bf16.mxu1 %v2259_v2  ;;  %1732 = vmatprep.subr.bf16.mxu0 %v2262_v3 }
  0xa9   : > { %v910_v17 = vrot.slane %v905_v0, %v909_v26  ;;  %v914_v1 = vrot.slane %v905_v0, %v913_v16 }
  0xab   : > { %1647 = vmatpush1.bf16.msra.mxu1 %v2257_v5  ;;  %1733 = vmatpush1.bf16.msra.mxu0 %v2260_v6 }
  0xac   : > { %1648 = vmatprep.subr.bf16.mxu1 %v2265_v27  ;;  %1734 = vmatprep.subr.bf16.mxu0 %v2268_v28 }
  0xaf   : > { %1649 = vmatpush1.bf16.msra.mxu1 %v2263_v29  ;;  %1735 = vmatpush1.bf16.msra.mxu0 %v2266_v30 }
  0xb0   : > { %1650 = vmatprep.subr.bf16.mxu1 %v2271_v31  ;;  %1736 = vmatprep.subr.bf16.mxu0 %v2274_v32 }
  0xb3   : > { %1651 = vmatpush1.bf16.msra.mxu1 %v2269_v33  ;;  %1737 = vmatpush1.bf16.msra.mxu0 %v2272_v35 }
  0xb4   : > { %1652 = vmatprep.subr.bf16.mxu1 %v2277_v36  ;;  %1738 = vmatprep.subr.bf16.mxu0 %v2280_v37 }
  0xb7   : > { %1653 = vmatpush1.bf16.msra.mxu1 %v2275_v40  ;;  %1739 = vmatpush1.bf16.msra.mxu0 %v2278_v41 }
  0xb8   : > { %1654 = vmatprep.subr.bf16.mxu1 %v2283_v42  ;;  %1740 = vmatprep.subr.bf16.mxu0 %v2286_v43 }
  0xbb   : > { %1655 = vmatpush1.bf16.msra.mxu1 %v2281_v44  ;;  %1741 = vmatpush1.bf16.msra.mxu0 %v2284_v45 }
  0xbc   : > { %1656 = vmatprep.subr.bf16.mxu1 %v2289_v46  ;;  %1742 = vmatprep.subr.bf16.mxu0 %v2292_v47 }
  0xbf   : > { %1657 = vmatpush1.bf16.msra.mxu1 %v2287_v48  ;;  %1743 = vmatpush1.bf16.msra.mxu0 %v2290_v49 }
  0xc0   : > { %1658 = vmatprep.subr.bf16.mxu1 %v2295_v50  ;;  %1744 = vmatprep.subr.bf16.mxu0 %v2298_v51 }
  0xc3   : > { %1659 = vmatpush1.bf16.msra.mxu1 %v2293_v52  ;;  %1745 = vmatpush1.bf16.msra.mxu0 %v2296_v53 }
  0xc4   : > { %1660 = vmatprep.subr.bf16.mxu1 %v2301_v54  ;;  %1746 = vmatprep.subr.bf16.mxu0 %v2304_v55 }
  0xc7   : > { %1661 = vmatpush1.bf16.msra.mxu1 %v2299_v56  ;;  %1747 = vmatpush1.bf16.msra.mxu0 %v2302_v57 }
  0xc8   : > { %1662 = vmatprep.subr.bf16.mxu1 %v2307_v58  ;;  %1748 = vmatprep.subr.bf16.mxu0 %v2310_v59 }
  0xcb   : > { %1663 = vmatpush1.bf16.msra.mxu1 %v2305_v60  ;;  %1749 = vmatpush1.bf16.msra.mxu0 %v2308_v61 }
  0xcc   : > { %1664 = vmatprep.subr.bf16.mxu1 %v2313_v62  ;;  %1750 = vmatprep.subr.bf16.mxu0 %v2316_v63 }
  0xcf   : > { %1665 = vmatpush1.bf16.msra.mxu1 %v2311_v4  ;;  %1751 = vmatpush1.bf16.msra.mxu0 %v2314_v7 }
  0xd0   : > { %1666 = vmatprep.subr.bf16.mxu1 %v2319_v8  ;;  %1752 = vmatprep.subr.bf16.mxu0 %v2322_v9 }
  0xd3   : > { %1667 = vmatpush1.bf16.msra.mxu1 %v2317_v10  ;;  %1753 = vmatpush1.bf16.msra.mxu0 %v2320_v11 }
  0xd4   : > { %1668 = vmatprep.subr.bf16.mxu1 %v2325_v12  ;;  %1754 = vmatprep.subr.bf16.mxu0 %v2328_v13 }
  0xd7   : > { %1669 = vmatpush1.bf16.msra.mxu1 %v2323_v14  ;;  %1755 = vmatpush1.bf16.msra.mxu0 %v2326_v15 }
  0xd8   : > { %1670 = vmatprep.subr.bf16.mxu1 %v2331_v18  ;;  %1756 = vmatprep.subr.bf16.mxu0 %v2334_v19 }
  0xdb   : > { %1671 = vmatpush1.bf16.msra.mxu1 %v2329_v20  ;;  %1757 = vmatpush1.bf16.msra.mxu0 %v2332_v21 }
  0xde   : > { %1673 = vmatmul.mubr.bf16.vlgmr.msra.gmra.mrb[0].mxu1 %v1942_v22  ;;  %1759 = vmatmul.mubr.bf16.vlgmr.msra.gmra.mrb[0].mxu0 %v1946_v23 }
 0x1b1   : > { %v1674_v2 = vpop.f32.mrb[0].mxu1  ;;  %v1760_v3 = vpop.f32.mrb[0].mxu0 }
 0x1b2   : > { %v2087_v5 = vadd.f32 %v1674_v2, %v910_v17  ;;  %v1676_v6 = vpop.f32.mrb[1].mxu1  ;;  %v1762_v27 = vpop.f32.mrb[1].mxu0 }
 0x1b3   : > { %v2089_v28 = vadd.f32 %v1676_v6, %v914_v1  ;;  %v1678_v29 = vpop.f32.mrb[2].mxu1  ;;  %v1764_v30 = vpop.f32.mrb[2].mxu0 }
 0x1b4   : > { %v2088_v31 = vadd.f32 %v2087_v5, %v1760_v3  ;;  %v2091_v32 = vadd.f32 %v1678_v29, %v910_v17  ;;  %v1680_v33 = vpop.f32.mrb[3].mxu1  ;;  %v1766_v34 = vpop.f32.mrb[3].mxu0 }
 0x1b5   : > { %v2090_v35 = vadd.f32 %v2089_v28, %v1762_v27  ;;  %v2093_v36 = vadd.f32 %v1680_v33, %v914_v1 }
 0x1b6   : > { %v1769_v37 = vmax.f32 %v2088_v31, 0.0  ;;  %v2092_v38 = vadd.f32 %v2091_v32, %v1764_v30 }
 0x1b7   : > { %v1770_v39 = vmax.f32 %v2090_v35, 0.0  ;;  %v2094_v40 = vadd.f32 %v2093_v36, %v1766_v34  ;;  %1793 = sbr.rel (!%p2430_p6) target bundleno = 454 (0x1c6), region = 74 }
 0x1b8   : > { %v1771_v41 = vmax.f32 %v2092_v38, 0.0 }
 0x1b9   : > { %v2084_v42 = vpack.c.bf16 %v1770_v39, %v1769_v37  ;;  %v1772_v43 = vmax.f32 %v2094_v40, 0.0 }
 0x1bb   : > { %1785 = vst [vmem:[%s753_s9] sm:$0xff] %v2084_v42  ;;  %v2085_v44 = vpack.c.bf16 %v1772_v43, %v1771_v41 }
 0x1bd   : > { %1786 = vst [vmem:[%s753_s9 + $0x8] sm:$0xff] %v2085_v44 }
 0x1c2   : > { %v1829_v45 = vld [vmem:[%s753_s9] sm:$0xff] }
 0x1c3   : > { %1830 = vst [vmem:[%s1799_s11] sm:$0xff] %v1829_v45 }
 0x1c4   : > { %v1831_v46 = vld [vmem:[%s753_s9 + $0x8] sm:$0xff] }
 0x1c5   : > { %1832 = vst [vmem:[%s1799_s11 + $0x10] sm:$0xff] %v1831_v46 }
 0x1c6 PF: > { %s13_s16 = sadd.s32 1, %s2373_s16   ;;  %s2932_s12 = smov %s2361_s13 }
 0x1c7   : > { %p10_p12 = scmp.ge.s32.totalorder %s13_s16, 4   ;;  %s2933_s13 = smov %s2435_s22 }
 0x1c8   : > { %s2934_s14 = smov %s2369_s15  ;;  %s2935_s15 = smov %s2937_s17 }
 0x1c9   :  { %12 = sbr.rel (!%p10_p12) target bundleno = 3 (0x3), region = 149 }

</bundles_post_ra>
